<compile_context>
chip_gen: v7x
topology: tpu7x:2x2x1
jax: 0.10.0
libtpu: 0.0.40
codegen_flags: <defaults>
</compile_context>

<pallas_src>
import jax
import jax.numpy as jnp
from jax.experimental import pallas as pl
from jax.experimental.pallas import tpu as pltpu

# ---- module hyper-parameters (from rateCA_local / Rule __init__) ----
RES = (128, 128)        # small demo size (module default 640x640); W multiple of 128
RADIUS = 2
K = 2 * RADIUS + 1      # unfold kernel size (5)
ETA = 0.05
EXCITE_PROB = 0.8
CONSTANT_CURRENT = 0.01
# plasticity = False in the module -> plasticity branch is dead code.


def _vmem_limit_bytes():
    # ~3/4 of physical VMEM: 96 MiB on v5e/v6e (128 MiB physical), 48 MiB on v7x (64 MiB).
    try:
        cap = pltpu.get_tpu_info().vmem_capacity_bytes
    except Exception:
        cap = 64 * 1024 * 1024
    return int(min(cap * 3 // 4, 100 * 1024 * 1024))


def _make_kernel(rows_per_step):
    """One Rule.forward step for the V channel.

    Grid axis 0 iterates over groups of `rows_per_step` kernel-row offsets dy
    (reduction axis). rows_per_step == K collapses the grid to a single step.

    v_ref    : (H, W)               V channel of x (resident across the grid)
    ei_ref   : (H, W)               EI map (resident)
    noise_ref: (H, W)               noise_input (resident)
    w_ref    : (rows_per_step*K,H,W) int8 taps of nearest_neighbours (streamed)
    scale_ref: (1,) SMEM f32        global int8 dequant scale
    out_ref  : (2, H, W)            ch0 = f32 accumulator / final V, ch1 = EI
    ve_ref   : (H, W)               f32 scratch: dy-shifted (V+noise)*EI
    """
    def kernel(v_ref, ei_ref, noise_ref, w_ref, scale_ref, out_ref, ve_ref):
        t = pl.program_id(0)
        H, W = v_ref.shape

        # --- t == 0: build (V+noise)*EI once, pre-shifted for dy = 0 ---
        @pl.when(t == 0)
        def _():
            ve = (v_ref[...] + noise_ref[...]) * ei_ref[...]
            ve_ref[...] = pltpu.roll(ve, RADIUS, axis=0)       # sublane shift for dy=0

        acc = None
        for r in range(rows_per_step):
            # advance the resident ve scratch to this dy's circular sublane shift
            # (incremental roll by -1 == H-1; static shift, XLU slot)
            if r == 0:
                @pl.when(t > 0)
                def _():
                    ve_ref[...] = pltpu.roll(ve_ref[...], H - 1, axis=0)
            else:
                ve_ref[...] = pltpu.roll(ve_ref[...], H - 1, axis=0)
            base = ve_ref[...]

            # partial sum over the K lane (dx) offsets of this dy row
            for dx in range(K):
                s = (RADIUS - dx) % W                           # circular lane shift
                shifted = base if s == 0 else pltpu.roll(base, s, axis=1)
                term = shifted * w_ref[r * K + dx].astype(jnp.float32)  # int8 stream
                acc = term if acc is None else acc + term

        @pl.when(t == 0)
        def _():
            out_ref[0] = acc                                    # init, no zeros pass

        @pl.when(t > 0)
        def _():
            out_ref[0] = out_ref[0] + acc

        # --- last step: fold dequant scale, sigmoid + leaky V update, EI pass-through ---
        @pl.when(t == pl.num_programs(0) - 1)
        def _():
            V = v_ref[...] + noise_ref[...]
            I = out_ref[0] * scale_ref[0]                       # single global scale
            sig = jax.nn.sigmoid(I)                             # self.afunc = torch.sigmoid
            out_ref[0] = (1.0 - ETA) * V + ETA * (1.0 - V) * sig
            out_ref[1] = ei_ref[...]                            # z = cat([V, EI])

    return kernel


def prepare_weights(nearest_neighbours):
    """One-time (init-path) weight prep: symmetric int8 quantization, single global scale.

    Replaces the per-call f32->bf16 cast; the forward path then streams int8 only.
    """
    w = jnp.asarray(nearest_neighbours, jnp.float32)
    amax = float(jnp.max(jnp.abs(w)))
    scale = amax / 127.0 if amax > 0.0 else 1.0
    w_q = jnp.clip(jnp.round(w / scale), -127.0, 127.0).astype(jnp.int8)
    return w_q, jnp.float32(scale)


def rateca_forward(x, noise_input, w_q, w_scale, *, rows_per_step=None):
    """x: (1, 2, H, W) NCHW [ch0 = V, ch1 = EI]; noise_input: (1, 1, H, W);
    w_q: (K*K, H, W) int8 quantized nearest_neighbours (see prepare_weights);
    w_scale: scalar f32 dequant scale.
    Returns z = cat([V_new, EI], axis=1) with shape (1, 2, H, W), f32."""
    H, W = x.shape[2], x.shape[3]
    V0 = x[0, 0].astype(jnp.float32)
    EI = x[0, 1].astype(jnp.float32)
    noise = noise_input[0, 0].astype(jnp.float32)
    scale_arr = jnp.reshape(jnp.asarray(w_scale, jnp.float32), (1,))

    if rows_per_step is None:
        # Whole int8 weight block tiny -> single step (grid overhead dominates at
        # small RES). Production 640x640 (~10 MB int8) streams one dy row per step.
        rows_per_step = K if (K * K * H * W) <= (2 << 20) else 1
    assert K % rows_per_step == 0
    n_steps = K // rows_per_step
    # Perf note: W a multiple of 128 (and H of 8) keeps loads/stores lane-dense
    # and unmasked; other sizes are correct but slower.

    out = pl.pallas_call(
        _make_kernel(rows_per_step),
        grid=(n_steps,),                                        # reduction over dy groups
        in_specs=[
            pl.BlockSpec((H, W), lambda t: (0, 0)),             # V (resident)
            pl.BlockSpec((H, W), lambda t: (0, 0)),             # EI (resident)
            pl.BlockSpec((H, W), lambda t: (0, 0)),             # noise (resident)
            pl.BlockSpec((rows_per_step * K, H, W), lambda t: (t, 0, 0)),  # int8 taps
            pl.BlockSpec(memory_space=pltpu.MemorySpace.SMEM),  # dequant scale
        ],
        out_specs=pl.BlockSpec((2, H, W), lambda t: (0, 0, 0)), # resident accumulator + EI
        out_shape=jax.ShapeDtypeStruct((2, H, W), jnp.float32),
        scratch_shapes=[pltpu.VMEM((H, W), jnp.float32)],       # single ve scratch
        compiler_params=pltpu.CompilerParams(
            dimension_semantics=("arbitrary",),
            vmem_limit_bytes=_vmem_limit_bytes(),
        ),
    )(V0, EI, noise, w_q, scale_arr)

    return out[None]                                            # (1, 2, H, W), no stack


def reference_forward(x, noise_input, nearest_neighbours):
    """Pure-JAX (f32) mirror of Rule.forward, for validation."""
    H, W = x.shape[2], x.shape[3]
    R = RADIUS
    V = x[0, 0] + noise_input[0, 0]
    EI = x[0, 1]
    vep = jnp.pad(V * EI, ((R, R), (R, R)), mode="wrap")
    I = jnp.zeros((H, W), jnp.float32)
    for i in range(K):
        for j in range(K):
            I = I + vep[i:i + H, j:j + W] * nearest_neighbours[i * K + j]
    V_new = (1.0 - ETA) * V + ETA * (1.0 - V) * jax.nn.sigmoid(I)
    return jnp.stack([V_new, EI], axis=0)[None]


def _build_inputs(key, H, W):
    """Deterministic parameter / input construction (mirrors initGrid)."""
    k1, k2, k3, k4, k5 = jax.random.split(key, 5)
    # channel 0: rand*2 > 0.8 -> {0,1}
    V0 = (jax.random.uniform(k1, (H, W)) * 2.0 > 0.8).astype(jnp.float32)
    # EI map: +1 excitatory (p=0.8), inhibitory scaled to -1/(1-p)
    ei = (jax.random.uniform(k2, (H, W)) < EXCITE_PROB).astype(jnp.float32) * 2.0 - 1.0
    ei = jnp.where(ei < 0.0, ei * (1.0 / (1.0 - EXCITE_PROB + 1e-6)), ei)
    x = jnp.stack([V0, ei], axis=0)[None].astype(jnp.float32)   # (1, 2, H, W)
    # noise_input = rand * constant_current * (rand > 0.9)
    noise_input = (
        jax.random.uniform(k3, (1, 1, H, W))
        * CONSTANT_CURRENT
        * (jax.random.uniform(k4, (1, 1, H, W)) > 0.9).astype(jnp.float32)
    ).astype(jnp.float32)
    # nearest_neighbours: per-pixel local kernel, center tap zeroed.
    # TODO(synk): CPPN-generated kernel replaced by deterministic uniform init.
    w = jax.random.uniform(k5, (K * K, H * W), dtype=jnp.float32)
    w = w.at[RADIUS * K + RADIUS, :].set(0.0)
    nearest_neighbours = w.reshape(K * K, H, W)
    return x, noise_input, nearest_neighbours


if __name__ == "__main__":
    fwd = jax.jit(rateca_forward, static_argnames=("rows_per_step",))

    # (128,128): module demo size, single-step kernel (auto rows_per_step=K).
    # (64,256): non-square + forced streaming path (grid=(K,)), exercising the
    #           production form and the roll indexing on both axes.
    for (H, W), rps in (((128, 128), None), ((64, 256), 1)):
        x, noise_input, nn_w = _build_inputs(jax.random.PRNGKey(0), H, W)
        w_q, w_scale = prepare_weights(nn_w)          # one-time init-path quantization
        z = fwd(x, noise_input, w_q, w_scale, rows_per_step=rps)
        z = jax.block_until_ready(z)
        assert z.shape == (1, 2, H, W) and z.dtype == jnp.float32

        # correctness check vs pure-JAX f32 reference (tolerance covers int8 weights)
        z_ref = reference_forward(x, noise_input, nn_w)
        max_err = float(jnp.max(jnp.abs(z - z_ref)))
        assert max_err < 2e-2, f"({H},{W}) max abs err {max_err}"

    print("KERNEL_OK")
</pallas_src>

<mosaic_0001>
module attributes {stable_mosaic.version = 11 : i64} {
  func.func @kernel(%arg0: i32, %arg1: memref<128x128xf32, #tpu.memory_space<vmem>>, %arg2: memref<128x128xf32, #tpu.memory_space<vmem>>, %arg3: memref<128x128xf32, #tpu.memory_space<vmem>>, %arg4: memref<25x128x128xi8, #tpu.memory_space<vmem>>, %arg5: memref<1xf32, #tpu.memory_space<smem>>, %arg6: memref<2x128x128xf32, #tpu.memory_space<vmem>>, %arg7: memref<128x128xf32, #tpu.memory_space<vmem>>) attributes {dimension_semantics = [#tpu.dimension_semantics<arbitrary>], iteration_bounds = array<i64: 1>, scalar_prefetch = 0 : i64, scratch_operands = 1 : i64, tpu.core_type = #tpu.core_type<tc>, window_params = [{pipeline_mode = #tpu.pipeline_mode<synchronous>, transform_indices = @transform_0, window_bounds = array<i64: 128, 128>}, {pipeline_mode = #tpu.pipeline_mode<synchronous>, transform_indices = @transform_1, window_bounds = array<i64: 128, 128>}, {pipeline_mode = #tpu.pipeline_mode<synchronous>, transform_indices = @transform_2, window_bounds = array<i64: 128, 128>}, {transform_indices = @transform_3, window_bounds = array<i64: 25, 128, 128>}, {transform_indices = @transform_4, window_bounds = array<i64: 1>}, {pipeline_mode = #tpu.pipeline_mode<synchronous>, transform_indices = @transform_5, window_bounds = array<i64: 2, 128, 128>}]} {
    %c0_i32 = arith.constant 0 : i32
    %0 = arith.cmpi eq, %arg0, %c0_i32 : i32
    %1 = arith.extui %0 : i1 to i32
    %c0_i32_0 = arith.constant 0 : i32
    %2 = arith.cmpi ne, %1, %c0_i32_0 : i32
    scf.if %2 {
      %c0_105 = arith.constant 0 : index
      %c0_106 = arith.constant 0 : index
      %176 = vector.load %arg1[%c0_105, %c0_106] : memref<128x128xf32, #tpu.memory_space<vmem>>, vector<128x128xf32>
      %c0_107 = arith.constant 0 : index
      %c0_108 = arith.constant 0 : index
      %177 = vector.load %arg3[%c0_107, %c0_108] : memref<128x128xf32, #tpu.memory_space<vmem>>, vector<128x128xf32>
      %178 = arith.addf %176, %177 : vector<128x128xf32>
      %c0_109 = arith.constant 0 : index
      %c0_110 = arith.constant 0 : index
      %179 = vector.load %arg2[%c0_109, %c0_110] : memref<128x128xf32, #tpu.memory_space<vmem>>, vector<128x128xf32>
      %180 = arith.mulf %178, %179 : vector<128x128xf32>
      %c2_i32_111 = arith.constant 2 : i32
      %181 = tpu.dynamic_rotate %180 by %c2_i32_111 dim 0 : vector<128x128xf32>, i32 -> vector<128x128xf32>
      %c0_112 = arith.constant 0 : index
      %c0_113 = arith.constant 0 : index
      %182 = vector.load %arg7[%c0_112, %c0_113] : memref<128x128xf32, #tpu.memory_space<vmem>>, vector<128x128xf32>
      tpu.vector_store %arg7[%c0_112, %c0_113], %181 {strides = array<i32>} : memref<128x128xf32, #tpu.memory_space<vmem>>, vector<128x128xf32>,
    } else {
    }
    %c0_i32_1 = arith.constant 0 : i32
    %3 = arith.cmpi sgt, %arg0, %c0_i32_1 : i32
    %4 = arith.extui %3 : i1 to i32
    %c0_i32_2 = arith.constant 0 : i32
    %5 = arith.cmpi ne, %4, %c0_i32_2 : i32
    scf.if %5 {
      %c0_105 = arith.constant 0 : index
      %c0_106 = arith.constant 0 : index
      %176 = vector.load %arg7[%c0_105, %c0_106] : memref<128x128xf32, #tpu.memory_space<vmem>>, vector<128x128xf32>
      %c127_i32_107 = arith.constant 127 : i32
      %177 = tpu.dynamic_rotate %176 by %c127_i32_107 dim 0 : vector<128x128xf32>, i32 -> vector<128x128xf32>
      %c0_108 = arith.constant 0 : index
      %c0_109 = arith.constant 0 : index
      %178 = vector.load %arg7[%c0_108, %c0_109] : memref<128x128xf32, #tpu.memory_space<vmem>>, vector<128x128xf32>
      tpu.vector_store %arg7[%c0_108, %c0_109], %177 {strides = array<i32>} : memref<128x128xf32, #tpu.memory_space<vmem>>, vector<128x128xf32>,
    } else {
    }
    %c0 = arith.constant 0 : index
    %c0_3 = arith.constant 0 : index
    %6 = vector.load %arg7[%c0, %c0_3] : memref<128x128xf32, #tpu.memory_space<vmem>>, vector<128x128xf32>
    %c2_i32 = arith.constant 2 : i32
    %7 = tpu.dynamic_rotate %6 by %c2_i32 dim 1 : vector<128x128xf32>, i32 -> vector<128x128xf32>
    %c0_4 = arith.constant 0 : index
    %c0_5 = arith.constant 0 : index
    %c0_6 = arith.constant 0 : index
    %8 = vector.load %arg4[%c0_4, %c0_5, %c0_6] : memref<25x128x128xi8, #tpu.memory_space<vmem>>, vector<1x128x128xi8>
    %9 = vector.shape_cast %8 : vector<1x128x128xi8> to vector<128x128xi8>
    %10 = arith.sitofp %9 : vector<128x128xi8> to vector<128x128xf32>
    %11 = arith.mulf %7, %10 : vector<128x128xf32>
    %c1_i32 = arith.constant 1 : i32
    %12 = tpu.dynamic_rotate %6 by %c1_i32 dim 1 : vector<128x128xf32>, i32 -> vector<128x128xf32>
    %c1 = arith.constant 1 : index
    %c0_7 = arith.constant 0 : index
    %c0_8 = arith.constant 0 : index
    %13 = vector.load %arg4[%c1, %c0_7, %c0_8] : memref<25x128x128xi8, #tpu.memory_space<vmem>>, vector<1x128x128xi8>
    %14 = vector.shape_cast %13 : vector<1x128x128xi8> to vector<128x128xi8>
    %15 = arith.sitofp %14 : vector<128x128xi8> to vector<128x128xf32>
    %16 = arith.mulf %12, %15 : vector<128x128xf32>
    %17 = arith.addf %11, %16 : vector<128x128xf32>
    %c2 = arith.constant 2 : index
    %c0_9 = arith.constant 0 : index
    %c0_10 = arith.constant 0 : index
    %18 = vector.load %arg4[%c2, %c0_9, %c0_10] : memref<25x128x128xi8, #tpu.memory_space<vmem>>, vector<1x128x128xi8>
    %19 = vector.shape_cast %18 : vector<1x128x128xi8> to vector<128x128xi8>
    %20 = arith.sitofp %19 : vector<128x128xi8> to vector<128x128xf32>
    %21 = arith.mulf %6, %20 : vector<128x128xf32>
    %22 = arith.addf %17, %21 : vector<128x128xf32>
    %c127_i32 = arith.constant 127 : i32
    %23 = tpu.dynamic_rotate %6 by %c127_i32 dim 1 : vector<128x128xf32>, i32 -> vector<128x128xf32>
    %c3 = arith.constant 3 : index
    %c0_11 = arith.constant 0 : index
    %c0_12 = arith.constant 0 : index
    %24 = vector.load %arg4[%c3, %c0_11, %c0_12] : memref<25x128x128xi8, #tpu.memory_space<vmem>>, vector<1x128x128xi8>
    %25 = vector.shape_cast %24 : vector<1x128x128xi8> to vector<128x128xi8>
    %26 = arith.sitofp %25 : vector<128x128xi8> to vector<128x128xf32>
    %27 = arith.mulf %23, %26 : vector<128x128xf32>
    %28 = arith.addf %22, %27 : vector<128x128xf32>
    %c126_i32 = arith.constant 126 : i32
    %29 = tpu.dynamic_rotate %6 by %c126_i32 dim 1 : vector<128x128xf32>, i32 -> vector<128x128xf32>
    %c4 = arith.constant 4 : index
    %c0_13 = arith.constant 0 : index
    %c0_14 = arith.constant 0 : index
    %30 = vector.load %arg4[%c4, %c0_13, %c0_14] : memref<25x128x128xi8, #tpu.memory_space<vmem>>, vector<1x128x128xi8>
    %31 = vector.shape_cast %30 : vector<1x128x128xi8> to vector<128x128xi8>
    %32 = arith.sitofp %31 : vector<128x128xi8> to vector<128x128xf32>
    %33 = arith.mulf %29, %32 : vector<128x128xf32>
    %34 = arith.addf %28, %33 : vector<128x128xf32>
    %c0_15 = arith.constant 0 : index
    %c0_16 = arith.constant 0 : index
    %35 = vector.load %arg7[%c0_15, %c0_16] : memref<128x128xf32, #tpu.memory_space<vmem>>, vector<128x128xf32>
    %c127_i32_17 = arith.constant 127 : i32
    %36 = tpu.dynamic_rotate %35 by %c127_i32_17 dim 0 : vector<128x128xf32>, i32 -> vector<128x128xf32>
    %c0_18 = arith.constant 0 : index
    %c0_19 = arith.constant 0 : index
    %37 = vector.load %arg7[%c0_18, %c0_19] : memref<128x128xf32, #tpu.memory_space<vmem>>, vector<128x128xf32>
    tpu.vector_store %arg7[%c0_18, %c0_19], %36 {strides = array<i32>} : memref<128x128xf32, #tpu.memory_space<vmem>>, vector<128x128xf32>,
    %c0_20 = arith.constant 0 : index
    %c0_21 = arith.constant 0 : index
    %38 = vector.load %arg7[%c0_20, %c0_21] : memref<128x128xf32, #tpu.memory_space<vmem>>, vector<128x128xf32>
    %c2_i32_22 = arith.constant 2 : i32
    %39 = tpu.dynamic_rotate %38 by %c2_i32_22 dim 1 : vector<128x128xf32>, i32 -> vector<128x128xf32>
    %c5 = arith.constant 5 : index
    %c0_23 = arith.constant 0 : index
    %c0_24 = arith.constant 0 : index
    %40 = vector.load %arg4[%c5, %c0_23, %c0_24] : memref<25x128x128xi8, #tpu.memory_space<vmem>>, vector<1x128x128xi8>
    %41 = vector.shape_cast %40 : vector<1x128x128xi8> to vector<128x128xi8>
    %42 = arith.sitofp %41 : vector<128x128xi8> to vector<128x128xf32>
    %43 = arith.mulf %39, %42 : vector<128x128xf32>
    %44 = arith.addf %34, %43 : vector<128x128xf32>
    %c1_i32_25 = arith.constant 1 : i32
    %45 = tpu.dynamic_rotate %38 by %c1_i32_25 dim 1 : vector<128x128xf32>, i32 -> vector<128x128xf32>
    %c6 = arith.constant 6 : index
    %c0_26 = arith.constant 0 : index
    %c0_27 = arith.constant 0 : index
    %46 = vector.load %arg4[%c6, %c0_26, %c0_27] : memref<25x128x128xi8, #tpu.memory_space<vmem>>, vector<1x128x128xi8>
    %47 = vector.shape_cast %46 : vector<1x128x128xi8> to vector<128x128xi8>
    %48 = arith.sitofp %47 : vector<128x128xi8> to vector<128x128xf32>
    %49 = arith.mulf %45, %48 : vector<128x128xf32>
    %50 = arith.addf %44, %49 : vector<128x128xf32>
    %c7 = arith.constant 7 : index
    %c0_28 = arith.constant 0 : index
    %c0_29 = arith.constant 0 : index
    %51 = vector.load %arg4[%c7, %c0_28, %c0_29] : memref<25x128x128xi8, #tpu.memory_space<vmem>>, vector<1x128x128xi8>
    %52 = vector.shape_cast %51 : vector<1x128x128xi8> to vector<128x128xi8>
    %53 = arith.sitofp %52 : vector<128x128xi8> to vector<128x128xf32>
    %54 = arith.mulf %38, %53 : vector<128x128xf32>
    %55 = arith.addf %50, %54 : vector<128x128xf32>
    %c127_i32_30 = arith.constant 127 : i32
    %56 = tpu.dynamic_rotate %38 by %c127_i32_30 dim 1 : vector<128x128xf32>, i32 -> vector<128x128xf32>
    %c8 = arith.constant 8 : index
    %c0_31 = arith.constant 0 : index
    %c0_32 = arith.constant 0 : index
    %57 = vector.load %arg4[%c8, %c0_31, %c0_32] : memref<25x128x128xi8, #tpu.memory_space<vmem>>, vector<1x128x128xi8>
    %58 = vector.shape_cast %57 : vector<1x128x128xi8> to vector<128x128xi8>
    %59 = arith.sitofp %58 : vector<128x128xi8> to vector<128x128xf32>
    %60 = arith.mulf %56, %59 : vector<128x128xf32>
    %61 = arith.addf %55, %60 : vector<128x128xf32>
    %c126_i32_33 = arith.constant 126 : i32
    %62 = tpu.dynamic_rotate %38 by %c126_i32_33 dim 1 : vector<128x128xf32>, i32 -> vector<128x128xf32>
    %c9 = arith.constant 9 : index
    %c0_34 = arith.constant 0 : index
    %c0_35 = arith.constant 0 : index
    %63 = vector.load %arg4[%c9, %c0_34, %c0_35] : memref<25x128x128xi8, #tpu.memory_space<vmem>>, vector<1x128x128xi8>
    %64 = vector.shape_cast %63 : vector<1x128x128xi8> to vector<128x128xi8>
    %65 = arith.sitofp %64 : vector<128x128xi8> to vector<128x128xf32>
    %66 = arith.mulf %62, %65 : vector<128x128xf32>
    %67 = arith.addf %61, %66 : vector<128x128xf32>
    %c0_36 = arith.constant 0 : index
    %c0_37 = arith.constant 0 : index
    %68 = vector.load %arg7[%c0_36, %c0_37] : memref<128x128xf32, #tpu.memory_space<vmem>>, vector<128x128xf32>
    %c127_i32_38 = arith.constant 127 : i32
    %69 = tpu.dynamic_rotate %68 by %c127_i32_38 dim 0 : vector<128x128xf32>, i32 -> vector<128x128xf32>
    %c0_39 = arith.constant 0 : index
    %c0_40 = arith.constant 0 : index
    %70 = vector.load %arg7[%c0_39, %c0_40] : memref<128x128xf32, #tpu.memory_space<vmem>>, vector<128x128xf32>
    tpu.vector_store %arg7[%c0_39, %c0_40], %69 {strides = array<i32>} : memref<128x128xf32, #tpu.memory_space<vmem>>, vector<128x128xf32>,
    %c0_41 = arith.constant 0 : index
    %c0_42 = arith.constant 0 : index
    %71 = vector.load %arg7[%c0_41, %c0_42] : memref<128x128xf32, #tpu.memory_space<vmem>>, vector<128x128xf32>
    %c2_i32_43 = arith.constant 2 : i32
    %72 = tpu.dynamic_rotate %71 by %c2_i32_43 dim 1 : vector<128x128xf32>, i32 -> vector<128x128xf32>
    %c10 = arith.constant 10 : index
    %c0_44 = arith.constant 0 : index
    %c0_45 = arith.constant 0 : index
    %73 = vector.load %arg4[%c10, %c0_44, %c0_45] : memref<25x128x128xi8, #tpu.memory_space<vmem>>, vector<1x128x128xi8>
    %74 = vector.shape_cast %73 : vector<1x128x128xi8> to vector<128x128xi8>
    %75 = arith.sitofp %74 : vector<128x128xi8> to vector<128x128xf32>
    %76 = arith.mulf %72, %75 : vector<128x128xf32>
    %77 = arith.addf %67, %76 : vector<128x128xf32>
    %c1_i32_46 = arith.constant 1 : i32
    %78 = tpu.dynamic_rotate %71 by %c1_i32_46 dim 1 : vector<128x128xf32>, i32 -> vector<128x128xf32>
    %c11 = arith.constant 11 : index
    %c0_47 = arith.constant 0 : index
    %c0_48 = arith.constant 0 : index
    %79 = vector.load %arg4[%c11, %c0_47, %c0_48] : memref<25x128x128xi8, #tpu.memory_space<vmem>>, vector<1x128x128xi8>
    %80 = vector.shape_cast %79 : vector<1x128x128xi8> to vector<128x128xi8>
    %81 = arith.sitofp %80 : vector<128x128xi8> to vector<128x128xf32>
    %82 = arith.mulf %78, %81 : vector<128x128xf32>
    %83 = arith.addf %77, %82 : vector<128x128xf32>
    %c12 = arith.constant 12 : index
    %c0_49 = arith.constant 0 : index
    %c0_50 = arith.constant 0 : index
    %84 = vector.load %arg4[%c12, %c0_49, %c0_50] : memref<25x128x128xi8, #tpu.memory_space<vmem>>, vector<1x128x128xi8>
    %85 = vector.shape_cast %84 : vector<1x128x128xi8> to vector<128x128xi8>
    %86 = arith.sitofp %85 : vector<128x128xi8> to vector<128x128xf32>
    %87 = arith.mulf %71, %86 : vector<128x128xf32>
    %88 = arith.addf %83, %87 : vector<128x128xf32>
    %c127_i32_51 = arith.constant 127 : i32
    %89 = tpu.dynamic_rotate %71 by %c127_i32_51 dim 1 : vector<128x128xf32>, i32 -> vector<128x128xf32>
    %c13 = arith.constant 13 : index
    %c0_52 = arith.constant 0 : index
    %c0_53 = arith.constant 0 : index
    %90 = vector.load %arg4[%c13, %c0_52, %c0_53] : memref<25x128x128xi8, #tpu.memory_space<vmem>>, vector<1x128x128xi8>
    %91 = vector.shape_cast %90 : vector<1x128x128xi8> to vector<128x128xi8>
    %92 = arith.sitofp %91 : vector<128x128xi8> to vector<128x128xf32>
    %93 = arith.mulf %89, %92 : vector<128x128xf32>
    %94 = arith.addf %88, %93 : vector<128x128xf32>
    %c126_i32_54 = arith.constant 126 : i32
    %95 = tpu.dynamic_rotate %71 by %c126_i32_54 dim 1 : vector<128x128xf32>, i32 -> vector<128x128xf32>
    %c14 = arith.constant 14 : index
    %c0_55 = arith.constant 0 : index
    %c0_56 = arith.constant 0 : index
    %96 = vector.load %arg4[%c14, %c0_55, %c0_56] : memref<25x128x128xi8, #tpu.memory_space<vmem>>, vector<1x128x128xi8>
    %97 = vector.shape_cast %96 : vector<1x128x128xi8> to vector<128x128xi8>
    %98 = arith.sitofp %97 : vector<128x128xi8> to vector<128x128xf32>
    %99 = arith.mulf %95, %98 : vector<128x128xf32>
    %100 = arith.addf %94, %99 : vector<128x128xf32>
    %c0_57 = arith.constant 0 : index
    %c0_58 = arith.constant 0 : index
    %101 = vector.load %arg7[%c0_57, %c0_58] : memref<128x128xf32, #tpu.memory_space<vmem>>, vector<128x128xf32>
    %c127_i32_59 = arith.constant 127 : i32
    %102 = tpu.dynamic_rotate %101 by %c127_i32_59 dim 0 : vector<128x128xf32>, i32 -> vector<128x128xf32>
    %c0_60 = arith.constant 0 : index
    %c0_61 = arith.constant 0 : index
    %103 = vector.load %arg7[%c0_60, %c0_61] : memref<128x128xf32, #tpu.memory_space<vmem>>, vector<128x128xf32>
    tpu.vector_store %arg7[%c0_60, %c0_61], %102 {strides = array<i32>} : memref<128x128xf32, #tpu.memory_space<vmem>>, vector<128x128xf32>,
    %c0_62 = arith.constant 0 : index
    %c0_63 = arith.constant 0 : index
    %104 = vector.load %arg7[%c0_62, %c0_63] : memref<128x128xf32, #tpu.memory_space<vmem>>, vector<128x128xf32>
    %c2_i32_64 = arith.constant 2 : i32
    %105 = tpu.dynamic_rotate %104 by %c2_i32_64 dim 1 : vector<128x128xf32>, i32 -> vector<128x128xf32>
    %c15 = arith.constant 15 : index
    %c0_65 = arith.constant 0 : index
    %c0_66 = arith.constant 0 : index
    %106 = vector.load %arg4[%c15, %c0_65, %c0_66] : memref<25x128x128xi8, #tpu.memory_space<vmem>>, vector<1x128x128xi8>
    %107 = vector.shape_cast %106 : vector<1x128x128xi8> to vector<128x128xi8>
    %108 = arith.sitofp %107 : vector<128x128xi8> to vector<128x128xf32>
    %109 = arith.mulf %105, %108 : vector<128x128xf32>
    %110 = arith.addf %100, %109 : vector<128x128xf32>
    %c1_i32_67 = arith.constant 1 : i32
    %111 = tpu.dynamic_rotate %104 by %c1_i32_67 dim 1 : vector<128x128xf32>, i32 -> vector<128x128xf32>
    %c16 = arith.constant 16 : index
    %c0_68 = arith.constant 0 : index
    %c0_69 = arith.constant 0 : index
    %112 = vector.load %arg4[%c16, %c0_68, %c0_69] : memref<25x128x128xi8, #tpu.memory_space<vmem>>, vector<1x128x128xi8>
    %113 = vector.shape_cast %112 : vector<1x128x128xi8> to vector<128x128xi8>
    %114 = arith.sitofp %113 : vector<128x128xi8> to vector<128x128xf32>
    %115 = arith.mulf %111, %114 : vector<128x128xf32>
    %116 = arith.addf %110, %115 : vector<128x128xf32>
    %c17 = arith.constant 17 : index
    %c0_70 = arith.constant 0 : index
    %c0_71 = arith.constant 0 : index
    %117 = vector.load %arg4[%c17, %c0_70, %c0_71] : memref<25x128x128xi8, #tpu.memory_space<vmem>>, vector<1x128x128xi8>
    %118 = vector.shape_cast %117 : vector<1x128x128xi8> to vector<128x128xi8>
    %119 = arith.sitofp %118 : vector<128x128xi8> to vector<128x128xf32>
    %120 = arith.mulf %104, %119 : vector<128x128xf32>
    %121 = arith.addf %116, %120 : vector<128x128xf32>
    %c127_i32_72 = arith.constant 127 : i32
    %122 = tpu.dynamic_rotate %104 by %c127_i32_72 dim 1 : vector<128x128xf32>, i32 -> vector<128x128xf32>
    %c18 = arith.constant 18 : index
    %c0_73 = arith.constant 0 : index
    %c0_74 = arith.constant 0 : index
    %123 = vector.load %arg4[%c18, %c0_73, %c0_74] : memref<25x128x128xi8, #tpu.memory_space<vmem>>, vector<1x128x128xi8>
    %124 = vector.shape_cast %123 : vector<1x128x128xi8> to vector<128x128xi8>
    %125 = arith.sitofp %124 : vector<128x128xi8> to vector<128x128xf32>
    %126 = arith.mulf %122, %125 : vector<128x128xf32>
    %127 = arith.addf %121, %126 : vector<128x128xf32>
    %c126_i32_75 = arith.constant 126 : i32
    %128 = tpu.dynamic_rotate %104 by %c126_i32_75 dim 1 : vector<128x128xf32>, i32 -> vector<128x128xf32>
    %c19 = arith.constant 19 : index
    %c0_76 = arith.constant 0 : index
    %c0_77 = arith.constant 0 : index
    %129 = vector.load %arg4[%c19, %c0_76, %c0_77] : memref<25x128x128xi8, #tpu.memory_space<vmem>>, vector<1x128x128xi8>
    %130 = vector.shape_cast %129 : vector<1x128x128xi8> to vector<128x128xi8>
    %131 = arith.sitofp %130 : vector<128x128xi8> to vector<128x128xf32>
    %132 = arith.mulf %128, %131 : vector<128x128xf32>
    %133 = arith.addf %127, %132 : vector<128x128xf32>
    %c0_78 = arith.constant 0 : index
    %c0_79 = arith.constant 0 : index
    %134 = vector.load %arg7[%c0_78, %c0_79] : memref<128x128xf32, #tpu.memory_space<vmem>>, vector<128x128xf32>
    %c127_i32_80 = arith.constant 127 : i32
    %135 = tpu.dynamic_rotate %134 by %c127_i32_80 dim 0 : vector<128x128xf32>, i32 -> vector<128x128xf32>
    %c0_81 = arith.constant 0 : index
    %c0_82 = arith.constant 0 : index
    %136 = vector.load %arg7[%c0_81, %c0_82] : memref<128x128xf32, #tpu.memory_space<vmem>>, vector<128x128xf32>
    tpu.vector_store %arg7[%c0_81, %c0_82], %135 {strides = array<i32>} : memref<128x128xf32, #tpu.memory_space<vmem>>, vector<128x128xf32>,
    %c0_83 = arith.constant 0 : index
    %c0_84 = arith.constant 0 : index
    %137 = vector.load %arg7[%c0_83, %c0_84] : memref<128x128xf32, #tpu.memory_space<vmem>>, vector<128x128xf32>
    %c2_i32_85 = arith.constant 2 : i32
    %138 = tpu.dynamic_rotate %137 by %c2_i32_85 dim 1 : vector<128x128xf32>, i32 -> vector<128x128xf32>
    %c20 = arith.constant 20 : index
    %c0_86 = arith.constant 0 : index
    %c0_87 = arith.constant 0 : index
    %139 = vector.load %arg4[%c20, %c0_86, %c0_87] : memref<25x128x128xi8, #tpu.memory_space<vmem>>, vector<1x128x128xi8>
    %140 = vector.shape_cast %139 : vector<1x128x128xi8> to vector<128x128xi8>
    %141 = arith.sitofp %140 : vector<128x128xi8> to vector<128x128xf32>
    %142 = arith.mulf %138, %141 : vector<128x128xf32>
    %143 = arith.addf %133, %142 : vector<128x128xf32>
    %c1_i32_88 = arith.constant 1 : i32
    %144 = tpu.dynamic_rotate %137 by %c1_i32_88 dim 1 : vector<128x128xf32>, i32 -> vector<128x128xf32>
    %c21 = arith.constant 21 : index
    %c0_89 = arith.constant 0 : index
    %c0_90 = arith.constant 0 : index
    %145 = vector.load %arg4[%c21, %c0_89, %c0_90] : memref<25x128x128xi8, #tpu.memory_space<vmem>>, vector<1x128x128xi8>
    %146 = vector.shape_cast %145 : vector<1x128x128xi8> to vector<128x128xi8>
    %147 = arith.sitofp %146 : vector<128x128xi8> to vector<128x128xf32>
    %148 = arith.mulf %144, %147 : vector<128x128xf32>
    %149 = arith.addf %143, %148 : vector<128x128xf32>
    %c22 = arith.constant 22 : index
    %c0_91 = arith.constant 0 : index
    %c0_92 = arith.constant 0 : index
    %150 = vector.load %arg4[%c22, %c0_91, %c0_92] : memref<25x128x128xi8, #tpu.memory_space<vmem>>, vector<1x128x128xi8>
    %151 = vector.shape_cast %150 : vector<1x128x128xi8> to vector<128x128xi8>
    %152 = arith.sitofp %151 : vector<128x128xi8> to vector<128x128xf32>
    %153 = arith.mulf %137, %152 : vector<128x128xf32>
    %154 = arith.addf %149, %153 : vector<128x128xf32>
    %c127_i32_93 = arith.constant 127 : i32
    %155 = tpu.dynamic_rotate %137 by %c127_i32_93 dim 1 : vector<128x128xf32>, i32 -> vector<128x128xf32>
    %c23 = arith.constant 23 : index
    %c0_94 = arith.constant 0 : index
    %c0_95 = arith.constant 0 : index
    %156 = vector.load %arg4[%c23, %c0_94, %c0_95] : memref<25x128x128xi8, #tpu.memory_space<vmem>>, vector<1x128x128xi8>
    %157 = vector.shape_cast %156 : vector<1x128x128xi8> to vector<128x128xi8>
    %158 = arith.sitofp %157 : vector<128x128xi8> to vector<128x128xf32>
    %159 = arith.mulf %155, %158 : vector<128x128xf32>
    %160 = arith.addf %154, %159 : vector<128x128xf32>
    %c126_i32_96 = arith.constant 126 : i32
    %161 = tpu.dynamic_rotate %137 by %c126_i32_96 dim 1 : vector<128x128xf32>, i32 -> vector<128x128xf32>
    %c24 = arith.constant 24 : index
    %c0_97 = arith.constant 0 : index
    %c0_98 = arith.constant 0 : index
    %162 = vector.load %arg4[%c24, %c0_97, %c0_98] : memref<25x128x128xi8, #tpu.memory_space<vmem>>, vector<1x128x128xi8>
    %163 = vector.shape_cast %162 : vector<1x128x128xi8> to vector<128x128xi8>
    %164 = arith.sitofp %163 : vector<128x128xi8> to vector<128x128xf32>
    %165 = arith.mulf %161, %164 : vector<128x128xf32>
    %166 = arith.addf %160, %165 : vector<128x128xf32>
    %c0_i32_99 = arith.constant 0 : i32
    %167 = arith.cmpi eq, %arg0, %c0_i32_99 : i32
    %168 = arith.extui %167 : i1 to i32
    %c0_i32_100 = arith.constant 0 : i32
    %169 = arith.cmpi ne, %168, %c0_i32_100 : i32
    scf.if %169 {
      %c0_105 = arith.constant 0 : index
      %c0_106 = arith.constant 0 : index
      %c0_107 = arith.constant 0 : index
      %176 = vector.load %arg6[%c0_105, %c0_106, %c0_107] : memref<2x128x128xf32, #tpu.memory_space<vmem>>, vector<1x128x128xf32>
      %177 = vector.shape_cast %176 : vector<1x128x128xf32> to vector<128x128xf32>
      %178 = vector.shape_cast %166 : vector<128x128xf32> to vector<1x128x128xf32>
      tpu.vector_store %arg6[%c0_105, %c0_106, %c0_107], %178 {strides = array<i32>} : memref<2x128x128xf32, #tpu.memory_space<vmem>>, vector<1x128x128xf32>,
    } else {
    }
    %c0_i32_101 = arith.constant 0 : i32
    %170 = arith.cmpi sgt, %arg0, %c0_i32_101 : i32
    %171 = arith.extui %170 : i1 to i32
    %c0_i32_102 = arith.constant 0 : i32
    %172 = arith.cmpi ne, %171, %c0_i32_102 : i32
    scf.if %172 {
      %c0_105 = arith.constant 0 : index
      %c0_106 = arith.constant 0 : index
      %c0_107 = arith.constant 0 : index
      %176 = vector.load %arg6[%c0_105, %c0_106, %c0_107] : memref<2x128x128xf32, #tpu.memory_space<vmem>>, vector<1x128x128xf32>
      %177 = vector.shape_cast %176 : vector<1x128x128xf32> to vector<128x128xf32>
      %178 = arith.addf %177, %166 : vector<128x128xf32>
      %c0_108 = arith.constant 0 : index
      %c0_109 = arith.constant 0 : index
      %c0_110 = arith.constant 0 : index
      %179 = vector.load %arg6[%c0_108, %c0_109, %c0_110] : memref<2x128x128xf32, #tpu.memory_space<vmem>>, vector<1x128x128xf32>
      %180 = vector.shape_cast %179 : vector<1x128x128xf32> to vector<128x128xf32>
      %181 = vector.shape_cast %178 : vector<128x128xf32> to vector<1x128x128xf32>
      tpu.vector_store %arg6[%c0_108, %c0_109, %c0_110], %181 {strides = array<i32>} : memref<2x128x128xf32, #tpu.memory_space<vmem>>, vector<1x128x128xf32>,
    } else {
    }
    %c0_i32_103 = arith.constant 0 : i32
    %173 = arith.cmpi eq, %arg0, %c0_i32_103 : i32
    %174 = arith.extui %173 : i1 to i32
    %c0_i32_104 = arith.constant 0 : i32
    %175 = arith.cmpi ne, %174, %c0_i32_104 : i32
    scf.if %175 {
      %c0_105 = arith.constant 0 : index
      %c0_106 = arith.constant 0 : index
      %176 = vector.load %arg1[%c0_105, %c0_106] : memref<128x128xf32, #tpu.memory_space<vmem>>, vector<128x128xf32>
      %c0_107 = arith.constant 0 : index
      %c0_108 = arith.constant 0 : index
      %177 = vector.load %arg3[%c0_107, %c0_108] : memref<128x128xf32, #tpu.memory_space<vmem>>, vector<128x128xf32>
      %178 = arith.addf %176, %177 : vector<128x128xf32>
      %c0_109 = arith.constant 0 : index
      %c0_110 = arith.constant 0 : index
      %c0_111 = arith.constant 0 : index
      %179 = vector.load %arg6[%c0_109, %c0_110, %c0_111] : memref<2x128x128xf32, #tpu.memory_space<vmem>>, vector<1x128x128xf32>
      %180 = vector.shape_cast %179 : vector<1x128x128xf32> to vector<128x128xf32>
      %c0_112 = arith.constant 0 : index
      %181 = memref.load %arg5[%c0_112] : memref<1xf32, #tpu.memory_space<smem>>
      %182 = vector.broadcast %181 : f32 to vector<128x128xf32>
      %183 = arith.mulf %180, %182 : vector<128x128xf32>
      %184 = arith.negf %183 : vector<128x128xf32>
      %185 = math.exp %184 : vector<128x128xf32>
      %cst = arith.constant 1.000000e+00 : f32
      %186 = vector.broadcast %cst : f32 to vector<128x128xf32>
      %187 = arith.addf %186, %185 : vector<128x128xf32>
      %188 = arith.divf %186, %187 : vector<128x128xf32>
      %cst_113 = arith.constant 0.949999988 : f32
      %189 = vector.broadcast %cst_113 : f32 to vector<128x128xf32>
      %190 = arith.mulf %189, %178 : vector<128x128xf32>
      %cst_114 = arith.constant 1.000000e+00 : f32
      %191 = vector.broadcast %cst_114 : f32 to vector<128x128xf32>
      %192 = arith.subf %191, %178 : vector<128x128xf32>
      %cst_115 = arith.constant 5.000000e-02 : f32
      %193 = vector.broadcast %cst_115 : f32 to vector<128x128xf32>
      %194 = arith.mulf %193, %192 : vector<128x128xf32>
      %195 = arith.mulf %194, %188 : vector<128x128xf32>
      %196 = arith.addf %190, %195 : vector<128x128xf32>
      %c0_116 = arith.constant 0 : index
      %c0_117 = arith.constant 0 : index
      %c0_118 = arith.constant 0 : index
      %197 = vector.load %arg6[%c0_116, %c0_117, %c0_118] : memref<2x128x128xf32, #tpu.memory_space<vmem>>, vector<1x128x128xf32>
      %198 = vector.shape_cast %197 : vector<1x128x128xf32> to vector<128x128xf32>
      %199 = vector.shape_cast %196 : vector<128x128xf32> to vector<1x128x128xf32>
      tpu.vector_store %arg6[%c0_116, %c0_117, %c0_118], %199 {strides = array<i32>} : memref<2x128x128xf32, #tpu.memory_space<vmem>>, vector<1x128x128xf32>,
      %c0_119 = arith.constant 0 : index
      %c0_120 = arith.constant 0 : index
      %200 = vector.load %arg2[%c0_119, %c0_120] : memref<128x128xf32, #tpu.memory_space<vmem>>, vector<128x128xf32>
      %c1_121 = arith.constant 1 : index
      %c0_122 = arith.constant 0 : index
      %c0_123 = arith.constant 0 : index
      %201 = vector.load %arg6[%c1_121, %c0_122, %c0_123] : memref<2x128x128xf32, #tpu.memory_space<vmem>>, vector<1x128x128xf32>
      %202 = vector.shape_cast %201 : vector<1x128x128xf32> to vector<128x128xf32>
      %203 = vector.shape_cast %200 : vector<128x128xf32> to vector<1x128x128xf32>
      tpu.vector_store %arg6[%c1_121, %c0_122, %c0_123], %203 {strides = array<i32>} : memref<2x128x128xf32, #tpu.memory_space<vmem>>, vector<1x128x128xf32>,
    } else {
    }
    return
  }
  func.func @transform_0(%arg0: i32) -> (i32, i32) {
    %c0_i32 = arith.constant 0 : i32
    %c0_i32_0 = arith.constant 0 : i32
    %c0_i32_1 = arith.constant 0 : i32
    return %c0_i32, %c0_i32_0 : i32, i32
  }
  func.func @transform_1(%arg0: i32) -> (i32, i32) {
    %c0_i32 = arith.constant 0 : i32
    %c0_i32_0 = arith.constant 0 : i32
    %c0_i32_1 = arith.constant 0 : i32
    return %c0_i32, %c0_i32_0 : i32, i32
  }
  func.func @transform_2(%arg0: i32) -> (i32, i32) {
    %c0_i32 = arith.constant 0 : i32
    %c0_i32_0 = arith.constant 0 : i32
    %c0_i32_1 = arith.constant 0 : i32
    return %c0_i32, %c0_i32_0 : i32, i32
  }
  func.func @transform_3(%arg0: i32) -> (i32, i32, i32) {
    %c0_i32 = arith.constant 0 : i32
    %c0_i32_0 = arith.constant 0 : i32
    %c0_i32_1 = arith.constant 0 : i32
    return %arg0, %c0_i32, %c0_i32_0 : i32, i32, i32
  }
  func.func @transform_4(%arg0: i32) -> i32 {
    %c0_i32 = arith.constant 0 : i32
    %c0_i32_0 = arith.constant 0 : i32
    return %c0_i32 : i32
  }
  func.func @transform_5(%arg0: i32) -> (i32, i32, i32) {
    %c0_i32 = arith.constant 0 : i32
    %c0_i32_0 = arith.constant 0 : i32
    %c0_i32_1 = arith.constant 0 : i32
    %c0_i32_2 = arith.constant 0 : i32
    return %c0_i32, %c0_i32_0, %c0_i32_1 : i32, i32, i32
  }
}

</mosaic_0001>

<bundles_post_ra>
// kernel: rateca_forward.1
= control target key start
LH: loop header
LB: loop body
LE: loop exit
PB: predicated region body
PF: predicated region fallthrough
CT: control target
= control target key end

     0   :  { %11 = vsyncpa [#allocation5], 0  ;;  %s7618_s0 = inlined_call_operand.vmem [shape: f32[128,128], index: 0, kind: input, shape index: {}]   ;;  %s7619_s1 = inlined_call_operand.vmem [shape: f32[128,128], index: 1, kind: input, shape index: {}]   ;;  %s7620_s2 = inlined_call_operand.vmem [shape: f32[128,128], index: 2, kind: input, shape index: {}]   ;;  %s7621_s3 = inlined_call_operand.hbm [shape: s8[25,128,128], index: 3, kind: input, shape index: {}]   ;;  %s7622_s4 = inlined_call_operand.<no memory space> [shape: f32[1], index: 4, kind: input, shape index: {}]   ;;  %s7623_s5 = inlined_call_operand.hbm [shape: f32[2,128,128], index: 5, kind: output, shape index: {}]  }
   0x1   :  { %12 = vsyncpa [#allocation6], 0  ;;  %s3398_s18 = smov [#allocation4]   ;;  %s3350_s22 = scalar_lea.hbm %s7621_s3, 12800 }
   0x2   :  { %s24_s19 = sshll.u32 %s3398_s18, 4  ;;  %p3351_p0 = scmp.ne.s32.totalorder %s7621_s3, %s3350_s22  ;;  %s25_s19 = int_to_ptr.vmem [resolvable:$true] %s24_s19 }
   0x3   :  { %p3354_p1 = scmp.lt.u32.totalorder %s3350_s22, %s7621_s3 }
   0x5   :  { %p3356_p2 = pnand %p3354_p1, %p3351_p0 }
   0x7   :  { %3359 = shalt.err (!%p3356_p2)
}
   0x8   :  { %s3360_s27 = scalar_lea.vmem %s25_s19, 12800  ;;  %p3365_p4 = scmp.lt.s32.totalorder %s25_s19, %s25_s19 }
   0x9   :  { %p3361_p3 = scmp.ne.s32.totalorder %s25_s19, %s3360_s27  ;;  %p3366_p5 = scmp.lt.s32.totalorder %s3360_s27, %s3360_s27 }
   0xb   :  { %p3367_p6 = por %p3366_p5, %p3365_p4 }
   0xd   :  { %p3368_p7 = pnand %p3367_p6, %p3361_p3 }
   0xf   :  { %3371 = shalt.err (!%p3368_p7)
}
  0x10   :  { %s3399_s28 = smov 128   ;;  %s3400_s29 = smov 8  }
  0x11   :  { %30 = dma.hbm_to_vmem [thread:$0]  %s7621_s3, 12800, %s25_s19, [#allocation5], %s3399_s28, %s3399_s28, %s3400_s29  }
  0x12   :  { %3394 = dma.done.wait [#allocation5], 12800  }
  0x13   :  { %3395 = vsyncadd [#allocation5], 4294954496  ;;  %v136_v0 = vlaneseq  ;;  %v41_v1 = vld [vmem:[%s7618_s0 + $0x8] sm:$0xff]  ;;  %v42_v2 = vld [vmem:[%s7618_s0 + $0x10] sm:$0xff]  ;;  %s3401_s13 = smov 2   ;;  %s3402_s9 = smov 1  }
  0x14   :  { %v57_v3 = vld [vmem:[%s7620_s2 + $0x8] sm:$0xff]  ;;  %v58_v4 = vld [vmem:[%s7620_s2 + $0x10] sm:$0xff]  ;;  %v40_v10 = vld [vmem:[%s7618_s0] sm:$0xff]  ;;  %s3403_s10 = smov 127   ;;  %s3404_s11 = smov 126  }
  0x15   :  { %v73_v5 = vadd.f32 %v57_v3, %v41_v1  ;;  %v89_v6 = vld [vmem:[%s7619_s1 + $0x8] sm:$0xff]  ;;  %v90_v7 = vld [vmem:[%s7619_s1 + $0x10] sm:$0xff]  ;;  %v3469_v8 = vshrl.u32 %v136_v0, 7  ;;  %v74_v9 = vadd.f32 %v58_v4, %v42_v2  ;;  %v55_v11 = vld [vmem:[%s7618_s0 + $0x78] sm:$0xff] }
  0x16   :  { %v56_v12 = vld [vmem:[%s7620_s2] sm:$0xff]  ;;  %v71_v14 = vld [vmem:[%s7620_s2 + $0x78] sm:$0xff]  ;;  %v45_v27 = vld [vmem:[%s7618_s0 + $0x28] sm:$0xff] }
  0x17   :  { %7699 = vst [vmem:[#allocation10_spill] sm:$0xff] %v3469_v8  ;;  %v105_v13 = vmul.f32 %v89_v6, %v73_v5  ;;  %v72_v15 = vadd.f32 %v56_v12, %v40_v10  ;;  %v88_v16 = vld [vmem:[%s7619_s1] sm:$0xff]  ;;  %v103_v17 = vld [vmem:[%s7619_s1 + $0x78] sm:$0xff]  ;;  %v106_v18 = vmul.f32 %v90_v7, %v74_v9  ;;  %v87_v19 = vadd.f32 %v71_v14, %v55_v11  ;;  %v61_v31 = vld [vmem:[%s7620_s2 + $0x28] sm:$0xff] }
  0x18   :  { %v43_v20 = vld [vmem:[%s7618_s0 + $0x18] sm:$0xff]  ;;  %vm138_vm0 = vcmp.lt.s32.totalorder %v3469_v8, 2  ;;  %v44_v26 = vld [vmem:[%s7618_s0 + $0x20] sm:$0xff]  ;;  %v93_v34 = vld [vmem:[%s7619_s1 + $0x28] sm:$0xff]  ;;  %v77_v37 = vadd.f32 %v61_v31, %v45_v27  ;;  %vm732_vm1 = vcmp.lt.s32.totalorder %v3469_v8, 7 }
  0x19   :  { %v59_v21 = vld [vmem:[%s7620_s2 + $0x18] sm:$0xff]  ;;  %v121_v23 = vrot.slane %v105_v13, 6  ;;  %v104_v24 = vmul.f32 %v88_v16, %v72_v15  ;;  %v60_v28 = vld [vmem:[%s7620_s2 + $0x20] sm:$0xff]  ;;  %v122_v29 = vrot.slane %v106_v18, 6  ;;  %v3508_v30 = vmul.f32 %v103_v17, %v87_v19  ;;  %v46_v38 = vld [vmem:[%s7618_s0 + $0x30] sm:$0xff] }
  0x1a   :  { %v91_v22 = vld [vmem:[%s7619_s1 + $0x18] sm:$0xff]  ;;  %v75_v25 = vadd.f32 %v59_v21, %v43_v20  ;;  %v76_v32 = vadd.f32 %v60_v28, %v44_v26  ;;  %v92_v33 = vld [vmem:[%s7619_s1 + $0x20] sm:$0xff]  ;;  %v62_v40 = vld [vmem:[%s7620_s2 + $0x30] sm:$0xff]  ;;  %v109_v49 = vmul.f32 %v93_v34, %v77_v37 }
  0x1b   :  { %v120_v35 = vrot.slane %v104_v24, 6  ;;  %v47_v39 = vld [vmem:[%s7618_s0 + $0x38] sm:$0xff]  ;;  %v3530_v41 = vsel %vm138_vm0, %v121_v23, %v122_v29  ;;  %v135_v42 = vrot.slane %v3508_v30, 6  ;;  %v78_v45 = vadd.f32 %v62_v40, %v46_v38  ;;  %v94_v46 = vld [vmem:[%s7619_s1 + $0x30] sm:$0xff]  ;;  %v48_v51 = vld [vmem:[%s7618_s0 + $0x40] sm:$0xff] }
  0x1c   :  { %v107_v36 = vmul.f32 %v91_v22, %v75_v25  ;;  %v108_v43 = vmul.f32 %v92_v33, %v76_v32  ;;  %v63_v44 = vld [vmem:[%s7620_s2 + $0x38] sm:$0xff]  ;;  %262 = vrot.lane.b32.xlu1 %v3530_v41, %s3401_s13  ;;  %v49_v52 = vld [vmem:[%s7618_s0 + $0x48] sm:$0xff]  ;;  %v64_v53 = vld [vmem:[%s7620_s2 + $0x40] sm:$0xff]  ;;  %v125_v62 = vrot.slane %v109_v49, 6 }
  0x1d   :  { %v95_v47 = vld [vmem:[%s7619_s1 + $0x38] sm:$0xff]  ;;  %v79_v50 = vadd.f32 %v63_v44, %v47_v39  ;;  %v3557_v54 = vsel %vm138_vm0, %v135_v42, %v120_v35  ;;  %v110_v56 = vmul.f32 %v94_v46, %v78_v45  ;;  %v65_v57 = vld [vmem:[%s7620_s2 + $0x48] sm:$0xff]  ;;  %v80_v58 = vadd.f32 %v64_v53, %v48_v51  ;;  %v96_v59 = vld [vmem:[%s7619_s1 + $0x40] sm:$0xff] }
  0x1e   :  { %v123_v48 = vrot.slane %v107_v36, 6  ;;  %v124_v55 = vrot.slane %v108_v43, 6  ;;  %v97_v60 = vld [vmem:[%s7619_s1 + $0x48] sm:$0xff]  ;;  %258 = vrot.lane.b32.xlu0 %v3557_v54, %s3401_s13  ;;  %v81_v0 = vadd.f32 %v65_v57, %v49_v52  ;;  %v50_v1 = vld [vmem:[%s7618_s0 + $0x50] sm:$0xff]  ;;  %v51_v2 = vld [vmem:[%s7618_s0 + $0x58] sm:$0xff]  ;;  %v3585_v4 = vsel %vm138_vm0, %v120_v35, %v121_v23 }
  0x1f   :  { %v111_v63 = vmul.f32 %v95_v47, %v79_v50  ;;  %v66_v3 = vld [vmem:[%s7620_s2 + $0x50] sm:$0xff]  ;;  %v67_v5 = vld [vmem:[%s7620_s2 + $0x58] sm:$0xff]  ;;  %v126_v6 = vrot.slane %v110_v56, 6  ;;  %v112_v7 = vmul.f32 %v96_v59, %v80_v58  ;;  %v52_v15 = vld [vmem:[%s7618_s0 + $0x60] sm:$0xff]  ;;  %v715_v57 = vrot.slane %v3585_v4, 1 }
  0x20   :  { %v3572_v61 = vsel %vm138_vm0, %v122_v29, %v123_v48  ;;  %v82_v9 = vadd.f32 %v66_v3, %v50_v1  ;;  %v3594_v10 = vsel %vm138_vm0, %v124_v55, %v125_v62  ;;  %v113_v12 = vmul.f32 %v97_v60, %v81_v0  ;;  %v98_v14 = vld [vmem:[%s7619_s1 + $0x50] sm:$0xff]  ;;  %v68_v16 = vld [vmem:[%s7620_s2 + $0x60] sm:$0xff]  ;;  %v99_v17 = vld [vmem:[%s7619_s1 + $0x58] sm:$0xff] }
  0x21   :  { %264 = vrot.lane.b32.xlu1 %v3572_v61, %s3401_s13  ;;  %v127_v11 = vrot.slane %v111_v63, 6  ;;  %v83_v13 = vadd.f32 %v67_v5, %v51_v2  ;;  %v53_v18 = vld [vmem:[%s7618_s0 + $0x68] sm:$0xff]  ;;  %v3618_v20 = vsel %vm138_vm0, %v123_v48, %v124_v55  ;;  %v128_v21 = vrot.slane %v112_v7, 6  ;;  %v100_v28 = vld [vmem:[%s7619_s1 + $0x60] sm:$0xff]  ;;  %v54_v31 = vld [vmem:[%s7618_s0 + $0x70] sm:$0xff] }
  0x22   :  { %260 = vrot.lane.b32.xlu0 %v3585_v4, %s3401_s13  ;;  %v69_v19 = vld [vmem:[%s7620_s2 + $0x68] sm:$0xff]  ;;  %v114_v22 = vmul.f32 %v98_v14, %v82_v9  ;;  %v84_v23 = vadd.f32 %v68_v16, %v52_v15  ;;  %v129_v25 = vrot.slane %v113_v12, 6  ;;  %v70_v32 = vld [vmem:[%s7620_s2 + $0x70] sm:$0xff]  ;;  %v3642_v33 = vsel %vm138_vm0, %v125_v62, %v126_v6 }
  0x23   :  { %v3624_v24 = vsel %vm138_vm0, %v126_v6, %v127_v11  ;;  %v115_v26 = vmul.f32 %v99_v17, %v83_v13  ;;  %v85_v27 = vadd.f32 %v69_v19, %v53_v18  ;;  %v101_v29 = vld [vmem:[%s7619_s1 + $0x68] sm:$0xff]  ;;  %v86_v39 = vadd.f32 %v70_v32, %v54_v31  ;;  %v102_v40 = vld [vmem:[%s7619_s1 + $0x70] sm:$0xff] }
  0x24   :  { %v130_v34 = vrot.slane %v114_v22, 6  ;;  %v116_v35 = vmul.f32 %v100_v28, %v84_v23  ;;  %v3648_v36 = vsel %vm138_vm0, %v128_v21, %v129_v25  ;;  %v3657_v43 = vsel %vm138_vm0, %v127_v11, %v128_v21 }
  0x25   :  { %268 = vrot.lane.b32.xlu1 %v3594_v10, %s3401_s13  ;;  %v131_v37 = vrot.slane %v115_v26, 6  ;;  %v117_v38 = vmul.f32 %v101_v29, %v85_v27  ;;  %v118_v47 = vmul.f32 %v102_v40, %v86_v39  ;;  %v716_v58 = vrot.slane %v3530_v41, 1 }
  0x26   :  { %266 = vrot.lane.b32.xlu0 %v3618_v20, %s3401_s13  ;;  %v132_v45 = vrot.slane %v116_v35, 6  ;;  %v3669_v48 = vsel %vm138_vm0, %v129_v25, %v130_v34  ;;  %v714_v60 = vrot.slane %v3557_v54, 1  ;;  %v717_v0 = vrot.slane %v3572_v61, 1 }
  0x27   :  { %v3663_v44 = vsel %vm138_vm0, %v130_v34, %v131_v37  ;;  %v133_v46 = vrot.slane %v117_v38, 6  ;;  %v134_v50 = vrot.slane %v118_v47, 6  ;;  %v3813_v63 = vsel %vm732_vm1, %v715_v57, %v716_v58 }
  0x28   :  { %v3681_v51 = vsel %vm138_vm0, %v131_v37, %v132_v45  ;;  %7703 = vst [vmem:[#allocation14_spill] sm:$0xff] %v3813_v63  ;;  %v718_v1 = vrot.slane %v3618_v20, 1  ;;  %v3823_v3 = vsel %vm732_vm1, %v714_v60, %v715_v57  ;;  %v719_v7 = vrot.slane %v3594_v10, 1 }
  0x29   :  { %272 = vrot.lane.b32.xlu1 %v3624_v24, %s3401_s13  ;;  %v3675_v49 = vsel %vm138_vm0, %v132_v45, %v133_v46  ;;  %v3689_v52 = vsel %vm138_vm0, %v134_v50, %v135_v42  ;;  %v3695_v53 = vsel %vm138_vm0, %v133_v46, %v134_v50  ;;  %7705 = vst [vmem:[#allocation16_spill] sm:$0xff] %v3823_v3  ;;  %v720_v9 = vrot.slane %v3642_v33, 1 }
  0x2a   :  { %270 = vrot.lane.b32.xlu0 %v3642_v33, %s3401_s13  ;;  %v3831_v6 = vsel %vm732_vm1, %v717_v0, %v718_v1  ;;  %v3841_v12 = vsel %vm732_vm1, %v716_v58, %v717_v0  ;;  %v721_v15 = vrot.slane %v3624_v24, 1  ;;  %v722_v16 = vrot.slane %v3657_v43, 1 }
  0x2b   :  { %7707 = vst [vmem:[#allocation18_spill] sm:$0xff] %v3831_v6  ;;  %7709 = vst [vmem:[#allocation20_spill] sm:$0xff] %v3841_v12  ;;  %v3849_v14 = vsel %vm732_vm1, %v719_v7, %v720_v9  ;;  %v3859_v18 = vsel %vm732_vm1, %v718_v1, %v719_v7  ;;  %v723_v22 = vrot.slane %v3648_v36, 1  ;;  %v724_v23 = vrot.slane %v3669_v48, 1 }
  0x2c   :  { %7711 = vst [vmem:[#allocation22_spill] sm:$0xff] %v3849_v14  ;;  %7713 = vst [vmem:[#allocation24_spill] sm:$0xff] %v3859_v18  ;;  %v3867_v21 = vsel %vm732_vm1, %v721_v15, %v722_v16  ;;  %v3877_v26 = vsel %vm732_vm1, %v720_v9, %v721_v15  ;;  %v725_v29 = vrot.slane %v3663_v44, 1  ;;  %v726_v31 = vrot.slane %v3681_v51, 1 }
  0x2d   :  { %276 = vrot.lane.b32.xlu1 %v3648_v36, %s3401_s13  ;;  %7715 = vst [vmem:[#allocation26_spill] sm:$0xff] %v3867_v21  ;;  %7717 = vst [vmem:[#allocation28_spill] sm:$0xff] %v3877_v26  ;;  %v3885_v28 = vsel %vm732_vm1, %v723_v22, %v724_v23  ;;  %v3895_v34 = vsel %vm732_vm1, %v722_v16, %v723_v22  ;;  %v727_v38 = vrot.slane %v3675_v49, 1  ;;  %v728_v39 = vrot.slane %v3695_v53, 1 }
  0x2e   :  { %274 = vrot.lane.b32.xlu0 %v3657_v43, %s3401_s13  ;;  %7719 = vst [vmem:[#allocation30_spill] sm:$0xff] %v3885_v28  ;;  %7721 = vst [vmem:[#allocation32_spill] sm:$0xff] %v3895_v34  ;;  %v3903_v37 = vsel %vm732_vm1, %v725_v29, %v726_v31  ;;  %v3913_v45 = vsel %vm732_vm1, %v724_v23, %v725_v29  ;;  %v729_v50 = vrot.slane %v3689_v52, 1 }
  0x2f   :  { %7723 = vst [vmem:[#allocation34_spill] sm:$0xff] %v3903_v37  ;;  %7725 = vst [vmem:[#allocation36_spill] sm:$0xff] %v3913_v45  ;;  %v3921_v47 = vsel %vm732_vm1, %v727_v38, %v728_v39  ;;  %v3930_v58 = vsel %vm732_vm1, %v726_v31, %v727_v38 }
  0x30   :  { %7727 = vst [vmem:[#allocation38_spill] sm:$0xff] %v3921_v47  ;;  %7729 = vst [vmem:[#allocation40_spill] sm:$0xff] %v3930_v58  ;;  %v3938_v1 = vsel %vm732_vm1, %v729_v50, %v714_v60  ;;  %v3946_v9 = vsel %vm732_vm1, %v728_v39, %v729_v50 }
  0x31   :  { %280 = vrot.lane.b32.xlu1 %v3663_v44, %s3401_s13  ;;  %7731 = vst [vmem:[#allocation42_spill] sm:$0xff] %v3938_v1  ;;  %7733 = vst [vmem:[#allocation44_spill] sm:$0xff] %v3946_v9 }
  0x32   :  { %278 = vrot.lane.b32.xlu0 %v3669_v48, %s3401_s13 }
  0x35   :  { %284 = vrot.lane.b32.xlu1 %v3675_v49, %s3401_s13 }
  0x36   :  { %282 = vrot.lane.b32.xlu0 %v3681_v51, %s3401_s13 }
  0x39   :  { %288 = vrot.lane.b32.xlu1 %v3689_v52, %s3401_s13 }
  0x3a   :  { %286 = vrot.lane.b32.xlu0 %v3695_v53, %s3401_s13 }
  0x3d   :  { %344 = vrot.lane.b32.xlu1 %v3585_v4, %s3402_s9 }
  0x3e   :  { %342 = vrot.lane.b32.xlu0 %v3557_v54, %s3402_s9 }
  0x41   :  { %348 = vrot.lane.b32.xlu1 %v3572_v61, %s3402_s9 }
  0x42   :  { %346 = vrot.lane.b32.xlu0 %v3530_v41, %s3402_s9 }
  0x45   :  { %352 = vrot.lane.b32.xlu1 %v3594_v10, %s3402_s9 }
  0x46   :  { %350 = vrot.lane.b32.xlu0 %v3618_v20, %s3402_s9 }
  0x49   :  { %356 = vrot.lane.b32.xlu1 %v3624_v24, %s3402_s9 }
  0x4a   :  { %354 = vrot.lane.b32.xlu0 %v3642_v33, %s3402_s9 }
  0x4d   :  { %360 = vrot.lane.b32.xlu1 %v3648_v36, %s3402_s9 }
  0x4e   :  { %358 = vrot.lane.b32.xlu0 %v3657_v43, %s3402_s9 }
  0x51   :  { %364 = vrot.lane.b32.xlu1 %v3663_v44, %s3402_s9 }
  0x52   :  { %362 = vrot.lane.b32.xlu0 %v3669_v48, %s3402_s9 }
  0x55   :  { %368 = vrot.lane.b32.xlu1 %v3675_v49, %s3402_s9 }
  0x56   :  { %366 = vrot.lane.b32.xlu0 %v3681_v51, %s3402_s9 }
  0x59   :  { %372 = vrot.lane.b32.xlu1 %v3689_v52, %s3402_s9 }
  0x5a   :  { %370 = vrot.lane.b32.xlu0 %v3695_v53, %s3402_s9 }
  0x5d   :  { %514 = vrot.lane.b32.xlu1 %v3585_v4, %s3403_s10 }
  0x5e   :  { %512 = vrot.lane.b32.xlu0 %v3557_v54, %s3403_s10 }
  0x61   :  { %518 = vrot.lane.b32.xlu1 %v3572_v61, %s3403_s10 }
  0x62   :  { %516 = vrot.lane.b32.xlu0 %v3530_v41, %s3403_s10 }
  0x65   :  { %522 = vrot.lane.b32.xlu1 %v3594_v10, %s3403_s10 }
  0x66   :  { %520 = vrot.lane.b32.xlu0 %v3618_v20, %s3403_s10 }
  0x69   :  { %526 = vrot.lane.b32.xlu1 %v3624_v24, %s3403_s10 }
  0x6a   :  { %524 = vrot.lane.b32.xlu0 %v3642_v33, %s3403_s10 }
  0x6d   :  { %530 = vrot.lane.b32.xlu1 %v3648_v36, %s3403_s10 }
  0x6e   :  { %528 = vrot.lane.b32.xlu0 %v3657_v43, %s3403_s10 }
  0x71   :  { %534 = vrot.lane.b32.xlu1 %v3663_v44, %s3403_s10 }
  0x72   :  { %532 = vrot.lane.b32.xlu0 %v3669_v48, %s3403_s10 }
  0x75   :  { %538 = vrot.lane.b32.xlu1 %v3675_v49, %s3403_s10 }
  0x76   :  { %536 = vrot.lane.b32.xlu0 %v3681_v51, %s3403_s10 }
  0x79   :  { %542 = vrot.lane.b32.xlu1 %v3689_v52, %s3403_s10 }
  0x7a   :  { %540 = vrot.lane.b32.xlu0 %v3695_v53, %s3403_s10 }
  0x7d   :  { %615 = vrot.lane.b32.xlu1 %v3585_v4, %s3404_s11 }
  0x7e   :  { %613 = vrot.lane.b32.xlu0 %v3557_v54, %s3404_s11 }
  0x81   :  { %619 = vrot.lane.b32.xlu1 %v3572_v61, %s3404_s11 }
  0x82   :  { %617 = vrot.lane.b32.xlu0 %v3530_v41, %s3404_s11 }
  0x85   :  { %623 = vrot.lane.b32.xlu1 %v3594_v10, %s3404_s11 }
  0x86   :  { %621 = vrot.lane.b32.xlu0 %v3618_v20, %s3404_s11 }
  0x89   :  { %627 = vrot.lane.b32.xlu1 %v3624_v24, %s3404_s11 }
  0x8a   :  { %625 = vrot.lane.b32.xlu0 %v3642_v33, %s3404_s11 }
  0x8d   :  { %631 = vrot.lane.b32.xlu1 %v3648_v36, %s3404_s11 }
  0x8e   :  { %629 = vrot.lane.b32.xlu0 %v3657_v43, %s3404_s11  ;;  %v3785_v30 = vpop.permute.xlu1 %262 }
  0x90   :  { %v3787_v42 = vpop.permute.xlu0 %258 }
  0x91   :  { %635 = vrot.lane.b32.xlu1 %v3663_v44, %s3404_s11 }
  0x92   :  { %633 = vrot.lane.b32.xlu0 %v3669_v48, %s3404_s11 }
  0x93   :  { %v3793_v55 = vpop.permute.xlu1 %264 }
  0x94   :  { %v3795_v56 = vpop.permute.xlu0 %260 }
  0x95   :  { %7700 = vst [vmem:[#allocation11_spill] sm:$0xff] %v3795_v56  ;;  %639 = vrot.lane.b32.xlu1 %v3675_v49, %s3404_s11 }
  0x96   :  { %637 = vrot.lane.b32.xlu0 %v3681_v51, %s3404_s11 }
  0x97   :  { %v3804_v59 = vpop.permute.xlu1 %268 }
  0x98   :  { %7701 = vst [vmem:[#allocation12_spill] sm:$0xff] %v3804_v59  ;;  %v3807_v62 = vpop.permute.xlu0 %266 }
  0x99   :  { %7702 = vst [vmem:[#allocation13_spill] sm:$0xff] %v3807_v62  ;;  %643 = vrot.lane.b32.xlu1 %v3689_v52, %s3404_s11 }
  0x9a   :  { %641 = vrot.lane.b32.xlu0 %v3695_v53, %s3404_s11 }
  0x9b   :  { %v3819_v2 = vpop.permute.xlu1 %272 }
  0x9c   :  { %7704 = vst [vmem:[#allocation15_spill] sm:$0xff] %v3819_v2  ;;  %v3825_v5 = vpop.permute.xlu0 %270 }
  0x9d   :  { %7706 = vst [vmem:[#allocation17_spill] sm:$0xff] %v3825_v5  ;;  %783 = vrot.lane.b32.xlu1 %v3813_v63, %s3401_s13  ;;  %v444_v5 = vld [vmem:[#allocation4 + $0x40] sm:$0xff] }
  0x9e   :  { %781 = vrot.lane.b32.xlu0 %v3823_v3, %s3401_s13 }
  0x9f   :  { %v3837_v11 = vpop.permute.xlu1 %276 }
  0xa0   :  { %7708 = vst [vmem:[#allocation19_spill] sm:$0xff] %v3837_v11  ;;  %v3843_v13 = vpop.permute.xlu0 %274 }
  0xa1   :  { %7710 = vst [vmem:[#allocation21_spill] sm:$0xff] %v3843_v13  ;;  %787 = vrot.lane.b32.xlu1 %v3831_v6, %s3401_s13  ;;  %v375_v13 = vld [vmem:[#allocation4 + $0x20] sm:$0xff] }
  0xa2   :  { %785 = vrot.lane.b32.xlu0 %v3841_v12, %s3401_s13 }
  0xa3   :  { %v3855_v17 = vpop.permute.xlu1 %280 }
  0xa4   :  { %7712 = vst [vmem:[#allocation23_spill] sm:$0xff] %v3855_v17  ;;  %v3861_v19 = vpop.permute.xlu0 %278 }
  0xa5   :  { %7714 = vst [vmem:[#allocation25_spill] sm:$0xff] %v3861_v19  ;;  %791 = vrot.lane.b32.xlu1 %v3849_v14, %s3401_s13 }
  0xa6   :  { %789 = vrot.lane.b32.xlu0 %v3859_v18, %s3401_s13 }
  0xa7   :  { %v3873_v25 = vpop.permute.xlu1 %284 }
  0xa8   :  { %7716 = vst [vmem:[#allocation27_spill] sm:$0xff] %v3873_v25  ;;  %v3879_v27 = vpop.permute.xlu0 %282 }
  0xa9   :  { %7718 = vst [vmem:[#allocation29_spill] sm:$0xff] %v3879_v27  ;;  %795 = vrot.lane.b32.xlu1 %v3867_v21, %s3401_s13 }
  0xaa   :  { %793 = vrot.lane.b32.xlu0 %v3877_v26, %s3401_s13 }
  0xab   :  { %v3891_v32 = vpop.permute.xlu1 %288 }
  0xac   :  { %7720 = vst [vmem:[#allocation31_spill] sm:$0xff] %v3891_v32  ;;  %v3897_v35 = vpop.permute.xlu0 %286 }
  0xad   :  { %7722 = vst [vmem:[#allocation33_spill] sm:$0xff] %v3897_v35  ;;  %799 = vrot.lane.b32.xlu1 %v3885_v28, %s3401_s13 }
  0xae   :  { %797 = vrot.lane.b32.xlu0 %v3895_v34, %s3401_s13 }
  0xaf   :  { %v3909_v40 = vpop.permute.xlu1 %344 }
  0xb0   :  { %7724 = vst [vmem:[#allocation35_spill] sm:$0xff] %v3909_v40  ;;  %v3915_v46 = vpop.permute.xlu0 %342 }
  0xb1   :  { %7726 = vst [vmem:[#allocation37_spill] sm:$0xff] %v3915_v46  ;;  %803 = vrot.lane.b32.xlu1 %v3903_v37, %s3401_s13 }
  0xb2   :  { %801 = vrot.lane.b32.xlu0 %v3913_v45, %s3401_s13 }
  0xb3   :  { %v3926_v57 = vpop.permute.xlu1 %348 }
  0xb4   :  { %7728 = vst [vmem:[#allocation39_spill] sm:$0xff] %v3926_v57  ;;  %v3932_v0 = vpop.permute.xlu0 %346 }
  0xb5   :  { %7730 = vst [vmem:[#allocation41_spill] sm:$0xff] %v3932_v0  ;;  %807 = vrot.lane.b32.xlu1 %v3921_v47, %s3401_s13 }
  0xb6   :  { %805 = vrot.lane.b32.xlu0 %v3930_v58, %s3401_s13 }
  0xb7   :  { %v3942_v7 = vpop.permute.xlu1 %352 }
  0xb8   :  { %7732 = vst [vmem:[#allocation43_spill] sm:$0xff] %v3942_v7  ;;  %v3948_v15 = vpop.permute.xlu0 %350 }
  0xb9   :  { %7734 = vst [vmem:[#allocation45_spill] sm:$0xff] %v3948_v15  ;;  %811 = vrot.lane.b32.xlu1 %v3938_v1, %s3401_s13  ;;  %v292_v15 = vld [vmem:[#allocation4 + $0x10] sm:$0xff] }
  0xba   :  { %809 = vrot.lane.b32.xlu0 %v3946_v9, %s3401_s13  ;;  %v303_v32 = vunpack.c.1.s8 %v292_v15  ;;  %v302_v27 = vunpack.c.0.s8 %v292_v15  ;;  %v305_v57 = vunpack.c.3.s8 %v292_v15  ;;  %v304_v46 = vunpack.c.2.s8 %v292_v15 }
  0xbb   :  { %v3954_v16 = vpop.permute.xlu1 %356 }
  0xbc   :  { %7735 = vst [vmem:[#allocation46_spill] sm:$0xff] %v3954_v16  ;;  %v3956_v60 = vpop.permute.xlu0 %354  ;;  %v4326_v2 = vcvt.s32.f32 %v302_v27  ;;  %v4328_v62 = vcvt.s32.f32 %v305_v57  ;;  %v382_v27 = vunpack.c.3.s8 %v375_v13  ;;  %v445_v57 = vld [vmem:[#allocation4 + $0x48] sm:$0xff] }
  0xbd   :  { %7736 = vst [vmem:[#allocation47_spill] sm:$0xff] %v3956_v60  ;;  %884 = vrot.lane.b32.xlu1 %v3813_v63, %s3402_s9 }
  0xbe   :  { %882 = vrot.lane.b32.xlu0 %v3823_v3, %s3402_s9  ;;  %7825 = vst [vmem:[#allocation136_spill] sm:$0xff] %v4326_v2  ;;  %7826 = vst [vmem:[#allocation137_spill] sm:$0xff] %v4328_v62 }
  0xbf   :  { %v3962_v22 = vpop.permute.xlu1 %360 }
  0xc0   :  { %7737 = vst [vmem:[#allocation48_spill] sm:$0xff] %v3962_v22  ;;  %v3964_v23 = vpop.permute.xlu0 %358 }
  0xc1   :  { %7738 = vst [vmem:[#allocation49_spill] sm:$0xff] %v3964_v23  ;;  %888 = vrot.lane.b32.xlu1 %v3831_v6, %s3402_s9  ;;  %v1256_v23 = vrot.slane %v3841_v12, 1 }
  0xc2   :  { %886 = vrot.lane.b32.xlu0 %v3841_v12, %s3402_s9 }
  0xc3   :  { %v3970_v29 = vpop.permute.xlu1 %364 }
  0xc4   :  { %7739 = vst [vmem:[#allocation50_spill] sm:$0xff] %v3970_v29  ;;  %v3972_v31 = vpop.permute.xlu0 %362 }
  0xc5   :  { %7740 = vst [vmem:[#allocation51_spill] sm:$0xff] %v3972_v31  ;;  %892 = vrot.lane.b32.xlu1 %v3849_v14, %s3402_s9 }
  0xc6   :  { %890 = vrot.lane.b32.xlu0 %v3859_v18, %s3402_s9 }
  0xc7   :  { %v3978_v38 = vpop.permute.xlu1 %368 }
  0xc8   :  { %7741 = vst [vmem:[#allocation52_spill] sm:$0xff] %v3978_v38  ;;  %v3980_v39 = vpop.permute.xlu0 %366 }
  0xc9   :  { %7742 = vst [vmem:[#allocation53_spill] sm:$0xff] %v3980_v39  ;;  %896 = vrot.lane.b32.xlu1 %v3867_v21, %s3402_s9 }
  0xca   :  { %894 = vrot.lane.b32.xlu0 %v3877_v26, %s3402_s9 }
  0xcb   :  { %v3986_v50 = vpop.permute.xlu1 %372 }
  0xcc   :  { %7743 = vst [vmem:[#allocation54_spill] sm:$0xff] %v3986_v50  ;;  %v3988_v29 = vpop.permute.xlu0 %370 }
  0xcd   :  { %7744 = vst [vmem:[#allocation55_spill] sm:$0xff] %v3988_v29  ;;  %900 = vrot.lane.b32.xlu1 %v3885_v28, %s3402_s9 }
  0xce   :  { %898 = vrot.lane.b32.xlu0 %v3895_v34, %s3402_s9 }
  0xcf   :  { %v3994_v31 = vpop.permute.xlu1 %514 }
  0xd0   :  { %7745 = vst [vmem:[#allocation56_spill] sm:$0xff] %v3994_v31  ;;  %v3996_v38 = vpop.permute.xlu0 %512 }
  0xd1   :  { %7746 = vst [vmem:[#allocation57_spill] sm:$0xff] %v3996_v38  ;;  %904 = vrot.lane.b32.xlu1 %v3903_v37, %s3402_s9 }
  0xd2   :  { %902 = vrot.lane.b32.xlu0 %v3913_v45, %s3402_s9 }
  0xd3   :  { %v4002_v39 = vpop.permute.xlu1 %518 }
  0xd4   :  { %7747 = vst [vmem:[#allocation58_spill] sm:$0xff] %v4002_v39  ;;  %v4004_v50 = vpop.permute.xlu0 %516 }
  0xd5   :  { %7748 = vst [vmem:[#allocation59_spill] sm:$0xff] %v4004_v50  ;;  %908 = vrot.lane.b32.xlu1 %v3921_v47, %s3402_s9 }
  0xd6   :  { %906 = vrot.lane.b32.xlu0 %v3930_v58, %s3402_s9 }
  0xd7   :  { %v4010_v29 = vpop.permute.xlu1 %522 }
  0xd8   :  { %7749 = vst [vmem:[#allocation60_spill] sm:$0xff] %v4010_v29  ;;  %v4012_v31 = vpop.permute.xlu0 %520 }
  0xd9   :  { %7750 = vst [vmem:[#allocation61_spill] sm:$0xff] %v4012_v31  ;;  %912 = vrot.lane.b32.xlu1 %v3938_v1, %s3402_s9 }
  0xda   :  { %910 = vrot.lane.b32.xlu0 %v3946_v9, %s3402_s9 }
  0xdb   :  { %v4018_v38 = vpop.permute.xlu1 %526 }
  0xdc   :  { %7751 = vst [vmem:[#allocation62_spill] sm:$0xff] %v4018_v38  ;;  %v4020_v39 = vpop.permute.xlu0 %524 }
  0xdd   :  { %7752 = vst [vmem:[#allocation63_spill] sm:$0xff] %v4020_v39  ;;  %1054 = vrot.lane.b32.xlu1 %v3813_v63, %s3403_s10 }
  0xde   :  { %1052 = vrot.lane.b32.xlu0 %v3823_v3, %s3403_s10 }
  0xdf   :  { %v4026_v50 = vpop.permute.xlu1 %530 }
  0xe0   :  { %7753 = vst [vmem:[#allocation64_spill] sm:$0xff] %v4026_v50  ;;  %v4028_v29 = vpop.permute.xlu0 %528 }
  0xe1   :  { %7754 = vst [vmem:[#allocation65_spill] sm:$0xff] %v4028_v29  ;;  %1058 = vrot.lane.b32.xlu1 %v3831_v6, %s3403_s10 }
  0xe2   :  { %1056 = vrot.lane.b32.xlu0 %v3841_v12, %s3403_s10 }
  0xe3   :  { %v4034_v31 = vpop.permute.xlu1 %534 }
  0xe4   :  { %7755 = vst [vmem:[#allocation66_spill] sm:$0xff] %v4034_v31  ;;  %v4036_v38 = vpop.permute.xlu0 %532 }
  0xe5   :  { %7756 = vst [vmem:[#allocation67_spill] sm:$0xff] %v4036_v38  ;;  %1062 = vrot.lane.b32.xlu1 %v3849_v14, %s3403_s10 }
  0xe6   :  { %1060 = vrot.lane.b32.xlu0 %v3859_v18, %s3403_s10 }
  0xe7   :  { %v4042_v39 = vpop.permute.xlu1 %538 }
  0xe8   :  { %7757 = vst [vmem:[#allocation68_spill] sm:$0xff] %v4042_v39  ;;  %v4044_v50 = vpop.permute.xlu0 %536 }
  0xe9   :  { %7758 = vst [vmem:[#allocation69_spill] sm:$0xff] %v4044_v50  ;;  %1066 = vrot.lane.b32.xlu1 %v3867_v21, %s3403_s10 }
  0xea   :  { %1064 = vrot.lane.b32.xlu0 %v3877_v26, %s3403_s10 }
  0xeb   :  { %v4050_v29 = vpop.permute.xlu1 %542 }
  0xec   :  { %7759 = vst [vmem:[#allocation70_spill] sm:$0xff] %v4050_v29  ;;  %v4052_v31 = vpop.permute.xlu0 %540 }
  0xed   :  { %7760 = vst [vmem:[#allocation71_spill] sm:$0xff] %v4052_v31  ;;  %1070 = vrot.lane.b32.xlu1 %v3885_v28, %s3403_s10 }
  0xee   :  { %1068 = vrot.lane.b32.xlu0 %v3895_v34, %s3403_s10 }
  0xef   :  { %v4058_v38 = vpop.permute.xlu1 %615 }
  0xf0   :  { %7761 = vst [vmem:[#allocation72_spill] sm:$0xff] %v4058_v38  ;;  %v4060_v39 = vpop.permute.xlu0 %613 }
  0xf1   :  { %7762 = vst [vmem:[#allocation73_spill] sm:$0xff] %v4060_v39  ;;  %1074 = vrot.lane.b32.xlu1 %v3903_v37, %s3403_s10 }
  0xf2   :  { %1072 = vrot.lane.b32.xlu0 %v3913_v45, %s3403_s10 }
  0xf3   :  { %v4066_v50 = vpop.permute.xlu1 %619 }
  0xf4   :  { %7763 = vst [vmem:[#allocation74_spill] sm:$0xff] %v4066_v50  ;;  %v4068_v29 = vpop.permute.xlu0 %617 }
  0xf5   :  { %7764 = vst [vmem:[#allocation75_spill] sm:$0xff] %v4068_v29  ;;  %1078 = vrot.lane.b32.xlu1 %v3921_v47, %s3403_s10 }
  0xf6   :  { %1076 = vrot.lane.b32.xlu0 %v3930_v58, %s3403_s10 }
  0xf7   :  { %v4074_v31 = vpop.permute.xlu1 %623 }
  0xf8   :  { %7765 = vst [vmem:[#allocation76_spill] sm:$0xff] %v4074_v31  ;;  %v4076_v38 = vpop.permute.xlu0 %621 }
  0xf9   :  { %7766 = vst [vmem:[#allocation77_spill] sm:$0xff] %v4076_v38  ;;  %1082 = vrot.lane.b32.xlu1 %v3938_v1, %s3403_s10 }
  0xfa   :  { %1080 = vrot.lane.b32.xlu0 %v3946_v9, %s3403_s10 }
  0xfb   :  { %v4082_v39 = vpop.permute.xlu1 %627 }
  0xfc   :  { %7767 = vst [vmem:[#allocation78_spill] sm:$0xff] %v4082_v39  ;;  %v4084_v50 = vpop.permute.xlu0 %625 }
  0xfd   :  { %7768 = vst [vmem:[#allocation79_spill] sm:$0xff] %v4084_v50  ;;  %1155 = vrot.lane.b32.xlu1 %v3813_v63, %s3404_s11 }
  0xfe   :  { %1153 = vrot.lane.b32.xlu0 %v3823_v3, %s3404_s11 }
  0xff   :  { %v4090_v29 = vpop.permute.xlu1 %631 }
 0x100   :  { %7769 = vst [vmem:[#allocation80_spill] sm:$0xff] %v4090_v29  ;;  %v4092_v31 = vpop.permute.xlu0 %629 }
 0x101   :  { %7770 = vst [vmem:[#allocation81_spill] sm:$0xff] %v4092_v31  ;;  %1159 = vrot.lane.b32.xlu1 %v3831_v6, %s3404_s11 }
 0x102   :  { %1157 = vrot.lane.b32.xlu0 %v3841_v12, %s3404_s11  ;;  %v1258_v12 = vrot.slane %v3859_v18, 1 }
 0x103   :  { %v4098_v38 = vpop.permute.xlu1 %635 }
 0x104   :  { %7771 = vst [vmem:[#allocation82_spill] sm:$0xff] %v4098_v38  ;;  %v4100_v39 = vpop.permute.xlu0 %633 }
 0x105   :  { %7772 = vst [vmem:[#allocation83_spill] sm:$0xff] %v4100_v39  ;;  %1163 = vrot.lane.b32.xlu1 %v3849_v14, %s3404_s11 }
 0x106   :  { %1161 = vrot.lane.b32.xlu0 %v3859_v18, %s3404_s11  ;;  %v1259_v18 = vrot.slane %v3849_v14, 1  ;;  %v1262_v14 = vrot.slane %v3895_v34, 1 }
 0x107   :  { %v4106_v50 = vpop.permute.xlu1 %639 }
 0x108   :  { %7773 = vst [vmem:[#allocation84_spill] sm:$0xff] %v4106_v50  ;;  %v4108_v29 = vpop.permute.xlu0 %637 }
 0x109   :  { %7774 = vst [vmem:[#allocation85_spill] sm:$0xff] %v4108_v29  ;;  %1167 = vrot.lane.b32.xlu1 %v3867_v21, %s3404_s11 }
 0x10a   :  { %1165 = vrot.lane.b32.xlu0 %v3877_v26, %s3404_s11 }
 0x10b   :  { %v4114_v31 = vpop.permute.xlu1 %643 }
 0x10c   :  { %7775 = vst [vmem:[#allocation86_spill] sm:$0xff] %v4114_v31  ;;  %v4116_v38 = vpop.permute.xlu0 %641 }
 0x10d   :  { %7776 = vst [vmem:[#allocation87_spill] sm:$0xff] %v4116_v38  ;;  %1171 = vrot.lane.b32.xlu1 %v3885_v28, %s3404_s11  ;;  %v1255_v38 = vrot.slane %v3813_v63, 1 }
 0x10e   :  { %1169 = vrot.lane.b32.xlu0 %v3895_v34, %s3404_s11  ;;  %v1263_v34 = vrot.slane %v3885_v28, 1  ;;  %v1266_v28 = vrot.slane %v3930_v58, 1 }
 0x10f   :  { %v4122_v39 = vpop.permute.xlu1 %783 }
 0x110   :  { %7777 = vst [vmem:[#allocation88_spill] sm:$0xff] %v4122_v39  ;;  %v4124_v50 = vpop.permute.xlu0 %781 }
 0x111   :  { %7778 = vst [vmem:[#allocation89_spill] sm:$0xff] %v4124_v50  ;;  %1175 = vrot.lane.b32.xlu1 %v3903_v37, %s3404_s11  ;;  %v1254_v50 = vrot.slane %v3823_v3, 1 }
 0x112   :  { %1173 = vrot.lane.b32.xlu0 %v3913_v45, %s3404_s11 }
 0x113   :  { %v4130_v29 = vpop.permute.xlu1 %787 }
 0x114   :  { %7779 = vst [vmem:[#allocation90_spill] sm:$0xff] %v4130_v29  ;;  %v4132_v31 = vpop.permute.xlu0 %785  ;;  %v1257_v29 = vrot.slane %v3831_v6, 1  ;;  %v1260_v6 = vrot.slane %v3877_v26, 1  ;;  %v1261_v26 = vrot.slane %v3867_v21, 1  ;;  %v1264_v21 = vrot.slane %v3913_v45, 1 }
 0x115   :  { %7780 = vst [vmem:[#allocation91_spill] sm:$0xff] %v4132_v31  ;;  %1179 = vrot.lane.b32.xlu1 %v3921_v47, %s3404_s11  ;;  %v4149_v31 = vsel %vm732_vm1, %v1255_v38, %v1256_v23  ;;  %v1265_v45 = vrot.slane %v3903_v37, 1  ;;  %v1268_v37 = vrot.slane %v3946_v9, 1 }
 0x116   :  { %1177 = vrot.lane.b32.xlu0 %v3930_v58, %s3404_s11  ;;  %7783 = vst [vmem:[#allocation94_spill] sm:$0xff] %v4149_v31  ;;  %v4167_v63 = vsel %vm732_vm1, %v1257_v29, %v1258_v12  ;;  %v4185_v16 = vsel %vm732_vm1, %v1259_v18, %v1260_v6  ;;  %v1267_v58 = vrot.slane %v3921_v47, 1 }
 0x117   :  { %v4140_v39 = vpop.permute.xlu1 %791  ;;  %7786 = vst [vmem:[#allocation97_spill] sm:$0xff] %v4167_v63  ;;  %7790 = vst [vmem:[#allocation101_spill] sm:$0xff] %v4185_v16 }
 0x118   :  { %7781 = vst [vmem:[#allocation92_spill] sm:$0xff] %v4140_v39  ;;  %v4143_v22 = vpop.permute.xlu0 %789  ;;  %v4159_v39 = vsel %vm732_vm1, %v1254_v50, %v1255_v38  ;;  %v4177_v38 = vsel %vm732_vm1, %v1256_v23, %v1257_v29  ;;  %v4195_v23 = vsel %vm732_vm1, %v1258_v12, %v1259_v18  ;;  %v4213_v12 = vsel %vm732_vm1, %v1260_v6, %v1261_v26 }
 0x119   :  { %7782 = vst [vmem:[#allocation93_spill] sm:$0xff] %v4143_v22  ;;  %1183 = vrot.lane.b32.xlu1 %v3938_v1, %s3404_s11  ;;  %7788 = vst [vmem:[#allocation99_spill] sm:$0xff] %v4177_v38  ;;  %v4231_v6 = vsel %vm732_vm1, %v1262_v14, %v1263_v34 }
 0x11a   :  { %1181 = vrot.lane.b32.xlu0 %v3946_v9, %s3404_s11  ;;  %7792 = vst [vmem:[#allocation103_spill] sm:$0xff] %v4195_v23  ;;  %7796 = vst [vmem:[#allocation107_spill] sm:$0xff] %v4213_v12  ;;  %v1269_v9 = vrot.slane %v3938_v1, 1 }
 0x11b   :  { %v4155_v60 = vpop.permute.xlu1 %795  ;;  %7800 = vst [vmem:[#allocation111_spill] sm:$0xff] %v4231_v6 }
 0x11c   :  { %7784 = vst [vmem:[#allocation95_spill] sm:$0xff] %v4155_v60  ;;  %v4161_v22 = vpop.permute.xlu0 %793 }
 0x11d   :  { %7785 = vst [vmem:[#allocation96_spill] sm:$0xff] %v4161_v22  ;;  %1320 = vrot.lane.b32.xlu1 %v4149_v31, %s3401_s13 }
 0x11e   :  { %1318 = vrot.lane.b32.xlu0 %v4159_v39, %s3401_s13 }
 0x11f   :  { %v4173_v60 = vpop.permute.xlu1 %799 }
 0x120   :  { %7787 = vst [vmem:[#allocation98_spill] sm:$0xff] %v4173_v60  ;;  %v4179_v22 = vpop.permute.xlu0 %797 }
 0x121   :  { %7789 = vst [vmem:[#allocation100_spill] sm:$0xff] %v4179_v22  ;;  %1324 = vrot.lane.b32.xlu1 %v4167_v63, %s3401_s13  ;;  %v4203_v22 = vsel %vm732_vm1, %v1261_v26, %v1262_v14  ;;  %v4249_v14 = vsel %vm732_vm1, %v1264_v21, %v1265_v45 }
 0x122   :  { %1322 = vrot.lane.b32.xlu0 %v4177_v38, %s3401_s13  ;;  %7794 = vst [vmem:[#allocation105_spill] sm:$0xff] %v4203_v22  ;;  %7804 = vst [vmem:[#allocation115_spill] sm:$0xff] %v4249_v14 }
 0x123   :  { %v4191_v60 = vpop.permute.xlu1 %803 }
 0x124   :  { %7791 = vst [vmem:[#allocation102_spill] sm:$0xff] %v4191_v60  ;;  %v4197_v29 = vpop.permute.xlu0 %801 }
 0x125   :  { %7793 = vst [vmem:[#allocation104_spill] sm:$0xff] %v4197_v29  ;;  %1328 = vrot.lane.b32.xlu1 %v4185_v16, %s3401_s13  ;;  %v4221_v29 = vsel %vm732_vm1, %v1263_v34, %v1264_v21  ;;  %v4266_v21 = vsel %vm732_vm1, %v1266_v28, %v1267_v58 }
 0x126   :  { %1326 = vrot.lane.b32.xlu0 %v4195_v23, %s3401_s13  ;;  %7798 = vst [vmem:[#allocation109_spill] sm:$0xff] %v4221_v29  ;;  %7808 = vst [vmem:[#allocation119_spill] sm:$0xff] %v4266_v21 }
 0x127   :  { %v4209_v60 = vpop.permute.xlu1 %807 }
 0x128   :  { %7795 = vst [vmem:[#allocation106_spill] sm:$0xff] %v4209_v60  ;;  %v4215_v18 = vpop.permute.xlu0 %805 }
 0x129   :  { %7797 = vst [vmem:[#allocation108_spill] sm:$0xff] %v4215_v18  ;;  %1332 = vrot.lane.b32.xlu1 %v4203_v22, %s3401_s13  ;;  %v4239_v18 = vsel %vm732_vm1, %v1265_v45, %v1266_v28 }
 0x12a   :  { %1330 = vrot.lane.b32.xlu0 %v4213_v12, %s3401_s13  ;;  %7802 = vst [vmem:[#allocation113_spill] sm:$0xff] %v4239_v18 }
 0x12b   :  { %v4227_v60 = vpop.permute.xlu1 %811 }
 0x12c   :  { %7799 = vst [vmem:[#allocation110_spill] sm:$0xff] %v4227_v60  ;;  %v4233_v26 = vpop.permute.xlu0 %809 }
 0x12d   :  { %7801 = vst [vmem:[#allocation112_spill] sm:$0xff] %v4233_v26  ;;  %1336 = vrot.lane.b32.xlu1 %v4221_v29, %s3401_s13  ;;  %v4257_v26 = vsel %vm732_vm1, %v1267_v58, %v1268_v37  ;;  %v290_v58 = vld [vmem:[#allocation4] sm:$0xff] }
 0x12e   :  { %1334 = vrot.lane.b32.xlu0 %v4231_v6, %s3401_s13  ;;  %7806 = vst [vmem:[#allocation117_spill] sm:$0xff] %v4257_v26  ;;  %v296_v1 = vunpack.c.2.s8 %v290_v58  ;;  %v294_v3 = vunpack.c.0.s8 %v290_v58 }
 0x12f   :  { %v4245_v60 = vpop.permute.xlu1 %884 }
 0x130   :  { %7803 = vst [vmem:[#allocation114_spill] sm:$0xff] %v4245_v60  ;;  %v4251_v34 = vpop.permute.xlu0 %882  ;;  %v4300_v25 = vcvt.s32.f32 %v296_v1 }
 0x131   :  { %7805 = vst [vmem:[#allocation116_spill] sm:$0xff] %v4251_v34  ;;  %1340 = vrot.lane.b32.xlu1 %v4239_v18, %s3401_s13  ;;  %v4274_v34 = vsel %vm732_vm1, %v1269_v9, %v1254_v50 }
 0x132   :  { %1338 = vrot.lane.b32.xlu0 %v4249_v14, %s3401_s13  ;;  %7810 = vst [vmem:[#allocation121_spill] sm:$0xff] %v4274_v34 }
 0x133   :  { %v4262_v47 = vpop.permute.xlu1 %888 }
 0x134   :  { %7807 = vst [vmem:[#allocation118_spill] sm:$0xff] %v4262_v47  ;;  %v4268_v45 = vpop.permute.xlu0 %886  ;;  %v4282_v47 = vsel %vm732_vm1, %v1268_v37, %v1269_v9  ;;  %v297_v37 = vunpack.c.3.s8 %v290_v58  ;;  %v295_v9 = vunpack.c.1.s8 %v290_v58 }
 0x135   :  { %7809 = vst [vmem:[#allocation120_spill] sm:$0xff] %v4268_v45  ;;  %1344 = vrot.lane.b32.xlu1 %v4257_v26, %s3401_s13  ;;  %7812 = vst [vmem:[#allocation123_spill] sm:$0xff] %v4282_v47  ;;  %v291_v45 = vld [vmem:[#allocation4 + $0x8] sm:$0xff] }
 0x136   :  { %1342 = vrot.lane.b32.xlu0 %v4266_v21, %s3401_s13  ;;  %v299_v8 = vunpack.c.1.s8 %v291_v45  ;;  %v298_v7 = vunpack.c.0.s8 %v291_v45  ;;  %v301_v0 = vunpack.c.3.s8 %v291_v45  ;;  %v4308_v17 = vcvt.s32.f32 %v297_v37 }
 0x137   :  { %v4278_v60 = vpop.permute.xlu1 %892  ;;  %v4310_v40 = vcvt.s32.f32 %v295_v9  ;;  %v4324_v9 = vcvt.s32.f32 %v303_v32 }
 0x138   :  { %7811 = vst [vmem:[#allocation122_spill] sm:$0xff] %v4278_v60  ;;  %v4284_v28 = vpop.permute.xlu0 %890  ;;  %v4312_v11 = vcvt.s32.f32 %v299_v8  ;;  %v4314_v1 = vcvt.s32.f32 %v298_v7  ;;  %v376_v8 = vld [vmem:[#allocation4 + $0x28] sm:$0xff]  ;;  %v4330_v7 = vcvt.s32.f32 %v304_v46  ;;  %v381_v46 = vunpack.c.2.s8 %v375_v13 }
 0x139   :  { %7813 = vst [vmem:[#allocation124_spill] sm:$0xff] %v4284_v28  ;;  %1348 = vrot.lane.b32.xlu1 %v4274_v34, %s3401_s13  ;;  %v293_v28 = vld [vmem:[#allocation4 + $0x18] sm:$0xff]  ;;  %7818 = vst [vmem:[#allocation129_spill] sm:$0xff] %v4310_v40  ;;  %v386_v2 = vunpack.c.3.s8 %v376_v8 }
 0x13a   :  { %1346 = vrot.lane.b32.xlu0 %v4282_v47, %s3401_s13  ;;  %v307_v19 = vunpack.c.1.s8 %v293_v28  ;;  %7819 = vst [vmem:[#allocation130_spill] sm:$0xff] %v4312_v11  ;;  %7820 = vst [vmem:[#allocation131_spill] sm:$0xff] %v4314_v1  ;;  %v308_v15 = vunpack.c.2.s8 %v293_v28  ;;  %v4358_v40 = vcvt.s32.f32 %v381_v46 }
 0x13b   :  { %v4290_v50 = vpop.permute.xlu1 %896  ;;  %7824 = vst [vmem:[#allocation135_spill] sm:$0xff] %v4324_v9  ;;  %7827 = vst [vmem:[#allocation138_spill] sm:$0xff] %v4330_v7  ;;  %v384_v7 = vunpack.c.1.s8 %v376_v8  ;;  %v448_v9 = vunpack.c.0.s8 %v444_v5 }
 0x13c   :  { %7814 = vst [vmem:[#allocation125_spill] sm:$0xff] %v4290_v50  ;;  %v4292_v60 = vpop.permute.xlu0 %894  ;;  %v300_v50 = vunpack.c.2.s8 %v291_v45  ;;  %v309_v45 = vunpack.c.3.s8 %v293_v28  ;;  %v4342_v62 = vcvt.s32.f32 %v308_v15  ;;  %v453_v15 = vunpack.c.1.s8 %v445_v57  ;;  %7837 = vst [vmem:[#allocation148_spill] sm:$0xff] %v4358_v40 }
 0x13d   :  { %7815 = vst [vmem:[#allocation126_spill] sm:$0xff] %v4292_v60  ;;  %1421 = vrot.lane.b32.xlu1 %v4149_v31, %s3402_s9  ;;  %v4302_v60 = vcvt.s32.f32 %v294_v3  ;;  %v4316_v3 = vcvt.s32.f32 %v301_v0  ;;  %v4332_v0 = vcvt.s32.f32 %v307_v19  ;;  %v383_v19 = vunpack.c.0.s8 %v376_v8 }
 0x13e   :  { %1419 = vrot.lane.b32.xlu0 %v4159_v39, %s3402_s9  ;;  %v4322_v37 = vcvt.s32.f32 %v300_v50  ;;  %v4340_v32 = vcvt.s32.f32 %v309_v45  ;;  %7832 = vst [vmem:[#allocation143_spill] sm:$0xff] %v4342_v62  ;;  %v4360_v56 = vcvt.s32.f32 %v384_v7  ;;  %v469_v46 = vcvt.s32.f32 %v453_v15  ;;  %v447_v15 = vld [vmem:[#allocation4 + $0x58] sm:$0xff] }
 0x13f   :  { %v4298_v35 = vpop.permute.xlu1 %900  ;;  %7821 = vst [vmem:[#allocation132_spill] sm:$0xff] %v4316_v3  ;;  %7828 = vst [vmem:[#allocation139_spill] sm:$0xff] %v4332_v0  ;;  %v379_v3 = vunpack.c.0.s8 %v375_v13  ;;  %v377_v0 = vld [vmem:[#allocation4 + $0x30] sm:$0xff]  ;;  %v455_v40 = vunpack.c.3.s8 %v445_v57  ;;  %v454_v7 = vunpack.c.2.s8 %v445_v57 }
 0x140   :  { %7816 = vst [vmem:[#allocation127_spill] sm:$0xff] %v4298_v35  ;;  %v4304_v58 = vpop.permute.xlu0 %898  ;;  %v306_v35 = vunpack.c.0.s8 %v293_v28  ;;  %7823 = vst [vmem:[#allocation134_spill] sm:$0xff] %v4322_v37  ;;  %v380_v28 = vunpack.c.1.s8 %v375_v13  ;;  %v385_v37 = vunpack.c.2.s8 %v376_v8  ;;  %v4356_v13 = vcvt.s32.f32 %v382_v27 }
 0x141   :  { %7817 = vst [vmem:[#allocation128_spill] sm:$0xff] %v4304_v58  ;;  %1425 = vrot.lane.b32.xlu1 %v4167_v63, %s3402_s9  ;;  %7831 = vst [vmem:[#allocation142_spill] sm:$0xff] %v4340_v32  ;;  %v4350_v32 = vcvt.s32.f32 %v379_v3  ;;  %v388_v11 = vunpack.c.1.s8 %v377_v0  ;;  %v387_v3 = vunpack.c.0.s8 %v377_v0 }
 0x142   :  { %1423 = vrot.lane.b32.xlu0 %v4177_v38, %s3402_s9  ;;  %v4338_v50 = vcvt.s32.f32 %v306_v35  ;;  %v451_v35 = vunpack.c.3.s8 %v444_v5  ;;  %v4348_v45 = vcvt.s32.f32 %v380_v28  ;;  %7836 = vst [vmem:[#allocation147_spill] sm:$0xff] %v4356_v13  ;;  %7838 = vst [vmem:[#allocation149_spill] sm:$0xff] %v4360_v56  ;;  %v4368_v28 = vcvt.s32.f32 %v386_v2 }
 0x143   :  { %v4320_v58 = vpop.permute.xlu1 %904  ;;  %7834 = vst [vmem:[#allocation145_spill] sm:$0xff] %v4350_v32  ;;  %v446_v32 = vld [vmem:[#allocation4 + $0x50] sm:$0xff] }
 0x144   :  { %7822 = vst [vmem:[#allocation133_spill] sm:$0xff] %v4320_v58  ;;  %v4334_v1 = vpop.permute.xlu0 %902  ;;  %7830 = vst [vmem:[#allocation141_spill] sm:$0xff] %v4338_v50  ;;  %v449_v58 = vunpack.c.1.s8 %v444_v5  ;;  %v450_v50 = vunpack.c.2.s8 %v444_v5  ;;  %v4362_v5 = vcvt.s32.f32 %v383_v19  ;;  %v467_v27 = vcvt.s32.f32 %v451_v35 }
 0x145   :  { %7829 = vst [vmem:[#allocation140_spill] sm:$0xff] %v4334_v1  ;;  %1429 = vrot.lane.b32.xlu1 %v4185_v16, %s3402_s9  ;;  %v4376_v19 = vcvt.s32.f32 %v388_v11  ;;  %v4381_v35 = vcvt.s32.f32 %v387_v3  ;;  %v470_v3 = vcvt.s32.f32 %v454_v7 }
 0x146   :  { %1427 = vrot.lane.b32.xlu0 %v4195_v23, %s3402_s9  ;;  %v465_v59 = vcvt.s32.f32 %v449_v58  ;;  %7839 = vst [vmem:[#allocation150_spill] sm:$0xff] %v4362_v5  ;;  %v466_v13 = vcvt.s32.f32 %v450_v50  ;;  %v4370_v58 = vcvt.s32.f32 %v385_v37  ;;  %v390_v5 = vunpack.c.3.s8 %v377_v0 }
 0x147   :  { %v4346_v1 = vpop.permute.xlu1 %908  ;;  %7843 = vst [vmem:[#allocation154_spill] sm:$0xff] %v4376_v19  ;;  %7844 = vst [vmem:[#allocation155_spill] sm:$0xff] %v4381_v35  ;;  %v389_v50 = vunpack.c.2.s8 %v377_v0  ;;  %v457_v37 = vunpack.c.1.s8 %v446_v32  ;;  %v4391_v19 = vmul.f32 %v467_v27, %v3572_v61  ;;  %v471_v0 = vcvt.s32.f32 %v455_v40 }
 0x148   :  { %7833 = vst [vmem:[#allocation144_spill] sm:$0xff] %v4346_v1  ;;  %v4352_v62 = vpop.permute.xlu0 %906  ;;  %v452_v1 = vunpack.c.0.s8 %v445_v57  ;;  %7841 = vst [vmem:[#allocation152_spill] sm:$0xff] %v4370_v58  ;;  %v4379_v2 = vmul.f32 %v465_v59, %v3585_v4  ;;  %v4394_v4 = vmul.f32 %v466_v13, %v3530_v41  ;;  %v459_v59 = vunpack.c.3.s8 %v446_v32 }
 0x149   :  { %7835 = vst [vmem:[#allocation146_spill] sm:$0xff] %v4352_v62  ;;  %1433 = vrot.lane.b32.xlu1 %v4203_v22, %s3402_s9  ;;  %v464_v62 = vcvt.s32.f32 %v448_v9  ;;  %v458_v35 = vunpack.c.2.s8 %v446_v32  ;;  %v460_v41 = vunpack.c.0.s8 %v447_v15  ;;  %v4408_v13 = vcvt.s32.f32 %v389_v50 }
 0x14a   :  { %1431 = vrot.lane.b32.xlu0 %v4213_v12, %s3402_s9  ;;  %v468_v9 = vcvt.s32.f32 %v452_v1  ;;  %v4397_v1 = vmul.f32 %v469_v46, %v3594_v10  ;;  %v545_v10 = vld [vmem:[#allocation4 + $0x60] sm:$0xff]  ;;  %v473_v46 = vcvt.s32.f32 %v457_v37 }
 0x14b   :  { %v4366_v8 = vpop.permute.xlu1 %912  ;;  %v4388_v11 = vmul.f32 %v464_v62, %v3557_v54  ;;  %v4403_v54 = vcvt.s32.f32 %v390_v5  ;;  %v461_v62 = vunpack.c.1.s8 %v447_v15  ;;  %7850 = vst [vmem:[#allocation161_spill] sm:$0xff] %v4408_v13  ;;  %v463_v5 = vunpack.c.3.s8 %v447_v15 }
 0x14c   :  { %7840 = vst [vmem:[#allocation151_spill] sm:$0xff] %v4366_v8  ;;  %v4372_v56 = vpop.permute.xlu0 %910  ;;  %v456_v8 = vunpack.c.0.s8 %v446_v32  ;;  %7846 = vst [vmem:[#allocation157_spill] sm:$0xff] %v4397_v1  ;;  %v4406_v61 = vmul.f32 %v468_v9, %v3618_v20  ;;  %v4415_v20 = vmul.f32 %v471_v0, %v3624_v24  ;;  %v4418_v9 = vmul.f32 %v470_v3, %v3642_v33 }
 0x14d   :  { %7842 = vst [vmem:[#allocation153_spill] sm:$0xff] %v4372_v56  ;;  %1437 = vrot.lane.b32.xlu1 %v4221_v29, %s3402_s9  ;;  %v378_v56 = vld [vmem:[#allocation4 + $0x38] sm:$0xff]  ;;  %7848 = vst [vmem:[#allocation159_spill] sm:$0xff] %v4403_v54  ;;  %v474_v50 = vcvt.s32.f32 %v458_v35  ;;  %v550_v37 = vunpack.c.1.s8 %v545_v10  ;;  %v4427_v1 = vmul.f32 %v473_v46, %v3648_v36  ;;  %v479_v3 = vcvt.s32.f32 %v463_v5  ;;  %v547_v46 = vld [vmem:[#allocation4 + $0x70] sm:$0xff] }
 0x14e   :  { %1435 = vrot.lane.b32.xlu0 %v4231_v6, %s3402_s9  ;;  %7849 = vst [vmem:[#allocation160_spill] sm:$0xff] %v4406_v61  ;;  %v392_v27 = vunpack.c.1.s8 %v378_v56  ;;  %v472_v40 = vcvt.s32.f32 %v456_v8  ;;  %v391_v7 = vunpack.c.0.s8 %v378_v56  ;;  %v394_v54 = vunpack.c.3.s8 %v378_v56  ;;  %v548_v5 = vld [vmem:[#allocation4 + $0x78] sm:$0xff] }
 0x14f   :  { %v4385_v57 = vpop.permute.xlu1 %1054  ;;  %v393_v8 = vunpack.c.2.s8 %v378_v56  ;;  %v476_v61 = vcvt.s32.f32 %v460_v41  ;;  %v546_v56 = vld [vmem:[#allocation4 + $0x68] sm:$0xff]  ;;  %v552_v36 = vunpack.c.3.s8 %v545_v10 }
 0x150   :  { %7845 = vst [vmem:[#allocation156_spill] sm:$0xff] %v4385_v57  ;;  %v4399_v58 = vpop.permute.xlu0 %1052  ;;  %v462_v57 = vunpack.c.2.s8 %v447_v15  ;;  %v549_v15 = vunpack.c.0.s8 %v545_v10  ;;  %v4430_v24 = vmul.f32 %v472_v40, %v3657_v43  ;;  %v4436_v35 = vcvt.s32.f32 %v391_v7 }
 0x151   :  { %7847 = vst [vmem:[#allocation158_spill] sm:$0xff] %v4399_v58  ;;  %1441 = vrot.lane.b32.xlu1 %v4239_v18, %s3402_s9  ;;  %v475_v58 = vcvt.s32.f32 %v459_v59  ;;  %v4424_v59 = vcvt.s32.f32 %v392_v27  ;;  %v4441_v41 = vcvt.s32.f32 %v394_v54  ;;  %v551_v27 = vunpack.c.2.s8 %v545_v10 }
 0x152   :  { %1439 = vrot.lane.b32.xlu0 %v4249_v14, %s3402_s9  ;;  %v4444_v43 = vmul.f32 %v474_v50, %v3669_v48  ;;  %v4450_v7 = vcvt.s32.f32 %v393_v8  ;;  %v554_v54 = vunpack.c.1.s8 %v546_v56  ;;  %v553_v48 = vunpack.c.0.s8 %v546_v56 }
 0x153   :  { %v4412_v32 = vpop.permute.xlu1 %1058  ;;  %v4439_v0 = vmul.f32 %v475_v58, %v3663_v44  ;;  %v4458_v58 = vmul.f32 %v476_v61, %v3681_v51  ;;  %v556_v10 = vunpack.c.3.s8 %v546_v56  ;;  %v555_v8 = vunpack.c.2.s8 %v546_v56 }
 0x154   :  { %7851 = vst [vmem:[#allocation162_spill] sm:$0xff] %v4412_v32  ;;  %v4420_v13 = vpop.permute.xlu0 %1056  ;;  %v477_v32 = vcvt.s32.f32 %v461_v62  ;;  %v478_v62 = vcvt.s32.f32 %v462_v57  ;;  %7854 = vst [vmem:[#allocation165_spill] sm:$0xff] %v4444_v43  ;;  %v4460_v57 = vcvt.s32.f32 %v549_v15  ;;  %v4472_v51 = vcvt.s32.f32 %v552_v36 }
 0x155   :  { %7852 = vst [vmem:[#allocation163_spill] sm:$0xff] %v4420_v13  ;;  %1445 = vrot.lane.b32.xlu1 %v4257_v26, %s3402_s9  ;;  %7856 = vst [vmem:[#allocation167_spill] sm:$0xff] %v4450_v7  ;;  %v4474_v61 = vcvt.s32.f32 %v551_v27  ;;  %v560_v15 = vunpack.c.3.s8 %v547_v46  ;;  %v646_v13 = vld [vmem:[#allocation4 + $0x80] sm:$0xff]  ;;  %v559_v56 = vunpack.c.2.s8 %v547_v46  ;;  %v563_v36 = vunpack.c.2.s8 %v548_v5 }
 0x156   :  { %1443 = vrot.lane.b32.xlu0 %v4266_v21, %s3402_s9  ;;  %v4455_v44 = vmul.f32 %v477_v32, %v3675_v49  ;;  %7859 = vst [vmem:[#allocation170_spill] sm:$0xff] %v4458_v58  ;;  %7860 = vst [vmem:[#allocation171_spill] sm:$0xff] %v4460_v57  ;;  %v4470_v49 = vmul.f32 %v478_v62, %v3695_v53  ;;  %v557_v32 = vunpack.c.0.s8 %v547_v46  ;;  %v561_v58 = vunpack.c.0.s8 %v548_v5 }
 0x157   :  { %v4434_v33 = vpop.permute.xlu1 %1062  ;;  %7864 = vst [vmem:[#allocation175_spill] sm:$0xff] %v4472_v51  ;;  %7865 = vst [vmem:[#allocation176_spill] sm:$0xff] %v4474_v61  ;;  %v4482_v53 = vcvt.s32.f32 %v553_v48  ;;  %v4484_v62 = vcvt.s32.f32 %v556_v10  ;;  %v650_v61 = vunpack.c.0.s8 %v646_v13  ;;  %v647_v51 = vld [vmem:[#allocation4 + $0x88] sm:$0xff]  ;;  %v653_v48 = vunpack.c.3.s8 %v646_v13 }
 0x158   :  { %7853 = vst [vmem:[#allocation164_spill] sm:$0xff] %v4434_v33  ;;  %v4446_v40 = vpop.permute.xlu0 %1060  ;;  %v4452_v33 = vcvt.s32.f32 %v550_v37  ;;  %7858 = vst [vmem:[#allocation169_spill] sm:$0xff] %v4455_v44  ;;  %v558_v37 = vunpack.c.1.s8 %v547_v46  ;;  %v651_v46 = vunpack.c.1.s8 %v646_v13  ;;  %v652_v10 = vunpack.c.2.s8 %v646_v13  ;;  %v649_v13 = vld [vmem:[#allocation4 + $0x98] sm:$0xff] }
 0x159   :  { %7855 = vst [vmem:[#allocation166_spill] sm:$0xff] %v4446_v40  ;;  %1449 = vrot.lane.b32.xlu1 %v4274_v34, %s3402_s9  ;;  %v4467_v40 = vmul.f32 %v479_v3, %v3689_v52  ;;  %7863 = vst [vmem:[#allocation174_spill] sm:$0xff] %v4470_v49  ;;  %v564_v52 = vunpack.c.3.s8 %v548_v5  ;;  %v4480_v3 = vcvt.s32.f32 %v554_v54  ;;  %v4496_v54 = vcvt.s32.f32 %v560_v15  ;;  %v7946_v44 = vld [vmem:[#allocation29_spill] sm:$0xff] }
 0x15a   :  { %7857 = vst [vmem:[#allocation168_spill] sm:$0xff] %v4452_v33  ;;  %1447 = vrot.lane.b32.xlu0 %v4282_v47, %s3402_s9  ;;  %7868 = vst [vmem:[#allocation179_spill] sm:$0xff] %v4482_v53  ;;  %v4492_v49 = vcvt.s32.f32 %v558_v37  ;;  %v4506_v37 = vcvt.s32.f32 %v561_v58  ;;  %v655_v15 = vunpack.c.1.s8 %v647_v51  ;;  %v815_v53 = vld [vmem:[#allocation4 + $0xa8] sm:$0xff] }
 0x15b   :  { %v4464_v50 = vpop.permute.xlu1 %1066  ;;  %7862 = vst [vmem:[#allocation173_spill] sm:$0xff] %v4467_v40  ;;  %7867 = vst [vmem:[#allocation178_spill] sm:$0xff] %v4480_v3  ;;  %v4494_v40 = vcvt.s32.f32 %v557_v32  ;;  %v4510_v32 = vcvt.s32.f32 %v563_v36 }
 0x15c   :  { %7861 = vst [vmem:[#allocation172_spill] sm:$0xff] %v4464_v50  ;;  %v4476_v57 = vpop.permute.xlu0 %1064  ;;  %v562_v50 = vunpack.c.1.s8 %v548_v5  ;;  %7869 = vst [vmem:[#allocation180_spill] sm:$0xff] %v4484_v62  ;;  %v648_v62 = vld [vmem:[#allocation4 + $0x90] sm:$0xff] }
 0x15d   :  { %7866 = vst [vmem:[#allocation177_spill] sm:$0xff] %v4476_v57  ;;  %1591 = vrot.lane.b32.xlu1 %v4149_v31, %s3403_s10  ;;  %v4490_v57 = vcvt.s32.f32 %v555_v8  ;;  %7872 = vst [vmem:[#allocation183_spill] sm:$0xff] %v4492_v49  ;;  %v4508_v49 = vcvt.s32.f32 %v564_v52  ;;  %v659_v58 = vunpack.c.1.s8 %v648_v62  ;;  %v4522_v52 = vcvt.s32.f32 %v652_v10 }
 0x15e   :  { %1589 = vrot.lane.b32.xlu0 %v4159_v39, %s3403_s10  ;;  %7873 = vst [vmem:[#allocation184_spill] sm:$0xff] %v4494_v40  ;;  %7874 = vst [vmem:[#allocation185_spill] sm:$0xff] %v4496_v54  ;;  %v4504_v8 = vcvt.s32.f32 %v562_v50  ;;  %v654_v54 = vunpack.c.0.s8 %v647_v51  ;;  %v657_v40 = vunpack.c.3.s8 %v647_v51  ;;  %v656_v50 = vunpack.c.2.s8 %v647_v51 }
 0x15f   :  { %v4488_v27 = vpop.permute.xlu1 %1070  ;;  %7871 = vst [vmem:[#allocation182_spill] sm:$0xff] %v4490_v57  ;;  %7878 = vst [vmem:[#allocation189_spill] sm:$0xff] %v4506_v37  ;;  %v4516_v57 = vcvt.s32.f32 %v651_v46  ;;  %v4520_v37 = vcvt.s32.f32 %v653_v48  ;;  %v658_v36 = vunpack.c.0.s8 %v648_v62  ;;  %v662_v46 = vunpack.c.0.s8 %v649_v13 }
 0x160   :  { %7870 = vst [vmem:[#allocation181_spill] sm:$0xff] %v4488_v27  ;;  %v4498_v5 = vpop.permute.xlu0 %1068  ;;  %v4502_v27 = vcvt.s32.f32 %v559_v56  ;;  %7877 = vst [vmem:[#allocation188_spill] sm:$0xff] %v4504_v8  ;;  %v4518_v56 = vcvt.s32.f32 %v650_v61  ;;  %v4528_v61 = vcvt.s32.f32 %v655_v15  ;;  %v4530_v51 = vcvt.s32.f32 %v654_v54 }
 0x161   :  { %7875 = vst [vmem:[#allocation186_spill] sm:$0xff] %v4498_v5  ;;  %1595 = vrot.lane.b32.xlu1 %v4167_v63, %s3403_s10  ;;  %7879 = vst [vmem:[#allocation190_spill] sm:$0xff] %v4508_v49  ;;  %v814_v49 = vld [vmem:[#allocation4 + $0xa0] sm:$0xff]  ;;  %v4532_v48 = vcvt.s32.f32 %v657_v40  ;;  %v664_v10 = vunpack.c.2.s8 %v649_v13  ;;  %v4542_v3 = vcvt.s32.f32 %v658_v36  ;;  %v4560_v36 = vmul.f32 %v4300_v25, %v3785_v30 }
 0x162   :  { %7876 = vst [vmem:[#allocation187_spill] sm:$0xff] %v4502_v27  ;;  %7880 = vst [vmem:[#allocation191_spill] sm:$0xff] %v4510_v32  ;;  %1593 = vrot.lane.b32.xlu0 %v4177_v38, %s3403_s10  ;;  %v661_v32 = vunpack.c.3.s8 %v648_v62  ;;  %v660_v27 = vunpack.c.2.s8 %v648_v62  ;;  %v818_v62 = vunpack.c.0.s8 %v814_v49  ;;  %v820_v54 = vunpack.c.2.s8 %v814_v49 }
 0x163   :  { %v4514_v5 = vpop.permute.xlu1 %1074  ;;  %7882 = vst [vmem:[#allocation193_spill] sm:$0xff] %v4516_v57  ;;  %7883 = vst [vmem:[#allocation194_spill] sm:$0xff] %v4518_v56  ;;  %v665_v57 = vunpack.c.3.s8 %v649_v13  ;;  %v819_v56 = vunpack.c.1.s8 %v814_v49  ;;  %v821_v40 = vunpack.c.3.s8 %v814_v49  ;;  %v822_v49 = vunpack.c.0.s8 %v815_v53 }
 0x164   :  { %7881 = vst [vmem:[#allocation192_spill] sm:$0xff] %v4514_v5  ;;  %7884 = vst [vmem:[#allocation195_spill] sm:$0xff] %v4520_v37  ;;  %v4524_v8 = vpop.permute.xlu0 %1072  ;;  %v663_v5 = vunpack.c.1.s8 %v649_v13  ;;  %v4540_v37 = vcvt.s32.f32 %v659_v58  ;;  %v4544_v15 = vcvt.s32.f32 %v661_v32  ;;  %v4550_v13 = vcvt.s32.f32 %v660_v27 }
 0x165   :  { %7885 = vst [vmem:[#allocation196_spill] sm:$0xff] %v4522_v52  ;;  %7886 = vst [vmem:[#allocation197_spill] sm:$0xff] %v4524_v8  ;;  %1599 = vrot.lane.b32.xlu1 %v4185_v16, %s3403_s10  ;;  %v4538_v8 = vcvt.s32.f32 %v656_v50  ;;  %v4554_v58 = vcvt.s32.f32 %v662_v46  ;;  %v4562_v32 = vcvt.s32.f32 %v664_v10  ;;  %v4570_v46 = vcvt.s32.f32 %v819_v56  ;;  %v7907_v56 = vld [vmem:[#allocation11_spill] sm:$0xff] }
 0x166   :  { %7887 = vst [vmem:[#allocation198_spill] sm:$0xff] %v4528_v61  ;;  %7888 = vst [vmem:[#allocation199_spill] sm:$0xff] %v4530_v51  ;;  %1597 = vrot.lane.b32.xlu0 %v4195_v23, %s3403_s10  ;;  %v4552_v50 = vcvt.s32.f32 %v663_v5  ;;  %v4568_v5 = vcvt.s32.f32 %v818_v62  ;;  %v326_v30 = vmul.f32 %v4302_v60, %v3787_v42  ;;  %v4576_v25 = vmul.f32 %v4308_v17, %v3793_v55  ;;  %v7908_v62 = vld [vmem:[#allocation129_spill] sm:$0xff]  ;;  %v7933_v61 = vld [vmem:[#allocation138_spill] sm:$0xff] }
 0x167   :  { %7889 = vst [vmem:[#allocation200_spill] sm:$0xff] %v4532_v48  ;;  %v4536_v52 = vpop.permute.xlu1 %1078  ;;  %7891 = vst [vmem:[#allocation202_spill] sm:$0xff] %v4538_v8  ;;  %v4578_v10 = vcvt.s32.f32 %v820_v54  ;;  %v817_v55 = vld [vmem:[#allocation4 + $0xb8] sm:$0xff]  ;;  %v4592_v17 = vcvt.s32.f32 %v822_v49 }
 0x168   :  { %7890 = vst [vmem:[#allocation201_spill] sm:$0xff] %v4536_v52  ;;  %7892 = vst [vmem:[#allocation203_spill] sm:$0xff] %v4540_v37  ;;  %v4546_v48 = vpop.permute.xlu0 %1076  ;;  %v4556_v52 = vcvt.s32.f32 %v665_v57  ;;  %v824_v57 = vunpack.c.2.s8 %v815_v53  ;;  %v831_v8 = vunpack.c.1.s8 %v817_v55 }
 0x169   :  { %7893 = vst [vmem:[#allocation204_spill] sm:$0xff] %v4542_v3  ;;  %7894 = vst [vmem:[#allocation205_spill] sm:$0xff] %v4544_v15  ;;  %1603 = vrot.lane.b32.xlu1 %v4203_v22, %s3403_s10  ;;  %v823_v15 = vunpack.c.1.s8 %v815_v53  ;;  %v7923_v3 = vld [vmem:[#allocation135_spill] sm:$0xff] }
 0x16a   :  { %7895 = vst [vmem:[#allocation206_spill] sm:$0xff] %v4546_v48  ;;  %7896 = vst [vmem:[#allocation207_spill] sm:$0xff] %v4550_v13  ;;  %v816_v48 = vld [vmem:[#allocation4 + $0xb0] sm:$0xff]  ;;  %1601 = vrot.lane.b32.xlu0 %v4213_v12, %s3403_s10  ;;  %v4608_v13 = vcvt.s32.f32 %v824_v57  ;;  %v7925_v57 = vld [vmem:[#allocation21_spill] sm:$0xff] }
 0x16b   :  { %7897 = vst [vmem:[#allocation208_spill] sm:$0xff] %v4552_v50  ;;  %7898 = vst [vmem:[#allocation209_spill] sm:$0xff] %v4554_v58  ;;  %v4566_v27 = vpop.permute.xlu1 %1082  ;;  %v826_v42 = vunpack.c.0.s8 %v816_v48  ;;  %v827_v60 = vunpack.c.1.s8 %v816_v48  ;;  %v4594_v54 = vcvt.s32.f32 %v823_v15  ;;  %v7920_v15 = vld [vmem:[#allocation17_spill] sm:$0xff] }
 0x16c   :  { %7899 = vst [vmem:[#allocation210_spill] sm:$0xff] %v4556_v52  ;;  %7900 = vst [vmem:[#allocation211_spill] sm:$0xff] %v4562_v32  ;;  %v825_v52 = vunpack.c.3.s8 %v815_v53  ;;  %v4580_v32 = vcvt.s32.f32 %v821_v40  ;;  %v4582_v58 = vpop.permute.xlu0 %1080  ;;  %v7909_v53 = vld [vmem:[#allocation12_spill] sm:$0xff]  ;;  %v828_v40 = vunpack.c.2.s8 %v816_v48 }
 0x16d   :  { %7901 = vst [vmem:[#allocation212_spill] sm:$0xff] %v4566_v27  ;;  %7902 = vst [vmem:[#allocation213_spill] sm:$0xff] %v4568_v5  ;;  %1607 = vrot.lane.b32.xlu1 %v4221_v29, %s3403_s10  ;;  %v327_v27 = vmul.f32 %v7908_v62, %v7907_v56  ;;  %v7915_v56 = vld [vmem:[#allocation131_spill] sm:$0xff] }
 0x16e   :  { %7903 = vst [vmem:[#allocation214_spill] sm:$0xff] %v4570_v46  ;;  %7904 = vst [vmem:[#allocation215_spill] sm:$0xff] %v4578_v10  ;;  %v7910_v46 = vld [vmem:[#allocation130_spill] sm:$0xff]  ;;  %v829_v10 = vunpack.c.3.s8 %v816_v48  ;;  %1605 = vrot.lane.b32.xlu0 %v4231_v6, %s3403_s10  ;;  %v4610_v49 = vcvt.s32.f32 %v825_v52  ;;  %v7926_v52 = vld [vmem:[#allocation136_spill] sm:$0xff] }
 0x16f   :  { %7905 = vst [vmem:[#allocation216_spill] sm:$0xff] %v4580_v32  ;;  %7906 = vst [vmem:[#allocation217_spill] sm:$0xff] %v4582_v58  ;;  %v4590_v5 = vmul.f32 %v7910_v46, %v7909_v53  ;;  %v4598_v58 = vpop.permute.xlu1 %1155  ;;  %v7914_v32 = vld [vmem:[#allocation13_spill] sm:$0xff]  ;;  %v7916_v46 = vld [vmem:[#allocation15_spill] sm:$0xff] }
 0x170   :  { %7911 = vst [vmem:[#allocation11_spill] sm:$0xff] %v4592_v17  ;;  %7912 = vst [vmem:[#allocation129_spill] sm:$0xff] %v4594_v54  ;;  %v4602_v62 = vmul.f32 %v7915_v56, %v7914_v32  ;;  %v7917_v53 = vld [vmem:[#allocation132_spill] sm:$0xff]  ;;  %v7921_v17 = vld [vmem:[#allocation134_spill] sm:$0xff]  ;;  %v4622_v56 = vpop.permute.xlu0 %1153 }
 0x171   :  { %7913 = vst [vmem:[#allocation12_spill] sm:$0xff] %v4598_v58  ;;  %v4606_v50 = vmul.f32 %v7917_v53, %v7916_v46  ;;  %7918 = vst [vmem:[#allocation130_spill] sm:$0xff] %v4608_v13  ;;  %v4614_v48 = vmul.f32 %v7921_v17, %v7920_v15  ;;  %v7922_v54 = vld [vmem:[#allocation19_spill] sm:$0xff]  ;;  %v830_v58 = vunpack.c.0.s8 %v817_v55  ;;  %v4620_v32 = vld [vmem:[#allocation4 + $0xe0] sm:$0xff]  ;;  %1611 = vrot.lane.b32.xlu1 %v4239_v18, %s3403_s10  ;;  %v4632_v15 = vcvt.s32.f32 %v826_v42 }
 0x172   :  { %7919 = vst [vmem:[#allocation13_spill] sm:$0xff] %v4610_v49  ;;  %v4618_v37 = vmul.f32 %v7923_v3, %v7922_v54  ;;  %7924 = vst [vmem:[#allocation131_spill] sm:$0xff] %v4622_v56  ;;  %v4628_v46 = vmul.f32 %v7926_v52, %v7925_v57  ;;  %v7927_v53 = vld [vmem:[#allocation35_spill] sm:$0xff]  ;;  %v4634_v3 = vcvt.s32.f32 %v827_v60  ;;  %v915_v54 = vld [vmem:[#allocation4 + $0xc0] sm:$0xff]  ;;  %v4644_v18 = vcvt.s32.f32 %v828_v40  ;;  %1609 = vrot.lane.b32.xlu0 %v4249_v14, %s3403_s10 }
 0x173   :  { %v412_v17 = vmul.f32 %v4348_v45, %v7927_v53  ;;  %7928 = vst [vmem:[#allocation15_spill] sm:$0xff] %v4632_v15  ;;  %v7930_v13 = vld [vmem:[#allocation23_spill] sm:$0xff]  ;;  %v7931_v49 = vld [vmem:[#allocation137_spill] sm:$0xff]  ;;  %v4646_v57 = vcvt.s32.f32 %v829_v10  ;;  %v4650_v45 = vpop.permute.xlu1 %1159  ;;  %v832_v53 = vunpack.c.2.s8 %v817_v55  ;;  %v4659_v40 = vcvt.s32.f32 %v830_v58 }
 0x174   :  { %7929 = vst [vmem:[#allocation132_spill] sm:$0xff] %v4634_v3  ;;  %v4638_v51 = vmul.f32 %v7931_v49, %v7930_v13  ;;  %v7932_v56 = vld [vmem:[#allocation25_spill] sm:$0xff]  ;;  %7934 = vst [vmem:[#allocation17_spill] sm:$0xff] %v4644_v18  ;;  %v833_v3 = vunpack.c.3.s8 %v817_v55  ;;  %v988_v13 = vunpack.c.0.s8 %v4620_v32  ;;  %v7939_v49 = vld [vmem:[#allocation27_spill] sm:$0xff]  ;;  %v4661_v10 = vcvt.s32.f32 %v831_v8  ;;  %v4663_v18 = vpop.permute.xlu0 %1157 }
 0x175   :  { %v4642_v33 = vmul.f32 %v7933_v61, %v7932_v56  ;;  %7935 = vst [vmem:[#allocation134_spill] sm:$0xff] %v4646_v57  ;;  %7936 = vst [vmem:[#allocation19_spill] sm:$0xff] %v4650_v45  ;;  %v7937_v42 = vld [vmem:[#allocation37_spill] sm:$0xff]  ;;  %v7940_v15 = vld [vmem:[#allocation139_spill] sm:$0xff]  ;;  %v919_v56 = vunpack.c.0.s8 %v915_v54  ;;  %1615 = vrot.lane.b32.xlu1 %v4257_v26, %s3403_s10  ;;  %v428_v45 = vadd.f32 %v412_v17, %v327_v27  ;;  %v920_v57 = vunpack.c.1.s8 %v915_v54 }
 0x176   :  { %v7938_v60 = vld [vmem:[#allocation145_spill] sm:$0xff]  ;;  %v4657_v61 = vmul.f32 %v7940_v15, %v7939_v49  ;;  %7941 = vst [vmem:[#allocation135_spill] sm:$0xff] %v4659_v40  ;;  %7942 = vst [vmem:[#allocation21_spill] sm:$0xff] %v4661_v10  ;;  %v989_v14 = vunpack.c.1.s8 %v4620_v32  ;;  %v7949_v58 = vld [vmem:[#allocation31_spill] sm:$0xff]  ;;  %v921_v10 = vunpack.c.2.s8 %v915_v54  ;;  %1613 = vrot.lane.b32.xlu0 %v4266_v21, %s3403_s10  ;;  %v1004_v43 = vcvt.s32.f32 %v988_v13 }
 0x177   :  { %v411_v52 = vmul.f32 %v7938_v60, %v7937_v42  ;;  %7943 = vst [vmem:[#allocation136_spill] sm:$0xff] %v4663_v18  ;;  %v7944_v42 = vld [vmem:[#allocation39_spill] sm:$0xff]  ;;  %v7947_v15 = vld [vmem:[#allocation141_spill] sm:$0xff]  ;;  %v7950_v8 = vld [vmem:[#allocation142_spill] sm:$0xff]  ;;  %v922_v18 = vunpack.c.3.s8 %v915_v54  ;;  %v4680_v27 = vpop.permute.xlu1 %1163  ;;  %v4694_v21 = vcvt.s32.f32 %v919_v56  ;;  %v990_v56 = vunpack.c.2.s8 %v4620_v32 }
 0x178   :  { %v7945_v60 = vld [vmem:[#allocation147_spill] sm:$0xff]  ;;  %v4672_v49 = vmul.f32 %v7947_v15, %v7946_v44  ;;  %v4676_v40 = vmul.f32 %v7950_v8, %v7949_v58  ;;  %7952 = vst [vmem:[#allocation137_spill] sm:$0xff] %v4680_v27  ;;  %v7953_v44 = vld [vmem:[#allocation33_spill] sm:$0xff]  ;;  %v7956_v8 = vld [vmem:[#allocation148_spill] sm:$0xff]  ;;  %v4696_v27 = vpop.permute.xlu0 %1161  ;;  %v4706_v13 = vcvt.s32.f32 %v921_v10 }
 0x179   :  { %v414_v55 = vmul.f32 %v7945_v60, %v7944_v42  ;;  %v427_v17 = vadd.f32 %v411_v52, %v326_v30  ;;  %v4682_v42 = vcvt.s32.f32 %v832_v53  ;;  %v4684_v60 = vcvt.s32.f32 %v833_v3  ;;  %v916_v26 = vld [vmem:[#allocation4 + $0xc8] sm:$0xff]  ;;  %v7955_v58 = vld [vmem:[#allocation41_spill] sm:$0xff]  ;;  %7959 = vst [vmem:[#allocation25_spill] sm:$0xff] %v4696_v27  ;;  %1619 = vrot.lane.b32.xlu1 %v4274_v34, %s3403_s10 }
 0x17a   :  { %7948 = vst [vmem:[#allocation35_spill] sm:$0xff] %v4672_v49  ;;  %7951 = vst [vmem:[#allocation23_spill] sm:$0xff] %v4676_v40  ;;  %v7954_v15 = vld [vmem:[#allocation143_spill] sm:$0xff]  ;;  %v413_v40 = vmul.f32 %v7956_v8, %v7955_v58  ;;  %v7958_v6 = vld [vmem:[#allocation149_spill] sm:$0xff]  ;;  %v4702_v3 = vadd.f32 %v4379_v2, %v428_v45  ;;  %v4704_v52 = vcvt.s32.f32 %v920_v57  ;;  %v1005_v53 = vcvt.s32.f32 %v989_v14  ;;  %1617 = vrot.lane.b32.xlu0 %v4282_v47, %s3403_s10 }
 0x17b   :  { %v4688_v7 = vmul.f32 %v7954_v15, %v7953_v44  ;;  %v7957_v54 = vld [vmem:[#allocation43_spill] sm:$0xff]  ;;  %v430_v30 = vadd.f32 %v414_v55, %v4576_v25  ;;  %7960 = vst [vmem:[#allocation138_spill] sm:$0xff] %v4706_v13  ;;  %v4708_v44 = vcvt.s32.f32 %v922_v18  ;;  %v4713_v15 = vpop.permute.xlu1 %1167  ;;  %v7962_v58 = vld [vmem:[#allocation45_spill] sm:$0xff]  ;;  %v7963_v25 = vld [vmem:[#allocation150_spill] sm:$0xff]  ;;  %v4718_v2 = vadd.f32 %v4388_v11, %v427_v17 }
 0x17c   :  { %v416_v49 = vmul.f32 %v7958_v6, %v7957_v54  ;;  %v923_v6 = vunpack.c.0.s8 %v916_v26  ;;  %7961 = vst [vmem:[#allocation37_spill] sm:$0xff] %v4713_v15  ;;  %v415_v55 = vmul.f32 %v7963_v25, %v7962_v58  ;;  %v924_v57 = vunpack.c.1.s8 %v916_v26  ;;  %v7964_v14 = vld [vmem:[#allocation16_spill] sm:$0xff]  ;;  %v4723_v18 = vld [vmem:[#allocation4 + $0xe8] sm:$0xff]  ;;  %v7966_v54 = vld [vmem:[#allocation46_spill] sm:$0xff]  ;;  %v4730_v13 = vpop.permute.xlu0 %1165 }
 0x17d   :  { %v4721_v45 = vmul.f32 %v1004_v43, %v7964_v14  ;;  %v429_v10 = vadd.f32 %v413_v40, %v4560_v36  ;;  %v418_v27 = vmul.f32 %v4368_v28, %v7966_v54  ;;  %v991_v15 = vunpack.c.3.s8 %v4620_v32  ;;  %7967 = vst [vmem:[#allocation27_spill] sm:$0xff] %v4730_v13  ;;  %1692 = vrot.lane.b32.xlu1 %v4149_v31, %s3404_s11  ;;  %v7968_v58 = vld [vmem:[#allocation14_spill] sm:$0xff]  ;;  %v7969_v36 = vld [vmem:[#allocation47_spill] sm:$0xff]  ;;  %v917_v28 = vld [vmem:[#allocation4 + $0xd0] sm:$0xff] }
 0x17e   :  { %v432_v8 = vadd.f32 %v416_v49, %v4590_v5  ;;  %v4735_v11 = vadd.f32 %v4391_v19, %v430_v30  ;;  %v925_v43 = vunpack.c.2.s8 %v916_v26  ;;  %v926_v17 = vunpack.c.3.s8 %v916_v26  ;;  %v7970_v5 = vld [vmem:[#allocation152_spill] sm:$0xff]  ;;  %1690 = vrot.lane.b32.xlu0 %v4159_v39, %s3404_s11  ;;  %v7974_v30 = vld [vmem:[#allocation154_spill] sm:$0xff] }
 0x17f   :  { %7965 = vst [vmem:[#allocation145_spill] sm:$0xff] %v4721_v45  ;;  %v4738_v25 = vmul.f32 %v1005_v53, %v7968_v58  ;;  %v417_v40 = vmul.f32 %v7970_v5, %v7969_v36  ;;  %v4742_v49 = vcvt.s32.f32 %v923_v6  ;;  %v1006_v32 = vcvt.s32.f32 %v990_v56  ;;  %v4747_v54 = vpop.permute.xlu1 %1171  ;;  %v7973_v26 = vld [vmem:[#allocation48_spill] sm:$0xff]  ;;  %v7975_v5 = vld [vmem:[#allocation157_spill] sm:$0xff] }
 0x180   :  { %v992_v14 = vunpack.c.0.s8 %v4723_v18  ;;  %7972 = vst [vmem:[#allocation39_spill] sm:$0xff] %v4747_v54  ;;  %v431_v19 = vadd.f32 %v415_v55, %v4602_v62  ;;  %v420_v53 = vmul.f32 %v7974_v30, %v7973_v26  ;;  %v4752_v58 = vcvt.s32.f32 %v924_v57  ;;  %v7981_v30 = vld [vmem:[#allocation49_spill] sm:$0xff] }
 0x181   :  { %7971 = vst [vmem:[#allocation139_spill] sm:$0xff] %v4742_v49  ;;  %v993_v36 = vunpack.c.1.s8 %v4723_v18  ;;  %v434_v6 = vadd.f32 %v418_v27, %v4606_v50  ;;  %v4757_v56 = vadd.f32 %v4394_v4, %v429_v10  ;;  %v4760_v13 = vadd.f32 %v7975_v5, %v432_v8  ;;  %v4762_v49 = vpop.permute.xlu0 %1169  ;;  %1696 = vrot.lane.b32.xlu1 %v4167_v63, %s3404_s11  ;;  %v7978_v27 = vld [vmem:[#allocation20_spill] sm:$0xff] }
 0x182   :  { %v1007_v45 = vcvt.s32.f32 %v991_v15  ;;  %7976 = vst [vmem:[#allocation147_spill] sm:$0xff] %v4762_v49  ;;  %v4766_v62 = vcvt.s32.f32 %v925_v43  ;;  %v4768_v55 = vcvt.s32.f32 %v926_v17  ;;  %v927_v57 = vunpack.c.0.s8 %v917_v28  ;;  %1694 = vrot.lane.b32.xlu0 %v4177_v38, %s3404_s11  ;;  %v7982_v17 = vld [vmem:[#allocation155_spill] sm:$0xff]  ;;  %v7983_v49 = vld [vmem:[#allocation160_spill] sm:$0xff] }
 0x183   :  { %v928_v26 = vunpack.c.1.s8 %v917_v28  ;;  %v433_v50 = vadd.f32 %v417_v40, %v4614_v48  ;;  %v4772_v4 = vmul.f32 %v1006_v32, %v7978_v27  ;;  %v1008_v10 = vcvt.s32.f32 %v992_v14  ;;  %v4777_v15 = vpop.permute.xlu1 %1175  ;;  %v4785_v40 = vld [vmem:[#allocation4 + $0xf0] sm:$0xff]  ;;  %v7984_v27 = vld [vmem:[#allocation18_spill] sm:$0xff] }
 0x184   :  { %7977 = vst [vmem:[#allocation29_spill] sm:$0xff] %v4766_v62  ;;  %v994_v8 = vunpack.c.2.s8 %v4723_v18  ;;  %7980 = vst [vmem:[#allocation31_spill] sm:$0xff] %v4777_v15  ;;  %v436_v43 = vadd.f32 %v420_v53, %v4618_v37  ;;  %v419_v5 = vmul.f32 %v7982_v17, %v7981_v30  ;;  %v4783_v54 = vadd.f32 %v7983_v49, %v431_v19  ;;  %v7987_v37 = vld [vmem:[#allocation50_spill] sm:$0xff]  ;;  %v7988_v49 = vld [vmem:[#allocation159_spill] sm:$0xff] }
 0x185   :  { %7979 = vst [vmem:[#allocation141_spill] sm:$0xff] %v4772_v4  ;;  %v1009_v48 = vcvt.s32.f32 %v993_v36  ;;  %v4788_v32 = vadd.f32 %v4415_v20, %v434_v6  ;;  %v929_v14 = vunpack.c.2.s8 %v917_v28  ;;  %v4791_v62 = vmul.f32 %v1007_v45, %v7984_v27  ;;  %v4794_v4 = vpop.permute.xlu0 %1173  ;;  %1700 = vrot.lane.b32.xlu1 %v4185_v16, %s3404_s11  ;;  %v918_v45 = vld [vmem:[#allocation4 + $0xd8] sm:$0xff]  ;;  %v7991_v30 = vld [vmem:[#allocation24_spill] sm:$0xff] }
 0x186   :  { %v995_v15 = vunpack.c.3.s8 %v4723_v18  ;;  %7986 = vst [vmem:[#allocation33_spill] sm:$0xff] %v4794_v4  ;;  %v422_v19 = vmul.f32 %v7988_v49, %v7987_v37  ;;  %v4800_v53 = vcvt.s32.f32 %v927_v57  ;;  %v4802_v36 = vcvt.s32.f32 %v928_v26  ;;  %1698 = vrot.lane.b32.xlu0 %v4195_v23, %s3404_s11  ;;  %v7994_v26 = vld [vmem:[#allocation51_spill] sm:$0xff]  ;;  %v7995_v37 = vld [vmem:[#allocation161_spill] sm:$0xff] }
 0x187   :  { %7985 = vst [vmem:[#allocation142_spill] sm:$0xff] %v4791_v62  ;;  %v930_v20 = vunpack.c.3.s8 %v917_v28  ;;  %v4805_v6 = vadd.f32 %v4418_v9, %v433_v50  ;;  %v4808_v17 = vmul.f32 %v1008_v10, %v7991_v30  ;;  %v1010_v18 = vcvt.s32.f32 %v994_v8  ;;  %v4813_v4 = vpop.permute.xlu1 %1179  ;;  %v7996_v50 = vld [vmem:[#allocation22_spill] sm:$0xff]  ;;  %v7998_v10 = vld [vmem:[#allocation52_spill] sm:$0xff] }
 0x188   :  { %7989 = vst [vmem:[#allocation143_spill] sm:$0xff] %v4800_v53  ;;  %7990 = vst [vmem:[#allocation41_spill] sm:$0xff] %v4802_v36  ;;  %v996_v27 = vunpack.c.0.s8 %v4785_v40  ;;  %v435_v57 = vadd.f32 %v419_v5, %v4628_v46  ;;  %v421_v28 = vmul.f32 %v7995_v37, %v7994_v26  ;;  %v4819_v9 = vadd.f32 %v4427_v1, %v436_v43  ;;  %v8003_v26 = vld [vmem:[#allocation28_spill] sm:$0xff]  ;;  %v8041_v36 = vld [vmem:[#allocation117_spill] sm:$0xff] }
 0x189   :  { %7992 = vst [vmem:[#allocation148_spill] sm:$0xff] %v4808_v17  ;;  %7993 = vst [vmem:[#allocation43_spill] sm:$0xff] %v4813_v4  ;;  %v4822_v49 = vmul.f32 %v1009_v48, %v7996_v50  ;;  %v424_v8 = vmul.f32 %v4424_v59, %v7998_v10  ;;  %v4826_v30 = vcvt.s32.f32 %v929_v14  ;;  %v1011_v17 = vcvt.s32.f32 %v995_v15  ;;  %v4829_v4 = vpop.permute.xlu0 %1177  ;;  %1704 = vrot.lane.b32.xlu1 %v4203_v22, %s3404_s11  ;;  %v8002_v48 = vld [vmem:[#allocation53_spill] sm:$0xff] }
 0x18a   :  { %v997_v53 = vunpack.c.1.s8 %v4785_v40  ;;  %8000 = vst [vmem:[#allocation150_spill] sm:$0xff] %v4829_v4  ;;  %v438_v46 = vadd.f32 %v422_v19, %v4638_v51  ;;  %v4834_v1 = vcvt.s32.f32 %v930_v20  ;;  %v931_v43 = vunpack.c.0.s8 %v918_v45  ;;  %1702 = vrot.lane.b32.xlu0 %v4213_v12, %s3404_s11  ;;  %v8006_v19 = vld [vmem:[#allocation54_spill] sm:$0xff] }
 0x18b   :  { %7997 = vst [vmem:[#allocation149_spill] sm:$0xff] %v4822_v49  ;;  %7999 = vst [vmem:[#allocation45_spill] sm:$0xff] %v4826_v30  ;;  %v998_v5 = vunpack.c.2.s8 %v4785_v40  ;;  %v423_v59 = vmul.f32 %v4436_v35, %v8002_v48  ;;  %v932_v14 = vunpack.c.1.s8 %v918_v45  ;;  %v4840_v15 = vmul.f32 %v1010_v18, %v8003_v26  ;;  %v4844_v50 = vpop.permute.xlu1 %1183  ;;  %v987_v48 = vld [vmem:[#allocation4 + $0xf8] sm:$0xff] }
 0x18c   :  { %8001 = vst [vmem:[#allocation16_spill] sm:$0xff] %v4834_v1  ;;  %v1012_v37 = vcvt.s32.f32 %v996_v27  ;;  %8005 = vst [vmem:[#allocation14_spill] sm:$0xff] %v4844_v50  ;;  %v437_v51 = vadd.f32 %v421_v28, %v4642_v33  ;;  %v426_v20 = vmul.f32 %v4441_v41, %v8006_v19  ;;  %v4850_v10 = vadd.f32 %v4430_v24, %v435_v57  ;;  %v8007_v27 = vld [vmem:[#allocation26_spill] sm:$0xff]  ;;  %v8011_v57 = vld [vmem:[#allocation35_spill] sm:$0xff] }
 0x18d   :  { %8004 = vst [vmem:[#allocation46_spill] sm:$0xff] %v4840_v15  ;;  %v999_v35 = vunpack.c.3.s8 %v4785_v40  ;;  %v440_v18 = vadd.f32 %v424_v8, %v4657_v61  ;;  %v933_v26 = vunpack.c.2.s8 %v918_v45  ;;  %v4855_v4 = vmul.f32 %v1011_v17, %v8007_v27  ;;  %v4857_v30 = vpop.permute.xlu0 %1181  ;;  %1708 = vrot.lane.b32.xlu1 %v4221_v29, %s3404_s11  ;;  %v1085_v8 = vld [vmem:[#allocation4 + $0x100] sm:$0xff]  ;;  %v8013_v17 = vld [vmem:[#allocation32_spill] sm:$0xff]  ;;  %v8015_v27 = vld [vmem:[#allocation111_spill] sm:$0xff] }
 0x18e   :  { %v1013_v15 = vcvt.s32.f32 %v997_v53  ;;  %8009 = vst [vmem:[#allocation152_spill] sm:$0xff] %v4857_v30  ;;  %v4862_v33 = vadd.f32 %v4439_v0, %v438_v46  ;;  %v4864_v24 = vcvt.s32.f32 %v931_v43  ;;  %v934_v41 = vunpack.c.3.s8 %v918_v45  ;;  %1706 = vrot.lane.b32.xlu0 %v8015_v27, %s3404_s11  ;;  %v8017_v0 = vld [vmem:[#allocation23_spill] sm:$0xff] }
 0x18f   :  { %8008 = vst [vmem:[#allocation47_spill] sm:$0xff] %v4855_v4  ;;  %v1014_v40 = vcvt.s32.f32 %v998_v5  ;;  %v439_v28 = vadd.f32 %v423_v59, %v8011_v57  ;;  %v4867_v61 = vcvt.s32.f32 %v932_v14  ;;  %v4870_v19 = vmul.f32 %v1012_v37, %v8013_v17  ;;  %v4874_v50 = vpop.permute.xlu1 %1320  ;;  %v8018_v43 = vld [vmem:[#allocation55_spill] sm:$0xff]  ;;  %v8020_v5 = vld [vmem:[#allocation165_spill] sm:$0xff]  ;;  %v8023_v17 = vld [vmem:[#allocation30_spill] sm:$0xff] }
 0x190   :  { %8010 = vst [vmem:[#allocation48_spill] sm:$0xff] %v4864_v24  ;;  %v1000_v53 = vunpack.c.0.s8 %v987_v48  ;;  %8016 = vst [vmem:[#allocation20_spill] sm:$0xff] %v4874_v50  ;;  %v442_v46 = vadd.f32 %v426_v20, %v8017_v0  ;;  %v8019_v30 = vld [vmem:[#allocation167_spill] sm:$0xff]  ;;  %v4880_v24 = vadd.f32 %v8020_v5, %v437_v51  ;;  %v1015_v59 = vcvt.s32.f32 %v999_v35  ;;  %v8021_v14 = vld [vmem:[#allocation169_spill] sm:$0xff] }
 0x191   :  { %8012 = vst [vmem:[#allocation154_spill] sm:$0xff] %v4867_v61  ;;  %8014 = vst [vmem:[#allocation157_spill] sm:$0xff] %v4870_v19  ;;  %v425_v45 = vmul.f32 %v8019_v30, %v8018_v43  ;;  %v4883_v57 = vadd.f32 %v8021_v14, %v440_v18  ;;  %v4885_v37 = vcvt.s32.f32 %v933_v26  ;;  %v4888_v19 = vmul.f32 %v1013_v15, %v8023_v17  ;;  %v4890_v4 = vpop.permute.xlu0 %1318  ;;  %v8026_v20 = vld [vmem:[#allocation113_spill] sm:$0xff]  ;;  %v8028_v51 = vld [vmem:[#allocation36_spill] sm:$0xff] }
 0x192   :  { %v1001_v61 = vunpack.c.1.s8 %v987_v48  ;;  %8025 = vst [vmem:[#allocation160_spill] sm:$0xff] %v4890_v4  ;;  %1712 = vrot.lane.b32.xlu1 %v8026_v20, %s3404_s11  ;;  %v4894_v0 = vcvt.s32.f32 %v934_v41  ;;  %v1089_v30 = vunpack.c.0.s8 %v1085_v8  ;;  %v4897_v43 = vmul.f32 %v1014_v40, %v8028_v51  ;;  %v8030_v18 = vld [vmem:[#allocation56_spill] sm:$0xff]  ;;  %v8032_v14 = vld [vmem:[#allocation170_spill] sm:$0xff]  ;;  %v8033_v4 = vld [vmem:[#allocation115_spill] sm:$0xff] }
 0x193   :  { %8022 = vst [vmem:[#allocation49_spill] sm:$0xff] %v4885_v37  ;;  %8024 = vst [vmem:[#allocation155_spill] sm:$0xff] %v4888_v19  ;;  %v1002_v35 = vunpack.c.2.s8 %v987_v48  ;;  %v8031_v5 = vld [vmem:[#allocation168_spill] sm:$0xff]  ;;  %v4902_v50 = vadd.f32 %v8032_v14, %v439_v28  ;;  %v1090_v15 = vunpack.c.1.s8 %v1085_v8  ;;  %v1016_v17 = vcvt.s32.f32 %v1000_v53  ;;  %1710 = vrot.lane.b32.xlu0 %v8033_v4, %s3404_s11  ;;  %v4906_v37 = vpop.permute.xlu1 %1324  ;;  %v8036_v40 = vld [vmem:[#allocation34_spill] sm:$0xff] }
 0x194   :  { %8027 = vst [vmem:[#allocation18_spill] sm:$0xff] %v4894_v0  ;;  %8029 = vst [vmem:[#allocation50_spill] sm:$0xff] %v4897_v43  ;;  %v582_v26 = vmul.f32 %v8031_v5, %v8030_v18  ;;  %v441_v41 = vadd.f32 %v425_v45, %v4688_v7  ;;  %v8035_v0 = vld [vmem:[#allocation173_spill] sm:$0xff]  ;;  %v4913_v51 = vmul.f32 %v1015_v59, %v8036_v40  ;;  %v1003_v43 = vunpack.c.3.s8 %v987_v48  ;;  %v8039_v5 = vld [vmem:[#allocation171_spill] sm:$0xff] }
 0x195   :  { %8034 = vst [vmem:[#allocation159_spill] sm:$0xff] %v4906_v37  ;;  %v4910_v19 = vadd.f32 %v8035_v0, %v442_v46  ;;  %v8038_v18 = vld [vmem:[#allocation57_spill] sm:$0xff]  ;;  %v1091_v14 = vunpack.c.2.s8 %v1085_v8  ;;  %v1092_v1 = vunpack.c.3.s8 %v1085_v8  ;;  %v1017_v53 = vcvt.s32.f32 %v1001_v61  ;;  %v4917_v49 = vpop.permute.xlu0 %1322  ;;  %v8043_v59 = vld [vmem:[#allocation58_spill] sm:$0xff]  ;;  %v8044_v0 = vld [vmem:[#allocation175_spill] sm:$0xff] }
 0x196   :  { %8037 = vst [vmem:[#allocation24_spill] sm:$0xff] %v4913_v51  ;;  %v581_v28 = vmul.f32 %v8039_v5, %v8038_v18  ;;  %8040 = vst [vmem:[#allocation51_spill] sm:$0xff] %v4917_v49  ;;  %1716 = vrot.lane.b32.xlu1 %v8041_v36, %s3404_s11  ;;  %v4921_v37 = vcvt.s32.f32 %v1089_v30  ;;  %v1018_v7 = vcvt.s32.f32 %v1002_v35  ;;  %v1792_v46 = vrot.slane %v4149_v31, 1  ;;  %v8046_v61 = vld [vmem:[#allocation40_spill] sm:$0xff]  ;;  %v8048_v5 = vld [vmem:[#allocation119_spill] sm:$0xff] }
 0x197   :  { %v1793_v45 = vrot.slane %v4177_v38, 1  ;;  %v4926_v48 = vadd.f32 %v582_v26, %v4702_v3  ;;  %v584_v40 = vmul.f32 %v8044_v0, %v8043_v59  ;;  %v4930_v8 = vcvt.s32.f32 %v1090_v15  ;;  %1714 = vrot.lane.b32.xlu0 %v8048_v5, %s3404_s11  ;;  %v4937_v30 = vpop.permute.xlu1 %1328  ;;  %v8050_v35 = vld [vmem:[#allocation59_spill] sm:$0xff]  ;;  %v8051_v49 = vld [vmem:[#allocation176_spill] sm:$0xff]  ;;  %v8052_v51 = vld [vmem:[#allocation174_spill] sm:$0xff] }
 0x198   :  { %8042 = vst [vmem:[#allocation161_spill] sm:$0xff] %v4921_v37  ;;  %v4933_v18 = vmul.f32 %v1016_v17, %v8046_v61  ;;  %8049 = vst [vmem:[#allocation53_spill] sm:$0xff] %v4937_v30  ;;  %v583_v37 = vmul.f32 %v8051_v49, %v8050_v35  ;;  %v4942_v38 = vadd.f32 %v8052_v51, %v441_v41  ;;  %v1086_v3 = vld [vmem:[#allocation4 + $0x108] sm:$0xff]  ;;  %v1019_v26 = vcvt.s32.f32 %v1003_v43  ;;  %v8055_v61 = vld [vmem:[#allocation38_spill] sm:$0xff] }
 0x199   :  { %8045 = vst [vmem:[#allocation22_spill] sm:$0xff] %v4930_v8  ;;  %v4946_v15 = vadd.f32 %v581_v28, %v4718_v2  ;;  %v4948_v17 = vcvt.s32.f32 %v1091_v14  ;;  %v4950_v0 = vcvt.s32.f32 %v1092_v1  ;;  %v4955_v30 = vpop.permute.xlu0 %1326  ;;  %v8058_v49 = vld [vmem:[#allocation44_spill] sm:$0xff]  ;;  %v4964_v51 = vsel %vm732_vm1, %v1792_v46, %v1793_v45  ;;  %v8066_v8 = vld [vmem:[#allocation42_spill] sm:$0xff] }
 0x19a   :  { %8047 = vst [vmem:[#allocation52_spill] sm:$0xff] %v4933_v18  ;;  %v4953_v18 = vmul.f32 %v1017_v53, %v8055_v61  ;;  %8057 = vst [vmem:[#allocation35_spill] sm:$0xff] %v4955_v30  ;;  %1720 = vrot.lane.b32.xlu1 %v4274_v34, %s3404_s11  ;;  %v4960_v41 = vmul.f32 %v1018_v7, %v8058_v49  ;;  %v1794_v2 = vrot.slane %v4167_v63, 1  ;;  %v1795_v1 = vrot.slane %v4195_v23, 1  ;;  %v8061_v14 = vld [vmem:[#allocation60_spill] sm:$0xff]  ;;  %v8062_v53 = vld [vmem:[#allocation178_spill] sm:$0xff] }
 0x19b   :  { %8053 = vst [vmem:[#allocation28_spill] sm:$0xff] %v4948_v17  ;;  %8054 = vst [vmem:[#allocation54_spill] sm:$0xff] %v4950_v0  ;;  %v4969_v28 = vadd.f32 %v584_v40, %v4735_v11  ;;  %v586_v35 = vmul.f32 %v8062_v53, %v8061_v14  ;;  %v1093_v61 = vunpack.c.0.s8 %v1086_v3  ;;  %v1094_v59 = vunpack.c.1.s8 %v1086_v3  ;;  %v1087_v30 = vld [vmem:[#allocation4 + $0x110] sm:$0xff]  ;;  %1718 = vrot.lane.b32.xlu0 %v4282_v47, %s3404_s11  ;;  %v4975_v7 = vpop.permute.xlu1 %1332  ;;  %v8064_v17 = vld [vmem:[#allocation61_spill] sm:$0xff] }
 0x19c   :  { %8056 = vst [vmem:[#allocation26_spill] sm:$0xff] %v4953_v18  ;;  %8059 = vst [vmem:[#allocation32_spill] sm:$0xff] %v4960_v41  ;;  %v4978_v49 = vadd.f32 %v583_v37, %v4757_v56  ;;  %v8065_v41 = vld [vmem:[#allocation179_spill] sm:$0xff]  ;;  %v4983_v11 = vmul.f32 %v1019_v26, %v8066_v8  ;;  %v8068_v40 = vrot.slane %v4159_v39, 1  ;;  %v8069_v53 = vld [vmem:[#allocation62_spill] sm:$0xff]  ;;  %v1095_v56 = vunpack.c.2.s8 %v1086_v3 }
 0x19d   :  { %8063 = vst [vmem:[#allocation23_spill] sm:$0xff] %v4975_v7  ;;  %v585_v0 = vmul.f32 %v8065_v41, %v8064_v17  ;;  %v8070_v18 = vld [vmem:[#allocation180_spill] sm:$0xff]  ;;  %v8071_v63 = vld [vmem:[#allocation63_spill] sm:$0xff]  ;;  %v8072_v7 = vld [vmem:[#allocation182_spill] sm:$0xff]  ;;  %v1096_v37 = vunpack.c.3.s8 %v1086_v3  ;;  %v4995_v62 = vpop.permute.xlu0 %1330  ;;  %v1097_v8 = vunpack.c.0.s8 %v1087_v30  ;;  %v5001_v26 = vsel %vm732_vm1, %v1794_v2, %v1795_v1 }
 0x19e   :  { %8067 = vst [vmem:[#allocation55_spill] sm:$0xff] %v4983_v11  ;;  %v4989_v14 = vsel %vm732_vm1, %v8068_v40, %v1792_v46  ;;  %v588_v23 = vmul.f32 %v8070_v18, %v8069_v53  ;;  %v587_v31 = vmul.f32 %v8072_v7, %v8071_v63  ;;  %8073 = vst [vmem:[#allocation167_spill] sm:$0xff] %v4995_v62  ;;  %1857 = vrot.lane.b32.xlu1 %v4964_v51, %s3401_s13  ;;  %v8077_v53 = vld [vmem:[#allocation64_spill] sm:$0xff]  ;;  %v8078_v62 = vld [vmem:[#allocation183_spill] sm:$0xff] }
 0x19f   :  { %v1796_v46 = vrot.slane %v4185_v16, 1  ;;  %v1797_v17 = vrot.slane %v4213_v12, 1  ;;  %v5006_v18 = vadd.f32 %v586_v35, %v4760_v13  ;;  %v5008_v63 = vcvt.s32.f32 %v1093_v61  ;;  %1855 = vrot.lane.b32.xlu0 %v4989_v14, %s3401_s13  ;;  %v5014_v7 = vpop.permute.xlu1 %1336  ;;  %v8079_v12 = vld [vmem:[#allocation65_spill] sm:$0xff]  ;;  %v8080_v16 = vld [vmem:[#allocation184_spill] sm:$0xff] }
 0x1a0   :  { %v5010_v3 = vcvt.s32.f32 %v1094_v59  ;;  %v1098_v41 = vunpack.c.1.s8 %v1087_v30  ;;  %8076 = vst [vmem:[#allocation30_spill] sm:$0xff] %v5014_v7  ;;  %v5017_v40 = vadd.f32 %v585_v0, %v4783_v54  ;;  %v590_v11 = vmul.f32 %v8078_v62, %v8077_v53 }
 0x1a1   :  { %8074 = vst [vmem:[#allocation165_spill] sm:$0xff] %v5008_v63  ;;  %v589_v13 = vmul.f32 %v8080_v16, %v8079_v12  ;;  %v5025_v35 = vsel %vm732_vm1, %v1793_v45, %v1794_v2  ;;  %v5028_v59 = vadd.f32 %v588_v23, %v4788_v32  ;;  %v5031_v61 = vadd.f32 %v587_v31, %v4805_v6  ;;  %v5037_v0 = vpop.permute.xlu0 %1334  ;;  %v1088_v12 = vld [vmem:[#allocation4 + $0x118] sm:$0xff]  ;;  %v8085_v32 = vld [vmem:[#allocation66_spill] sm:$0xff] }
 0x1a2   :  { %8075 = vst [vmem:[#allocation169_spill] sm:$0xff] %v5010_v3  ;;  %v5033_v7 = vcvt.s32.f32 %v1095_v56  ;;  %v5035_v54 = vcvt.s32.f32 %v1096_v37  ;;  %8083 = vst [vmem:[#allocation168_spill] sm:$0xff] %v5037_v0  ;;  %1861 = vrot.lane.b32.xlu1 %v5001_v26, %s3401_s13  ;;  %v5041_v16 = vcvt.s32.f32 %v1097_v8  ;;  %v5045_v62 = vsel %vm732_vm1, %v1796_v46, %v1797_v17  ;;  %v8086_v6 = vld [vmem:[#allocation185_spill] sm:$0xff] }
 0x1a3   :  { %v1798_v23 = vrot.slane %v4203_v22, 1  ;;  %v1799_v31 = vrot.slane %v8015_v27, 1  ;;  %v592_v45 = vmul.f32 %v8086_v6, %v8085_v32  ;;  %v5051_v2 = vcvt.s32.f32 %v1098_v41  ;;  %1859 = vrot.lane.b32.xlu0 %v5025_v35, %s3401_s13  ;;  %v5055_v8 = vpop.permute.xlu1 %1340  ;;  %v8091_v32 = vld [vmem:[#allocation68_spill] sm:$0xff]  ;;  %v8094_v3 = vld [vmem:[#allocation189_spill] sm:$0xff]  ;;  %v8102_v22 = vld [vmem:[#allocation191_spill] sm:$0xff] }
 0x1a4   :  { %8081 = vst [vmem:[#allocation36_spill] sm:$0xff] %v5033_v7  ;;  %8082 = vst [vmem:[#allocation56_spill] sm:$0xff] %v5035_v54  ;;  %v1099_v56 = vunpack.c.2.s8 %v1087_v30  ;;  %v1100_v37 = vunpack.c.3.s8 %v1087_v30  ;;  %v5058_v53 = vadd.f32 %v590_v11, %v4819_v9  ;;  %v5061_v0 = vadd.f32 %v589_v13, %v4850_v10  ;;  %v8090_v54 = vld [vmem:[#allocation187_spill] sm:$0xff]  ;;  %v8092_v30 = vld [vmem:[#allocation188_spill] sm:$0xff] }
 0x1a5   :  { %8084 = vst [vmem:[#allocation170_spill] sm:$0xff] %v5041_v16  ;;  %8087 = vst [vmem:[#allocation173_spill] sm:$0xff] %v5051_v2  ;;  %v8089_v16 = vld [vmem:[#allocation67_spill] sm:$0xff]  ;;  %v5067_v41 = vsel %vm732_vm1, %v1795_v1, %v1796_v46  ;;  %v594_v6 = vmul.f32 %v8092_v30, %v8091_v32  ;;  %v8093_v2 = vld [vmem:[#allocation69_spill] sm:$0xff]  ;;  %v1102_v27 = vunpack.c.1.s8 %v1088_v12  ;;  %v5073_v9 = vpop.permute.xlu0 %1338  ;;  %v1103_v10 = vunpack.c.2.s8 %v1088_v12 }
 0x1a6   :  { %8088 = vst [vmem:[#allocation34_spill] sm:$0xff] %v5055_v8  ;;  %v591_v7 = vmul.f32 %v8090_v54, %v8089_v16  ;;  %v593_v63 = vmul.f32 %v8094_v3, %v8093_v2  ;;  %v1101_v8 = vunpack.c.0.s8 %v1088_v12  ;;  %8095 = vst [vmem:[#allocation57_spill] sm:$0xff] %v5073_v9  ;;  %1865 = vrot.lane.b32.xlu1 %v5045_v62, %s3401_s13  ;;  %v1800_v1 = vrot.slane %v4221_v29, 1  ;;  %v8099_v30 = vld [vmem:[#allocation70_spill] sm:$0xff] }
 0x1a7   :  { %v5079_v11 = vsel %vm732_vm1, %v1798_v23, %v1799_v31  ;;  %v1801_v46 = vrot.slane %v8033_v4, 1  ;;  %v5084_v13 = vadd.f32 %v592_v45, %v4862_v33  ;;  %v5086_v3 = vcvt.s32.f32 %v1099_v56  ;;  %1863 = vrot.lane.b32.xlu0 %v5067_v41, %s3401_s13  ;;  %v5092_v2 = vpop.permute.xlu1 %1344  ;;  %v8100_v9 = vld [vmem:[#allocation190_spill] sm:$0xff]  ;;  %v8101_v4 = vld [vmem:[#allocation71_spill] sm:$0xff] }
 0x1a8   :  { %v5088_v54 = vcvt.s32.f32 %v1100_v37  ;;  %v1104_v16 = vunpack.c.3.s8 %v1088_v12  ;;  %8098 = vst [vmem:[#allocation175_spill] sm:$0xff] %v5092_v2  ;;  %v5095_v32 = vadd.f32 %v591_v7, %v4880_v24  ;;  %v596_v29 = vmul.f32 %v8100_v9, %v8099_v30  ;;  %v1186_v45 = vld [vmem:[#allocation4 + $0x120] sm:$0xff]  ;;  %v1187_v9 = vld [vmem:[#allocation4 + $0x128] sm:$0xff] }
 0x1a9   :  { %8096 = vst [vmem:[#allocation171_spill] sm:$0xff] %v5086_v3  ;;  %v595_v33 = vmul.f32 %v8102_v22, %v8101_v4  ;;  %v5103_v56 = vsel %vm732_vm1, %v1797_v17, %v1798_v23  ;;  %v5106_v12 = vadd.f32 %v594_v6, %v4883_v57  ;;  %v5109_v37 = vadd.f32 %v593_v63, %v4902_v50  ;;  %v5115_v7 = vpop.permute.xlu0 %1342  ;;  %v8107_v17 = vld [vmem:[#allocation72_spill] sm:$0xff]  ;;  %v8108_v63 = vld [vmem:[#allocation193_spill] sm:$0xff] }
 0x1aa   :  { %8097 = vst [vmem:[#allocation58_spill] sm:$0xff] %v5088_v54  ;;  %v5111_v2 = vcvt.s32.f32 %v1101_v8  ;;  %v5113_v24 = vcvt.s32.f32 %v1102_v27  ;;  %8105 = vst [vmem:[#allocation176_spill] sm:$0xff] %v5115_v7  ;;  %1869 = vrot.lane.b32.xlu1 %v5079_v11, %s3401_s13  ;;  %v5119_v22 = vcvt.s32.f32 %v1103_v10  ;;  %v5123_v4 = vsel %vm732_vm1, %v1800_v1, %v1801_v46  ;;  %v8115_v54 = vld [vmem:[#allocation75_spill] sm:$0xff]  ;;  %v8116_v3 = vld [vmem:[#allocation196_spill] sm:$0xff] }
 0x1ab   :  { %v1802_v57 = vrot.slane %v8026_v20, 1  ;;  %v1803_v50 = vrot.slane %v8048_v5, 1  ;;  %v683_v23 = vmul.f32 %v8108_v63, %v8107_v17  ;;  %v5129_v27 = vcvt.s32.f32 %v1104_v16  ;;  %1867 = vrot.lane.b32.xlu0 %v5103_v56, %s3401_s13  ;;  %v5133_v10 = vpop.permute.xlu1 %1348  ;;  %v8113_v17 = vld [vmem:[#allocation74_spill] sm:$0xff]  ;;  %v8114_v63 = vld [vmem:[#allocation195_spill] sm:$0xff] }
 0x1ac   :  { %8103 = vst [vmem:[#allocation40_spill] sm:$0xff] %v5111_v2  ;;  %8104 = vst [vmem:[#allocation59_spill] sm:$0xff] %v5113_v24  ;;  %v1190_v8 = vunpack.c.0.s8 %v1186_v45  ;;  %v1191_v6 = vunpack.c.1.s8 %v1186_v45  ;;  %v5136_v30 = vadd.f32 %v596_v29, %v4910_v19  ;;  %v5139_v7 = vadd.f32 %v595_v33, %v4942_v38  ;;  %v8112_v24 = vld [vmem:[#allocation194_spill] sm:$0xff] }
 0x1ad   :  { %8106 = vst [vmem:[#allocation174_spill] sm:$0xff] %v5119_v22  ;;  %8109 = vst [vmem:[#allocation38_spill] sm:$0xff] %v5129_v27  ;;  %v8111_v22 = vld [vmem:[#allocation73_spill] sm:$0xff]  ;;  %v5145_v16 = vsel %vm732_vm1, %v1799_v31, %v1800_v1  ;;  %v685_v27 = vmul.f32 %v8114_v63, %v8113_v17  ;;  %v684_v5 = vmul.f32 %v8116_v3, %v8115_v54  ;;  %v1193_v20 = vunpack.c.3.s8 %v1186_v45  ;;  %v5151_v29 = vpop.permute.xlu0 %1346  ;;  %v8121_v17 = vld [vmem:[#allocation76_spill] sm:$0xff] }
 0x1ae   :  { %8110 = vst [vmem:[#allocation44_spill] sm:$0xff] %v5133_v10  ;;  %v682_v2 = vmul.f32 %v8112_v24, %v8111_v22  ;;  %v1192_v10 = vunpack.c.2.s8 %v1186_v45  ;;  %8117 = vst [vmem:[#allocation60_spill] sm:$0xff] %v5151_v29  ;;  %1873 = vrot.lane.b32.xlu1 %v5123_v4, %s3401_s13  ;;  %v1194_v38 = vunpack.c.0.s8 %v1187_v9  ;;  %v5157_v19 = vsel %vm732_vm1, %v1802_v57, %v1803_v50  ;;  %v8122_v63 = vld [vmem:[#allocation198_spill] sm:$0xff] }
 0x1af   :  { %v1804_v31 = vrot.slane %v8041_v36, 1  ;;  %v1805_v1 = vrot.slane %v4282_v47, 1  ;;  %v5162_v33 = vadd.f32 %v683_v23, %v4926_v48  ;;  %v5164_v3 = vcvt.s32.f32 %v1190_v8  ;;  %1871 = vrot.lane.b32.xlu0 %v5145_v16, %s3401_s13  ;;  %v5170_v24 = vpop.permute.xlu1 %1421  ;;  %v8123_v47 = vld [vmem:[#allocation77_spill] sm:$0xff]  ;;  %v8124_v36 = vld [vmem:[#allocation199_spill] sm:$0xff] }
 0x1b0   :  { %v5166_v54 = vcvt.s32.f32 %v1191_v6  ;;  %v1195_v45 = vunpack.c.1.s8 %v1187_v9  ;;  %8120 = vst [vmem:[#allocation179_spill] sm:$0xff] %v5170_v24  ;;  %v5173_v22 = vadd.f32 %v682_v2, %v4946_v15  ;;  %v687_v29 = vmul.f32 %v8122_v63, %v8121_v17  ;;  %v1188_v15 = vld [vmem:[#allocation4 + $0x130] sm:$0xff]  ;;  %v8133_v17 = vld [vmem:[#allocation202_spill] sm:$0xff] }
 0x1b1   :  { %8118 = vst [vmem:[#allocation178_spill] sm:$0xff] %v5164_v3  ;;  %v686_v48 = vmul.f32 %v8124_v36, %v8123_v47  ;;  %v5181_v23 = vsel %vm732_vm1, %v1801_v46, %v1802_v57  ;;  %v5184_v8 = vadd.f32 %v685_v27, %v4969_v28  ;;  %v5186_v6 = vcvt.s32.f32 %v1192_v10  ;;  %v5190_v2 = vpop.permute.xlu0 %1419  ;;  %v8131_v57 = vld [vmem:[#allocation200_spill] sm:$0xff]  ;;  %v8132_v10 = vld [vmem:[#allocation79_spill] sm:$0xff] }
 0x1b2   :  { %8119 = vst [vmem:[#allocation61_spill] sm:$0xff] %v5166_v54  ;;  %v5188_v3 = vcvt.s32.f32 %v1193_v20  ;;  %v1196_v24 = vunpack.c.2.s8 %v1187_v9  ;;  %8127 = vst [vmem:[#allocation180_spill] sm:$0xff] %v5190_v2  ;;  %1877 = vrot.lane.b32.xlu1 %v5157_v19, %s3401_s13  ;;  %v5195_v47 = vadd.f32 %v684_v5, %v4978_v49  ;;  %v5197_v36 = vcvt.s32.f32 %v1194_v38  ;;  %v8130_v20 = vld [vmem:[#allocation78_spill] sm:$0xff]  ;;  %v1189_v54 = vld [vmem:[#allocation4 + $0x138] sm:$0xff] }
 0x1b3   :  { %8125 = vst [vmem:[#allocation42_spill] sm:$0xff] %v5186_v6  ;;  %v5201_v28 = vsel %vm732_vm1, %v1804_v31, %v1805_v1  ;;  %v1806_v46 = vrot.slane %v4274_v34, 1  ;;  %v689_v27 = vmul.f32 %v8131_v57, %v8130_v20  ;;  %v688_v63 = vmul.f32 %v8133_v17, %v8132_v10  ;;  %1875 = vrot.lane.b32.xlu0 %v5181_v23, %s3401_s13  ;;  %v5212_v5 = vpop.permute.xlu1 %1425  ;;  %v8137_v57 = vld [vmem:[#allocation80_spill] sm:$0xff] }
 0x1b4   :  { %8126 = vst [vmem:[#allocation62_spill] sm:$0xff] %v5188_v3  ;;  %8128 = vst [vmem:[#allocation63_spill] sm:$0xff] %v5197_v36  ;;  %v5208_v2 = vcvt.s32.f32 %v1195_v45  ;;  %v1197_v3 = vunpack.c.3.s8 %v1187_v9  ;;  %v5215_v49 = vadd.f32 %v687_v29, %v5006_v18  ;;  %v5218_v38 = vadd.f32 %v686_v48, %v5017_v40  ;;  %v8138_v45 = vld [vmem:[#allocation203_spill] sm:$0xff]  ;;  %v8139_v9 = vld [vmem:[#allocation81_spill] sm:$0xff] }
 0x1b5   :  { %8129 = vst [vmem:[#allocation182_spill] sm:$0xff] %v5201_v28  ;;  %8135 = vst [vmem:[#allocation183_spill] sm:$0xff] %v5212_v5  ;;  %v1198_v36 = vunpack.c.0.s8 %v1188_v15  ;;  %v5222_v20 = vsel %vm732_vm1, %v1803_v50, %v1804_v31  ;;  %v691_v10 = vmul.f32 %v8138_v45, %v8137_v57  ;;  %v8140_v17 = vld [vmem:[#allocation204_spill] sm:$0xff]  ;;  %v5228_v6 = vcvt.s32.f32 %v1196_v24  ;;  %v5230_v18 = vpop.permute.xlu0 %1423  ;;  %v8143_v40 = vld [vmem:[#allocation82_spill] sm:$0xff] }
 0x1b6   :  { %8134 = vst [vmem:[#allocation64_spill] sm:$0xff] %v5208_v2  ;;  %8136 = vst [vmem:[#allocation65_spill] sm:$0xff] %v5222_v20  ;;  %v690_v2 = vmul.f32 %v8140_v17, %v8139_v9  ;;  %v1199_v5 = vunpack.c.1.s8 %v1188_v15  ;;  %1881 = vrot.lane.b32.xlu1 %v5201_v28, %s3401_s13  ;;  %v8144_v29 = vld [vmem:[#allocation205_spill] sm:$0xff]  ;;  %v1200_v50 = vunpack.c.2.s8 %v1188_v15  ;;  %v1201_v31 = vunpack.c.3.s8 %v1188_v15  ;;  %v8146_v9 = vld [vmem:[#allocation83_spill] sm:$0xff] }
 0x1b7   :  { %8141 = vst [vmem:[#allocation184_spill] sm:$0xff] %v5228_v6  ;;  %8142 = vst [vmem:[#allocation66_spill] sm:$0xff] %v5230_v18  ;;  %v693_v48 = vmul.f32 %v8144_v29, %v8143_v40  ;;  %v8145_v34 = vrot.slane %v4159_v39, 1  ;;  %v5243_v24 = vadd.f32 %v689_v27, %v5028_v59  ;;  %v5246_v45 = vadd.f32 %v688_v63, %v5031_v61  ;;  %v8147_v17 = vld [vmem:[#allocation207_spill] sm:$0xff]  ;;  %v5254_v15 = vpop.permute.xlu1 %1429  ;;  %v8153_v63 = vld [vmem:[#allocation208_spill] sm:$0xff] }
 0x1b8   :  { %v692_v18 = vmul.f32 %v8147_v17, %v8146_v9  ;;  %v5250_v6 = vcvt.s32.f32 %v1197_v3  ;;  %1879 = vrot.lane.b32.xlu0 %v5222_v20, %s3401_s13  ;;  %8149 = vst [vmem:[#allocation67_spill] sm:$0xff] %v5254_v15  ;;  %v5256_v40 = vcvt.s32.f32 %v1198_v36  ;;  %v1203_v29 = vunpack.c.1.s8 %v1189_v54  ;;  %v8152_v3 = vld [vmem:[#allocation84_spill] sm:$0xff]  ;;  %v1351_v15 = vld [vmem:[#allocation4 + $0x140] sm:$0xff] }
 0x1b9   :  { %v5240_v57 = vsel %vm732_vm1, %v1806_v46, %v8145_v34  ;;  %v1202_v34 = vunpack.c.0.s8 %v1189_v54  ;;  %v5260_v59 = vsel %vm732_vm1, %v1805_v1, %v1806_v46  ;;  %v5263_v61 = vadd.f32 %v691_v10, %v5058_v53  ;;  %v5272_v36 = vpop.permute.xlu0 %1427  ;;  %v8156_v46 = vld [vmem:[#allocation85_spill] sm:$0xff] }
 0x1ba   :  { %8148 = vst [vmem:[#allocation185_spill] sm:$0xff] %v5250_v6  ;;  %8150 = vst [vmem:[#allocation187_spill] sm:$0xff] %v5256_v40  ;;  %v5266_v27 = vadd.f32 %v690_v2, %v5061_v0  ;;  %v695_v9 = vmul.f32 %v8153_v63, %v8152_v3  ;;  %v5270_v17 = vcvt.s32.f32 %v1199_v5  ;;  %1885 = vrot.lane.b32.xlu1 %v5240_v57, %s3401_s13  ;;  %v8157_v53 = vld [vmem:[#allocation209_spill] sm:$0xff]  ;;  %v5281_v43 = vcvt.s32.f32 %v1200_v50  ;;  %v8160_v5 = vld [vmem:[#allocation86_spill] sm:$0xff] }
 0x1bb   :  { %8151 = vst [vmem:[#allocation68_spill] sm:$0xff] %v5260_v59  ;;  %8155 = vst [vmem:[#allocation69_spill] sm:$0xff] %v5272_v36  ;;  %v5277_v1 = vadd.f32 %v693_v48, %v5084_v13  ;;  %v694_v10 = vmul.f32 %v8157_v53, %v8156_v46  ;;  %v5283_v0 = vcvt.s32.f32 %v1201_v31  ;;  %v5286_v2 = vadd.f32 %v692_v18, %v5095_v32  ;;  %v8161_v3 = vld [vmem:[#allocation210_spill] sm:$0xff]  ;;  %v5292_v13 = vpop.permute.xlu1 %1433  ;;  %v8163_v48 = vld [vmem:[#allocation87_spill] sm:$0xff] }
 0x1bc   :  { %8154 = vst [vmem:[#allocation188_spill] sm:$0xff] %v5270_v17  ;;  %8158 = vst [vmem:[#allocation189_spill] sm:$0xff] %v5281_v43  ;;  %v697_v63 = vmul.f32 %v8161_v3, %v8160_v5  ;;  %v1204_v36 = vunpack.c.2.s8 %v1189_v54  ;;  %v1205_v40 = vunpack.c.3.s8 %v1189_v54  ;;  %1883 = vrot.lane.b32.xlu0 %v5260_v59, %s3401_s13  ;;  %v8164_v17 = vld [vmem:[#allocation211_spill] sm:$0xff]  ;;  %v5296_v50 = vcvt.s32.f32 %v1202_v34  ;;  %v8167_v18 = vld [vmem:[#allocation89_spill] sm:$0xff] }
 0x1bd   :  { %8159 = vst [vmem:[#allocation70_spill] sm:$0xff] %v5283_v0  ;;  %8162 = vst [vmem:[#allocation190_spill] sm:$0xff] %v5292_v13  ;;  %v696_v46 = vmul.f32 %v8164_v17, %v8163_v48  ;;  %v5298_v31 = vcvt.s32.f32 %v1203_v29  ;;  %v1355_v53 = vunpack.c.0.s8 %v1351_v15  ;;  %v5301_v32 = vadd.f32 %v695_v9, %v5106_v12  ;;  %v8168_v5 = vld [vmem:[#allocation213_spill] sm:$0xff]  ;;  %v8169_v54 = vld [vmem:[#allocation88_spill] sm:$0xff]  ;;  %v5307_v13 = vpop.permute.xlu0 %1431 }
 0x1be   :  { %8165 = vst [vmem:[#allocation71_spill] sm:$0xff] %v5296_v50  ;;  %v850_v3 = vmul.f32 %v8168_v5, %v8167_v18  ;;  %v8170_v0 = vld [vmem:[#allocation214_spill] sm:$0xff]  ;;  %v1356_v6 = vunpack.c.1.s8 %v1351_v15  ;;  %v1352_v59 = vld [vmem:[#allocation4 + $0x148] sm:$0xff]  ;;  %8171 = vst [vmem:[#allocation72_spill] sm:$0xff] %v5307_v13  ;;  %1958 = vrot.lane.b32.xlu1 %v4964_v51, %s3402_s9  ;;  %v5312_v34 = vadd.f32 %v694_v10, %v5109_v37  ;;  %v1357_v9 = vunpack.c.2.s8 %v1351_v15 }
 0x1bf   :  { %8166 = vst [vmem:[#allocation191_spill] sm:$0xff] %v5298_v31  ;;  %v851_v43 = vmul.f32 %v8170_v0, %v8169_v54  ;;  %v8172_v29 = vld [vmem:[#allocation90_spill] sm:$0xff]  ;;  %v8173_v17 = vld [vmem:[#allocation216_spill] sm:$0xff]  ;;  %v1358_v48 = vunpack.c.3.s8 %v1351_v15  ;;  %v5317_v18 = vadd.f32 %v697_v63, %v5136_v30  ;;  %v8174_v5 = vld [vmem:[#allocation91_spill] sm:$0xff]  ;;  %v5321_v31 = vcvt.s32.f32 %v1204_v36  ;;  %v5327_v37 = vpop.permute.xlu1 %1437 }
 0x1c0   :  { %v853_v12 = vmul.f32 %v8173_v17, %v8172_v29  ;;  %v8175_v0 = vld [vmem:[#allocation215_spill] sm:$0xff]  ;;  %v5323_v13 = vcvt.s32.f32 %v1205_v40  ;;  %1956 = vrot.lane.b32.xlu0 %v4989_v14, %s3402_s9  ;;  %8178 = vst [vmem:[#allocation194_spill] sm:$0xff] %v5327_v37  ;;  %v5330_v10 = vadd.f32 %v696_v46, %v5139_v7  ;;  %v5332_v29 = vcvt.s32.f32 %v1355_v53  ;;  %v8180_v40 = vld [vmem:[#allocation92_spill] sm:$0xff]  ;;  %v8181_v17 = vld [vmem:[#allocation129_spill] sm:$0xff] }
 0x1c1   :  { %v852_v54 = vmul.f32 %v8175_v0, %v8174_v5  ;;  %8176 = vst [vmem:[#allocation193_spill] sm:$0xff] %v5321_v31  ;;  %v1359_v15 = vunpack.c.0.s8 %v1352_v59  ;;  %v1360_v30 = vunpack.c.1.s8 %v1352_v59  ;;  %v5335_v63 = vadd.f32 %v850_v3, %v5173_v22  ;;  %v5344_v37 = vpop.permute.xlu0 %1435  ;;  %v8184_v46 = vld [vmem:[#allocation93_spill] sm:$0xff]  ;;  %v8185_v22 = vld [vmem:[#allocation11_spill] sm:$0xff] }
 0x1c2   :  { %8177 = vst [vmem:[#allocation73_spill] sm:$0xff] %v5323_v13  ;;  %8179 = vst [vmem:[#allocation74_spill] sm:$0xff] %v5332_v29  ;;  %v5338_v36 = vadd.f32 %v851_v43, %v5162_v33  ;;  %v855_v5 = vmul.f32 %v8181_v17, %v8180_v40  ;;  %v5342_v0 = vcvt.s32.f32 %v1356_v6  ;;  %v1353_v13 = vld [vmem:[#allocation4 + $0x150] sm:$0xff]  ;;  %1962 = vrot.lane.b32.xlu1 %v5001_v26, %s3402_s9  ;;  %v5353_v3 = vcvt.s32.f32 %v1357_v9  ;;  %v8188_v6 = vld [vmem:[#allocation95_spill] sm:$0xff] }
 0x1c3   :  { %8183 = vst [vmem:[#allocation75_spill] sm:$0xff] %v5344_v37  ;;  %v5349_v7 = vadd.f32 %v853_v12, %v5184_v8  ;;  %v854_v53 = vmul.f32 %v8185_v22, %v8184_v46  ;;  %v5355_v43 = vcvt.s32.f32 %v1358_v48  ;;  %v5358_v33 = vadd.f32 %v852_v54, %v5195_v47  ;;  %v8189_v40 = vld [vmem:[#allocation13_spill] sm:$0xff]  ;;  %v5364_v8 = vpop.permute.xlu1 %1441  ;;  %v8191_v12 = vld [vmem:[#allocation96_spill] sm:$0xff] }
 0x1c4   :  { %8182 = vst [vmem:[#allocation195_spill] sm:$0xff] %v5342_v0  ;;  %8186 = vst [vmem:[#allocation196_spill] sm:$0xff] %v5353_v3  ;;  %v857_v17 = vmul.f32 %v8189_v40, %v8188_v6  ;;  %v1361_v37 = vunpack.c.2.s8 %v1352_v59  ;;  %v1362_v29 = vunpack.c.3.s8 %v1352_v59  ;;  %1960 = vrot.lane.b32.xlu0 %v5025_v35, %s3402_s9  ;;  %v8192_v0 = vld [vmem:[#allocation130_spill] sm:$0xff]  ;;  %v5368_v9 = vcvt.s32.f32 %v1359_v15  ;;  %v8194_v54 = vld [vmem:[#allocation100_spill] sm:$0xff] }
 0x1c5   :  { %8187 = vst [vmem:[#allocation76_spill] sm:$0xff] %v5355_v43  ;;  %8190 = vst [vmem:[#allocation198_spill] sm:$0xff] %v5364_v8  ;;  %v856_v46 = vmul.f32 %v8192_v0, %v8191_v12  ;;  %v5370_v48 = vcvt.s32.f32 %v1360_v30  ;;  %v1363_v22 = vunpack.c.0.s8 %v1353_v13  ;;  %v5373_v47 = vadd.f32 %v855_v5, %v5215_v49  ;;  %v8195_v6 = vld [vmem:[#allocation15_spill] sm:$0xff]  ;;  %v8196_v59 = vld [vmem:[#allocation98_spill] sm:$0xff]  ;;  %v5379_v8 = vpop.permute.xlu0 %1439 }
 0x1c6   :  { %v858_v40 = vmul.f32 %v8195_v6, %v8194_v54  ;;  %v8197_v43 = vld [vmem:[#allocation132_spill] sm:$0xff]  ;;  %v1364_v31 = vunpack.c.1.s8 %v1353_v13  ;;  %v1354_v50 = vld [vmem:[#allocation4 + $0x158] sm:$0xff]  ;;  %8198 = vst [vmem:[#allocation199_spill] sm:$0xff] %v5379_v8  ;;  %1966 = vrot.lane.b32.xlu1 %v5045_v62, %s3402_s9  ;;  %v5384_v15 = vadd.f32 %v854_v53, %v5218_v38  ;;  %v8199_v30 = vld [vmem:[#allocation102_spill] sm:$0xff]  ;;  %v1365_v5 = vunpack.c.2.s8 %v1353_v13 }
 0x1c7   :  { %8193 = vst [vmem:[#allocation77_spill] sm:$0xff] %v5370_v48  ;;  %v859_v3 = vmul.f32 %v8197_v43, %v8196_v59  ;;  %v8200_v0 = vld [vmem:[#allocation134_spill] sm:$0xff]  ;;  %v1366_v12 = vunpack.c.3.s8 %v1353_v13  ;;  %v5389_v54 = vadd.f32 %v857_v17, %v5243_v24  ;;  %v8201_v6 = vld [vmem:[#allocation104_spill] sm:$0xff]  ;;  %v8202_v43 = vld [vmem:[#allocation17_spill] sm:$0xff]  ;;  %v5393_v48 = vcvt.s32.f32 %v1361_v37  ;;  %v5399_v38 = vpop.permute.xlu1 %1445 }
 0x1c8   :  { %v861_v49 = vmul.f32 %v8200_v0, %v8199_v30  ;;  %v860_v59 = vmul.f32 %v8202_v43, %v8201_v6  ;;  %v5395_v8 = vcvt.s32.f32 %v1362_v29  ;;  %1964 = vrot.lane.b32.xlu0 %v5067_v41, %s3402_s9  ;;  %8204 = vst [vmem:[#allocation200_spill] sm:$0xff] %v5399_v38  ;;  %v5402_v53 = vadd.f32 %v856_v46, %v5246_v45  ;;  %v8206_v29 = vld [vmem:[#allocation106_spill] sm:$0xff]  ;;  %v8207_v0 = vld [vmem:[#allocation21_spill] sm:$0xff] }
 0x1c9   :  { %8203 = vst [vmem:[#allocation78_spill] sm:$0xff] %v5393_v48  ;;  %v5404_v30 = vcvt.s32.f32 %v1363_v22  ;;  %v1367_v13 = vunpack.c.0.s8 %v1354_v50  ;;  %v1368_v24 = vunpack.c.1.s8 %v1354_v50  ;;  %v5407_v17 = vadd.f32 %v858_v40, %v5266_v27  ;;  %v5416_v48 = vpop.permute.xlu0 %1443  ;;  %v8209_v46 = vld [vmem:[#allocation114_spill] sm:$0xff] }
 0x1ca   :  { %v5410_v37 = vadd.f32 %v859_v3, %v5263_v61  ;;  %v863_v6 = vmul.f32 %v8207_v0, %v8206_v29  ;;  %v5414_v43 = vcvt.s32.f32 %v1364_v31  ;;  %8208 = vst [vmem:[#allocation202_spill] sm:$0xff] %v5416_v48  ;;  %1970 = vrot.lane.b32.xlu1 %v5079_v11, %s3402_s9  ;;  %v5421_v45 = vadd.f32 %v861_v49, %v5277_v1  ;;  %v1452_v3 = vld [vmem:[#allocation4 + $0x160] sm:$0xff]  ;;  %v8211_v29 = vld [vmem:[#allocation108_spill] sm:$0xff]  ;;  %v8212_v0 = vld [vmem:[#allocation135_spill] sm:$0xff] }
 0x1cb   :  { %8205 = vst [vmem:[#allocation79_spill] sm:$0xff] %v5404_v30  ;;  %v952_v27 = vmul.f32 %v4704_v52, %v8209_v46  ;;  %v5425_v22 = vcvt.s32.f32 %v1365_v5  ;;  %v5427_v61 = vcvt.s32.f32 %v1366_v12  ;;  %v5429_v40 = vld [vmem:[#allocation4 + $0x180] sm:$0xff]  ;;  %v5432_v31 = vadd.f32 %v860_v59, %v5286_v2  ;;  %v5438_v1 = vpop.permute.xlu1 %1449  ;;  %v8214_v52 = vld [vmem:[#allocation112_spill] sm:$0xff] }
 0x1cc   :  { %v862_v48 = vmul.f32 %v8212_v0, %v8211_v29  ;;  %v1369_v38 = vunpack.c.2.s8 %v1354_v50  ;;  %v1370_v30 = vunpack.c.3.s8 %v1354_v50  ;;  %1968 = vrot.lane.b32.xlu0 %v5103_v56, %s3402_s9  ;;  %8213 = vst [vmem:[#allocation203_spill] sm:$0xff] %v5438_v1  ;;  %v864_v49 = vmul.f32 %v4682_v42, %v8214_v52  ;;  %v8215_v5 = vld [vmem:[#allocation110_spill] sm:$0xff]  ;;  %v8217_v29 = vld [vmem:[#allocation116_spill] sm:$0xff] }
 0x1cd   :  { %8210 = vst [vmem:[#allocation80_spill] sm:$0xff] %v5425_v22  ;;  %v865_v12 = vmul.f32 %v4684_v60, %v8215_v5  ;;  %v5444_v46 = vcvt.s32.f32 %v1367_v13  ;;  %v5446_v2 = vcvt.s32.f32 %v1368_v24  ;;  %v5449_v59 = vadd.f32 %v863_v6, %v5301_v32  ;;  %v5453_v22 = vpop.permute.xlu0 %1447  ;;  %v8219_v13 = vld [vmem:[#allocation118_spill] sm:$0xff] }
 0x1ce   :  { %v951_v50 = vmul.f32 %v4694_v21, %v8217_v29  ;;  %v1456_v0 = vunpack.c.0.s8 %v1452_v3  ;;  %8218 = vst [vmem:[#allocation204_spill] sm:$0xff] %v5453_v22  ;;  %1974 = vrot.lane.b32.xlu1 %v5123_v4, %s3402_s9  ;;  %v1525_v42 = vunpack.c.0.s8 %v5429_v40  ;;  %v968_v60 = vadd.f32 %v952_v27, %v5338_v36  ;;  %v8220_v21 = vld [vmem:[#allocation120_spill] sm:$0xff]  ;;  %v8221_v5 = vld [vmem:[#allocation138_spill] sm:$0xff] }
 0x1cf   :  { %8216 = vst [vmem:[#allocation81_spill] sm:$0xff] %v5444_v46  ;;  %v954_v24 = vmul.f32 %v4708_v44, %v8219_v13  ;;  %v1457_v52 = vunpack.c.1.s8 %v1452_v3  ;;  %v1526_v32 = vunpack.c.1.s8 %v5429_v40  ;;  %v5463_v6 = vadd.f32 %v862_v48, %v5312_v34  ;;  %v5473_v36 = vpop.permute.xlu1 %1591  ;;  %v1453_v13 = vld [vmem:[#allocation4 + $0x168] sm:$0xff] }
 0x1d0   :  { %v953_v29 = vmul.f32 %v8221_v5, %v8220_v21  ;;  %v5467_v22 = vcvt.s32.f32 %v1369_v38  ;;  %v5469_v1 = vcvt.s32.f32 %v1370_v30  ;;  %1972 = vrot.lane.b32.xlu0 %v5145_v16, %s3402_s9  ;;  %8224 = vst [vmem:[#allocation83_spill] sm:$0xff] %v5473_v36  ;;  %v5476_v44 = vadd.f32 %v864_v49, %v5330_v10  ;;  %v8225_v38 = vld [vmem:[#allocation122_spill] sm:$0xff] }
 0x1d1   :  { %v5479_v27 = vadd.f32 %v865_v12, %v5317_v18  ;;  %v1458_v34 = vunpack.c.2.s8 %v1452_v3  ;;  %v1459_v48 = vunpack.c.3.s8 %v1452_v3  ;;  %v967_v21 = vadd.f32 %v951_v50, %v5335_v63 }
 0x1d2   :  { %8222 = vst [vmem:[#allocation82_spill] sm:$0xff] %v5467_v22  ;;  %8223 = vst [vmem:[#allocation205_spill] sm:$0xff] %v5469_v1  ;;  %v956_v30 = vmul.f32 %v4752_v58, %v8225_v38  ;;  %v5484_v5 = vcvt.s32.f32 %v1456_v0  ;;  %v1541_v22 = vcvt.s32.f32 %v1525_v42  ;;  %v5486_v1 = vpop.permute.xlu0 %1589  ;;  %1978 = vrot.lane.b32.xlu1 %v5157_v19, %s3402_s9  ;;  %v970_v10 = vadd.f32 %v954_v24, %v5349_v7  ;;  %v8230_v42 = vld [vmem:[#allocation124_spill] sm:$0xff]  ;;  %v8231_v38 = vld [vmem:[#allocation139_spill] sm:$0xff] }
 0x1d3   :  { %8227 = vst [vmem:[#allocation84_spill] sm:$0xff] %v5486_v1  ;;  %v5492_v18 = vadd.f32 %v4738_v25, %v968_v60  ;;  %v5494_v3 = vcvt.s32.f32 %v1457_v52  ;;  %v1542_v49 = vcvt.s32.f32 %v1526_v32  ;;  %v969_v63 = vadd.f32 %v953_v29, %v5358_v33  ;;  %v5500_v0 = vpop.permute.xlu1 %1595  ;;  %v8234_v52 = vld [vmem:[#allocation125_spill] sm:$0xff] }
 0x1d4   :  { %8226 = vst [vmem:[#allocation207_spill] sm:$0xff] %v5484_v5  ;;  %v1460_v12 = vunpack.c.0.s8 %v1453_v13  ;;  %v1461_v58 = vunpack.c.1.s8 %v1453_v13  ;;  %1976 = vrot.lane.b32.xlu0 %v5181_v23, %s3402_s9  ;;  %v1527_v50 = vunpack.c.2.s8 %v5429_v40  ;;  %8229 = vst [vmem:[#allocation85_spill] sm:$0xff] %v5500_v0  ;;  %v955_v7 = vmul.f32 %v8231_v38, %v8230_v42  ;;  %v8235_v29 = vld [vmem:[#allocation145_spill] sm:$0xff]  ;;  %v8264_v5 = vld [vmem:[#allocation47_spill] sm:$0xff] }
 0x1d5   :  { %8228 = vst [vmem:[#allocation208_spill] sm:$0xff] %v5494_v3  ;;  %v5504_v24 = vcvt.s32.f32 %v1458_v34  ;;  %v5506_v25 = vcvt.s32.f32 %v1459_v48  ;;  %v1528_v60 = vunpack.c.3.s8 %v5429_v40  ;;  %v972_v33 = vadd.f32 %v956_v30, %v5373_v47  ;;  %v1522_v34 = vld [vmem:[#allocation4 + $0x188] sm:$0xff]  ;;  %v8238_v48 = vld [vmem:[#allocation142_spill] sm:$0xff] }
 0x1d6   :  { %v958_v32 = vmul.f32 %v4768_v55, %v8234_v52  ;;  %v5513_v1 = vadd.f32 %v8235_v29, %v967_v21  ;;  %v5516_v36 = vmul.f32 %v1541_v22, %v4159_v39  ;;  %v5518_v0 = vpop.permute.xlu0 %1593  ;;  %1982 = vrot.lane.b32.xlu1 %v5201_v28, %s3402_s9  ;;  %v5523_v42 = vadd.f32 %v8238_v48, %v970_v10  ;;  %v8239_v30 = vld [vmem:[#allocation94_spill] sm:$0xff]  ;;  %v8241_v55 = vld [vmem:[#allocation141_spill] sm:$0xff]  ;;  %v1454_v22 = vld [vmem:[#allocation4 + $0x170] sm:$0xff] }
 0x1d7   :  { %8232 = vst [vmem:[#allocation209_spill] sm:$0xff] %v5504_v24  ;;  %8233 = vst [vmem:[#allocation86_spill] sm:$0xff] %v5506_v25  ;;  %v1462_v40 = vunpack.c.2.s8 %v1453_v13  ;;  %v1463_v47 = vunpack.c.3.s8 %v1453_v13  ;;  %v5526_v38 = vmul.f32 %v1542_v49, %v8239_v30  ;;  %v5529_v21 = vadd.f32 %v8241_v55, %v969_v63  ;;  %v8245_v13 = vld [vmem:[#allocation126_spill] sm:$0xff]  ;;  %v8246_v48 = vld [vmem:[#allocation29_spill] sm:$0xff] }
 0x1d8   :  { %8236 = vst [vmem:[#allocation210_spill] sm:$0xff] %v5516_v36  ;;  %8237 = vst [vmem:[#allocation87_spill] sm:$0xff] %v5518_v0  ;;  %v5531_v52 = vcvt.s32.f32 %v1460_v12  ;;  %v5533_v39 = vcvt.s32.f32 %v1461_v58  ;;  %v1543_v29 = vcvt.s32.f32 %v1527_v50  ;;  %1980 = vrot.lane.b32.xlu0 %v5222_v20, %s3402_s9  ;;  %v5537_v0 = vpop.permute.xlu1 %1599  ;;  %v971_v10 = vadd.f32 %v955_v7, %v5384_v15  ;;  %v8247_v12 = vld [vmem:[#allocation127_spill] sm:$0xff]  ;;  %v8248_v55 = vld [vmem:[#allocation41_spill] sm:$0xff] }
 0x1d9   :  { %8240 = vst [vmem:[#allocation211_spill] sm:$0xff] %v5526_v38  ;;  %8244 = vst [vmem:[#allocation88_spill] sm:$0xff] %v5537_v0  ;;  %v957_v49 = vmul.f32 %v8246_v48, %v8245_v13  ;;  %v1544_v30 = vcvt.s32.f32 %v1528_v60  ;;  %v1529_v36 = vunpack.c.0.s8 %v1522_v34  ;;  %v974_v63 = vadd.f32 %v958_v32, %v5389_v54  ;;  %v8253_v48 = vld [vmem:[#allocation128_spill] sm:$0xff]  ;;  %v8254_v54 = vld [vmem:[#allocation143_spill] sm:$0xff] }
 0x1da   :  { %8242 = vst [vmem:[#allocation89_spill] sm:$0xff] %v5531_v52  ;;  %8243 = vst [vmem:[#allocation213_spill] sm:$0xff] %v5533_v39  ;;  %v960_v58 = vmul.f32 %v8248_v55, %v8247_v12  ;;  %v8249_v52 = vld [vmem:[#allocation149_spill] sm:$0xff]  ;;  %v5548_v50 = vpop.permute.xlu0 %1597  ;;  %v1530_v39 = vunpack.c.1.s8 %v1522_v34  ;;  %1986 = vrot.lane.b32.xlu1 %v5240_v57, %s3402_s9  ;;  %v5552_v15 = vcvt.s32.f32 %v1462_v40  ;;  %v5554_v7 = vcvt.s32.f32 %v1463_v47  ;;  %v8255_v0 = vld [vmem:[#allocation99_spill] sm:$0xff] }
 0x1db   :  { %v5546_v38 = vadd.f32 %v8249_v52, %v972_v33  ;;  %8250 = vst [vmem:[#allocation214_spill] sm:$0xff] %v5548_v50  ;;  %v1464_v60 = vunpack.c.0.s8 %v1454_v22  ;;  %v1465_v13 = vunpack.c.1.s8 %v1454_v22  ;;  %v959_v32 = vmul.f32 %v8254_v54, %v8253_v48  ;;  %v8257_v33 = vld [vmem:[#allocation68_spill] sm:$0xff] }
 0x1dc   :  { %8251 = vst [vmem:[#allocation90_spill] sm:$0xff] %v5552_v15  ;;  %8252 = vst [vmem:[#allocation216_spill] sm:$0xff] %v5554_v7  ;;  %v5559_v12 = vmul.f32 %v1543_v29, %v8255_v0  ;;  %1984 = vrot.lane.b32.xlu0 %v8257_v33, %s3402_s9  ;;  %v1531_v52 = vunpack.c.2.s8 %v1522_v34  ;;  %v1532_v55 = vunpack.c.3.s8 %v1522_v34  ;;  %v5563_v50 = vpop.permute.xlu1 %1603  ;;  %v973_v40 = vadd.f32 %v957_v49, %v5402_v53  ;;  %v8259_v15 = vld [vmem:[#allocation148_spill] sm:$0xff]  ;;  %v8260_v7 = vld [vmem:[#allocation97_spill] sm:$0xff] }
 0x1dd   :  { %8258 = vst [vmem:[#allocation215_spill] sm:$0xff] %v5563_v50  ;;  %v5567_v47 = vadd.f32 %v8259_v15, %v971_v10  ;;  %v5570_v24 = vmul.f32 %v1544_v30, %v8260_v7  ;;  %v1545_v25 = vcvt.s32.f32 %v1529_v36  ;;  %v5572_v48 = vld [vmem:[#allocation4 + $0x190] sm:$0xff]  ;;  %v976_v0 = vadd.f32 %v960_v58, %v5410_v37  ;;  %v8262_v29 = vld [vmem:[#allocation133_spill] sm:$0xff] }
 0x1de   :  { %8256 = vst [vmem:[#allocation91_spill] sm:$0xff] %v5559_v12  ;;  %v8263_v54 = vld [vmem:[#allocation16_spill] sm:$0xff]  ;;  %v5578_v34 = vadd.f32 %v8264_v5, %v974_v63  ;;  %v1546_v50 = vcvt.s32.f32 %v1530_v39  ;;  %v5580_v3 = vpop.permute.xlu0 %1601  ;;  %2128 = vrot.lane.b32.xlu1 %v4964_v51, %s3403_s10  ;;  %v5584_v53 = vcvt.s32.f32 %v1464_v60  ;;  %v5586_v10 = vcvt.s32.f32 %v1465_v13  ;;  %v1455_v30 = vld [vmem:[#allocation4 + $0x178] sm:$0xff] }
 0x1df   :  { %8261 = vst [vmem:[#allocation92_spill] sm:$0xff] %v5570_v24  ;;  %v962_v12 = vmul.f32 %v8263_v54, %v8262_v29  ;;  %8265 = vst [vmem:[#allocation129_spill] sm:$0xff] %v5580_v3  ;;  %v1466_v36 = vunpack.c.2.s8 %v1454_v22  ;;  %v1467_v49 = vunpack.c.3.s8 %v1454_v22  ;;  %v975_v37 = vadd.f32 %v959_v32, %v5407_v17  ;;  %v8269_v63 = vld [vmem:[#allocation140_spill] sm:$0xff]  ;;  %v8270_v7 = vld [vmem:[#allocation45_spill] sm:$0xff] }
 0x1e0   :  { %8266 = vst [vmem:[#allocation93_spill] sm:$0xff] %v5584_v53  ;;  %8267 = vst [vmem:[#allocation11_spill] sm:$0xff] %v5586_v10  ;;  %v1547_v58 = vcvt.s32.f32 %v1531_v52  ;;  %v1548_v15 = vcvt.s32.f32 %v1532_v55  ;;  %2126 = vrot.lane.b32.xlu0 %v4989_v14, %s3403_s10  ;;  %v1533_v5 = vunpack.c.0.s8 %v5572_v48  ;;  %v5592_v39 = vpop.permute.xlu1 %1607  ;;  %v961_v60 = vmul.f32 %v8270_v7, %v8269_v63  ;;  %v8271_v29 = vld [vmem:[#allocation46_spill] sm:$0xff]  ;;  %v8272_v54 = vld [vmem:[#allocation103_spill] sm:$0xff] }
 0x1e1   :  { %8268 = vst [vmem:[#allocation95_spill] sm:$0xff] %v5592_v39  ;;  %v5597_v13 = vadd.f32 %v8271_v29, %v973_v40  ;;  %v5600_v22 = vmul.f32 %v1545_v25, %v8272_v54  ;;  %v1534_v17 = vunpack.c.1.s8 %v5572_v48  ;;  %v978_v32 = vadd.f32 %v962_v12, %v5421_v45  ;;  %v8274_v52 = vld [vmem:[#allocation144_spill] sm:$0xff]  ;;  %v8275_v55 = vld [vmem:[#allocation154_spill] sm:$0xff]  ;;  %v8276_v53 = vld [vmem:[#allocation155_spill] sm:$0xff] }
 0x1e2   :  { %v964_v3 = vmul.f32 %v8275_v55, %v8274_v52  ;;  %v5607_v10 = vadd.f32 %v8276_v53, %v976_v0  ;;  %v8277_v39 = vld [vmem:[#allocation101_spill] sm:$0xff]  ;;  %v5612_v63 = vpop.permute.xlu0 %1605  ;;  %2132 = vrot.lane.b32.xlu1 %v5001_v26, %s3403_s10  ;;  %v5616_v25 = vcvt.s32.f32 %v1466_v36  ;;  %v5618_v40 = vcvt.s32.f32 %v1467_v49  ;;  %v8283_v54 = vld [vmem:[#allocation107_spill] sm:$0xff]  ;;  %v8288_v49 = vld [vmem:[#allocation146_spill] sm:$0xff] }
 0x1e3   :  { %8273 = vst [vmem:[#allocation13_spill] sm:$0xff] %v5600_v22  ;;  %v5610_v24 = vmul.f32 %v1546_v50, %v8277_v39  ;;  %8279 = vst [vmem:[#allocation130_spill] sm:$0xff] %v5612_v63  ;;  %v1468_v7 = vunpack.c.0.s8 %v1455_v30  ;;  %v1469_v45 = vunpack.c.1.s8 %v1455_v30  ;;  %v8282_v12 = vld [vmem:[#allocation157_spill] sm:$0xff]  ;;  %v5624_v0 = vmul.f32 %v1547_v58, %v8283_v54  ;;  %v8289_v55 = vld [vmem:[#allocation48_spill] sm:$0xff] }
 0x1e4   :  { %8280 = vst [vmem:[#allocation100_spill] sm:$0xff] %v5616_v25  ;;  %8281 = vst [vmem:[#allocation15_spill] sm:$0xff] %v5618_v40  ;;  %v5621_v29 = vadd.f32 %v8282_v12, %v975_v37  ;;  %v8285_v53 = vld [vmem:[#allocation105_spill] sm:$0xff]  ;;  %v1549_v39 = vcvt.s32.f32 %v1533_v5  ;;  %2130 = vrot.lane.b32.xlu0 %v5025_v35, %s3403_s10  ;;  %v5631_v52 = vpop.permute.xlu1 %1611  ;;  %v977_v36 = vadd.f32 %v961_v60, %v5432_v31  ;;  %v1550_v25 = vcvt.s32.f32 %v1534_v17  ;;  %v8292_v31 = vld [vmem:[#allocation151_spill] sm:$0xff] }
 0x1e5   :  { %8278 = vst [vmem:[#allocation96_spill] sm:$0xff] %v5610_v24  ;;  %8284 = vst [vmem:[#allocation98_spill] sm:$0xff] %v5624_v0  ;;  %v5627_v50 = vmul.f32 %v1548_v15, %v8285_v53  ;;  %v963_v63 = vmul.f32 %v8289_v55, %v8288_v49  ;;  %v1535_v37 = vunpack.c.2.s8 %v5572_v48  ;;  %v5637_v12 = vld [vmem:[#allocation4 + $0x198] sm:$0xff]  ;;  %v980_v58 = vadd.f32 %v964_v3, %v5449_v59  ;;  %v8290_v15 = vld [vmem:[#allocation24_spill] sm:$0xff] }
 0x1e6   :  { %8287 = vst [vmem:[#allocation102_spill] sm:$0xff] %v5631_v52  ;;  %v5641_v54 = vadd.f32 %v8290_v15, %v978_v32  ;;  %v1470_v5 = vunpack.c.2.s8 %v1455_v30  ;;  %v5643_v53 = vpop.permute.xlu0 %1609  ;;  %v1536_v52 = vunpack.c.3.s8 %v5572_v48  ;;  %2136 = vrot.lane.b32.xlu1 %v5045_v62, %s3403_s10  ;;  %v8293_v60 = vld [vmem:[#allocation18_spill] sm:$0xff]  ;;  %v5650_v49 = vcvt.s32.f32 %v1468_v7  ;;  %v8296_v59 = vld [vmem:[#allocation153_spill] sm:$0xff] }
 0x1e7   :  { %8286 = vst [vmem:[#allocation132_spill] sm:$0xff] %v5627_v50  ;;  %8291 = vst [vmem:[#allocation134_spill] sm:$0xff] %v5643_v53  ;;  %v966_v17 = vmul.f32 %v8293_v60, %v8292_v31  ;;  %v5652_v55 = vcvt.s32.f32 %v1469_v45  ;;  %v1471_v0 = vunpack.c.3.s8 %v1455_v30  ;;  %v8297_v3 = vld [vmem:[#allocation49_spill] sm:$0xff]  ;;  %v1622_v15 = vld [vmem:[#allocation4 + $0x1a0] sm:$0xff]  ;;  %v1537_v48 = vunpack.c.0.s8 %v5637_v12 }
 0x1e8   :  { %8294 = vst [vmem:[#allocation104_spill] sm:$0xff] %v5650_v49  ;;  %v965_v32 = vmul.f32 %v8297_v3, %v8296_v59  ;;  %v8298_v50 = vld [vmem:[#allocation111_spill] sm:$0xff]  ;;  %2134 = vrot.lane.b32.xlu0 %v5067_v41, %s3403_s10  ;;  %v1538_v53 = vunpack.c.1.s8 %v5637_v12  ;;  %v5663_v31 = vpop.permute.xlu1 %1615  ;;  %v979_v7 = vadd.f32 %v963_v63, %v5463_v6  ;;  %v8301_v45 = vld [vmem:[#allocation50_spill] sm:$0xff]  ;;  %v8302_v60 = vld [vmem:[#allocation109_spill] sm:$0xff]  ;;  %v1551_v3 = vcvt.s32.f32 %v1535_v37 }
 0x1e9   :  { %8295 = vst [vmem:[#allocation17_spill] sm:$0xff] %v5652_v55  ;;  %v5657_v40 = vmul.f32 %v1549_v39, %v8298_v50  ;;  %8300 = vst [vmem:[#allocation21_spill] sm:$0xff] %v5663_v31  ;;  %v5667_v30 = vadd.f32 %v8301_v45, %v977_v36  ;;  %v5670_v59 = vmul.f32 %v1550_v25, %v8302_v60  ;;  %v8304_v50 = vld [vmem:[#allocation26_spill] sm:$0xff]  ;;  %v1552_v49 = vcvt.s32.f32 %v1536_v52 }
 0x1ea   :  { %v5673_v39 = vadd.f32 %v8304_v50, %v980_v58  ;;  %v5677_v55 = vpop.permute.xlu0 %1613  ;;  %2140 = vrot.lane.b32.xlu1 %v5079_v11, %s3403_s10  ;;  %v1539_v6 = vunpack.c.2.s8 %v5637_v12  ;;  %v982_v63 = vadd.f32 %v966_v17, %v5479_v27  ;;  %v5683_v36 = vcvt.s32.f32 %v1471_v0  ;;  %v8308_v58 = vld [vmem:[#allocation156_spill] sm:$0xff]  ;;  %v8309_v60 = vld [vmem:[#allocation22_spill] sm:$0xff]  ;;  %v8313_v0 = vld [vmem:[#allocation115_spill] sm:$0xff] }
 0x1eb   :  { %8299 = vst [vmem:[#allocation106_spill] sm:$0xff] %v5657_v40  ;;  %8303 = vst [vmem:[#allocation114_spill] sm:$0xff] %v5670_v59  ;;  %v5675_v40 = vcvt.s32.f32 %v1470_v5  ;;  %v1626_v25 = vunpack.c.0.s8 %v1622_v15  ;;  %v1627_v45 = vunpack.c.1.s8 %v1622_v15  ;;  %v981_v37 = vadd.f32 %v965_v32, %v5476_v44  ;;  %v8315_v44 = vld [vmem:[#allocation52_spill] sm:$0xff] }
 0x1ec   :  { %8306 = vst [vmem:[#allocation135_spill] sm:$0xff] %v5677_v55  ;;  %8307 = vst [vmem:[#allocation112_spill] sm:$0xff] %v5683_v36  ;;  %v1122_v5 = vmul.f32 %v8309_v60, %v8308_v58  ;;  %v1553_v50 = vcvt.s32.f32 %v1537_v48  ;;  %v1554_v52 = vcvt.s32.f32 %v1538_v53  ;;  %2138 = vrot.lane.b32.xlu0 %v5103_v56, %s3403_s10  ;;  %v5690_v31 = vpop.permute.xlu1 %1619  ;;  %v8311_v55 = vld [vmem:[#allocation158_spill] sm:$0xff]  ;;  %v1628_v27 = vunpack.c.2.s8 %v1622_v15  ;;  %v8316_v48 = vld [vmem:[#allocation113_spill] sm:$0xff] }
 0x1ed   :  { %8305 = vst [vmem:[#allocation108_spill] sm:$0xff] %v5675_v40  ;;  %8310 = vst [vmem:[#allocation110_spill] sm:$0xff] %v5690_v31  ;;  %v8312_v40 = vld [vmem:[#allocation161_spill] sm:$0xff]  ;;  %v5695_v17 = vmul.f32 %v1551_v3, %v8313_v0  ;;  %v1540_v36 = vunpack.c.3.s8 %v5637_v12  ;;  %v5699_v32 = vadd.f32 %v8315_v44, %v979_v7  ;;  %v1629_v58 = vunpack.c.3.s8 %v1622_v15  ;;  %v8321_v3 = vld [vmem:[#allocation55_spill] sm:$0xff] }
 0x1ee   :  { %v1121_v59 = vmul.f32 %v8312_v40, %v8311_v55  ;;  %v5702_v53 = vmul.f32 %v1552_v49, %v8316_v48  ;;  %v1555_v60 = vcvt.s32.f32 %v1539_v6  ;;  %v5704_v22 = vpop.permute.xlu0 %1617  ;;  %2144 = vrot.lane.b32.xlu1 %v5123_v4, %s3403_s10  ;;  %v8319_v40 = vld [vmem:[#allocation162_spill] sm:$0xff]  ;;  %v5711_v0 = vadd.f32 %v8321_v3, %v982_v63  ;;  %v1623_v15 = vld [vmem:[#allocation4 + $0x1a8] sm:$0xff]  ;;  %v8324_v6 = vld [vmem:[#allocation32_spill] sm:$0xff] }
 0x1ef   :  { %8314 = vst [vmem:[#allocation116_spill] sm:$0xff] %v5695_v17  ;;  %8318 = vst [vmem:[#allocation120_spill] sm:$0xff] %v5704_v22  ;;  %v8320_v55 = vld [vmem:[#allocation54_spill] sm:$0xff]  ;;  %v5713_v12 = vcvt.s32.f32 %v1626_v25  ;;  %v5715_v7 = vcvt.s32.f32 %v1627_v45  ;;  %v5718_v49 = vadd.f32 %v1122_v5, %v5492_v18  ;;  %v5721_v44 = vadd.f32 %v8324_v6, %v981_v37  ;;  %v8325_v48 = vld [vmem:[#allocation119_spill] sm:$0xff] }
 0x1f0   :  { %8317 = vst [vmem:[#allocation118_spill] sm:$0xff] %v5702_v53  ;;  %v1124_v31 = vmul.f32 %v8320_v55, %v8319_v40  ;;  %v5724_v22 = vmul.f32 %v1553_v50, %v8325_v48  ;;  %v8327_v17 = vld [vmem:[#allocation117_spill] sm:$0xff]  ;;  %2142 = vrot.lane.b32.xlu0 %v5145_v16, %s3403_s10  ;;  %v5731_v63 = vpop.permute.xlu1 %1692  ;;  %v5734_v25 = vadd.f32 %v1121_v59, %v5513_v1  ;;  %v8330_v45 = vld [vmem:[#allocation163_spill] sm:$0xff]  ;;  %v8331_v18 = vld [vmem:[#allocation28_spill] sm:$0xff]  ;;  %v5738_v40 = vcvt.s32.f32 %v1628_v27 }
 0x1f1   :  { %8322 = vst [vmem:[#allocation138_spill] sm:$0xff] %v5713_v12  ;;  %8323 = vst [vmem:[#allocation122_spill] sm:$0xff] %v5715_v7  ;;  %v5727_v53 = vmul.f32 %v1554_v52, %v8327_v17  ;;  %v1123_v5 = vmul.f32 %v8331_v18, %v8330_v45  ;;  %v1624_v37 = vld [vmem:[#allocation4 + $0x1b0] sm:$0xff]  ;;  %v1556_v55 = vcvt.s32.f32 %v1540_v36  ;;  %v5740_v50 = vcvt.s32.f32 %v1629_v58  ;;  %v8334_v17 = vld [vmem:[#allocation123_spill] sm:$0xff] }
 0x1f2   :  { %8326 = vst [vmem:[#allocation124_spill] sm:$0xff] %v5724_v22  ;;  %8329 = vst [vmem:[#allocation125_spill] sm:$0xff] %v5731_v63  ;;  %v1630_v3 = vunpack.c.0.s8 %v1623_v15  ;;  %v1631_v52 = vunpack.c.1.s8 %v1623_v15  ;;  %v5743_v6 = vmul.f32 %v1555_v60, %v8334_v17  ;;  %v5745_v48 = vpop.permute.xlu0 %1690  ;;  %2148 = vrot.lane.b32.xlu1 %v5157_v19, %s3403_s10  ;;  %v5750_v1 = vadd.f32 %v1124_v31, %v5523_v42  ;;  %v8337_v59 = vld [vmem:[#allocation166_spill] sm:$0xff]  ;;  %v8338_v27 = vld [vmem:[#allocation165_spill] sm:$0xff] }
 0x1f3   :  { %8328 = vst [vmem:[#allocation139_spill] sm:$0xff] %v5727_v53  ;;  %8332 = vst [vmem:[#allocation145_spill] sm:$0xff] %v5738_v40  ;;  %v1125_v45 = vmul.f32 %v8338_v27, %v8337_v59  ;;  %v8339_v18 = vld [vmem:[#allocation164_spill] sm:$0xff]  ;;  %v8340_v36 = vld [vmem:[#allocation169_spill] sm:$0xff]  ;;  %v1632_v63 = vunpack.c.2.s8 %v1623_v15  ;;  %v1634_v22 = vunpack.c.0.s8 %v1624_v37  ;;  %v5765_v31 = vadd.f32 %v1123_v5, %v5529_v21 }
 0x1f4   :  { %8333 = vst [vmem:[#allocation142_spill] sm:$0xff] %v5740_v50  ;;  %8335 = vst [vmem:[#allocation94_spill] sm:$0xff] %v5743_v6  ;;  %v1126_v58 = vmul.f32 %v8340_v36, %v8339_v18  ;;  %v8341_v40 = vld [vmem:[#allocation177_spill] sm:$0xff]  ;;  %v8342_v50 = vld [vmem:[#allocation36_spill] sm:$0xff]  ;;  %2146 = vrot.lane.b32.xlu0 %v5181_v23, %s3403_s10  ;;  %v5762_v42 = vpop.permute.xlu1 %1696  ;;  %v1635_v36 = vunpack.c.1.s8 %v1624_v37  ;;  %v1636_v24 = vunpack.c.2.s8 %v1624_v37 }
 0x1f5   :  { %8336 = vst [vmem:[#allocation141_spill] sm:$0xff] %v5745_v48  ;;  %v1127_v12 = vmul.f32 %v8342_v50, %v8341_v40  ;;  %v8343_v60 = vld [vmem:[#allocation172_spill] sm:$0xff]  ;;  %v1633_v48 = vunpack.c.3.s8 %v1623_v15  ;;  %8345 = vst [vmem:[#allocation126_spill] sm:$0xff] %v5762_v42  ;;  %v8346_v59 = vld [vmem:[#allocation181_spill] sm:$0xff]  ;;  %v5774_v15 = vcvt.s32.f32 %v1630_v3  ;;  %v5783_v21 = vadd.f32 %v1125_v45, %v5567_v47 }
 0x1f6   :  { %v8344_v17 = vld [vmem:[#allocation56_spill] sm:$0xff]  ;;  %v8347_v27 = vld [vmem:[#allocation173_spill] sm:$0xff]  ;;  %v8350_v40 = vld [vmem:[#allocation186_spill] sm:$0xff]  ;;  %v5778_v46 = vpop.permute.xlu0 %1694  ;;  %2152 = vrot.lane.b32.xlu1 %v5201_v28, %s3403_s10  ;;  %v5786_v5 = vadd.f32 %v1126_v58, %v5546_v38 }
 0x1f7   :  { %v1128_v6 = vmul.f32 %v8344_v17, %v8343_v60  ;;  %v1130_v18 = vmul.f32 %v8347_v27, %v8346_v59  ;;  %v8348_v7 = vld [vmem:[#allocation121_spill] sm:$0xff]  ;;  %v8351_v50 = vld [vmem:[#allocation170_spill] sm:$0xff]  ;;  %8352 = vst [vmem:[#allocation127_spill] sm:$0xff] %v5774_v15  ;;  %v5776_v17 = vcvt.s32.f32 %v1631_v52  ;;  %8354 = vst [vmem:[#allocation149_spill] sm:$0xff] %v5778_v46  ;;  %v5791_v3 = vadd.f32 %v1127_v12, %v5597_v13 }
 0x1f8   :  { %v5770_v53 = vmul.f32 %v1556_v55, %v8348_v7  ;;  %v1129_v60 = vmul.f32 %v8351_v50, %v8350_v40  ;;  %v5788_v7 = vcvt.s32.f32 %v1632_v63  ;;  %v1637_v55 = vunpack.c.3.s8 %v1624_v37  ;;  %v1625_v59 = vld [vmem:[#allocation4 + $0x1b8] sm:$0xff]  ;;  %2150 = vrot.lane.b32.xlu0 %v5222_v20, %s3403_s10  ;;  %v5802_v47 = vpop.permute.xlu1 %1700  ;;  %v8360_v37 = vld [vmem:[#allocation171_spill] sm:$0xff]  ;;  %v8361_v13 = vld [vmem:[#allocation192_spill] sm:$0xff] }
 0x1f9   :  { %8353 = vst [vmem:[#allocation41_spill] sm:$0xff] %v5776_v17  ;;  %v5794_v52 = vadd.f32 %v1128_v6, %v5578_v34  ;;  %v5796_v27 = vcvt.s32.f32 %v1633_v48  ;;  %v5798_v40 = vcvt.s32.f32 %v1634_v22  ;;  %8358 = vst [vmem:[#allocation148_spill] sm:$0xff] %v5802_v47  ;;  %v5805_v38 = vadd.f32 %v1130_v18, %v5607_v10  ;;  %v8359_v63 = vld [vmem:[#allocation197_spill] sm:$0xff]  ;;  %v8362_v12 = vld [vmem:[#allocation58_spill] sm:$0xff] }
 0x1fa   :  { %8349 = vst [vmem:[#allocation29_spill] sm:$0xff] %v5770_v53  ;;  %8355 = vst [vmem:[#allocation128_spill] sm:$0xff] %v5788_v7  ;;  %v1131_v45 = vmul.f32 %v8360_v37, %v8359_v63  ;;  %v1132_v58 = vmul.f32 %v8362_v12, %v8361_v13  ;;  %v5811_v34 = vcvt.s32.f32 %v1635_v36  ;;  %v1723_v6 = vld [vmem:[#allocation4 + $0x1c0] sm:$0xff]  ;;  %v5814_v22 = vadd.f32 %v1129_v60, %v5621_v29  ;;  %v5818_v47 = vpop.permute.xlu0 %1698  ;;  %v8367_v18 = vld [vmem:[#allocation40_spill] sm:$0xff] }
 0x1fb   :  { %8356 = vst [vmem:[#allocation143_spill] sm:$0xff] %v5796_v27  ;;  %8357 = vst [vmem:[#allocation99_spill] sm:$0xff] %v5798_v40  ;;  %v5816_v48 = vcvt.s32.f32 %v1636_v24  ;;  %v1638_v50 = vunpack.c.0.s8 %v1625_v59  ;;  %v1639_v46 = vunpack.c.1.s8 %v1625_v59  ;;  %2156 = vrot.lane.b32.xlu1 %v5240_v57, %s3403_s10  ;;  %v8366_v10 = vld [vmem:[#allocation206_spill] sm:$0xff]  ;;  %v8368_v37 = vld [vmem:[#allocation201_spill] sm:$0xff]  ;;  %v5826_v12 = vcvt.s32.f32 %v1637_v55 }
 0x1fc   :  { %8363 = vst [vmem:[#allocation97_spill] sm:$0xff] %v5811_v34  ;;  %8365 = vst [vmem:[#allocation16_spill] sm:$0xff] %v5818_v47  ;;  %v1133_v63 = vmul.f32 %v8367_v18, %v8366_v10  ;;  %v8369_v13 = vld [vmem:[#allocation59_spill] sm:$0xff]  ;;  %v1640_v42 = vunpack.c.2.s8 %v1625_v59  ;;  %v8371_v29 = vld [vmem:[#allocation217_spill] sm:$0xff]  ;;  %v1641_v7 = vunpack.c.3.s8 %v1625_v59  ;;  %v1727_v47 = vunpack.c.0.s8 %v1723_v6  ;;  %2154 = vrot.lane.b32.xlu0 %v8257_v33, %s3403_s10  ;;  %v5834_v27 = vpop.permute.xlu1 %1704 }
 0x1fd   :  { %8364 = vst [vmem:[#allocation133_spill] sm:$0xff] %v5816_v48  ;;  %v1134_v36 = vmul.f32 %v8369_v13, %v8368_v37  ;;  %8370 = vst [vmem:[#allocation47_spill] sm:$0xff] %v5826_v12  ;;  %v8372_v60 = vld [vmem:[#allocation174_spill] sm:$0xff]  ;;  %v8373_v48 = vld [vmem:[#allocation212_spill] sm:$0xff]  ;;  %v5837_v10 = vadd.f32 %v1131_v45, %v5667_v30  ;;  %v5840_v55 = vadd.f32 %v1132_v58, %v5641_v54  ;;  %v5846_v59 = vcvt.s32.f32 %v1638_v50 }
 0x1fe   :  { %v1135_v24 = vmul.f32 %v8372_v60, %v8371_v29  ;;  %v8374_v34 = vld [vmem:[#allocation38_spill] sm:$0xff]  ;;  %8375 = vst [vmem:[#allocation140_spill] sm:$0xff] %v5834_v27  ;;  %v8376_v18 = vld [vmem:[#allocation12_spill] sm:$0xff]  ;;  %v8377_v37 = vld [vmem:[#allocation61_spill] sm:$0xff]  ;;  %v1728_v29 = vunpack.c.1.s8 %v1723_v6  ;;  %v1729_v17 = vunpack.c.2.s8 %v1723_v6  ;;  %v5850_v15 = vpop.permute.xlu0 %1702  ;;  %v5855_v54 = vadd.f32 %v1133_v63, %v5699_v32 }
 0x1ff   :  { %v1136_v40 = vmul.f32 %v8374_v34, %v8373_v48  ;;  %v1223_v13 = vmul.f32 %v8377_v37, %v8376_v18  ;;  %v8378_v60 = vld [vmem:[#allocation131_spill] sm:$0xff]  ;;  %v8379_v12 = vld [vmem:[#allocation178_spill] sm:$0xff]  ;;  %8380 = vst [vmem:[#allocation45_spill] sm:$0xff] %v5846_v59  ;;  %v5848_v48 = vcvt.s32.f32 %v1639_v46  ;;  %8382 = vst [vmem:[#allocation103_spill] sm:$0xff] %v5850_v15  ;;  %2229 = vrot.lane.b32.xlu1 %v4964_v51, %s3404_s11  ;;  %v5860_v45 = vcvt.s32.f32 %v1640_v42 }
 0x200   :  { %v1222_v34 = vmul.f32 %v8379_v12, %v8378_v60  ;;  %v5858_v30 = vadd.f32 %v1134_v36, %v5673_v39  ;;  %v1730_v58 = vunpack.c.3.s8 %v1723_v6  ;;  %v1724_v12 = vld [vmem:[#allocation4 + $0x1c8] sm:$0xff]  ;;  %v5863_v50 = vadd.f32 %v1135_v24, %v5721_v44  ;;  %2227 = vrot.lane.b32.xlu0 %v4989_v14, %s3404_s11  ;;  %v5874_v32 = vpop.permute.xlu1 %1708  ;;  %v8387_v42 = vld [vmem:[#allocation136_spill] sm:$0xff]  ;;  %v8388_v6 = vld [vmem:[#allocation42_spill] sm:$0xff] }
 0x201   :  { %8381 = vst [vmem:[#allocation46_spill] sm:$0xff] %v5848_v48  ;;  %8383 = vst [vmem:[#allocation144_spill] sm:$0xff] %v5860_v45  ;;  %v5866_v46 = vadd.f32 %v1136_v40, %v5711_v0  ;;  %v5868_v18 = vcvt.s32.f32 %v1641_v7  ;;  %v5870_v37 = vcvt.s32.f32 %v1727_v47  ;;  %v5877_v39 = vadd.f32 %v1223_v13, %v5718_v49  ;;  %v8389_v44 = vld [vmem:[#allocation19_spill] sm:$0xff]  ;;  %v8390_v36 = vld [vmem:[#allocation62_spill] sm:$0xff] }
 0x202   :  { %8386 = vst [vmem:[#allocation101_spill] sm:$0xff] %v5874_v32  ;;  %v1224_v63 = vmul.f32 %v8388_v6, %v8387_v42  ;;  %v1225_v24 = vmul.f32 %v8390_v36, %v8389_v44  ;;  %v5883_v0 = vcvt.s32.f32 %v1728_v29  ;;  %v1725_v7 = vld [vmem:[#allocation4 + $0x1d0] sm:$0xff]  ;;  %v5886_v40 = vadd.f32 %v1222_v34, %v5734_v25  ;;  %v5890_v32 = vpop.permute.xlu0 %1706  ;;  %v8394_v49 = vld [vmem:[#allocation25_spill] sm:$0xff]  ;;  %v8395_v13 = vld [vmem:[#allocation63_spill] sm:$0xff] }
 0x203   :  { %8384 = vst [vmem:[#allocation154_spill] sm:$0xff] %v5868_v18  ;;  %8385 = vst [vmem:[#allocation155_spill] sm:$0xff] %v5870_v37  ;;  %v5888_v47 = vcvt.s32.f32 %v1729_v17  ;;  %v1731_v60 = vunpack.c.0.s8 %v1724_v12  ;;  %v1732_v15 = vunpack.c.1.s8 %v1724_v12  ;;  %2233 = vrot.lane.b32.xlu1 %v5001_v26, %s3404_s11  ;;  %v1226_v42 = vmul.f32 %v8395_v13, %v8394_v49  ;;  %v8396_v6 = vld [vmem:[#allocation137_spill] sm:$0xff]  ;;  %v8397_v44 = vld [vmem:[#allocation64_spill] sm:$0xff] }
 0x204   :  { %8391 = vst [vmem:[#allocation157_spill] sm:$0xff] %v5883_v0  ;;  %8393 = vst [vmem:[#allocation105_spill] sm:$0xff] %v5890_v32  ;;  %v1227_v29 = vmul.f32 %v8397_v44, %v8396_v6  ;;  %v5898_v36 = vcvt.s32.f32 %v1730_v58  ;;  %v1733_v27 = vunpack.c.2.s8 %v1724_v12  ;;  %v8399_v25 = vld [vmem:[#allocation27_spill] sm:$0xff]  ;;  %v8400_v34 = vld [vmem:[#allocation184_spill] sm:$0xff]  ;;  %v1734_v45 = vunpack.c.3.s8 %v1724_v12  ;;  %2231 = vrot.lane.b32.xlu0 %v5025_v35, %s3404_s11  ;;  %v5906_v18 = vpop.permute.xlu1 %1712 }
 0x205   :  { %8392 = vst [vmem:[#allocation107_spill] sm:$0xff] %v5888_v47  ;;  %v1228_v17 = vmul.f32 %v8400_v34, %v8399_v25  ;;  %v8401_v47 = vld [vmem:[#allocation37_spill] sm:$0xff]  ;;  %v1735_v32 = vunpack.c.0.s8 %v1725_v7  ;;  %8403 = vst [vmem:[#allocation48_spill] sm:$0xff] %v5906_v18  ;;  %v5909_v49 = vadd.f32 %v1224_v63, %v5765_v31  ;;  %v5912_v58 = vadd.f32 %v1225_v24, %v5750_v1  ;;  %v8404_v13 = vld [vmem:[#allocation39_spill] sm:$0xff] }
 0x206   :  { %8398 = vst [vmem:[#allocation146_spill] sm:$0xff] %v5898_v36  ;;  %v8402_v0 = vld [vmem:[#allocation185_spill] sm:$0xff]  ;;  %v8405_v6 = vld [vmem:[#allocation188_spill] sm:$0xff]  ;;  %v1736_v25 = vunpack.c.1.s8 %v1725_v7  ;;  %v8406_v34 = vld [vmem:[#allocation147_spill] sm:$0xff]  ;;  %v5918_v12 = vcvt.s32.f32 %v1731_v60  ;;  %v1737_v48 = vunpack.c.2.s8 %v1725_v7  ;;  %v5922_v59 = vpop.permute.xlu0 %1710  ;;  %v5927_v1 = vadd.f32 %v1226_v42, %v5783_v21 }
 0x207   :  { %v1229_v37 = vmul.f32 %v8402_v0, %v8401_v47  ;;  %v1231_v44 = vmul.f32 %v8405_v6, %v8404_v13  ;;  %v8407_v36 = vld [vmem:[#allocation187_spill] sm:$0xff]  ;;  %v5920_v47 = vcvt.s32.f32 %v1732_v15  ;;  %8410 = vst [vmem:[#allocation18_spill] sm:$0xff] %v5922_v59  ;;  %2237 = vrot.lane.b32.xlu1 %v5045_v62, %s3404_s11  ;;  %v5930_v31 = vadd.f32 %v1227_v29, %v5786_v5  ;;  %v8418_v29 = vld [vmem:[#allocation70_spill] sm:$0xff] }
 0x208   :  { %v1230_v0 = vmul.f32 %v8407_v36, %v8406_v34  ;;  %8408 = vst [vmem:[#allocation24_spill] sm:$0xff] %v5918_v12  ;;  %v5932_v63 = vcvt.s32.f32 %v1733_v27  ;;  %v1738_v24 = vunpack.c.3.s8 %v1725_v7  ;;  %v1726_v36 = vld [vmem:[#allocation4 + $0x1d8] sm:$0xff]  ;;  %v5935_v60 = vadd.f32 %v1228_v17, %v5791_v3  ;;  %2235 = vrot.lane.b32.xlu0 %v5067_v41, %s3404_s11  ;;  %v5946_v21 = vpop.permute.xlu1 %1716  ;;  %v8417_v3 = vld [vmem:[#allocation31_spill] sm:$0xff] }
 0x209   :  { %8409 = vst [vmem:[#allocation151_spill] sm:$0xff] %v5920_v47  ;;  %v5938_v15 = vadd.f32 %v1229_v37, %v5794_v52  ;;  %v5940_v13 = vcvt.s32.f32 %v1734_v45  ;;  %v5942_v6 = vcvt.s32.f32 %v1735_v32  ;;  %8414 = vst [vmem:[#allocation50_spill] sm:$0xff] %v5946_v21  ;;  %v5949_v5 = vadd.f32 %v1231_v44, %v5805_v38  ;;  %v8415_v27 = vld [vmem:[#allocation33_spill] sm:$0xff]  ;;  %v1888_v45 = vld [vmem:[#allocation4 + $0x1e0] sm:$0xff] }
 0x20a   :  { %8411 = vst [vmem:[#allocation153_spill] sm:$0xff] %v5932_v63  ;;  %v8416_v7 = vld [vmem:[#allocation189_spill] sm:$0xff]  ;;  %v1233_v17 = vmul.f32 %v8418_v29, %v8417_v3  ;;  %v5955_v52 = vcvt.s32.f32 %v1736_v25  ;;  %v5958_v37 = vadd.f32 %v1230_v0, %v5814_v22  ;;  %v5960_v32 = vcvt.s32.f32 %v1737_v48  ;;  %v5962_v59 = vpop.permute.xlu0 %1714  ;;  %v8422_v38 = vld [vmem:[#allocation150_spill] sm:$0xff]  ;;  %v8423_v44 = vld [vmem:[#allocation71_spill] sm:$0xff] }
 0x20b   :  { %8412 = vst [vmem:[#allocation49_spill] sm:$0xff] %v5940_v13  ;;  %8413 = vst [vmem:[#allocation111_spill] sm:$0xff] %v5942_v6  ;;  %v1232_v42 = vmul.f32 %v8416_v7, %v8415_v27  ;;  %v1739_v34 = vunpack.c.0.s8 %v1726_v36  ;;  %v1740_v21 = vunpack.c.1.s8 %v1726_v36  ;;  %2241 = vrot.lane.b32.xlu1 %v5079_v11, %s3404_s11  ;;  %v1234_v27 = vmul.f32 %v8423_v44, %v8422_v38  ;;  %v8424_v7 = vld [vmem:[#allocation43_spill] sm:$0xff]  ;;  %v8427_v22 = vld [vmem:[#allocation152_spill] sm:$0xff] }
 0x20c   :  { %8419 = vst [vmem:[#allocation109_spill] sm:$0xff] %v5955_v52  ;;  %8420 = vst [vmem:[#allocation26_spill] sm:$0xff] %v5960_v32  ;;  %v8425_v3 = vld [vmem:[#allocation191_spill] sm:$0xff]  ;;  %v5970_v29 = vcvt.s32.f32 %v1738_v24  ;;  %v1741_v18 = vunpack.c.2.s8 %v1726_v36  ;;  %v8428_v0 = vld [vmem:[#allocation193_spill] sm:$0xff]  ;;  %2239 = vrot.lane.b32.xlu0 %v5103_v56, %s3404_s11  ;;  %v5978_v63 = vpop.permute.xlu1 %1720  ;;  %v1892_v13 = vunpack.c.0.s8 %v1888_v45  ;;  %v5984_v24 = vadd.f32 %v1233_v17, %v5840_v55 }
 0x20d   :  { %8421 = vst [vmem:[#allocation156_spill] sm:$0xff] %v5962_v59  ;;  %v1235_v25 = vmul.f32 %v8425_v3, %v8424_v7  ;;  %v1236_v48 = vmul.f32 %v8428_v0, %v8427_v22  ;;  %v8429_v32 = vld [vmem:[#allocation14_spill] sm:$0xff]  ;;  %v8430_v52 = vld [vmem:[#allocation73_spill] sm:$0xff]  ;;  %v1742_v59 = vunpack.c.3.s8 %v1726_v36  ;;  %8431 = vst [vmem:[#allocation158_spill] sm:$0xff] %v5978_v63  ;;  %v5981_v38 = vadd.f32 %v1232_v42, %v5837_v10 }
 0x20e   :  { %8426 = vst [vmem:[#allocation22_spill] sm:$0xff] %v5970_v29  ;;  %v1237_v6 = vmul.f32 %v8430_v52, %v8429_v32  ;;  %v8432_v44 = vld [vmem:[#allocation20_spill] sm:$0xff]  ;;  %v8433_v7 = vld [vmem:[#allocation195_spill] sm:$0xff]  ;;  %v1893_v22 = vunpack.c.1.s8 %v1888_v45  ;;  %v8435_v29 = vld [vmem:[#allocation74_spill] sm:$0xff]  ;;  %v5990_v32 = vcvt.s32.f32 %v1739_v34  ;;  %v5992_v47 = vcvt.s32.f32 %v1740_v21  ;;  %v5994_v36 = vpop.permute.xlu0 %1718 }
 0x20f   :  { %v1388_v3 = vmul.f32 %v8433_v7, %v8432_v44  ;;  %v8434_v0 = vld [vmem:[#allocation160_spill] sm:$0xff]  ;;  %8438 = vst [vmem:[#allocation52_spill] sm:$0xff] %v5994_v36  ;;  %2245 = vrot.lane.b32.xlu1 %v5123_v4, %s3404_s11  ;;  %v1894_v10 = vunpack.c.2.s8 %v1888_v45  ;;  %v5999_v55 = vadd.f32 %v1234_v27, %v5855_v54  ;;  %v6002_v42 = vadd.f32 %v1235_v25, %v5858_v30 }
 0x210   :  { %v1387_v52 = vmul.f32 %v8435_v29, %v8434_v0  ;;  %8436 = vst [vmem:[#allocation161_spill] sm:$0xff] %v5990_v32  ;;  %8437 = vst [vmem:[#allocation115_spill] sm:$0xff] %v5992_v47  ;;  %v6004_v17 = vcvt.s32.f32 %v1741_v18  ;;  %v1895_v44 = vunpack.c.3.s8 %v1888_v45  ;;  %v1889_v29 = vld [vmem:[#allocation4 + $0x1e8] sm:$0xff]  ;;  %v6007_v34 = vadd.f32 %v1236_v48, %v5863_v50  ;;  %2243 = vrot.lane.b32.xlu0 %v5145_v16, %s3404_s11  ;;  %v6018_v27 = vpop.permute.xlu1 %1857  ;;  %v8444_v45 = vld [vmem:[#allocation196_spill] sm:$0xff] }
 0x211   :  { %v6010_v21 = vadd.f32 %v1237_v6, %v5866_v46  ;;  %v6012_v7 = vcvt.s32.f32 %v1742_v59  ;;  %v6016_v54 = vcvt.s32.f32 %v1892_v13  ;;  %8442 = vst [vmem:[#allocation55_spill] sm:$0xff] %v6018_v27  ;;  %v6021_v30 = vadd.f32 %v1388_v3, %v5877_v39  ;;  %v8443_v18 = vld [vmem:[#allocation51_spill] sm:$0xff]  ;;  %v8446_v48 = vld [vmem:[#allocation76_spill] sm:$0xff]  ;;  %v8452_v27 = vld [vmem:[#allocation77_spill] sm:$0xff] }
 0x212   :  { %8439 = vst [vmem:[#allocation113_spill] sm:$0xff] %v6004_v17  ;;  %v1389_v25 = vmul.f32 %v8444_v45, %v8443_v18  ;;  %v8445_v50 = vld [vmem:[#allocation159_spill] sm:$0xff]  ;;  %v6027_v46 = vcvt.s32.f32 %v1893_v22  ;;  %v6030_v59 = vadd.f32 %v1387_v52, %v5886_v40  ;;  %v6032_v6 = vpop.permute.xlu0 %1855  ;;  %v6036_v13 = vcvt.s32.f32 %v1894_v10  ;;  %v8451_v45 = vld [vmem:[#allocation53_spill] sm:$0xff]  ;;  %v1890_v40 = vld [vmem:[#allocation4 + $0x1f0] sm:$0xff] }
 0x213   :  { %8440 = vst [vmem:[#allocation162_spill] sm:$0xff] %v6012_v7  ;;  %8441 = vst [vmem:[#allocation54_spill] sm:$0xff] %v6016_v54  ;;  %v1390_v0 = vmul.f32 %v8446_v48, %v8445_v50  ;;  %2249 = vrot.lane.b32.xlu1 %v5157_v19, %s3404_s11  ;;  %v1896_v39 = vunpack.c.0.s8 %v1889_v29  ;;  %v1897_v3 = vunpack.c.1.s8 %v1889_v29  ;;  %v8450_v54 = vld [vmem:[#allocation35_spill] sm:$0xff]  ;;  %v1392_v50 = vmul.f32 %v8452_v27, %v8451_v45  ;;  %v8457_v45 = vld [vmem:[#allocation78_spill] sm:$0xff] }
 0x214   :  { %8447 = vst [vmem:[#allocation32_spill] sm:$0xff] %v6027_v46  ;;  %8448 = vst [vmem:[#allocation119_spill] sm:$0xff] %v6032_v6  ;;  %v1391_v18 = vmul.f32 %v5368_v9, %v8450_v54  ;;  %v6042_v22 = vcvt.s32.f32 %v1895_v44  ;;  %v1898_v48 = vunpack.c.2.s8 %v1889_v29  ;;  %v8454_v52 = vld [vmem:[#allocation23_spill] sm:$0xff]  ;;  %2247 = vrot.lane.b32.xlu0 %v5181_v23, %s3404_s11  ;;  %v6048_v10 = vpop.permute.xlu1 %1861  ;;  %v2329_v9 = vrot.slane %v4964_v51, 1  ;;  %v8475_v47 = vld [vmem:[#allocation80_spill] sm:$0xff] }
 0x215   :  { %8449 = vst [vmem:[#allocation117_spill] sm:$0xff] %v6036_v13  ;;  %v1394_v6 = vmul.f32 %v5395_v8, %v8454_v52  ;;  %8455 = vst [vmem:[#allocation28_spill] sm:$0xff] %v6048_v10  ;;  %v1899_v13 = vunpack.c.3.s8 %v1889_v29  ;;  %v6053_v54 = vadd.f32 %v1389_v25, %v5909_v49  ;;  %v6056_v44 = vadd.f32 %v1390_v0, %v5912_v58  ;;  %v8456_v27 = vld [vmem:[#allocation167_spill] sm:$0xff]  ;;  %v8461_v0 = vld [vmem:[#allocation30_spill] sm:$0xff] }
 0x216   :  { %8453 = vst [vmem:[#allocation163_spill] sm:$0xff] %v6042_v22  ;;  %v1393_v22 = vmul.f32 %v8457_v45, %v8456_v27  ;;  %v2330_v8 = vrot.slane %v5025_v35, 1  ;;  %v6061_v52 = vpop.permute.xlu0 %1859  ;;  %v6065_v29 = vcvt.s32.f32 %v1896_v39  ;;  %v6067_v46 = vcvt.s32.f32 %v1897_v3 }
 0x217   :  { %8458 = vst [vmem:[#allocation123_spill] sm:$0xff] %v6061_v52  ;;  %2253 = vrot.lane.b32.xlu1 %v5201_v28, %s3404_s11  ;;  %v1900_v10 = vunpack.c.0.s8 %v1890_v40  ;;  %v1901_v49 = vunpack.c.1.s8 %v1890_v40  ;;  %v6070_v25 = vadd.f32 %v1391_v18, %v5927_v1  ;;  %v6073_v58 = vadd.f32 %v1392_v50, %v5930_v31 }
 0x218   :  { %8459 = vst [vmem:[#allocation166_spill] sm:$0xff] %v6065_v29  ;;  %8460 = vst [vmem:[#allocation165_spill] sm:$0xff] %v6067_v46  ;;  %v1396_v27 = vmul.f32 %v5414_v43, %v8461_v0  ;;  %v6077_v45 = vcvt.s32.f32 %v1898_v48  ;;  %v6080_v52 = vadd.f32 %v1394_v6, %v5938_v15  ;;  %2251 = vrot.lane.b32.xlu0 %v5222_v20, %s3404_s11  ;;  %v6084_v39 = vpop.permute.xlu1 %1865  ;;  %v6086_v3 = vcvt.s32.f32 %v1899_v13  ;;  %v8467_v15 = vld [vmem:[#allocation168_spill] sm:$0xff]  ;;  %v8468_v6 = vld [vmem:[#allocation79_spill] sm:$0xff] }
 0x219   :  { %8463 = vst [vmem:[#allocation169_spill] sm:$0xff] %v6084_v39  ;;  %v8465_v1 = vrot.slane %v4989_v14, 1  ;;  %v2331_v43 = vrot.slane %v5001_v26, 1  ;;  %v6096_v50 = vadd.f32 %v1393_v22, %v5935_v60  ;;  %v1395_v48 = vmul.f32 %v8468_v6, %v8467_v15  ;;  %v8473_v6 = vld [vmem:[#allocation34_spill] sm:$0xff] }
 0x21a   :  { %8462 = vst [vmem:[#allocation164_spill] sm:$0xff] %v6077_v45  ;;  %8464 = vst [vmem:[#allocation177_spill] sm:$0xff] %v6086_v3  ;;  %v6102_v0 = vsel %vm732_vm1, %v2329_v9, %v2330_v8  ;;  %v2332_v13 = vrot.slane %v5067_v41, 1  ;;  %v1891_v45 = vld [vmem:[#allocation4 + $0x1f8] sm:$0xff]  ;;  %v6105_v3 = vpop.permute.xlu0 %1863  ;;  %v6111_v46 = vcvt.s32.f32 %v1901_v49  ;;  %v1902_v60 = vunpack.c.2.s8 %v1890_v40 }
 0x21b   :  { %v6092_v31 = vsel %vm732_vm1, %v8465_v1, %v2329_v9  ;;  %8469 = vst [vmem:[#allocation36_spill] sm:$0xff] %v6102_v0  ;;  %8470 = vst [vmem:[#allocation172_spill] sm:$0xff] %v6105_v3  ;;  %2257 = vrot.lane.b32.xlu1 %v5240_v57, %s3404_s11  ;;  %v6109_v1 = vcvt.s32.f32 %v1900_v10  ;;  %v1903_v22 = vunpack.c.3.s8 %v1890_v40  ;;  %v6114_v15 = vadd.f32 %v1396_v27, %v5949_v5  ;;  %v8474_v3 = vld [vmem:[#allocation57_spill] sm:$0xff]  ;;  %v8478_v27 = vld [vmem:[#allocation175_spill] sm:$0xff] }
 0x21c   :  { %8472 = vst [vmem:[#allocation181_spill] sm:$0xff] %v6111_v46  ;;  %v1398_v9 = vmul.f32 %v5427_v61, %v8473_v6  ;;  %v2333_v39 = vrot.slane %v5045_v62, 1  ;;  %v2334_v29 = vrot.slane %v5103_v56, 1  ;;  %v1397_v32 = vmul.f32 %v8475_v47, %v8474_v3  ;;  %2255 = vrot.lane.b32.xlu0 %v8257_v33, %s3404_s11  ;;  %v6124_v10 = vpop.permute.xlu1 %1869  ;;  %v8481_v46 = vld [vmem:[#allocation81_spill] sm:$0xff] }
 0x21d   :  { %8471 = vst [vmem:[#allocation56_spill] sm:$0xff] %v6109_v1  ;;  %8476 = vst [vmem:[#allocation173_spill] sm:$0xff] %v6124_v10  ;;  %v6128_v40 = vsel %vm732_vm1, %v2330_v8, %v2331_v43  ;;  %v1904_v5 = vunpack.c.0.s8 %v1891_v45  ;;  %v1905_v49 = vunpack.c.1.s8 %v1891_v45  ;;  %v6131_v61 = vadd.f32 %v1395_v48, %v5958_v37  ;;  %v8480_v1 = vld [vmem:[#allocation176_spill] sm:$0xff] }
 0x21e   :  { %8477 = vst [vmem:[#allocation121_spill] sm:$0xff] %v6128_v40  ;;  %v1400_v6 = vmul.f32 %v5446_v2, %v8478_v27  ;;  %v6137_v47 = vsel %vm732_vm1, %v2331_v43, %v2332_v13  ;;  %v2335_v3 = vrot.slane %v5079_v11, 1  ;;  %v1399_v10 = vmul.f32 %v8481_v46, %v8480_v1  ;;  %v6142_v7 = vpop.permute.xlu0 %1867 }
 0x21f   :  { %8479 = vst [vmem:[#allocation186_spill] sm:$0xff] %v6137_v47  ;;  %8482 = vst [vmem:[#allocation170_spill] sm:$0xff] %v6142_v7  ;;  %2394 = vrot.lane.b32.xlu1 %v6102_v0, %s3401_s13  ;;  %v6146_v8 = vcvt.s32.f32 %v1902_v60  ;;  %v6148_v37 = vcvt.s32.f32 %v1903_v22  ;;  %v2336_v2 = vrot.slane %v5145_v16, 1  ;;  %v6152_v48 = vadd.f32 %v1398_v9, %v5984_v24  ;;  %v8490_v7 = vld [vmem:[#allocation205_spill] sm:$0xff] }
 0x220   :  { %v6156_v43 = vsel %vm732_vm1, %v2332_v13, %v2333_v39  ;;  %v6160_v46 = vsel %vm732_vm1, %v2333_v39, %v2334_v29  ;;  %v1906_v1 = vunpack.c.2.s8 %v1891_v45  ;;  %v6163_v27 = vadd.f32 %v1397_v32, %v5981_v38  ;;  %2392 = vrot.lane.b32.xlu0 %v6092_v31, %s3401_s13  ;;  %v6167_v60 = vpop.permute.xlu1 %1873  ;;  %v1989_v13 = vld [vmem:[#allocation4 + $0x200] sm:$0xff] }
 0x221   :  { %8483 = vst [vmem:[#allocation197_spill] sm:$0xff] %v6146_v8  ;;  %8484 = vst [vmem:[#allocation171_spill] sm:$0xff] %v6148_v37  ;;  %v6169_v22 = vcvt.s32.f32 %v1904_v5  ;;  %v6171_v24 = vcvt.s32.f32 %v1905_v49  ;;  %v1907_v9 = vunpack.c.3.s8 %v1891_v45  ;;  %v6173_v8 = vld [vmem:[#allocation4 + $0x220] sm:$0xff]  ;;  %v6176_v39 = vadd.f32 %v1400_v6, %v6002_v42  ;;  %v8489_v37 = vld [vmem:[#allocation44_spill] sm:$0xff] }
 0x222   :  { %8485 = vst [vmem:[#allocation192_spill] sm:$0xff] %v6160_v46  ;;  %8486 = vst [vmem:[#allocation58_spill] sm:$0xff] %v6167_v60  ;;  %v1402_v38 = vmul.f32 %v8490_v7, %v8489_v37  ;;  %v6182_v32 = vsel %vm732_vm1, %v2334_v29, %v2335_v3  ;;  %v2337_v60 = vrot.slane %v5123_v4, 1  ;;  %v6186_v5 = vadd.f32 %v1399_v10, %v5999_v55  ;;  %v8491_v49 = vld [vmem:[#allocation179_spill] sm:$0xff]  ;;  %v8492_v45 = vld [vmem:[#allocation208_spill] sm:$0xff] }
 0x223   :  { %8487 = vst [vmem:[#allocation206_spill] sm:$0xff] %v6169_v22  ;;  %8488 = vst [vmem:[#allocation40_spill] sm:$0xff] %v6171_v24  ;;  %v1489_v22 = vmul.f32 %v8492_v45, %v8491_v49  ;;  %v6190_v24 = vpop.permute.xlu0 %1871  ;;  %2398 = vrot.lane.b32.xlu1 %v6137_v47, %s3401_s13  ;;  %v6196_v42 = vsel %vm732_vm1, %v2335_v3, %v2336_v2  ;;  %v2338_v7 = vrot.slane %v5181_v23, 1  ;;  %v8494_v29 = vld [vmem:[#allocation60_spill] sm:$0xff]  ;;  %v8495_v6 = vld [vmem:[#allocation82_spill] sm:$0xff]  ;;  %v6201_v63 = vcvt.s32.f32 %v1906_v1 }
 0x224   :  { %8493 = vst [vmem:[#allocation201_spill] sm:$0xff] %v6190_v24  ;;  %v1401_v37 = vmul.f32 %v8495_v6, %v8494_v29  ;;  %v1993_v55 = vunpack.c.0.s8 %v1989_v13  ;;  %v2062_v10 = vunpack.c.0.s8 %v6173_v8  ;;  %v8497_v49 = vld [vmem:[#allocation180_spill] sm:$0xff]  ;;  %v8498_v45 = vld [vmem:[#allocation207_spill] sm:$0xff]  ;;  %2396 = vrot.lane.b32.xlu0 %v6128_v40, %s3401_s13  ;;  %v6208_v17 = vpop.permute.xlu1 %1877  ;;  %v6210_v3 = vcvt.s32.f32 %v1907_v9 }
 0x225   :  { %8496 = vst [vmem:[#allocation59_spill] sm:$0xff] %v6201_v63  ;;  %v1488_v24 = vmul.f32 %v8498_v45, %v8497_v49  ;;  %8499 = vst [vmem:[#allocation217_spill] sm:$0xff] %v6208_v17  ;;  %v1994_v36 = vunpack.c.1.s8 %v1989_v13  ;;  %v2339_v12 = vrot.slane %v5157_v19, 1  ;;  %v6214_v29 = vadd.f32 %v1402_v38, %v6010_v21  ;;  %v8502_v63 = vld [vmem:[#allocation183_spill] sm:$0xff]  ;;  %v8503_v17 = vld [vmem:[#allocation86_spill] sm:$0xff] }
 0x226   :  { %8500 = vst [vmem:[#allocation174_spill] sm:$0xff] %v6210_v3  ;;  %v6218_v1 = vsel %vm732_vm1, %v2336_v2, %v2337_v60  ;;  %v2340_v6 = vrot.slane %v5222_v20, 1  ;;  %v2063_v49 = vunpack.c.1.s8 %v6173_v8  ;;  %v1505_v45 = vadd.f32 %v1489_v22, %v6021_v30 }
 0x227   :  { %8501 = vst [vmem:[#allocation212_spill] sm:$0xff] %v6218_v1  ;;  %v1491_v9 = vmul.f32 %v8503_v17, %v8502_v63  ;;  %v6225_v3 = vpop.permute.xlu0 %1875  ;;  %2402 = vrot.lane.b32.xlu1 %v6160_v46, %s3401_s13  ;;  %v6231_v21 = vsel %vm732_vm1, %v2337_v60, %v2338_v7  ;;  %v1995_v2 = vunpack.c.2.s8 %v1989_v13  ;;  %v6234_v38 = vadd.f32 %v1401_v37, %v6007_v34  ;;  %v8506_v63 = vld [vmem:[#allocation66_spill] sm:$0xff]  ;;  %v8507_v17 = vld [vmem:[#allocation209_spill] sm:$0xff]  ;;  %v1990_v37 = vld [vmem:[#allocation4 + $0x208] sm:$0xff] }
 0x228   :  { %8504 = vst [vmem:[#allocation38_spill] sm:$0xff] %v6225_v3  ;;  %v6236_v20 = vcvt.s32.f32 %v1993_v55  ;;  %v1996_v53 = vunpack.c.3.s8 %v1989_v13  ;;  %v2078_v30 = vcvt.s32.f32 %v2062_v10  ;;  %v1504_v22 = vadd.f32 %v1488_v24, %v6030_v59  ;;  %2400 = vrot.lane.b32.xlu0 %v6156_v43, %s3401_s13  ;;  %v6243_v46 = vpop.permute.xlu1 %1881 }
 0x229   :  { %v1490_v3 = vmul.f32 %v8507_v17, %v8506_v63  ;;  %8508 = vst [vmem:[#allocation61_spill] sm:$0xff] %v6243_v46  ;;  %v6245_v60 = vcvt.s32.f32 %v1994_v36  ;;  %v6249_v34 = vsel %vm732_vm1, %v2338_v7, %v2339_v12  ;;  %v6253_v13 = vsel %vm732_vm1, %v2339_v12, %v2340_v6  ;;  %v8512_v63 = vld [vmem:[#allocation67_spill] sm:$0xff]  ;;  %v8513_v17 = vld [vmem:[#allocation213_spill] sm:$0xff] }
 0x22a   :  { %8505 = vst [vmem:[#allocation12_spill] sm:$0xff] %v6236_v20  ;;  %8510 = vst [vmem:[#allocation178_spill] sm:$0xff] %v6249_v34  ;;  %v2341_v59 = vrot.slane %v5201_v28, 1  ;;  %v2342_v24 = vrot.slane %v8257_v33, 1  ;;  %v2079_v55 = vcvt.s32.f32 %v2063_v49  ;;  %v1507_v10 = vadd.f32 %v1491_v9, %v6056_v44  ;;  %v8514_v46 = vld [vmem:[#allocation211_spill] sm:$0xff]  ;;  %v8519_v9 = vld [vmem:[#allocation69_spill] sm:$0xff] }
 0x22b   :  { %8509 = vst [vmem:[#allocation131_spill] sm:$0xff] %v6245_v60  ;;  %8511 = vst [vmem:[#allocation136_spill] sm:$0xff] %v6253_v13  ;;  %v1493_v36 = vmul.f32 %v8513_v17, %v8512_v63  ;;  %v6261_v20 = vadd.f32 %v8514_v46, %v1505_v45  ;;  %v6263_v7 = vpop.permute.xlu0 %1879  ;;  %2406 = vrot.lane.b32.xlu1 %v6196_v42, %s3401_s13  ;;  %v6267_v12 = vcvt.s32.f32 %v1995_v2  ;;  %v6269_v60 = vcvt.s32.f32 %v1996_v53  ;;  %v8520_v63 = vld [vmem:[#allocation89_spill] sm:$0xff]  ;;  %v8521_v45 = vld [vmem:[#allocation210_spill] sm:$0xff] }
 0x22c   :  { %8515 = vst [vmem:[#allocation42_spill] sm:$0xff] %v6263_v7  ;;  %v1997_v28 = vunpack.c.0.s8 %v1990_v37  ;;  %v1998_v33 = vunpack.c.1.s8 %v1990_v37  ;;  %v6272_v49 = vmul.f32 %v2078_v30, %v4989_v14  ;;  %v1506_v44 = vadd.f32 %v1490_v3, %v6053_v54  ;;  %2404 = vrot.lane.b32.xlu0 %v6182_v32, %s3401_s13  ;;  %v6282_v2 = vpop.permute.xlu1 %1885 }
 0x22d   :  { %8516 = vst [vmem:[#allocation19_spill] sm:$0xff] %v6267_v12  ;;  %8517 = vst [vmem:[#allocation62_spill] sm:$0xff] %v6269_v60  ;;  %v1492_v46 = vmul.f32 %v8520_v63, %v8519_v9  ;;  %v6278_v17 = vadd.f32 %v8521_v45, %v1504_v22  ;;  %v2064_v53 = vunpack.c.2.s8 %v6173_v8  ;;  %v6287_v7 = vsel %vm732_vm1, %v2340_v6, %v2341_v59  ;;  %v6297_v22 = vld [vmem:[#allocation4 + $0x228] sm:$0xff]  ;;  %v8526_v63 = vld [vmem:[#allocation190_spill] sm:$0xff] }
 0x22e   :  { %8518 = vst [vmem:[#allocation25_spill] sm:$0xff] %v6272_v49  ;;  %8522 = vst [vmem:[#allocation63_spill] sm:$0xff] %v6282_v2  ;;  %v6291_v54 = vsel %vm732_vm1, %v2341_v59, %v2342_v24  ;;  %v2343_v3 = vrot.slane %v5240_v57, 1  ;;  %v6295_v30 = vmul.f32 %v2079_v55, %v4964_v51  ;;  %v1509_v9 = vadd.f32 %v1493_v36, %v6073_v58  ;;  %v8527_v45 = vld [vmem:[#allocation216_spill] sm:$0xff]  ;;  %v8532_v36 = vld [vmem:[#allocation91_spill] sm:$0xff] }
 0x22f   :  { %8523 = vst [vmem:[#allocation137_spill] sm:$0xff] %v6287_v7  ;;  %8524 = vst [vmem:[#allocation64_spill] sm:$0xff] %v6291_v54  ;;  %v1495_v49 = vmul.f32 %v8527_v45, %v8526_v63  ;;  %v8528_v12 = vld [vmem:[#allocation92_spill] sm:$0xff]  ;;  %v6305_v6 = vpop.permute.xlu0 %1883  ;;  %2410 = vrot.lane.b32.xlu1 %v6231_v21, %s3401_s13  ;;  %v2065_v59 = vunpack.c.3.s8 %v6173_v8  ;;  %v6310_v2 = vcvt.s32.f32 %v1997_v28  ;;  %v6312_v51 = vcvt.s32.f32 %v1998_v33 }
 0x230   :  { %8525 = vst [vmem:[#allocation27_spill] sm:$0xff] %v6295_v30  ;;  %v6303_v60 = vadd.f32 %v8528_v12, %v1507_v10  ;;  %8529 = vst [vmem:[#allocation184_spill] sm:$0xff] %v6305_v6  ;;  %v1999_v55 = vunpack.c.2.s8 %v1990_v37  ;;  %v2000_v30 = vunpack.c.3.s8 %v1990_v37  ;;  %v1508_v58 = vadd.f32 %v1492_v46, %v6070_v25  ;;  %2408 = vrot.lane.b32.xlu0 %v6218_v1, %s3401_s13  ;;  %v6320_v10 = vpop.permute.xlu1 %1958  ;;  %v1991_v12 = vld [vmem:[#allocation4 + $0x210] sm:$0xff] }
 0x231   :  { %8530 = vst [vmem:[#allocation37_spill] sm:$0xff] %v6310_v2  ;;  %8531 = vst [vmem:[#allocation185_spill] sm:$0xff] %v6312_v51  ;;  %v6316_v63 = vadd.f32 %v8532_v36, %v1506_v44  ;;  %v2080_v45 = vcvt.s32.f32 %v2064_v53  ;;  %v2066_v8 = vunpack.c.0.s8 %v6297_v22  ;;  %v8534_v28 = vld [vmem:[#allocation72_spill] sm:$0xff]  ;;  %v8535_v2 = vld [vmem:[#allocation90_spill] sm:$0xff]  ;;  %v6327_v37 = vsel %vm732_vm1, %v2342_v24, %v2343_v3 }
 0x232   :  { %8533 = vst [vmem:[#allocation39_spill] sm:$0xff] %v6320_v10  ;;  %v1494_v33 = vmul.f32 %v8535_v2, %v8534_v28  ;;  %8536 = vst [vmem:[#allocation188_spill] sm:$0xff] %v6327_v37  ;;  %v8537_v25 = vrot.slane %v4989_v14, 1  ;;  %v2067_v46 = vunpack.c.1.s8 %v6297_v22  ;;  %v1511_v36 = vadd.f32 %v1495_v49, %v6080_v52  ;;  %v8539_v53 = vld [vmem:[#allocation194_spill] sm:$0xff]  ;;  %v8540_v51 = vld [vmem:[#allocation11_spill] sm:$0xff] }
 0x233   :  { %v1497_v10 = vmul.f32 %v8540_v51, %v8539_v53  ;;  %v8541_v6 = vld [vmem:[#allocation96_spill] sm:$0xff]  ;;  %v6342_v2 = vpop.permute.xlu0 %1956  ;;  %2414 = vrot.lane.b32.xlu1 %v6253_v13, %s3401_s13  ;;  %v2081_v14 = vcvt.s32.f32 %v2065_v59  ;;  %v6346_v24 = vcvt.s32.f32 %v1999_v55  ;;  %v6348_v18 = vcvt.s32.f32 %v2000_v30  ;;  %v8548_v30 = vld [vmem:[#allocation75_spill] sm:$0xff]  ;;  %v8549_v55 = vld [vmem:[#allocation93_spill] sm:$0xff] }
 0x234   :  { %v6333_v44 = vsel %vm732_vm1, %v2343_v3, %v8537_v25  ;;  %v6340_v1 = vadd.f32 %v8541_v6, %v1509_v9  ;;  %8542 = vst [vmem:[#allocation187_spill] sm:$0xff] %v6342_v2  ;;  %v2001_v3 = vunpack.c.0.s8 %v1991_v12  ;;  %v2002_v28 = vunpack.c.1.s8 %v1991_v12  ;;  %v8545_v25 = vld [vmem:[#allocation13_spill] sm:$0xff]  ;;  %2412 = vrot.lane.b32.xlu0 %v6249_v34, %s3401_s13  ;;  %v6355_v49 = vpop.permute.xlu1 %1962  ;;  %v8550_v2 = vld [vmem:[#allocation198_spill] sm:$0xff]  ;;  %v8551_v34 = vld [vmem:[#allocation15_spill] sm:$0xff] }
 0x235   :  { %8538 = vst [vmem:[#allocation147_spill] sm:$0xff] %v6333_v44  ;;  %8543 = vst [vmem:[#allocation33_spill] sm:$0xff] %v6346_v24  ;;  %v6351_v52 = vadd.f32 %v8545_v25, %v1508_v58  ;;  %v6358_v9 = vmul.f32 %v2080_v45, %v5025_v35  ;;  %v2082_v6 = vcvt.s32.f32 %v2066_v8  ;;  %v2068_v59 = vunpack.c.2.s8 %v6297_v22  ;;  %v2060_v25 = vld [vmem:[#allocation4 + $0x230] sm:$0xff] }
 0x236   :  { %8544 = vst [vmem:[#allocation189_spill] sm:$0xff] %v6348_v18  ;;  %8546 = vst [vmem:[#allocation31_spill] sm:$0xff] %v6355_v49  ;;  %v1510_v51 = vadd.f32 %v1494_v33, %v6096_v50  ;;  %v1496_v53 = vmul.f32 %v8549_v55, %v8548_v30  ;;  %v2083_v24 = vcvt.s32.f32 %v2067_v46  ;;  %v2069_v58 = vunpack.c.3.s8 %v6297_v22  ;;  %v8552_v13 = vld [vmem:[#allocation132_spill] sm:$0xff] }
 0x237   :  { %8547 = vst [vmem:[#allocation70_spill] sm:$0xff] %v6358_v9  ;;  %v1513_v18 = vadd.f32 %v1497_v10, %v6114_v15  ;;  %v1499_v49 = vmul.f32 %v8551_v34, %v8550_v2  ;;  %v6369_v35 = vadd.f32 %v8552_v13, %v1511_v36  ;;  %v6371_v45 = vpop.permute.xlu0 %1960  ;;  %2418 = vrot.lane.b32.xlu1 %v6291_v54, %s3401_s13  ;;  %v6378_v8 = vcvt.s32.f32 %v2001_v3  ;;  %v8556_v10 = vld [vmem:[#allocation199_spill] sm:$0xff]  ;;  %v8557_v46 = vld [vmem:[#allocation100_spill] sm:$0xff]  ;;  %v1992_v36 = vld [vmem:[#allocation4 + $0x218] sm:$0xff] }
 0x238   :  { %v6376_v50 = vmul.f32 %v2081_v14, %v5001_v26  ;;  %v6380_v22 = vcvt.s32.f32 %v2002_v28  ;;  %v2003_v33 = vunpack.c.2.s8 %v1991_v12  ;;  %v2004_v15 = vunpack.c.3.s8 %v1991_v12  ;;  %2416 = vrot.lane.b32.xlu0 %v6287_v7, %s3401_s13  ;;  %v6386_v13 = vpop.permute.xlu1 %1966  ;;  %v8559_v28 = vld [vmem:[#allocation98_spill] sm:$0xff] }
 0x239   :  { %8554 = vst [vmem:[#allocation71_spill] sm:$0xff] %v6378_v8  ;;  %v1498_v34 = vmul.f32 %v8557_v46, %v8556_v10  ;;  %v6389_v2 = vmul.f32 %v2082_v6, %v5067_v41  ;;  %v2084_v26 = vcvt.s32.f32 %v2068_v59  ;;  %v2070_v14 = vunpack.c.0.s8 %v2060_v25  ;;  %v8561_v46 = vld [vmem:[#allocation200_spill] sm:$0xff]  ;;  %v8562_v8 = vld [vmem:[#allocation17_spill] sm:$0xff]  ;;  %v8563_v9 = vld [vmem:[#allocation114_spill] sm:$0xff] }
 0x23a   :  { %8553 = vst [vmem:[#allocation150_spill] sm:$0xff] %v6376_v50  ;;  %8555 = vst [vmem:[#allocation43_spill] sm:$0xff] %v6380_v22  ;;  %v1512_v3 = vadd.f32 %v1496_v53, %v6131_v61  ;;  %v6393_v30 = vadd.f32 %v8559_v28, %v1510_v51  ;;  %v6396_v12 = vmul.f32 %v2083_v24, %v5045_v62  ;;  %v2085_v55 = vcvt.s32.f32 %v2069_v58  ;;  %v8569_v53 = vld [vmem:[#allocation202_spill] sm:$0xff]  ;;  %v8570_v58 = vld [vmem:[#allocation104_spill] sm:$0xff] }
 0x23b   :  { %8558 = vst [vmem:[#allocation191_spill] sm:$0xff] %v6389_v2  ;;  %v1515_v10 = vadd.f32 %v1499_v49, %v6152_v48  ;;  %v1501_v22 = vmul.f32 %v8562_v8, %v8561_v46  ;;  %v6402_v50 = vadd.f32 %v8563_v9, %v1513_v18  ;;  %v6404_v41 = vpop.permute.xlu0 %1964  ;;  %2422 = vrot.lane.b32.xlu1 %v6333_v44, %s3401_s13  ;;  %v2071_v61 = vunpack.c.1.s8 %v2060_v25 }
 0x23c   :  { %8560 = vst [vmem:[#allocation152_spill] sm:$0xff] %v6396_v12  ;;  %8564 = vst [vmem:[#allocation193_spill] sm:$0xff] %v6404_v41  ;;  %v6408_v6 = vcvt.s32.f32 %v2003_v33  ;;  %v6410_v59 = vcvt.s32.f32 %v2004_v15  ;;  %v2005_v62 = vunpack.c.0.s8 %v1992_v36  ;;  %v2006_v24 = vunpack.c.1.s8 %v1992_v36  ;;  %2420 = vrot.lane.b32.xlu0 %v6327_v37, %s3401_s13  ;;  %v6415_v49 = vpop.permute.xlu1 %1970  ;;  %v8571_v33 = vld [vmem:[#allocation106_spill] sm:$0xff] }
 0x23d   :  { %v1514_v48 = vadd.f32 %v1498_v34, %v6163_v27  ;;  %8567 = vst [vmem:[#allocation20_spill] sm:$0xff] %v6415_v49  ;;  %v6418_v18 = vmul.f32 %v2084_v26, %v5103_v56  ;;  %v2086_v9 = vcvt.s32.f32 %v2070_v14  ;;  %v2072_v51 = vunpack.c.2.s8 %v2060_v25  ;;  %v2061_v34 = vld [vmem:[#allocation4 + $0x238] sm:$0xff] }
 0x23e   :  { %8565 = vst [vmem:[#allocation14_spill] sm:$0xff] %v6408_v6  ;;  %8566 = vst [vmem:[#allocation73_spill] sm:$0xff] %v6410_v59  ;;  %v1500_v8 = vmul.f32 %v8570_v58, %v8569_v53  ;;  %v6423_v15 = vadd.f32 %v8571_v33, %v1512_v3  ;;  %v6426_v28 = vmul.f32 %v2085_v55, %v5079_v11  ;;  %v2073_v27 = vunpack.c.3.s8 %v2060_v25  ;;  %v8573_v6 = vld [vmem:[#allocation118_spill] sm:$0xff]  ;;  %v8575_v53 = vld [vmem:[#allocation203_spill] sm:$0xff] }
 0x23f   :  { %8568 = vst [vmem:[#allocation195_spill] sm:$0xff] %v6418_v18  ;;  %v1517_v46 = vadd.f32 %v1501_v22, %v6176_v39  ;;  %v6430_v59 = vadd.f32 %v8573_v6, %v1515_v10  ;;  %v6432_v56 = vpop.permute.xlu0 %1968  ;;  %2495 = vrot.lane.b32.xlu1 %v6102_v0, %s3402_s9  ;;  %v2007_v26 = vunpack.c.2.s8 %v1992_v36  ;;  %v2087_v14 = vcvt.s32.f32 %v2071_v61  ;;  %v8576_v3 = vld [vmem:[#allocation112_spill] sm:$0xff]  ;;  %v2159_v10 = vld [vmem:[#allocation4 + $0x240] sm:$0xff]  ;;  %v2162_v49 = vld [vmem:[#allocation4 + $0x258] sm:$0xff] }
 0x240   :  { %8572 = vst [vmem:[#allocation160_spill] sm:$0xff] %v6426_v28  ;;  %8574 = vst [vmem:[#allocation74_spill] sm:$0xff] %v6432_v56  ;;  %v1503_v58 = vmul.f32 %v8576_v3, %v8575_v53  ;;  %v6438_v33 = vcvt.s32.f32 %v2005_v62  ;;  %v6440_v11 = vcvt.s32.f32 %v2006_v24  ;;  %v2008_v25 = vunpack.c.3.s8 %v1992_v36  ;;  %v8579_v55 = vld [vmem:[#allocation116_spill] sm:$0xff]  ;;  %2493 = vrot.lane.b32.xlu0 %v6092_v31, %s3402_s9  ;;  %v6447_v22 = vpop.permute.xlu1 %1974 }
 0x241   :  { %v6443_v39 = vadd.f32 %v8579_v55, %v1514_v48  ;;  %8580 = vst [vmem:[#allocation159_spill] sm:$0xff] %v6447_v22  ;;  %v6450_v6 = vmul.f32 %v2086_v9, %v5145_v16  ;;  %v2088_v61 = vcvt.s32.f32 %v2072_v51  ;;  %v2074_v18 = vunpack.c.0.s8 %v2061_v34  ;;  %v8582_v53 = vld [vmem:[#allocation204_spill] sm:$0xff]  ;;  %v8584_v48 = vld [vmem:[#allocation139_spill] sm:$0xff] }
 0x242   :  { %8577 = vst [vmem:[#allocation51_spill] sm:$0xff] %v6438_v33  ;;  %8578 = vst [vmem:[#allocation196_spill] sm:$0xff] %v6440_v11  ;;  %v1516_v62 = vadd.f32 %v1500_v8, %v6186_v5  ;;  %v8583_v24 = vld [vmem:[#allocation108_spill] sm:$0xff]  ;;  %v2089_v36 = vcvt.s32.f32 %v2073_v27  ;;  %v2075_v33 = vunpack.c.1.s8 %v2061_v34  ;;  %v6456_v55 = vadd.f32 %v8584_v48, %v1517_v46  ;;  %v8588_v46 = vld [vmem:[#allocation122_spill] sm:$0xff] }
 0x243   :  { %8581 = vst [vmem:[#allocation76_spill] sm:$0xff] %v6450_v6  ;;  %v1502_v3 = vmul.f32 %v8583_v24, %v8582_v53  ;;  %v6458_v11 = vpop.permute.xlu0 %1972  ;;  %2499 = vrot.lane.b32.xlu1 %v6137_v47, %s3402_s9  ;;  %v6462_v28 = vcvt.s32.f32 %v2007_v26  ;;  %v6465_v16 = vmul.f32 %v2087_v14, %v5123_v4  ;;  %v2076_v9 = vunpack.c.2.s8 %v2061_v34  ;;  %v8587_v53 = vld [vmem:[#allocation83_spill] sm:$0xff] }
 0x244   :  { %8585 = vst [vmem:[#allocation35_spill] sm:$0xff] %v6458_v11  ;;  %v1519_v5 = vadd.f32 %v1503_v58, %v6214_v29  ;;  %v6468_v51 = vcvt.s32.f32 %v2008_v25  ;;  %v2163_v8 = vunpack.c.0.s8 %v2159_v10  ;;  %v2077_v27 = vunpack.c.3.s8 %v2061_v34  ;;  %2497 = vrot.lane.b32.xlu0 %v6128_v40, %s3402_s9  ;;  %v6474_v48 = vpop.permute.xlu1 %1978  ;;  %v8591_v29 = vld [vmem:[#allocation124_spill] sm:$0xff]  ;;  %v8625_v22 = vld [vmem:[#allocation95_spill] sm:$0xff] }
 0x245   :  { %8586 = vst [vmem:[#allocation53_spill] sm:$0xff] %v6465_v16  ;;  %v1659_v24 = vmul.f32 %v8588_v46, %v8587_v53  ;;  %8589 = vst [vmem:[#allocation77_spill] sm:$0xff] %v6474_v48  ;;  %v2164_v26 = vunpack.c.1.s8 %v2159_v10  ;;  %v6477_v6 = vmul.f32 %v2088_v61, %v5181_v23  ;;  %v2090_v4 = vcvt.s32.f32 %v2074_v18  ;;  %v8593_v53 = vld [vmem:[#allocation84_spill] sm:$0xff]  ;;  %v8594_v46 = vld [vmem:[#allocation138_spill] sm:$0xff] }
 0x246   :  { %v1518_v14 = vadd.f32 %v1502_v3, %v6234_v38  ;;  %v6481_v58 = vadd.f32 %v8591_v29, %v1516_v62  ;;  %v6484_v34 = vmul.f32 %v2089_v36, %v5157_v19  ;;  %v2091_v25 = vcvt.s32.f32 %v2075_v33  ;;  %v8596_v48 = vld [vmem:[#allocation192_spill] sm:$0xff]  ;;  %v2160_v18 = vld [vmem:[#allocation4 + $0x248] sm:$0xff]  ;;  %v8597_v38 = vld [vmem:[#allocation85_spill] sm:$0xff] }
 0x247   :  { %8590 = vst [vmem:[#allocation23_spill] sm:$0xff] %v6477_v6  ;;  %v1658_v16 = vmul.f32 %v8594_v46, %v8593_v53  ;;  %v6488_v2 = vpop.permute.xlu0 %1976  ;;  %2503 = vrot.lane.b32.xlu1 %v8596_v48, %s3402_s9  ;;  %v2165_v23 = vunpack.c.2.s8 %v2159_v10  ;;  %v2166_v61 = vunpack.c.3.s8 %v2159_v10  ;;  %v2092_v6 = vcvt.s32.f32 %v2076_v9  ;;  %v8598_v3 = vld [vmem:[#allocation142_spill] sm:$0xff]  ;;  %v8599_v29 = vld [vmem:[#allocation29_spill] sm:$0xff]  ;;  %v8600_v53 = vld [vmem:[#allocation87_spill] sm:$0xff] }
 0x248   :  { %8592 = vst [vmem:[#allocation167_spill] sm:$0xff] %v6484_v34  ;;  %8595 = vst [vmem:[#allocation78_spill] sm:$0xff] %v6488_v2  ;;  %v1661_v62 = vmul.f32 %v8598_v3, %v8597_v38  ;;  %v6495_v11 = vadd.f32 %v8599_v29, %v1519_v5  ;;  %v6497_v19 = vcvt.s32.f32 %v2163_v8  ;;  %v2093_v33 = vcvt.s32.f32 %v2077_v27  ;;  %v8601_v46 = vld [vmem:[#allocation145_spill] sm:$0xff]  ;;  %2501 = vrot.lane.b32.xlu0 %v6156_v43, %s3402_s9  ;;  %v6506_v10 = vpop.permute.xlu1 %1982  ;;  %v8605_v5 = vld [vmem:[#allocation94_spill] sm:$0xff] }
 0x249   :  { %v6500_v36 = vadd.f32 %v1659_v24, %v6261_v20  ;;  %v1660_v34 = vmul.f32 %v8601_v46, %v8600_v53  ;;  %8602 = vst [vmem:[#allocation30_spill] sm:$0xff] %v6506_v10  ;;  %v6508_v9 = vcvt.s32.f32 %v2164_v26  ;;  %v8603_v38 = vld [vmem:[#allocation65_spill] sm:$0xff]  ;;  %v6514_v8 = vadd.f32 %v8605_v5, %v1518_v14  ;;  %v8606_v20 = vld [vmem:[#allocation182_spill] sm:$0xff]  ;;  %v8611_v14 = vld [vmem:[#allocation68_spill] sm:$0xff] }
 0x24a   :  { %v6511_v3 = vmul.f32 %v2090_v4, %v8603_v38  ;;  %v2167_v27 = vunpack.c.0.s8 %v2160_v18  ;;  %v2168_v29 = vunpack.c.1.s8 %v2160_v18  ;;  %v6517_v24 = vmul.f32 %v2091_v25, %v8606_v20  ;;  %v2161_v38 = vld [vmem:[#allocation4 + $0x250] sm:$0xff]  ;;  %v8613_v25 = vld [vmem:[#allocation214_spill] sm:$0xff]  ;;  %v8614_v20 = vld [vmem:[#allocation127_spill] sm:$0xff] }
 0x24b   :  { %v6520_v53 = vadd.f32 %v1658_v16, %v6278_v17  ;;  %v6522_v46 = vpop.permute.xlu0 %1980  ;;  %2507 = vrot.lane.b32.xlu1 %v6196_v42, %s3402_s9  ;;  %v6526_v26 = vcvt.s32.f32 %v2165_v23  ;;  %v6528_v4 = vcvt.s32.f32 %v2166_v61  ;;  %v6531_v5 = vmul.f32 %v2092_v6, %v8611_v14  ;;  %v8615_v16 = vld [vmem:[#allocation88_spill] sm:$0xff]  ;;  %v8617_v61 = vld [vmem:[#allocation215_spill] sm:$0xff]  ;;  %v8619_v14 = vld [vmem:[#allocation129_spill] sm:$0xff] }
 0x24c   :  { %8604 = vst [vmem:[#allocation10_spill] sm:$0xff] %v6511_v3  ;;  %8607 = vst [vmem:[#allocation168_spill] sm:$0xff] %v6517_v24  ;;  %v6534_v3 = vadd.f32 %v1661_v62, %v6303_v60  ;;  %v1662_v17 = vmul.f32 %v8614_v20, %v8613_v25  ;;  %v8616_v24 = vld [vmem:[#allocation41_spill] sm:$0xff]  ;;  %v6541_v10 = vmul.f32 %v2093_v33, %v5240_v57  ;;  %v8618_v2 = vld [vmem:[#allocation143_spill] sm:$0xff]  ;;  %2505 = vrot.lane.b32.xlu0 %v6182_v32, %s3402_s9  ;;  %v6550_v60 = vpop.permute.xlu1 %1986 }
 0x24d   :  { %8608 = vst [vmem:[#allocation79_spill] sm:$0xff] %v6522_v46  ;;  %8609 = vst [vmem:[#allocation34_spill] sm:$0xff] %v6526_v26  ;;  %v1663_v46 = vmul.f32 %v8616_v24, %v8615_v16  ;;  %v6544_v23 = vadd.f32 %v1660_v34, %v6316_v63  ;;  %v1665_v12 = vmul.f32 %v8618_v2, %v8617_v61  ;;  %v2169_v6 = vunpack.c.2.s8 %v2160_v18  ;;  %v8620_v25 = vld [vmem:[#allocation128_spill] sm:$0xff]  ;;  %v8623_v63 = vld [vmem:[#allocation130_spill] sm:$0xff] }
 0x24e   :  { %8610 = vst [vmem:[#allocation57_spill] sm:$0xff] %v6528_v4  ;;  %8612 = vst [vmem:[#allocation80_spill] sm:$0xff] %v6531_v5  ;;  %v2170_v62 = vunpack.c.3.s8 %v2160_v18  ;;  %v1664_v20 = vmul.f32 %v8620_v25, %v8619_v14  ;;  %v6554_v24 = vcvt.s32.f32 %v2167_v27  ;;  %v6556_v57 = vcvt.s32.f32 %v2168_v29  ;;  %v8624_v34 = vld [vmem:[#allocation99_spill] sm:$0xff]  ;;  %v8626_v2 = vld [vmem:[#allocation97_spill] sm:$0xff] }
 0x24f   :  { %v2171_v33 = vunpack.c.0.s8 %v2161_v38  ;;  %v1666_v16 = vmul.f32 %v8624_v34, %v8623_v63  ;;  %v1667_v61 = vmul.f32 %v8626_v2, %v8625_v22  ;;  %v6562_v56 = vpop.permute.xlu0 %1984  ;;  %2511 = vrot.lane.b32.xlu1 %v6231_v21, %s3402_s9  ;;  %v2172_v18 = vunpack.c.1.s8 %v2161_v38  ;;  %v8627_v14 = vld [vmem:[#allocation102_spill] sm:$0xff]  ;;  %v8628_v25 = vld [vmem:[#allocation47_spill] sm:$0xff]  ;;  %v8631_v4 = vld [vmem:[#allocation212_spill] sm:$0xff] }
 0x250   :  { %8621 = vst [vmem:[#allocation175_spill] sm:$0xff] %v6554_v24  ;;  %8622 = vst [vmem:[#allocation176_spill] sm:$0xff] %v6556_v57  ;;  %v2173_v26 = vunpack.c.2.s8 %v2161_v38  ;;  %v6567_v27 = vadd.f32 %v1662_v17, %v6351_v52  ;;  %v6570_v29 = vadd.f32 %v1663_v46, %v6340_v1  ;;  %v1669_v63 = vmul.f32 %v8628_v25, %v8627_v14  ;;  %v8629_v2 = vld [vmem:[#allocation134_spill] sm:$0xff]  ;;  %v8630_v24 = vld [vmem:[#allocation133_spill] sm:$0xff]  ;;  %v6581_v41 = vpop.permute.xlu1 %2128 }
 0x251   :  { %v2174_v34 = vunpack.c.3.s8 %v2161_v38  ;;  %v6575_v22 = vadd.f32 %v1665_v12, %v6369_v35  ;;  %v1668_v57 = vmul.f32 %v8630_v24, %v8629_v2  ;;  %2509 = vrot.lane.b32.xlu0 %v8631_v4, %s3402_s9  ;;  %v6583_v52 = vcvt.s32.f32 %v2169_v6  ;;  %v8635_v6 = vld [vmem:[#allocation136_spill] sm:$0xff]  ;;  %v8639_v2 = vld [vmem:[#allocation45_spill] sm:$0xff] }
 0x252   :  { %v6585_v17 = vcvt.s32.f32 %v2170_v62  ;;  %v6588_v1 = vadd.f32 %v1664_v20, %v6393_v30  ;;  %v6590_v46 = vcvt.s32.f32 %v2171_v33  ;;  %v2175_v38 = vunpack.c.0.s8 %v2162_v49  ;;  %v2260_v30 = vld [vmem:[#allocation4 + $0x260] sm:$0xff]  ;;  %v8638_v33 = vld [vmem:[#allocation135_spill] sm:$0xff] }
 0x253   :  { %8632 = vst [vmem:[#allocation81_spill] sm:$0xff] %v6583_v52  ;;  %v2176_v35 = vunpack.c.1.s8 %v2162_v49  ;;  %v6593_v12 = vadd.f32 %v1666_v16, %v6423_v15  ;;  %v6596_v24 = vadd.f32 %v1667_v61, %v6402_v50  ;;  %v6598_v14 = vpop.permute.xlu0 %2126  ;;  %2515 = vrot.lane.b32.xlu1 %v8635_v6, %s3402_s9  ;;  %v6602_v62 = vcvt.s32.f32 %v2172_v18  ;;  %v8640_v16 = vld [vmem:[#allocation21_spill] sm:$0xff]  ;;  %v8644_v18 = vld [vmem:[#allocation154_spill] sm:$0xff]  ;;  %v8647_v6 = vld [vmem:[#allocation120_spill] sm:$0xff] }
 0x254   :  { %8633 = vst [vmem:[#allocation44_spill] sm:$0xff] %v6585_v17  ;;  %8634 = vst [vmem:[#allocation205_spill] sm:$0xff] %v6590_v46  ;;  %v6604_v25 = vcvt.s32.f32 %v2173_v26  ;;  %v6607_v20 = vadd.f32 %v1669_v63, %v6430_v59  ;;  %v1670_v15 = vmul.f32 %v8639_v2, %v8638_v33  ;;  %v8641_v46 = vld [vmem:[#allocation46_spill] sm:$0xff]  ;;  %v6613_v61 = vcvt.s32.f32 %v2174_v34  ;;  %v8648_v33 = vld [vmem:[#allocation144_spill] sm:$0xff] }
 0x255   :  { %8636 = vst [vmem:[#allocation179_spill] sm:$0xff] %v6602_v62  ;;  %v1671_v50 = vmul.f32 %v8641_v46, %v8640_v16  ;;  %v6616_v52 = vadd.f32 %v1668_v57, %v6443_v39  ;;  %v8643_v17 = vld [vmem:[#allocation110_spill] sm:$0xff]  ;;  %v2177_v59 = vunpack.c.2.s8 %v2162_v49  ;;  %v2178_v63 = vunpack.c.3.s8 %v2162_v49  ;;  %v8651_v39 = vld [vmem:[#allocation141_spill] sm:$0xff]  ;;  %v8652_v57 = vld [vmem:[#allocation155_spill] sm:$0xff] }
 0x256   :  { %8637 = vst [vmem:[#allocation208_spill] sm:$0xff] %v6604_v25  ;;  %8642 = vst [vmem:[#allocation60_spill] sm:$0xff] %v6613_v61  ;;  %v1673_v62 = vmul.f32 %v8644_v18, %v8643_v17  ;;  %v8645_v26 = vld [vmem:[#allocation178_spill] sm:$0xff]  ;;  %v6622_v25 = vpop.permute.xlu1 %2132  ;;  %v1672_v2 = vmul.f32 %v8648_v33, %v8647_v6  ;;  %v6626_v4 = vcvt.s32.f32 %v2175_v38  ;;  %v6628_v34 = vcvt.s32.f32 %v2176_v35  ;;  %v8653_v61 = vld [vmem:[#allocation125_spill] sm:$0xff] }
 0x257   :  { %2513 = vrot.lane.b32.xlu0 %v8645_v26, %s3402_s9  ;;  %8646 = vst [vmem:[#allocation82_spill] sm:$0xff] %v6622_v25  ;;  %v2264_v46 = vunpack.c.0.s8 %v2260_v30  ;;  %v1759_v16 = vmul.f32 %v8652_v57, %v8651_v39  ;;  %v8654_v17 = vld [vmem:[#allocation157_spill] sm:$0xff]  ;;  %v6634_v5 = vpop.permute.xlu0 %2130  ;;  %2519 = vrot.lane.b32.xlu1 %v6291_v54, %s3402_s9  ;;  %v2265_v49 = vunpack.c.1.s8 %v2260_v30  ;;  %v2266_v26 = vunpack.c.2.s8 %v2260_v30  ;;  %v2261_v25 = vld [vmem:[#allocation4 + $0x268] sm:$0xff]  ;;  %v8655_v6 = vld [vmem:[#allocation126_spill] sm:$0xff] }
 0x258   :  { %8649 = vst [vmem:[#allocation180_spill] sm:$0xff] %v6626_v4  ;;  %8650 = vst [vmem:[#allocation207_spill] sm:$0xff] %v6628_v34  ;;  %v1760_v18 = vmul.f32 %v8654_v17, %v8653_v61  ;;  %v6639_v38 = vadd.f32 %v1670_v15, %v6481_v58  ;;  %v6642_v35 = vadd.f32 %v1671_v50, %v6456_v55  ;;  %v8656_v33 = vld [vmem:[#allocation146_spill] sm:$0xff]  ;;  %v2267_v57 = vunpack.c.3.s8 %v2260_v30  ;;  %v8657_v17 = vld [vmem:[#allocation149_spill] sm:$0xff] }
 0x259   :  { %v1762_v39 = vmul.f32 %v8656_v33, %v8655_v6  ;;  %v6647_v61 = vadd.f32 %v1673_v62, %v6495_v11  ;;  %v8658_v4 = vld [vmem:[#allocation107_spill] sm:$0xff]  ;;  %v6655_v58 = vcvt.s32.f32 %v2177_v59  ;;  %v6657_v15 = vcvt.s32.f32 %v2178_v63  ;;  %v8664_v33 = vld [vmem:[#allocation24_spill] sm:$0xff] }
 0x25a   :  { %v1761_v34 = vmul.f32 %v8658_v4, %v8657_v17  ;;  %v6653_v54 = vpop.permute.xlu1 %2136  ;;  %v1688_v55 = vadd.f32 %v1672_v2, %v6514_v8  ;;  %v6660_v50 = vcvt.s32.f32 %v2264_v46  ;;  %v2268_v30 = vunpack.c.0.s8 %v2261_v25  ;;  %v2262_v8 = vld [vmem:[#allocation4 + $0x270] sm:$0xff]  ;;  %v8666_v17 = vld [vmem:[#allocation151_spill] sm:$0xff] }
 0x25b   :  { %2517 = vrot.lane.b32.xlu0 %v6287_v7, %s3402_s9  ;;  %8659 = vst [vmem:[#allocation183_spill] sm:$0xff] %v6653_v54  ;;  %v2269_v6 = vunpack.c.1.s8 %v2261_v25  ;;  %v6663_v11 = vadd.f32 %v1759_v16, %v6520_v53  ;;  %v6666_v4 = vadd.f32 %v1760_v18, %v6500_v36  ;;  %v6668_v62 = vpop.permute.xlu0 %2134  ;;  %2523 = vrot.lane.b32.xlu1 %v6333_v44, %s3402_s9  ;;  %v6672_v59 = vcvt.s32.f32 %v2265_v49  ;;  %v8663_v46 = vld [vmem:[#allocation16_spill] sm:$0xff]  ;;  %v8669_v49 = vld [vmem:[#allocation49_spill] sm:$0xff] }
 0x25c   :  { %8660 = vst [vmem:[#allocation86_spill] sm:$0xff] %v6660_v50  ;;  %8661 = vst [vmem:[#allocation66_spill] sm:$0xff] %v6668_v62  ;;  %v6674_v63 = vcvt.s32.f32 %v2266_v26  ;;  %v6677_v2 = vadd.f32 %v1762_v39, %v6534_v3  ;;  %v1763_v53 = vmul.f32 %v8664_v33, %v8663_v46  ;;  %v8665_v16 = vld [vmem:[#allocation148_spill] sm:$0xff]  ;;  %v6683_v18 = vcvt.s32.f32 %v2267_v57  ;;  %v8672_v46 = vld [vmem:[#allocation153_spill] sm:$0xff] }
 0x25d   :  { %v1764_v36 = vmul.f32 %v8666_v17, %v8665_v16  ;;  %v6686_v7 = vadd.f32 %v1761_v34, %v6544_v23  ;;  %v8668_v44 = vld [vmem:[#allocation140_spill] sm:$0xff]  ;;  %v2270_v3 = vunpack.c.2.s8 %v2261_v25  ;;  %v2271_v39 = vunpack.c.3.s8 %v2261_v25  ;;  %v8675_v23 = vld [vmem:[#allocation105_spill] sm:$0xff]  ;;  %v8676_v34 = vld [vmem:[#allocation111_spill] sm:$0xff] }
 0x25e   :  { %8662 = vst [vmem:[#allocation209_spill] sm:$0xff] %v6674_v63  ;;  %8667 = vst [vmem:[#allocation67_spill] sm:$0xff] %v6683_v18  ;;  %v1766_v62 = vmul.f32 %v8669_v49, %v8668_v44  ;;  %v6692_v26 = vpop.permute.xlu1 %2140  ;;  %v8671_v63 = vld [vmem:[#allocation103_spill] sm:$0xff]  ;;  %v6696_v54 = vcvt.s32.f32 %v2268_v30  ;;  %v6698_v57 = vcvt.s32.f32 %v2269_v6  ;;  %v2272_v16 = vunpack.c.0.s8 %v2262_v8  ;;  %v8677_v18 = vld [vmem:[#allocation101_spill] sm:$0xff] }
 0x25f   :  { %2521 = vrot.lane.b32.xlu0 %v6327_v37, %s3402_s9  ;;  %8670 = vst [vmem:[#allocation213_spill] sm:$0xff] %v6692_v26  ;;  %v1765_v33 = vmul.f32 %v8672_v46, %v8671_v63  ;;  %v1767_v17 = vmul.f32 %v8676_v34, %v8675_v23  ;;  %v8678_v44 = vld [vmem:[#allocation109_spill] sm:$0xff]  ;;  %v6704_v50 = vpop.permute.xlu0 %2138  ;;  %2665 = vrot.lane.b32.xlu1 %v6102_v0, %s3403_s10  ;;  %v2273_v25 = vunpack.c.1.s8 %v2262_v8  ;;  %v2274_v37 = vunpack.c.2.s8 %v2262_v8  ;;  %v8680_v6 = vld [vmem:[#allocation48_spill] sm:$0xff]  ;;  %v8681_v46 = vld [vmem:[#allocation22_spill] sm:$0xff] }
 0x260   :  { %8673 = vst [vmem:[#allocation211_spill] sm:$0xff] %v6696_v54  ;;  %8674 = vst [vmem:[#allocation69_spill] sm:$0xff] %v6698_v57  ;;  %v1768_v49 = vmul.f32 %v8678_v44, %v8677_v18  ;;  %v1779_v63 = vadd.f32 %v1763_v53, %v6567_v27  ;;  %v1780_v30 = vadd.f32 %v1764_v36, %v6570_v29  ;;  %v2275_v57 = vunpack.c.3.s8 %v2262_v8  ;;  %v8682_v34 = vld [vmem:[#allocation18_spill] sm:$0xff]  ;;  %v6723_v27 = vld [vmem:[#allocation4 + $0x278] sm:$0xff] }
 0x261   :  { %8679 = vst [vmem:[#allocation89_spill] sm:$0xff] %v6704_v50  ;;  %v1770_v54 = vmul.f32 %v8681_v46, %v8680_v6  ;;  %v1782_v23 = vadd.f32 %v1766_v62, %v6575_v22  ;;  %v8683_v26 = vld [vmem:[#allocation26_spill] sm:$0xff]  ;;  %v6719_v0 = vcvt.s32.f32 %v2270_v3  ;;  %v6721_v50 = vcvt.s32.f32 %v2271_v39  ;;  %8684 = vst [vmem:[#allocation210_spill] sm:$0xff] %v6723_v27  ;;  %v8685_v53 = vld [vmem:[#allocation52_spill] sm:$0xff] }
 0x262   :  { %v1769_v18 = vmul.f32 %v8683_v26, %v8682_v34  ;;  %v6717_v44 = vpop.permute.xlu1 %2144  ;;  %v1781_v29 = vadd.f32 %v1765_v33, %v6588_v1  ;;  %v8686_v8 = vld [vmem:[#allocation113_spill] sm:$0xff]  ;;  %v8687_v22 = vld [vmem:[#allocation158_spill] sm:$0xff]  ;;  %v6730_v26 = vcvt.s32.f32 %v2272_v16  ;;  %v6733_v46 = vadd.f32 %v1767_v17, %v6593_v12  ;;  %v8692_v16 = vld [vmem:[#allocation63_spill] sm:$0xff] }
 0x263   :  { %2663 = vrot.lane.b32.xlu0 %v6092_v31, %s3403_s10  ;;  %v1773_v36 = vmul.f32 %v8686_v8, %v8685_v53  ;;  %v8688_v62 = vld [vmem:[#allocation162_spill] sm:$0xff]  ;;  %v6736_v3 = vadd.f32 %v1768_v49, %v6596_v24  ;;  %v6738_v39 = vpop.permute.xlu0 %2142  ;;  %2669 = vrot.lane.b32.xlu1 %v6137_v47, %s3403_s10  ;;  %v6742_v1 = vcvt.s32.f32 %v2273_v25  ;;  %v6744_v33 = vcvt.s32.f32 %v2274_v37  ;;  %v8695_v49 = vld [vmem:[#allocation156_spill] sm:$0xff]  ;;  %v8709_v27 = vld [vmem:[#allocation163_spill] sm:$0xff] }
 0x264   :  { %v1774_v6 = vmul.f32 %v8688_v62, %v8687_v22  ;;  %8689 = vst [vmem:[#allocation190_spill] sm:$0xff] %v6730_v26  ;;  %v6747_v34 = vadd.f32 %v1770_v54, %v6607_v20  ;;  %v8693_v53 = vld [vmem:[#allocation174_spill] sm:$0xff]  ;;  %v6751_v12 = vcvt.s32.f32 %v2275_v57  ;;  %v6755_v17 = vadd.f32 %v1769_v18, %v6616_v52  ;;  %v8696_v22 = vld [vmem:[#allocation161_spill] sm:$0xff]  ;;  %v8698_v26 = vld [vmem:[#allocation115_spill] sm:$0xff] }
 0x265   :  { %8690 = vst [vmem:[#allocation216_spill] sm:$0xff] %v6742_v1  ;;  %8691 = vst [vmem:[#allocation92_spill] sm:$0xff] %v6744_v33  ;;  %v1939_v8 = vmul.f32 %v8693_v53, %v8692_v16  ;;  %v1771_v62 = vmul.f32 %v8696_v22, %v8695_v49  ;;  %v8697_v25 = vld [vmem:[#allocation50_spill] sm:$0xff]  ;;  %v8699_v33 = vld [vmem:[#allocation55_spill] sm:$0xff]  ;;  %v1789_v57 = vadd.f32 %v1773_v36, %v1688_v55 }
 0x266   :  { %8694 = vst [vmem:[#allocation91_spill] sm:$0xff] %v6751_v12  ;;  %v1772_v37 = vmul.f32 %v8698_v26, %v8697_v25  ;;  %v8700_v47 = vld [vmem:[#allocation32_spill] sm:$0xff]  ;;  %v6765_v20 = vpop.permute.xlu1 %2148  ;;  %v1790_v16 = vadd.f32 %v1774_v6, %v6647_v61  ;;  %v8703_v52 = vld [vmem:[#allocation59_spill] sm:$0xff]  ;;  %v2040_v49 = vmul.f32 %v6468_v51, %v6550_v60  ;;  %v8705_v24 = vld [vmem:[#allocation54_spill] sm:$0xff] }
 0x267   :  { %v1925_v54 = vmul.f32 %v8700_v47, %v8699_v33  ;;  %2667 = vrot.lane.b32.xlu0 %v6128_v40, %s3403_s10  ;;  %8701 = vst [vmem:[#allocation72_spill] sm:$0xff] %v6765_v20  ;;  %v8702_v53 = vld [vmem:[#allocation184_spill] sm:$0xff]  ;;  %v8704_v22 = vld [vmem:[#allocation119_spill] sm:$0xff]  ;;  %v8707_v12 = vld [vmem:[#allocation117_spill] sm:$0xff]  ;;  %v6780_v36 = vpop.permute.xlu0 %2146  ;;  %2673 = vrot.lane.b32.xlu1 %v8596_v48, %s3403_s10 }
 0x268   :  { %v1938_v18 = vmul.f32 %v8703_v52, %v8702_v53  ;;  %v1924_v26 = vmul.f32 %v8705_v24, %v8704_v22  ;;  %v8706_v25 = vld [vmem:[#allocation123_spill] sm:$0xff]  ;;  %v8708_v33 = vld [vmem:[#allocation28_spill] sm:$0xff]  ;;  %8712 = vst [vmem:[#allocation90_spill] sm:$0xff] %v6780_v36  ;;  %v8714_v6 = vld [vmem:[#allocation166_spill] sm:$0xff]  ;;  %v1955_v52 = vadd.f32 %v1939_v8, %v1790_v16  ;;  %v6803_v8 = vadd.f32 %v1771_v62, %v6639_v38 }
 0x269   :  { %v1926_v47 = vmul.f32 %v8707_v12, %v8706_v25  ;;  %v1927_v40 = vmul.f32 %v8709_v27, %v8708_v33  ;;  %v8710_v1 = vld [vmem:[#allocation39_spill] sm:$0xff]  ;;  %v8713_v61 = vld [vmem:[#allocation172_spill] sm:$0xff]  ;;  %v8715_v60 = vld [vmem:[#allocation169_spill] sm:$0xff]  ;;  %v2039_v12 = vmul.f32 %v6462_v28, %v6562_v56  ;;  %v6791_v27 = vadd.f32 %v1772_v37, %v6642_v35 }
 0x26a   :  { %v8711_v20 = vld [vmem:[#allocation131_spill] sm:$0xff]  ;;  %v1928_v51 = vmul.f32 %v8714_v6, %v8713_v61  ;;  %v8716_v53 = vld [vmem:[#allocation165_spill] sm:$0xff]  ;;  %v8720_v48 = vld [vmem:[#allocation12_spill] sm:$0xff]  ;;  %v6800_v61 = vpop.permute.xlu1 %2152  ;;  %v1954_v37 = vadd.f32 %v1938_v18, %v1789_v57  ;;  %v2056_v16 = vadd.f32 %v2040_v49, %v1955_v52 }
 0x26b   :  { %v2026_v55 = vmul.f32 %v8711_v20, %v8710_v1  ;;  %v1929_v24 = vmul.f32 %v8716_v53, %v8715_v60  ;;  %v1941_v1 = vadd.f32 %v1925_v54, %v6666_v4  ;;  %v8717_v20 = vld [vmem:[#allocation173_spill] sm:$0xff]  ;;  %v8719_v33 = vld [vmem:[#allocation187_spill] sm:$0xff]  ;;  %2671 = vrot.lane.b32.xlu0 %v6156_v43, %s3403_s10  ;;  %v8721_v28 = vld [vmem:[#allocation170_spill] sm:$0xff]  ;;  %v1940_v4 = vadd.f32 %v1924_v26, %v6663_v11 }
 0x26c   :  { %v8718_v22 = vld [vmem:[#allocation177_spill] sm:$0xff]  ;;  %v2025_v36 = vmul.f32 %v8720_v48, %v8719_v33  ;;  %v8722_v56 = vld [vmem:[#allocation164_spill] sm:$0xff]  ;;  %v1943_v54 = vadd.f32 %v1927_v40, %v6677_v2  ;;  %v8723_v60 = vld [vmem:[#allocation31_spill] sm:$0xff]  ;;  %2677 = vrot.lane.b32.xlu1 %v6196_v42, %s3403_s10  ;;  %v1942_v38 = vadd.f32 %v1926_v47, %v6686_v7  ;;  %v1944_v62 = vadd.f32 %v1928_v51, %v1779_v63 }
 0x26d   :  { %v1931_v25 = vmul.f32 %v8718_v22, %v8717_v20  ;;  %v1930_v35 = vmul.f32 %v8722_v56, %v8721_v28  ;;  %v2042_v6 = vadd.f32 %v2026_v55, %v1941_v1  ;;  %v8724_v48 = vld [vmem:[#allocation62_spill] sm:$0xff]  ;;  %v6811_v20 = vpop.permute.xlu0 %2150  ;;  %v1945_v22 = vadd.f32 %v1929_v24, %v1780_v30  ;;  %v8726_v49 = vld [vmem:[#allocation181_spill] sm:$0xff]  ;;  %v8727_v40 = vld [vmem:[#allocation19_spill] sm:$0xff] }
 0x26e   :  { %v2028_v53 = vmul.f32 %v8724_v48, %v8723_v60  ;;  %v2055_v33 = vadd.f32 %v2039_v12, %v1954_v37  ;;  %v8725_v18 = vld [vmem:[#allocation58_spill] sm:$0xff]  ;;  %v2041_v26 = vadd.f32 %v2025_v36, %v1940_v4  ;;  %v2027_v2 = vmul.f32 %v8727_v40, %v6371_v45  ;;  %v2157_v55 = vpop.permute.xlu1 %2156  ;;  %v8728_v30 = vld [vmem:[#allocation201_spill] sm:$0xff]  ;;  %v8731_v45 = vld [vmem:[#allocation27_spill] sm:$0xff] }
 0x26f   :  { %v1947_v57 = vadd.f32 %v1931_v25, %v1782_v23  ;;  %v1933_v11 = vmul.f32 %v8726_v49, %v8725_v18  ;;  %2675 = vrot.lane.b32.xlu0 %v6182_v32, %s3403_s10  ;;  %v1946_v52 = vadd.f32 %v1930_v35, %v1781_v29  ;;  %v2196_v1 = vmul.f32 %v6508_v9, %v6581_v41  ;;  %v8729_v23 = vld [vmem:[#allocation56_spill] sm:$0xff]  ;;  %v8730_v36 = vld [vmem:[#allocation185_spill] sm:$0xff] }
 0x270   :  { %v2125_v7 = vadd.f32 %v6541_v10, %v2056_v16  ;;  %v2210_v63 = vmul.f32 %v6657_v15, %v2157_v55  ;;  %v1932_v47 = vmul.f32 %v8729_v23, %v8728_v30  ;;  %v2044_v51 = vadd.f32 %v2028_v53, %v1943_v54  ;;  %2681 = vrot.lane.b32.xlu1 %v6231_v21, %s3403_s10  ;;  %v8732_v9 = vld [vmem:[#allocation80_spill] sm:$0xff]  ;;  %v8733_v35 = vld [vmem:[#allocation193_spill] sm:$0xff] }
 0x271   :  { %v2030_v24 = vmul.f32 %v8730_v36, %v6386_v13  ;;  %v2111_v12 = vadd.f32 %v8731_v45, %v2042_v6  ;;  %v2155_v25 = vpop.permute.xlu0 %2154  ;;  %v2195_v41 = vmul.f32 %v6497_v19, %v6598_v14  ;;  %v2124_v10 = vadd.f32 %v8732_v9, %v2055_v33  ;;  %v8734_v13 = vld [vmem:[#allocation37_spill] sm:$0xff]  ;;  %v8736_v54 = vld [vmem:[#allocation212_spill] sm:$0xff]  ;;  %v8737_v19 = vld [vmem:[#allocation82_spill] sm:$0xff] }
 0x272   :  { %v2209_v15 = vmul.f32 %v6655_v58, %v2155_v25  ;;  %v6837_v29 = vadd.f32 %v2210_v63, %v2125_v7  ;;  %v1949_v28 = vadd.f32 %v1933_v11, %v6736_v3  ;;  %v2043_v56 = vadd.f32 %v2027_v2, %v1942_v38  ;;  %v8735_v16 = vld [vmem:[#allocation25_spill] sm:$0xff]  ;;  %v2230_v6 = vpop.permute.xlu1 %2229  ;;  %v8739_v33 = vld [vmem:[#allocation20_spill] sm:$0xff]  ;;  %v8741_v11 = vld [vmem:[#allocation150_spill] sm:$0xff] }
 0x273   :  { %v2029_v37 = vmul.f32 %v8734_v13, %v8733_v35  ;;  %v2110_v4 = vadd.f32 %v8735_v16, %v2041_v26  ;;  %2679 = vrot.lane.b32.xlu0 %v8736_v54, %s3403_s10  ;;  %v2212_v60 = vadd.f32 %v2196_v1, %v2111_v12  ;;  %v8738_v14 = vld [vmem:[#allocation57_spill] sm:$0xff]  ;;  %v2297_v58 = vmul.f32 %v6672_v59, %v2230_v6  ;;  %v8742_v2 = vld [vmem:[#allocation136_spill] sm:$0xff]  ;;  %v8743_v1 = vld [vmem:[#allocation34_spill] sm:$0xff] }
 0x274   :  { %v2198_v48 = vmul.f32 %v8738_v14, %v8737_v19  ;;  %v6847_v53 = vadd.f32 %v2209_v15, %v2124_v10  ;;  %v1948_v3 = vadd.f32 %v1932_v47, %v6733_v46  ;;  %v2046_v38 = vadd.f32 %v2030_v24, %v1945_v22  ;;  %v8740_v18 = vld [vmem:[#allocation189_spill] sm:$0xff]  ;;  %2685 = vrot.lane.b32.xlu1 %v8742_v2, %s3403_s10  ;;  %v8744_v63 = vld [vmem:[#allocation86_spill] sm:$0xff]  ;;  %v8746_v46 = vld [vmem:[#allocation171_spill] sm:$0xff] }
 0x275   :  { %v2032_v49 = vmul.f32 %v8740_v18, %v8739_v33  ;;  %v2113_v26 = vadd.f32 %v8741_v11, %v2044_v51  ;;  %v2228_v40 = vpop.permute.xlu0 %2227  ;;  %v2211_v55 = vadd.f32 %v2195_v41, %v2110_v4  ;;  %v2197_v7 = vmul.f32 %v8743_v1, %v6634_v5  ;;  %v8745_v59 = vld [vmem:[#allocation217_spill] sm:$0xff]  ;;  %v8747_v36 = vld [vmem:[#allocation74_spill] sm:$0xff]  ;;  %v8751_v10 = vld [vmem:[#allocation183_spill] sm:$0xff] }
 0x276   :  { %v2296_v30 = vmul.f32 %v8744_v63, %v2228_v40  ;;  %v6859_v23 = vadd.f32 %v2297_v58, %v2212_v60  ;;  %v1935_v22 = vmul.f32 %v8746_v46, %v8745_v59  ;;  %v2045_v47 = vadd.f32 %v2029_v37, %v1944_v62  ;;  %v8748_v24 = vld [vmem:[#allocation33_spill] sm:$0xff]  ;;  %v8749_v51 = vld [vmem:[#allocation70_spill] sm:$0xff]  ;;  %v2234_v41 = vpop.permute.xlu1 %2233  ;;  %v8752_v5 = vld [vmem:[#allocation176_spill] sm:$0xff] }
 0x277   :  { %v2031_v45 = vmul.f32 %v8748_v24, %v8747_v36  ;;  %v2112_v12 = vadd.f32 %v8749_v51, %v2043_v56  ;;  %v8750_v25 = vld [vmem:[#allocation178_spill] sm:$0xff]  ;;  %v2214_v9 = vadd.f32 %v2198_v48, %v2113_v26  ;;  %v2200_v15 = vmul.f32 %v8752_v5, %v8751_v10  ;;  %v8753_v13 = vld [vmem:[#allocation67_spill] sm:$0xff]  ;;  %v8755_v6 = vld [vmem:[#allocation197_spill] sm:$0xff] }
 0x278   :  { %2683 = vrot.lane.b32.xlu0 %v8750_v25, %s3403_s10  ;;  %v6870_v35 = vadd.f32 %v2296_v30, %v2211_v55  ;;  %v2299_v16 = vmul.f32 %v8753_v13, %v2234_v41  ;;  %v8754_v4 = vld [vmem:[#allocation38_spill] sm:$0xff]  ;;  %v2048_v37 = vadd.f32 %v2032_v49, %v1947_v57  ;;  %v8756_v60 = vld [vmem:[#allocation159_spill] sm:$0xff]  ;;  %v8758_v56 = vld [vmem:[#allocation152_spill] sm:$0xff]  ;;  %v1951_v30 = vadd.f32 %v1935_v22, %v6747_v34 }
 0x279   :  { %v1934_v62 = vmul.f32 %v8755_v6, %v8754_v4  ;;  %v8757_v19 = vld [vmem:[#allocation43_spill] sm:$0xff]  ;;  %v2115_v58 = vadd.f32 %v8758_v56, %v2046_v38  ;;  %v2232_v33 = vpop.permute.xlu0 %2231  ;;  %v8759_v18 = vld [vmem:[#allocation64_spill] sm:$0xff]  ;;  %v2213_v48 = vadd.f32 %v2197_v7, %v2112_v12  ;;  %v8760_v11 = vld [vmem:[#allocation66_spill] sm:$0xff]  ;;  %v2047_v57 = vadd.f32 %v2031_v45, %v1946_v52 }
 0x27a   :  { %v2034_v14 = vmul.f32 %v8757_v19, %v8756_v60  ;;  %2689 = vrot.lane.b32.xlu1 %v8759_v18, %s3403_s10  ;;  %v8761_v26 = vld [vmem:[#allocation175_spill] sm:$0xff]  ;;  %v8762_v55 = vld [vmem:[#allocation209_spill] sm:$0xff]  ;;  %v6883_v63 = vadd.f32 %v2299_v16, %v2214_v9  ;;  %v2238_v51 = vpop.permute.xlu1 %2237  ;;  %v8768_v41 = vld [vmem:[#allocation44_spill] sm:$0xff] }
 0x27b   :  { %v2199_v40 = vmul.f32 %v8761_v26, %v8760_v11  ;;  %v2298_v1 = vmul.f32 %v8762_v55, %v2232_v33  ;;  %v8763_v49 = vld [vmem:[#allocation35_spill] sm:$0xff]  ;;  %v8766_v24 = vld [vmem:[#allocation137_spill] sm:$0xff]  ;;  %v2216_v7 = vadd.f32 %v2200_v15, %v2115_v58  ;;  %v1950_v34 = vadd.f32 %v1934_v62, %v6755_v17  ;;  %v8772_v4 = vld [vmem:[#allocation160_spill] sm:$0xff] }
 0x27c   :  { %v8764_v59 = vld [vmem:[#allocation71_spill] sm:$0xff]  ;;  %2687 = vrot.lane.b32.xlu0 %v8766_v24, %s3403_s10  ;;  %v8767_v12 = vld [vmem:[#allocation213_spill] sm:$0xff]  ;;  %v2050_v52 = vadd.f32 %v2034_v14, %v1949_v28  ;;  %v8778_v17 = vld [vmem:[#allocation40_spill] sm:$0xff] }
 0x27d   :  { %v2033_v46 = vmul.f32 %v8764_v59, %v8763_v49  ;;  %v8765_v36 = vld [vmem:[#allocation191_spill] sm:$0xff]  ;;  %v2202_v10 = vmul.f32 %v8768_v41, %v8767_v12  ;;  %v6893_v5 = vadd.f32 %v2298_v1, %v2213_v48  ;;  %v8769_v9 = vld [vmem:[#allocation69_spill] sm:$0xff]  ;;  %v2236_v6 = vpop.permute.xlu0 %2235  ;;  %v8779_v14 = vld [vmem:[#allocation78_spill] sm:$0xff] }
 0x27e   :  { %v2114_v38 = vadd.f32 %v8765_v36, %v2045_v47  ;;  %v2301_v13 = vmul.f32 %v8769_v9, %v2238_v51  ;;  %v8770_v22 = vld [vmem:[#allocation77_spill] sm:$0xff]  ;;  %v2117_v47 = vadd.f32 %v8772_v4, %v2048_v37  ;;  %v8773_v60 = vld [vmem:[#allocation147_spill] sm:$0xff]  ;;  %v8780_v55 = vld [vmem:[#allocation14_spill] sm:$0xff] }
 0x27f   :  { %v8771_v45 = vld [vmem:[#allocation73_spill] sm:$0xff]  ;;  %2693 = vrot.lane.b32.xlu1 %v8773_v60, %s3403_s10  ;;  %v8776_v33 = vld [vmem:[#allocation211_spill] sm:$0xff]  ;;  %v2049_v62 = vadd.f32 %v2033_v46, %v1948_v3  ;;  %v2035_v1 = vmul.f32 %v8780_v55, %v8779_v14  ;;  %v8782_v59 = vld [vmem:[#allocation188_spill] sm:$0xff] }
 0x280   :  { %v2036_v16 = vmul.f32 %v8771_v45, %v8770_v22  ;;  %v2215_v15 = vadd.f32 %v2199_v40, %v2114_v38  ;;  %v8774_v19 = vld [vmem:[#allocation89_spill] sm:$0xff]  ;;  %v2300_v48 = vmul.f32 %v8776_v33, %v2236_v6  ;;  %v6905_v11 = vadd.f32 %v2301_v13, %v2216_v7  ;;  %v8781_v37 = vld [vmem:[#allocation195_spill] sm:$0xff]  ;;  %2691 = vrot.lane.b32.xlu0 %v8782_v59, %s3403_s10  ;;  %v2242_v40 = vpop.permute.xlu1 %2241  ;;  %v8784_v41 = vld [vmem:[#allocation42_spill] sm:$0xff] }
 0x281   :  { %v8775_v56 = vld [vmem:[#allocation81_spill] sm:$0xff]  ;;  %v2116_v49 = vadd.f32 %v8781_v37, %v2047_v57  ;;  %v2218_v36 = vadd.f32 %v2202_v10, %v2117_v47  ;;  %v8783_v38 = vld [vmem:[#allocation179_spill] sm:$0xff]  ;;  %v2303_v7 = vmul.f32 %v6721_v50, %v2242_v40  ;;  %v8785_v9 = vld [vmem:[#allocation206_spill] sm:$0xff]  ;;  %v2240_v6 = vpop.permute.xlu0 %2239 }
 0x282   :  { %v2201_v58 = vmul.f32 %v8775_v56, %v8774_v19  ;;  %v8777_v26 = vld [vmem:[#allocation61_spill] sm:$0xff]  ;;  %v2204_v51 = vmul.f32 %v8783_v38, %v6717_v44  ;;  %v6916_v12 = vadd.f32 %v2300_v48, %v2215_v15  ;;  %v1936_v3 = vmul.f32 %v8785_v9, %v8784_v41  ;;  %v8786_v13 = vld [vmem:[#allocation30_spill] sm:$0xff]  ;;  %v8787_v22 = vld [vmem:[#allocation196_spill] sm:$0xff] }
 0x283   :  { %v1937_v28 = vmul.f32 %v8778_v17, %v8777_v26  ;;  %v2052_v46 = vadd.f32 %v2036_v16, %v1951_v30  ;;  %v2038_v45 = vmul.f32 %v8787_v22, %v8786_v13  ;;  %v8788_v57 = vld [vmem:[#allocation53_spill] sm:$0xff]  ;;  %v8789_v19 = vld [vmem:[#allocation36_spill] sm:$0xff]  ;;  %v2302_v15 = vmul.f32 %v6719_v0, %v2240_v6  ;;  %v8791_v16 = vld [vmem:[#allocation79_spill] sm:$0xff] }
 0x284   :  { %v2119_v4 = vadd.f32 %v8788_v57, %v2050_v52  ;;  %2766 = vrot.lane.b32.xlu1 %v8789_v19, %s3404_s11  ;;  %v2217_v10 = vadd.f32 %v2201_v58, %v2116_v49  ;;  %v8790_v44 = vld [vmem:[#allocation205_spill] sm:$0xff]  ;;  %v6929_v50 = vadd.f32 %v2303_v7, %v2218_v36  ;;  %v2051_v30 = vadd.f32 %v2035_v1, %v1950_v34  ;;  %v8792_v33 = vld [vmem:[#allocation51_spill] sm:$0xff]  ;;  %v8793_v26 = vld [vmem:[#allocation76_spill] sm:$0xff]  ;;  %v2246_v17 = vpop.permute.xlu1 %2245 }
 0x285   :  { %v2203_v47 = vmul.f32 %v8790_v44, %v6738_v39  ;;  %v1953_v56 = vadd.f32 %v1937_v28, %v6791_v27  ;;  %v2037_v48 = vmul.f32 %v8792_v33, %v8791_v16  ;;  %v2118_v52 = vadd.f32 %v8793_v26, %v2049_v62  ;;  %2764 = vrot.lane.b32.xlu0 %v6092_v31, %s3404_s11  ;;  %v8794_v14 = vld [vmem:[#allocation72_spill] sm:$0xff]  ;;  %v8797_v28 = vld [vmem:[#allocation167_spill] sm:$0xff]  ;;  %v2244_v40 = vpop.permute.xlu0 %2243  ;;  %v8798_v62 = vld [vmem:[#allocation186_spill] sm:$0xff] }
 0x286   :  { %v2220_v58 = vadd.f32 %v2204_v51, %v2119_v4  ;;  %v8795_v55 = vld [vmem:[#allocation60_spill] sm:$0xff]  ;;  %v6939_v37 = vadd.f32 %v2302_v15, %v2217_v10  ;;  %v1952_v27 = vadd.f32 %v1936_v3, %v6803_v8  ;;  %v2121_v1 = vadd.f32 %v8797_v28, %v2052_v46  ;;  %v8799_v36 = vld [vmem:[#allocation210_spill] sm:$0xff]  ;;  %v8803_v6 = vld [vmem:[#allocation23_spill] sm:$0xff] }
 0x287   :  { %v2206_v39 = vmul.f32 %v8795_v55, %v8794_v14  ;;  %v8796_v0 = vld [vmem:[#allocation216_spill] sm:$0xff]  ;;  %v2054_v34 = vadd.f32 %v2038_v45, %v1953_v56  ;;  %v2276_v38 = vunpack.c.0.s8 %v8799_v36  ;;  %v2219_v7 = vadd.f32 %v2203_v47, %v2118_v52  ;;  %v8800_v51 = vld [vmem:[#allocation90_spill] sm:$0xff]  ;;  %v8804_v3 = vld [vmem:[#allocation121_spill] sm:$0xff] }
 0x288   :  { %v2305_v49 = vmul.f32 %v8796_v0, %v2246_v17  ;;  %2770 = vrot.lane.b32.xlu1 %v8798_v62, %s3404_s11  ;;  %v8801_v41 = vld [vmem:[#allocation208_spill] sm:$0xff]  ;;  %v8802_v13 = vld [vmem:[#allocation190_spill] sm:$0xff]  ;;  %v2053_v4 = vadd.f32 %v2037_v48, %v1952_v27  ;;  %v2120_v8 = vadd.f32 %v8803_v6, %v2051_v30  ;;  %v2250_v46 = vpop.permute.xlu1 %2249  ;;  %v8805_v45 = vunpack.c.1.s8 %v8799_v36  ;;  %v8806_v15 = vld [vmem:[#allocation207_spill] sm:$0xff] }
 0x289   :  { %v2205_v9 = vmul.f32 %v8801_v41, %v8800_v51  ;;  %v2304_v22 = vmul.f32 %v8802_v13, %v2244_v40  ;;  %2768 = vrot.lane.b32.xlu0 %v8804_v3, %s3404_s11  ;;  %v2279_v44 = vunpack.c.3.s8 %v8799_v36  ;;  %v2222_v47 = vadd.f32 %v2206_v39, %v2121_v1  ;;  %v8807_v33 = vld [vmem:[#allocation91_spill] sm:$0xff]  ;;  %v2425_v48 = vld [vmem:[#allocation4 + $0x280] sm:$0xff]  ;;  %v8808_v52 = vld [vmem:[#allocation168_spill] sm:$0xff]  ;;  %v2248_v17 = vpop.permute.xlu0 %2247 }
 0x28a   :  { %v6950_v57 = vadd.f32 %v2305_v49, %v2220_v58  ;;  %v2293_v10 = vcvt.s32.f32 %v8805_v45  ;;  %v2208_v56 = vmul.f32 %v8806_v15, %v6800_v61  ;;  %v2307_v26 = vmul.f32 %v8807_v33, %v2250_v46  ;;  %v8809_v58 = vld [vmem:[#allocation192_spill] sm:$0xff]  ;;  %v2426_v15 = vld [vmem:[#allocation4 + $0x288] sm:$0xff] }
 0x28b   :  { %v6960_v16 = vadd.f32 %v2304_v22, %v2219_v7  ;;  %v2123_v30 = vadd.f32 %v8808_v52, %v2054_v34  ;;  %v2292_v14 = vcvt.s32.f32 %v2276_v38  ;;  %v2278_v55 = vunpack.c.2.s8 %v8799_v36  ;;  %v8810_v39 = vld [vmem:[#allocation180_spill] sm:$0xff]  ;;  %v8812_v7 = vld [vmem:[#allocation10_spill] sm:$0xff] }
 0x28c   :  { %2774 = vrot.lane.b32.xlu1 %v8809_v58, %s3404_s11  ;;  %v2221_v0 = vadd.f32 %v2205_v9, %v2120_v8  ;;  %v2207_v49 = vmul.f32 %v8810_v39, %v6811_v20  ;;  %v8811_v27 = vld [vmem:[#allocation92_spill] sm:$0xff]  ;;  %v6970_v28 = vadd.f32 %v2307_v26, %v2222_v47  ;;  %v2254_v1 = vpop.permute.xlu1 %2253  ;;  %v2295_v34 = vcvt.s32.f32 %v2279_v44 }
 0x28d   :  { %v2306_v61 = vmul.f32 %v8811_v27, %v2248_v17  ;;  %2772 = vrot.lane.b32.xlu0 %v6156_v43, %s3404_s11  ;;  %v2430_v40 = vunpack.c.1.s8 %v2425_v48  ;;  %v2122_v51 = vadd.f32 %v8812_v7, %v2053_v4  ;;  %v2224_v41 = vadd.f32 %v2208_v56, %v2123_v30  ;;  %v2252_v9 = vpop.permute.xlu0 %2251 }
 0x28e   :  { %v2309_v36 = vmul.f32 %v2293_v10, %v2254_v1  ;;  %v2294_v20 = vcvt.s32.f32 %v2278_v55  ;;  %v2308_v22 = vmul.f32 %v2292_v14, %v2252_v9  ;;  %v2429_v8 = vunpack.c.0.s8 %v2425_v48 }
 0x28f   :  { %v6975_v38 = vadd.f32 %v2306_v61, %v2221_v0  ;;  %v2223_v13 = vadd.f32 %v2207_v49, %v2122_v51  ;;  %v2446_v44 = vcvt.s32.f32 %v2430_v40  ;;  %v2432_v47 = vunpack.c.3.s8 %v2425_v48  ;;  %v2427_v51 = vld [vmem:[#allocation4 + $0x290] sm:$0xff] }
 0x290   :  { %2778 = vrot.lane.b32.xlu1 %v6196_v42, %s3404_s11  ;;  %v6979_v6 = vadd.f32 %v2309_v36, %v2224_v41  ;;  %v2258_v46 = vpop.permute.xlu1 %2257  ;;  %v2445_v26 = vcvt.s32.f32 %v2429_v8  ;;  %v2431_v52 = vunpack.c.2.s8 %v2425_v48  ;;  %v2434_v0 = vunpack.c.1.s8 %v2426_v15 }
 0x291   :  { %2776 = vrot.lane.b32.xlu0 %v6182_v32, %s3404_s11  ;;  %v6983_v45 = vadd.f32 %v2308_v22, %v2223_v13  ;;  %v2311_v4 = vmul.f32 %v2295_v34, %v2258_v46  ;;  %v2256_v10 = vpop.permute.xlu0 %2255  ;;  %v2448_v55 = vcvt.s32.f32 %v2432_v47  ;;  %v2433_v48 = vunpack.c.0.s8 %v2426_v15 }
 0x292   :  { %v2310_v56 = vmul.f32 %v2294_v20, %v2256_v10  ;;  %v2447_v27 = vcvt.s32.f32 %v2431_v52  ;;  %v2450_v34 = vcvt.s32.f32 %v2434_v0  ;;  %v2436_v40 = vunpack.c.3.s8 %v2426_v15 }
 0x293   :  { %v6988_v33 = vadd.f32 %v2311_v4, %v6837_v29  ;;  %v2449_v36 = vcvt.s32.f32 %v2433_v48  ;;  %v2435_v9 = vunpack.c.2.s8 %v2426_v15  ;;  %v2438_v8 = vunpack.c.1.s8 %v2427_v51 }
 0x294   :  { %2782 = vrot.lane.b32.xlu1 %v6231_v21, %s3404_s11  ;;  %v2395_v30 = vpop.permute.xlu1 %2394  ;;  %v6993_v17 = vadd.f32 %v2310_v56, %v6847_v53  ;;  %v2452_v22 = vcvt.s32.f32 %v2436_v40  ;;  %v2437_v47 = vunpack.c.0.s8 %v2427_v51  ;;  %v2439_v0 = vunpack.c.2.s8 %v2427_v51 }
 0x295   :  { %2780 = vrot.lane.b32.xlu0 %v8736_v54, %s3404_s11  ;;  %v2462_v14 = vmul.f32 %v2446_v44, %v2395_v30  ;;  %v2393_v39 = vpop.permute.xlu0 %2392  ;;  %v2451_v44 = vcvt.s32.f32 %v2435_v9  ;;  %v2454_v56 = vcvt.s32.f32 %v2438_v8  ;;  %v2428_v30 = vld [vmem:[#allocation4 + $0x298] sm:$0xff] }
 0x296   :  { %v2461_v49 = vmul.f32 %v2445_v26, %v2393_v39  ;;  %v2440_v26 = vunpack.c.3.s8 %v2427_v51  ;;  %v2455_v40 = vcvt.s32.f32 %v2439_v0  ;;  %v2444_v9 = vunpack.c.3.s8 %v2428_v30 }
 0x297   :  { %v6998_v29 = vadd.f32 %v2462_v14, %v6859_v23  ;;  %v2443_v8 = vunpack.c.2.s8 %v2428_v30 }
 0x298   :  { %2786 = vrot.lane.b32.xlu1 %v8742_v2, %s3404_s11  ;;  %v2399_v61 = vpop.permute.xlu1 %2398  ;;  %v7003_v53 = vadd.f32 %v2461_v49, %v6870_v35  ;;  %v2456_v48 = vcvt.s32.f32 %v2440_v26 }
 0x299   :  { %2784 = vrot.lane.b32.xlu0 %v8750_v25, %s3404_s11  ;;  %v2464_v1 = vmul.f32 %v2448_v55, %v2399_v61  ;;  %v2397_v7 = vpop.permute.xlu0 %2396  ;;  %v2442_v61 = vunpack.c.1.s8 %v2428_v30 }
 0x29a   :  { %v2463_v41 = vmul.f32 %v2447_v27, %v2397_v7  ;;  %v2441_v7 = vunpack.c.0.s8 %v2428_v30 }
 0x29b   :  { %v7008_v23 = vadd.f32 %v2464_v1, %v6883_v63  ;;  %v2458_v51 = vcvt.s32.f32 %v2442_v61  ;;  %v3218_v61 = vld [vmem:[%s7619_s1 + $0x30] sm:$0xff] }
 0x29c   :  { %2790 = vrot.lane.b32.xlu1 %v8759_v18, %s3404_s11  ;;  %v2403_v20 = vpop.permute.xlu1 %2402  ;;  %v7013_v35 = vadd.f32 %v2463_v41, %v6893_v5  ;;  %3235 = vst [vmem:[#allocation7 + $0xb0] sm:$0xff] %v3218_v61 }
 0x29d   :  { %2788 = vrot.lane.b32.xlu0 %v8766_v24, %s3404_s11  ;;  %v2466_v13 = vmul.f32 %v2450_v34, %v2403_v20  ;;  %v2401_v46 = vpop.permute.xlu0 %2400 }
 0x29e   :  { %v2465_v4 = vmul.f32 %v2449_v36, %v2401_v46 }
 0x29f   :  { %v7018_v63 = vadd.f32 %v2466_v13, %v6905_v11  ;;  %v2453_v11 = vcvt.s32.f32 %v2437_v47 }
 0x2a0   :  { %2794 = vrot.lane.b32.xlu1 %v8773_v60, %s3404_s11  ;;  %v2407_v10 = vpop.permute.xlu1 %2406  ;;  %v7023_v5 = vadd.f32 %v2465_v4, %v6916_v12 }
 0x2a1   :  { %2792 = vrot.lane.b32.xlu0 %v8782_v59, %s3404_s11  ;;  %v2468_v15 = vmul.f32 %v2452_v22, %v2407_v10  ;;  %v2405_v52 = vpop.permute.xlu0 %2404  ;;  %v2457_v22 = vcvt.s32.f32 %v2441_v7  ;;  %v3221_v7 = vld [vmem:[%s7619_s1 + $0x48] sm:$0xff] }
 0x2a2   :  { %v2467_v14 = vmul.f32 %v2451_v44, %v2405_v52  ;;  %v2460_v44 = vcvt.s32.f32 %v2444_v9  ;;  %v3225_v9 = vld [vmem:[%s7619_s1 + $0x68] sm:$0xff]  ;;  %3238 = vst [vmem:[#allocation7 + $0xc8] sm:$0xff] %v3221_v7 }
 0x2a3   :  { %v7026_v55 = vadd.f32 %v2468_v15, %v6929_v50  ;;  %v2459_v15 = vcvt.s32.f32 %v2443_v8  ;;  %3242 = vst [vmem:[#allocation7 + $0xe8] sm:$0xff] %v3225_v9 }
 0x2a4   :  { %v2411_v39 = vpop.permute.xlu1 %2410  ;;  %v7029_v49 = vadd.f32 %v2467_v14, %v6939_v37 }
 0x2a5   :  { %8813 = vst [vmem:[#allocation194_spill] sm:$0xff] %v7026_v55  ;;  %v2470_v27 = vmul.f32 %v2454_v56, %v2411_v39  ;;  %v2409_v12 = vpop.permute.xlu0 %2408 }
 0x2a6   :  { %8814 = vst [vmem:[#allocation11_spill] sm:$0xff] %v7029_v49  ;;  %v2469_v1 = vmul.f32 %v2453_v11, %v2409_v12  ;;  %v3219_v12 = vld [vmem:[%s7619_s1 + $0x38] sm:$0xff] }
 0x2a7   :  { %v7032_v34 = vadd.f32 %v2470_v27, %v6950_v57  ;;  %v3216_v27 = vld [vmem:[%s7619_s1 + $0x20] sm:$0xff]  ;;  %3236 = vst [vmem:[#allocation7 + $0xb8] sm:$0xff] %v3219_v12 }
 0x2a8   :  { %v2415_v41 = vpop.permute.xlu1 %2414  ;;  %v7035_v50 = vadd.f32 %v2469_v1, %v6960_v16  ;;  %v3220_v1 = vld [vmem:[%s7619_s1 + $0x40] sm:$0xff]  ;;  %3233 = vst [vmem:[#allocation7 + $0xa0] sm:$0xff] %v3216_v27 }
 0x2a9   :  { %8815 = vst [vmem:[#allocation96_spill] sm:$0xff] %v7032_v34  ;;  %v2472_v36 = vmul.f32 %v2456_v48, %v2415_v41  ;;  %v2413_v20 = vpop.permute.xlu0 %2412  ;;  %v3217_v48 = vld [vmem:[%s7619_s1 + $0x28] sm:$0xff]  ;;  %v3222_v41 = vld [vmem:[%s7619_s1 + $0x50] sm:$0xff]  ;;  %3237 = vst [vmem:[#allocation7 + $0xc0] sm:$0xff] %v3220_v1 }
 0x2aa   :  { %8816 = vst [vmem:[#allocation13_spill] sm:$0xff] %v7035_v50  ;;  %v2471_v37 = vmul.f32 %v2455_v40, %v2413_v20  ;;  %3234 = vst [vmem:[#allocation7 + $0xa8] sm:$0xff] %v3217_v48  ;;  %v3226_v20 = vld [vmem:[%s7619_s1 + $0x70] sm:$0xff] }
 0x2ab   :  { %v7038_v13 = vadd.f32 %v2472_v36, %v6970_v28  ;;  %v3223_v36 = vld [vmem:[%s7619_s1 + $0x58] sm:$0xff]  ;;  %3239 = vst [vmem:[#allocation7 + $0xd0] sm:$0xff] %v3222_v41  ;;  %3243 = vst [vmem:[#allocation7 + $0xf0] sm:$0xff] %v3226_v20 }
 0x2ac   :  { %v2419_v46 = vpop.permute.xlu1 %2418  ;;  %v7041_v57 = vadd.f32 %v2471_v37, %v6975_v38  ;;  %3240 = vst [vmem:[#allocation7 + $0xd8] sm:$0xff] %v3223_v36 }
 0x2ad   :  { %8817 = vst [vmem:[#allocation75_spill] sm:$0xff] %v7038_v13  ;;  %v2474_v4 = vmul.f32 %v2458_v51, %v2419_v46  ;;  %v2417_v47 = vpop.permute.xlu0 %2416  ;;  %v3224_v51 = vld [vmem:[%s7619_s1 + $0x60] sm:$0xff] }
 0x2ae   :  { %8818 = vst [vmem:[#allocation93_spill] sm:$0xff] %v7041_v57  ;;  %v2473_v10 = vmul.f32 %v2457_v22, %v2417_v47  ;;  %v3227_v22 = vld [vmem:[%s7619_s1 + $0x78] sm:$0xff]  ;;  %3241 = vst [vmem:[#allocation7 + $0xe0] sm:$0xff] %v3224_v51  ;;  %v2595_v46 = vld [vmem:[#allocation4 + $0x2c0] sm:$0xff] }
 0x2af   :  { %v7044_v16 = vadd.f32 %v2474_v4, %v6979_v6  ;;  %v3212_v6 = vld [vmem:[%s7619_s1] sm:$0xff]  ;;  %3244 = vst [vmem:[#allocation7 + $0xf8] sm:$0xff] %v3227_v22  ;;  %v2599_v47 = vunpack.c.0.s8 %v2595_v46 }
 0x2b0   :  { %v2423_v56 = vpop.permute.xlu1 %2422  ;;  %v7047_v26 = vadd.f32 %v2473_v10, %v6983_v45  ;;  %v3213_v45 = vld [vmem:[%s7619_s1 + $0x8] sm:$0xff]  ;;  %3229 = vst [vmem:[#allocation7 + $0x80] sm:$0xff] %v3212_v6  ;;  %v2526_v4 = vld [vmem:[#allocation4 + $0x2a0] sm:$0xff]  ;;  %v2600_v10 = vunpack.c.1.s8 %v2595_v46  ;;  %v2601_v6 = vunpack.c.2.s8 %v2595_v46 }
 0x2b1   :  { %8819 = vst [vmem:[#allocation198_spill] sm:$0xff] %v7044_v16  ;;  %v2476_v28 = vmul.f32 %v2460_v44, %v2423_v56  ;;  %v2421_v52 = vpop.permute.xlu0 %2420  ;;  %3230 = vst [vmem:[#allocation7 + $0x88] sm:$0xff] %v3213_v45  ;;  %v2530_v56 = vunpack.c.0.s8 %v2526_v4  ;;  %v2602_v45 = vunpack.c.3.s8 %v2595_v46  ;;  %v2615_v12 = vcvt.s32.f32 %v2599_v47 }
 0x2b2   :  { %8820 = vst [vmem:[#allocation15_spill] sm:$0xff] %v7047_v26  ;;  %v2475_v14 = vmul.f32 %v2459_v15, %v2421_v52  ;;  %v2596_v15 = vld [vmem:[#allocation4 + $0x2c8] sm:$0xff]  ;;  %v2616_v1 = vcvt.s32.f32 %v2600_v10  ;;  %v2617_v20 = vcvt.s32.f32 %v2601_v6 }
 0x2b3   :  { %v7050_v30 = vadd.f32 %v2476_v28, %v6988_v33  ;;  %v3214_v33 = vld [vmem:[%s7619_s1 + $0x10] sm:$0xff]  ;;  %v2531_v28 = vunpack.c.1.s8 %v2526_v4  ;;  %v2527_v52 = vld [vmem:[#allocation4 + $0x2a8] sm:$0xff]  ;;  %v2603_v48 = vunpack.c.0.s8 %v2596_v15  ;;  %v2604_v7 = vunpack.c.1.s8 %v2596_v15 }
 0x2b4   :  { %v7052_v38 = vpop.permute.xlu1 %2495  ;;  %v7055_v11 = vadd.f32 %v2475_v14, %v6993_v17  ;;  %v3215_v17 = vld [vmem:[%s7619_s1 + $0x18] sm:$0xff]  ;;  %3231 = vst [vmem:[#allocation7 + $0x90] sm:$0xff] %v3214_v33  ;;  %v2532_v33 = vunpack.c.2.s8 %v2526_v4  ;;  %v2534_v61 = vunpack.c.0.s8 %v2527_v52  ;;  %v7121_v41 = vcvt.s32.f32 %v2530_v56 }
 0x2b5   :  { %8821 = vst [vmem:[#allocation132_spill] sm:$0xff] %v7050_v30  ;;  %v7057_v0 = vpop.permute.xlu0 %2493  ;;  %3232 = vst [vmem:[#allocation7 + $0x98] sm:$0xff] %v3215_v17  ;;  %v2533_v17 = vunpack.c.3.s8 %v2526_v4  ;;  %v7123_v36 = vcvt.s32.f32 %v2531_v28  ;;  %v2535_v51 = vunpack.c.1.s8 %v2527_v52  ;;  %v2536_v22 = vunpack.c.2.s8 %v2527_v52 }
 0x2b6   :  { %8822 = vst [vmem:[#allocation199_spill] sm:$0xff] %v7055_v11  ;;  %v2528_v11 = vld [vmem:[#allocation4 + $0x2b0] sm:$0xff]  ;;  %v2618_v46 = vcvt.s32.f32 %v2602_v45  ;;  %v2605_v30 = vunpack.c.2.s8 %v2596_v15  ;;  %v2606_v4 = vunpack.c.3.s8 %v2596_v15  ;;  %v7127_v26 = vcvt.s32.f32 %v2532_v33 }
 0x2b7   :  { %v7129_v16 = vcvt.s32.f32 %v2533_v17  ;;  %v2537_v47 = vunpack.c.3.s8 %v2527_v52  ;;  %v2619_v56 = vcvt.s32.f32 %v2603_v48  ;;  %v7133_v13 = vcvt.s32.f32 %v2534_v61  ;;  %v2597_v45 = vld [vmem:[#allocation4 + $0x2d0] sm:$0xff] }
 0x2b8   :  { %v7068_v39 = vpop.permute.xlu1 %2499  ;;  %v7136_v28 = vmul.f32 %v2615_v12, %v6092_v31  ;;  %v7139_v6 = vmul.f32 %v2616_v1, %v8789_v19  ;;  %v2620_v57 = vcvt.s32.f32 %v2604_v7  ;;  %v7141_v50 = vcvt.s32.f32 %v2535_v51  ;;  %v2598_v19 = vld [vmem:[#allocation4 + $0x2d8] sm:$0xff] }
 0x2b9   :  { %v7088_v40 = vpop.permute.xlu0 %2497  ;;  %v2538_v15 = vunpack.c.0.s8 %v2528_v11  ;;  %v2539_v33 = vunpack.c.1.s8 %v2528_v11  ;;  %v7146_v52 = vmul.f32 %v2617_v20, %v8804_v3  ;;  %v7148_v48 = vcvt.s32.f32 %v2536_v22  ;;  %v2529_v20 = vld [vmem:[#allocation4 + $0x2b8] sm:$0xff] }
 0x2ba   :  { %8824 = vst [vmem:[#allocation98_spill] sm:$0xff] %v7136_v28  ;;  %8825 = vst [vmem:[#allocation200_spill] sm:$0xff] %v7139_v6  ;;  %v7151_v61 = vmul.f32 %v2618_v46, %v8798_v62  ;;  %v2621_v31 = vcvt.s32.f32 %v2605_v30  ;;  %v2622_v12 = vcvt.s32.f32 %v2606_v4  ;;  %v7153_v1 = vcvt.s32.f32 %v2537_v47 }
 0x2bb   :  { %8827 = vst [vmem:[#allocation114_spill] sm:$0xff] %v7146_v52  ;;  %v7158_v51 = vmul.f32 %v2619_v56, %v6156_v43  ;;  %v2607_v34 = vunpack.c.0.s8 %v2597_v45  ;;  %v2608_v49 = vunpack.c.1.s8 %v2597_v45  ;;  %v2540_v6 = vunpack.c.2.s8 %v2528_v11 }
 0x2bc   :  { %v7108_v37 = vpop.permute.xlu1 %2503  ;;  %8828 = vst [vmem:[#allocation202_spill] sm:$0xff] %v7151_v61  ;;  %v2541_v3 = vunpack.c.3.s8 %v2528_v11  ;;  %v7161_v22 = vmul.f32 %v2620_v57, %v8809_v58  ;;  %v2609_v62 = vunpack.c.2.s8 %v2597_v45  ;;  %v7163_v46 = vcvt.s32.f32 %v2538_v15  ;;  %v2696_v57 = vld [vmem:[#allocation4 + $0x2e0] sm:$0xff] }
 0x2bd   :  { %v7113_v8 = vpop.permute.xlu0 %2501  ;;  %8830 = vst [vmem:[#allocation106_spill] sm:$0xff] %v7158_v51  ;;  %v7165_v30 = vcvt.s32.f32 %v2539_v33  ;;  %v2610_v47 = vunpack.c.3.s8 %v2597_v45  ;;  %v2611_v52 = vunpack.c.0.s8 %v2598_v19  ;;  %v7170_v43 = vmul.f32 %v2621_v31, %v6182_v32 }
 0x2be   :  { %8831 = vst [vmem:[#allocation118_spill] sm:$0xff] %v7161_v22  ;;  %v7173_v56 = vmul.f32 %v2622_v12, %v6196_v42  ;;  %v2612_v11 = vunpack.c.1.s8 %v2598_v19  ;;  %v2613_v51 = vunpack.c.2.s8 %v2598_v19  ;;  %v2542_v61 = vunpack.c.0.s8 %v2529_v20 }
 0x2bf   :  { %8833 = vst [vmem:[#allocation112_spill] sm:$0xff] %v7170_v43  ;;  %v2623_v15 = vcvt.s32.f32 %v2607_v34  ;;  %v2624_v22 = vcvt.s32.f32 %v2608_v49  ;;  %v2614_v33 = vunpack.c.3.s8 %v2598_v19  ;;  %v2543_v45 = vunpack.c.1.s8 %v2529_v20 }
 0x2c0   :  { %v7115_v44 = vpop.permute.xlu1 %2507  ;;  %8834 = vst [vmem:[#allocation116_spill] sm:$0xff] %v7173_v56  ;;  %v2625_v28 = vcvt.s32.f32 %v2609_v62  ;;  %v2544_v32 = vunpack.c.2.s8 %v2529_v20  ;;  %v2545_v42 = vunpack.c.3.s8 %v2529_v20  ;;  %v2626_v12 = vcvt.s32.f32 %v2610_v47 }
 0x2c1   :  { %v7117_v14 = vpop.permute.xlu0 %2505  ;;  %v2627_v43 = vcvt.s32.f32 %v2611_v52  ;;  %v2700_v56 = vunpack.c.0.s8 %v2696_v57  ;;  %v2701_v55 = vunpack.c.1.s8 %v2696_v57  ;;  %v7188_v34 = vmul.f32 %v2623_v15, %v8736_v54  ;;  %v2697_v52 = vld [vmem:[#allocation4 + $0x2e8] sm:$0xff]  ;;  %v2698_v54 = vld [vmem:[#allocation4 + $0x2f0] sm:$0xff] }
 0x2c2   :  { %v2630_v19 = vcvt.s32.f32 %v2614_v33  ;;  %v2702_v20 = vunpack.c.2.s8 %v2696_v57  ;;  %v2703_v62 = vunpack.c.3.s8 %v2696_v57  ;;  %v7196_v47 = vmul.f32 %v2625_v28, %v8750_v25  ;;  %v2699_v33 = vld [vmem:[#allocation4 + $0x2f8] sm:$0xff] }
 0x2c3   :  { %8837 = vst [vmem:[#allocation139_spill] sm:$0xff] %v7188_v34  ;;  %v7205_v15 = vmul.f32 %v2626_v12, %v8742_v2  ;;  %v7212_v57 = vcvt.s32.f32 %v2701_v55  ;;  %v2706_v2 = vunpack.c.2.s8 %v2697_v52 }
 0x2c4   :  { %v7119_v27 = vpop.permute.xlu1 %2511  ;;  %8839 = vst [vmem:[#allocation122_spill] sm:$0xff] %v7196_v47  ;;  %v7223_v12 = vmul.f32 %v2630_v19, %v8773_v60  ;;  %v7227_v55 = vcvt.s32.f32 %v2703_v62  ;;  %v2954_v60 = vld [vmem:[%s7620_s2] sm:$0xff]  ;;  %v2713_v19 = vunpack.c.1.s8 %v2699_v33  ;;  %v2715_v62 = vunpack.c.3.s8 %v2699_v33 }
 0x2c5   :  { %v7125_v9 = vpop.permute.xlu0 %2509  ;;  %8842 = vst [vmem:[#allocation138_spill] sm:$0xff] %v7205_v15 }
 0x2c6   :  { %8846 = vst [vmem:[#allocation87_spill] sm:$0xff] %v7223_v12  ;;  %8848 = vst [vmem:[#allocation65_spill] sm:$0xff] %v7227_v55 }
 0x2c8   :  { %v7131_v10 = vpop.permute.xlu1 %2515 }
 0x2c9   :  { %8823 = vst [vmem:[#allocation100_spill] sm:$0xff] %v7131_v10  ;;  %v7143_v17 = vpop.permute.xlu0 %2513  ;;  %v2628_v10 = vcvt.s32.f32 %v2612_v11 }
 0x2ca   :  { %8826 = vst [vmem:[#allocation17_spill] sm:$0xff] %v7143_v17  ;;  %v7183_v17 = vcvt.s32.f32 %v2542_v61  ;;  %v7200_v61 = vcvt.s32.f32 %v2545_v42  ;;  %v2705_v42 = vunpack.c.1.s8 %v2697_v52 }
 0x2cb   :  { %v7215_v25 = vmul.f32 %v2628_v10, %v8759_v18  ;;  %v2709_v10 = vunpack.c.1.s8 %v2698_v54 }
 0x2cc   :  { %v7155_v7 = vpop.permute.xlu1 %2519  ;;  %8841 = vst [vmem:[#allocation84_spill] sm:$0xff] %v7200_v61 }
 0x2cd   :  { %8829 = vst [vmem:[#allocation104_spill] sm:$0xff] %v7155_v7  ;;  %v7167_v4 = vpop.permute.xlu0 %2517  ;;  %v7177_v7 = vcvt.s32.f32 %v2540_v6  ;;  %v7191_v6 = vmul.f32 %v2624_v22, %v6231_v21  ;;  %v7208_v21 = vmul.f32 %v2627_v43, %v8766_v24  ;;  %v7210_v22 = vcvt.s32.f32 %v2700_v56  ;;  %8844 = vst [vmem:[#allocation142_spill] sm:$0xff] %v7215_v25  ;;  %v2797_v24 = vld [vmem:[#allocation4 + $0x300] sm:$0xff] }
 0x2ce   :  { %8832 = vst [vmem:[#allocation203_spill] sm:$0xff] %v7167_v4  ;;  %v7179_v4 = vcvt.s32.f32 %v2541_v3  ;;  %v7193_v3 = vcvt.s32.f32 %v2543_v45  ;;  %v7225_v43 = vcvt.s32.f32 %v2702_v20  ;;  %v2707_v56 = vunpack.c.3.s8 %v2697_v52 }
 0x2cf   :  { %8838 = vst [vmem:[#allocation83_spill] sm:$0xff] %v7191_v6  ;;  %8843 = vst [vmem:[#allocation85_spill] sm:$0xff] %v7208_v21  ;;  %v2708_v21 = vunpack.c.0.s8 %v2698_v54  ;;  %v2714_v20 = vunpack.c.2.s8 %v2699_v33  ;;  %v2801_v12 = vunpack.c.0.s8 %v2797_v24  ;;  %v2802_v15 = vunpack.c.1.s8 %v2797_v24 }
 0x2d0   :  { %v7175_v58 = vpop.permute.xlu1 %2523  ;;  %8847 = vst [vmem:[#allocation145_spill] sm:$0xff] %v7225_v43  ;;  %v7245_v47 = vcvt.s32.f32 %v2707_v56  ;;  %v2803_v6 = vunpack.c.2.s8 %v2797_v24 }
 0x2d1   :  { %8835 = vst [vmem:[#allocation204_spill] sm:$0xff] %v7175_v58  ;;  %v7181_v31 = vpop.permute.xlu0 %2521  ;;  %v2629_v58 = vcvt.s32.f32 %v2613_v51  ;;  %v7198_v51 = vcvt.s32.f32 %v2544_v32  ;;  %v2704_v32 = vunpack.c.0.s8 %v2697_v52  ;;  %v7247_v61 = vcvt.s32.f32 %v2708_v21 }
 0x2d2   :  { %8836 = vst [vmem:[#allocation108_spill] sm:$0xff] %v7181_v31  ;;  %v7239_v31 = vcvt.s32.f32 %v2705_v42  ;;  %8854 = vst [vmem:[#allocation88_spill] sm:$0xff] %v7245_v47  ;;  %v7261_v56 = vcvt.s32.f32 %v2714_v20  ;;  %v7263_v21 = vcvt.s32.f32 %v2715_v62  ;;  %v2956_v20 = vld [vmem:[%s7620_s2 + $0x10] sm:$0xff]  ;;  %v2804_v62 = vunpack.c.3.s8 %v2797_v24 }
 0x2d3   :  { %8840 = vst [vmem:[#allocation124_spill] sm:$0xff] %v7198_v51  ;;  %v7218_v28 = vmul.f32 %v2629_v58, %v8782_v59  ;;  %v2710_v59 = vunpack.c.2.s8 %v2698_v54  ;;  %v2711_v58 = vunpack.c.3.s8 %v2698_v54  ;;  %v2938_v51 = vld [vmem:[%s7618_s0] sm:$0xff]  ;;  %v7237_v52 = vcvt.s32.f32 %v2704_v32  ;;  %8855 = vst [vmem:[#allocation41_spill] sm:$0xff] %v7247_v61 }
 0x2d4   :  { %v7185_v49 = vpop.permute.xlu1 %2665  ;;  %8851 = vst [vmem:[#allocation68_spill] sm:$0xff] %v7239_v31  ;;  %v7243_v54 = vcvt.s32.f32 %v2706_v2  ;;  %v2970_v34 = vadd.f32 %v2954_v60, %v2938_v51  ;;  %v2798_v31 = vld [vmem:[#allocation4 + $0x308] sm:$0xff]  ;;  %v2799_v2 = vld [vmem:[#allocation4 + $0x310] sm:$0xff]  ;;  %8862 = vst [vmem:[#allocation95_spill] sm:$0xff] %v7261_v56  ;;  %v7265_v51 = vcvt.s32.f32 %v2801_v12  ;;  %v7281_v60 = vstv %s7622_s4 }
 0x2d5   :  { %v7202_v11 = vpop.permute.xlu0 %2663  ;;  %8845 = vst [vmem:[#allocation29_spill] sm:$0xff] %v7218_v28  ;;  %v2712_v28 = vunpack.c.0.s8 %v2699_v33  ;;  %8850 = vst [vmem:[#allocation182_spill] sm:$0xff] %v7237_v52  ;;  %v7253_v33 = vcvt.s32.f32 %v2710_v59  ;;  %v7255_v32 = vcvt.s32.f32 %v2711_v58  ;;  %v2955_v59 = vld [vmem:[%s7620_s2 + $0x8] sm:$0xff]  ;;  %v2941_v56 = vld [vmem:[%s7618_s0 + $0x18] sm:$0xff]  ;;  %v2808_v47 = vunpack.c.3.s8 %v2798_v31 }
 0x2d6   :  { %8853 = vst [vmem:[#allocation127_spill] sm:$0xff] %v7243_v54  ;;  %v7259_v54 = vcvt.s32.f32 %v2713_v19  ;;  %8863 = vst [vmem:[#allocation97_spill] sm:$0xff] %v7263_v21  ;;  %v7283_v12 = vmul.f32 0.95, %v2970_v34  ;;  %v7285_v19 = vcvt.s32.f32 %v2802_v15  ;;  %v2957_v21 = vld [vmem:[%s7620_s2 + $0x18] sm:$0xff]  ;;  %v2809_v24 = vunpack.c.0.s8 %v2799_v2 }
 0x2d7   :  { %8858 = vst [vmem:[#allocation129_spill] sm:$0xff] %v7253_v33  ;;  %8859 = vst [vmem:[#allocation128_spill] sm:$0xff] %v7255_v32  ;;  %v7257_v42 = vcvt.s32.f32 %v2712_v28  ;;  %v2940_v28 = vld [vmem:[%s7618_s0 + $0x10] sm:$0xff]  ;;  %v2805_v33 = vunpack.c.0.s8 %v2798_v31  ;;  %v2800_v15 = vld [vmem:[#allocation4 + $0x318] sm:$0xff]  ;;  %v2810_v52 = vunpack.c.1.s8 %v2799_v2 }
 0x2d8   :  { %v7220_v45 = vpop.permute.xlu1 %2669  ;;  %8861 = vst [vmem:[#allocation99_spill] sm:$0xff] %v7259_v54  ;;  %8864 = vst [vmem:[#allocation102_spill] sm:$0xff] %v7265_v51  ;;  %v7296_v54 = vcvt.s32.f32 %v2803_v6  ;;  %v7302_v51 = vcvt.s32.f32 %v2804_v62  ;;  %v2813_v6 = vunpack.c.0.s8 %v2800_v15  ;;  %v2959_v62 = vld [vmem:[%s7620_s2 + $0x28] sm:$0xff] }
 0x2d9   :  { %v7229_v18 = vpop.permute.xlu0 %2667  ;;  %8860 = vst [vmem:[#allocation130_spill] sm:$0xff] %v7257_v42  ;;  %8866 = vst [vmem:[#allocation134_spill] sm:$0xff] %v7281_v60  ;;  %v3132_v42 = vsub.f32 1.0, %v2970_v34  ;;  %v2812_v34 = vunpack.c.3.s8 %v2799_v2  ;;  %v7306_v55 = vcvt.s32.f32 %v2805_v33  ;;  %v7322_v33 = vcvt.s32.f32 %v2809_v24 }
 0x2da   :  { %8849 = vst [vmem:[#allocation94_spill] sm:$0xff] %v7229_v18  ;;  %v7251_v18 = vcvt.s32.f32 %v2709_v10  ;;  %v2939_v10 = vld [vmem:[%s7618_s0 + $0x8] sm:$0xff]  ;;  %8867 = vst [vmem:[#allocation133_spill] sm:$0xff] %v7283_v12  ;;  %v2806_v12 = vunpack.c.1.s8 %v2798_v31  ;;  %v7338_v24 = vcvt.s32.f32 %v2813_v6 }
 0x2db   :  { %8868 = vst [vmem:[#allocation135_spill] sm:$0xff] %v7285_v19  ;;  %8869 = vst [vmem:[#allocation45_spill] sm:$0xff] %v7296_v54  ;;  %v2971_v61 = vadd.f32 %v2955_v59, %v2939_v10  ;;  %v2814_v54 = vunpack.c.1.s8 %v2800_v15  ;;  %v7304_v19 = vmul.f32 0.05, %v3132_v42  ;;  %v2815_v10 = vunpack.c.2.s8 %v2800_v15 }
 0x2dc   :  { %v7241_v25 = vpop.permute.xlu1 %2673  ;;  %8857 = vst [vmem:[#allocation143_spill] sm:$0xff] %v7251_v18  ;;  %v2807_v18 = vunpack.c.2.s8 %v2798_v31  ;;  %8873 = vst [vmem:[#allocation154_spill] sm:$0xff] %v7306_v55  ;;  %v7320_v42 = vcvt.s32.f32 %v2808_v47  ;;  %v7336_v47 = vcvt.s32.f32 %v2812_v34 }
 0x2dd   :  { %8852 = vst [vmem:[#allocation214_spill] sm:$0xff] %v7241_v25  ;;  %v7249_v43 = vpop.permute.xlu0 %2671  ;;  %v2973_v25 = vadd.f32 %v2957_v21, %v2941_v56  ;;  %8872 = vst [vmem:[#allocation110_spill] sm:$0xff] %v7304_v19  ;;  %v3133_v59 = vsub.f32 1.0, %v2971_v61  ;;  %v2942_v56 = vld [vmem:[%s7618_s0 + $0x20] sm:$0xff]  ;;  %v7330_v19 = vcvt.s32.f32 %v2810_v52  ;;  %v7348_v52 = vcvt.s32.f32 %v2815_v10 }
 0x2de   :  { %8856 = vst [vmem:[#allocation215_spill] sm:$0xff] %v7249_v43  ;;  %v2811_v43 = vunpack.c.2.s8 %v2799_v2  ;;  %v2958_v2 = vld [vmem:[%s7620_s2 + $0x20] sm:$0xff]  ;;  %v7318_v21 = vcvt.s32.f32 %v2807_v18  ;;  %8876 = vst [vmem:[#allocation141_spill] sm:$0xff] %v7320_v42  ;;  %v2562_v42 = vmul.f32 %v7121_v41, %v7057_v0  ;;  %v7354_v6 = vmul.f32 0.95, %v2971_v61 }
 0x2df   :  { %8877 = vst [vmem:[#allocation155_spill] sm:$0xff] %v7322_v33  ;;  %v7340_v33 = vcvt.s32.f32 %v2814_v54  ;;  %v7346_v55 = vadd.f32 %v2958_v2, %v2942_v56  ;;  %v7356_v54 = vmul.f32 0.05, %v3133_v59  ;;  %v2564_v0 = vmul.f32 %v7127_v26, %v7088_v40  ;;  %v2944_v26 = vld [vmem:[%s7618_s0 + $0x30] sm:$0xff]  ;;  %v2961_v59 = vld [vmem:[%s7620_s2 + $0x38] sm:$0xff] }
 0x2e0   :  { %v7276_v58 = vpop.permute.xlu1 %2677  ;;  %8875 = vst [vmem:[#allocation144_spill] sm:$0xff] %v7318_v21  ;;  %v2816_v21 = vunpack.c.3.s8 %v2800_v15  ;;  %v7374_v10 = vmul.f32 0.95, %v2973_v25 }
 0x2e1   :  { %8865 = vst [vmem:[#allocation47_spill] sm:$0xff] %v7276_v58  ;;  %v7298_v32 = vpop.permute.xlu0 %2675  ;;  %v2972_v58 = vadd.f32 %v2956_v20, %v2940_v28  ;;  %v2943_v20 = vld [vmem:[%s7618_s0 + $0x28] sm:$0xff] }
 0x2e2   :  { %8870 = vst [vmem:[#allocation21_spill] sm:$0xff] %v7298_v32  ;;  %v7308_v32 = vcvt.s32.f32 %v2806_v12  ;;  %v3135_v12 = vsub.f32 1.0, %v2973_v25  ;;  %v7358_v15 = vadd.f32 %v2959_v62, %v2943_v20  ;;  %v7382_v40 = vcvt.s32.f32 %v2816_v21 }
 0x2e3   :  { %v3134_v28 = vsub.f32 1.0, %v2972_v58  ;;  %v7372_v61 = vmul.f32 0.95, %v2972_v58  ;;  %v3136_v25 = vsub.f32 1.0, %v7346_v55  ;;  %v2945_v58 = vld [vmem:[%s7618_s0 + $0x38] sm:$0xff]  ;;  %v2570_v21 = vmul.f32 %v7163_v46, %v7125_v9 }
 0x2e4   :  { %v7300_v60 = vpop.permute.xlu1 %2681  ;;  %v2733_v46 = vmul.f32 %v7212_v57, %v7185_v49  ;;  %v8890_v57 = vld [vmem:[#allocation93_spill] sm:$0xff] }
 0x2e5   :  { %8871 = vst [vmem:[#allocation46_spill] sm:$0xff] %v7300_v60  ;;  %v7310_v31 = vpop.permute.xlu0 %2679  ;;  %v2563_v60 = vmul.f32 %v7123_v36, %v7052_v38  ;;  %v2567_v38 = vmul.f32 %v7141_v50, %v7108_v37  ;;  %v7364_v41 = vmul.f32 0.05, %v3134_v28  ;;  %v7366_v36 = vmul.f32 0.05, %v3135_v12  ;;  %v2960_v50 = vld [vmem:[%s7620_s2 + $0x30] sm:$0xff] }
 0x2e6   :  { %8874 = vst [vmem:[#allocation120_spill] sm:$0xff] %v7310_v31  ;;  %v7332_v31 = vcvt.s32.f32 %v2811_v43  ;;  %v2565_v43 = vmul.f32 %v7129_v16, %v7068_v39  ;;  %v2566_v16 = vmul.f32 %v7133_v13, %v7113_v8  ;;  %v2578_v37 = vadd.f32 %v2562_v42, %v7003_v53  ;;  %v8878_v28 = vld [vmem:[#allocation17_spill] sm:$0xff] }
 0x2e7   :  { %v2579_v13 = vadd.f32 %v2563_v60, %v6998_v29  ;;  %v2569_v8 = vmul.f32 %v7153_v1, %v7115_v44  ;;  %v2568_v53 = vmul.f32 %v7148_v48, %v7117_v14  ;;  %v2571_v29 = vmul.f32 %v7165_v30, %v7119_v27  ;;  %v8879_v48 = vld [vmem:[#allocation100_spill] sm:$0xff] }
 0x2e8   :  { %v7334_v18 = vpop.permute.xlu1 %2685  ;;  %v2581_v56 = vadd.f32 %v2565_v43, %v7008_v23  ;;  %v2580_v1 = vadd.f32 %v2564_v0, %v7013_v35  ;;  %v2583_v2 = vadd.f32 %v2567_v38, %v7018_v63  ;;  %v7407_v42 = vadd.f32 %v2960_v50, %v2944_v26  ;;  %v8880_v35 = vld [vmem:[#allocation194_spill] sm:$0xff]  ;;  %v8882_v43 = vld [vmem:[#allocation200_spill] sm:$0xff] }
 0x2e9   :  { %v2582_v23 = vadd.f32 %v2566_v16, %v7023_v5  ;;  %v2572_v14 = vmul.f32 %v7177_v7, %v8878_v28  ;;  %v2573_v27 = vmul.f32 %v7179_v4, %v8879_v48  ;;  %v7416_v12 = vadd.f32 %v2961_v59, %v2945_v58  ;;  %v8881_v63 = vld [vmem:[#allocation98_spill] sm:$0xff]  ;;  %v8883_v5 = vld [vmem:[#allocation11_spill] sm:$0xff]  ;;  %v8884_v38 = vld [vmem:[#allocation96_spill] sm:$0xff] }
 0x2ea   :  { %v7352_v34 = vpop.permute.xlu0 %2683  ;;  %v2585_v20 = vadd.f32 %v2569_v8, %v8880_v35  ;;  %v2647_v62 = vadd.f32 %v8881_v63, %v2578_v37  ;;  %v2648_v9 = vadd.f32 %v8882_v43, %v2579_v13  ;;  %v2584_v0 = vadd.f32 %v2568_v53, %v8883_v5  ;;  %v8885_v16 = vld [vmem:[#allocation104_spill] sm:$0xff]  ;;  %v8886_v26 = vld [vmem:[#allocation202_spill] sm:$0xff]  ;;  %v8887_v59 = vld [vmem:[#allocation13_spill] sm:$0xff] }
 0x2eb   :  { %v2587_v7 = vadd.f32 %v2571_v29, %v8884_v38  ;;  %v2575_v4 = vmul.f32 %v7193_v3, %v8885_v16  ;;  %v2650_v50 = vadd.f32 %v8886_v26, %v2581_v56  ;;  %v2586_v8 = vadd.f32 %v2570_v21, %v8887_v59  ;;  %v8888_v13 = vld [vmem:[#allocation114_spill] sm:$0xff]  ;;  %v8891_v35 = vld [vmem:[#allocation75_spill] sm:$0xff]  ;;  %v8894_v21 = vld [vmem:[#allocation65_spill] sm:$0xff] }
 0x2ec   :  { %v7370_v39 = vpop.permute.xlu1 %2689  ;;  %v2732_v37 = vmul.f32 %v7210_v22, %v7202_v11  ;;  %v2649_v28 = vadd.f32 %v8888_v13, %v2580_v1  ;;  %v8889_v48 = vld [vmem:[#allocation118_spill] sm:$0xff]  ;;  %v2588_v53 = vadd.f32 %v2572_v14, %v8890_v57  ;;  %v2589_v29 = vadd.f32 %v2573_v27, %v8891_v35  ;;  %v8892_v63 = vld [vmem:[#allocation203_spill] sm:$0xff]  ;;  %v8895_v26 = vld [vmem:[#allocation116_spill] sm:$0xff] }
 0x2ed   :  { %v2652_v49 = vadd.f32 %v8889_v48, %v2583_v2  ;;  %v2574_v3 = vmul.f32 %v7183_v17, %v8892_v63  ;;  %v8893_v43 = vld [vmem:[#allocation106_spill] sm:$0xff]  ;;  %v2749_v38 = vadd.f32 %v2733_v46, %v2648_v9  ;;  %v2735_v16 = vmul.f32 %v8894_v21, %v7220_v45  ;;  %v8896_v22 = vld [vmem:[#allocation135_spill] sm:$0xff]  ;;  %v8899_v14 = vld [vmem:[#allocation145_spill] sm:$0xff] }
 0x2ee   :  { %v7400_v60 = vpop.permute.xlu0 %2687  ;;  %v2651_v56 = vadd.f32 %v8893_v43, %v2582_v23  ;;  %v2654_v11 = vadd.f32 %v8895_v26, %v2585_v20  ;;  %v8897_v59 = vld [vmem:[#allocation198_spill] sm:$0xff]  ;;  %v8900_v27 = vld [vmem:[#allocation112_spill] sm:$0xff]  ;;  %v8901_v35 = vld [vmem:[#allocation83_spill] sm:$0xff]  ;;  %v2748_v23 = vadd.f32 %v2732_v37, %v2647_v62 }
 0x2ef   :  { %v2591_v2 = vadd.f32 %v2575_v4, %v8897_v59  ;;  %v8898_v13 = vld [vmem:[#allocation94_spill] sm:$0xff]  ;;  %v2653_v57 = vadd.f32 %v8900_v27, %v2584_v0  ;;  %v2656_v17 = vadd.f32 %v8901_v35, %v2587_v7  ;;  %v8902_v43 = vld [vmem:[#allocation139_spill] sm:$0xff]  ;;  %v2751_v7 = vadd.f32 %v2735_v16, %v2650_v50  ;;  %v8915_v50 = vld [vmem:[#allocation45_spill] sm:$0xff] }
 0x2f0   :  { %v2734_v48 = vmul.f32 %v8899_v14, %v8898_v13  ;;  %v7450_v9 = vadd.f32 %v8902_v43, %v2586_v8  ;;  %v8903_v46 = vld [vmem:[#allocation102_spill] sm:$0xff]  ;;  %v8904_v20 = vld [vmem:[#allocation15_spill] sm:$0xff]  ;;  %v8913_v43 = vld [vmem:[#allocation68_spill] sm:$0xff] }
 0x2f1   :  { %v7414_v30 = vpop.permute.xlu1 %2693  ;;  %v2590_v26 = vadd.f32 %v2574_v3, %v8904_v20  ;;  %v8907_v59 = vld [vmem:[#allocation122_spill] sm:$0xff] }
 0x2f2   :  { %v7428_v58 = vpop.permute.xlu0 %2691  ;;  %v7457_v44 = vadd.f32 %v8907_v59, %v2588_v53  ;;  %v8908_v13 = vld [vmem:[#allocation138_spill] sm:$0xff]  ;;  %v2750_v35 = vadd.f32 %v2734_v48, %v2649_v28  ;;  %v8918_v28 = vld [vmem:[#allocation132_spill] sm:$0xff]  ;;  %v8919_v59 = vld [vmem:[#allocation47_spill] sm:$0xff] }
 0x2f3   :  { %v2658_v0 = vadd.f32 %v8908_v13, %v2589_v29  ;;  %v8909_v62 = vld [vmem:[#allocation134_spill] sm:$0xff]  ;;  %v8920_v13 = vld [vmem:[#allocation88_spill] sm:$0xff] }
 0x2f4   :  { %v8912_v3 = vld [vmem:[#allocation214_spill] sm:$0xff] }
 0x2f5   :  { %v8914_v20 = vld [vmem:[#allocation142_spill] sm:$0xff] }
 0x2f6   :  { %v2767_v5 = vpop.permute.xlu1 %2766 }
 0x2f7   :  { %v2834_v1 = vmul.f32 %v8896_v22, %v2767_v5  ;;  %v2765_v63 = vpop.permute.xlu0 %2764  ;;  %v8905_v5 = vld [vmem:[#allocation204_spill] sm:$0xff] }
 0x2f8   :  { %v2833_v45 = vmul.f32 %v8903_v46, %v2765_v63  ;;  %v8906_v22 = vld [vmem:[#allocation84_spill] sm:$0xff]  ;;  %v8910_v63 = vld [vmem:[#allocation215_spill] sm:$0xff]  ;;  %v2737_v46 = vmul.f32 %v8913_v43, %v8912_v3 }
 0x2f9   :  { %v2850_v21 = vadd.f32 %v2834_v1, %v2749_v38  ;;  %v2577_v4 = vmul.f32 %v8906_v22, %v8905_v5  ;;  %v8911_v38 = vld [vmem:[#allocation182_spill] sm:$0xff]  ;;  %v7467_v5 = vadd.f32 %v8914_v20, %v2591_v2 }
 0x2fa   :  { %v2771_v14 = vpop.permute.xlu1 %2770  ;;  %v2849_v27 = vadd.f32 %v2833_v45, %v2748_v23  ;;  %v2736_v1 = vmul.f32 %v8911_v38, %v8910_v63  ;;  %v8916_v45 = vld [vmem:[#allocation108_spill] sm:$0xff]  ;;  %v8921_v63 = vld [vmem:[#allocation85_spill] sm:$0xff]  ;;  %v2753_v20 = vadd.f32 %v2737_v46, %v2652_v49 }
 0x2fb   :  { %v3005_v37 = vmul.f32 %v8909_v62, %v2850_v21  ;;  %v2836_v8 = vmul.f32 %v7302_v51, %v2771_v14  ;;  %v2769_v53 = vpop.permute.xlu0 %2768  ;;  %v8917_v21 = vld [vmem:[#allocation124_spill] sm:$0xff]  ;;  %v2593_v48 = vadd.f32 %v2577_v4, %v8918_v28  ;;  %v2739_v14 = vmul.f32 %v8920_v13, %v8919_v59  ;;  %v8925_v59 = vld [vmem:[#allocation199_spill] sm:$0xff]  ;;  %v8928_v13 = vld [vmem:[#allocation141_spill] sm:$0xff] }
 0x2fc   :  { %v3004_v29 = vmul.f32 %v8909_v62, %v2849_v27  ;;  %v2835_v16 = vmul.f32 %v8915_v50, %v2769_v53  ;;  %v2576_v51 = vmul.f32 %v8917_v21, %v8916_v45  ;;  %v7477_v38 = vadd.f32 %v8921_v63, %v2590_v26  ;;  %v8924_v26 = vld [vmem:[#allocation154_spill] sm:$0xff] }
 0x2fd   :  { %v3263_v22 = vmul.f32 -1.442695, %v3005_v37  ;;  %v2852_v23 = vadd.f32 %v2836_v8, %v2751_v7  ;;  %v2752_v37 = vadd.f32 %v2736_v1, %v2651_v56  ;;  %v8922_v7 = vld [vmem:[#allocation21_spill] sm:$0xff]  ;;  %v8923_v8 = vld [vmem:[#allocation127_spill] sm:$0xff] }
 0x2fe   :  { %v2775_v2 = vpop.permute.xlu1 %2774  ;;  %v3262_v3 = vmul.f32 -1.442695, %v3004_v29  ;;  %v2851_v43 = vadd.f32 %v2835_v16, %v2750_v35  ;;  %v2738_v53 = vmul.f32 %v8923_v8, %v8922_v7  ;;  %v7486_v29 = vadd.f32 %v2576_v51, %v8925_v59  ;;  %v8927_v16 = vld [vmem:[#allocation143_spill] sm:$0xff] }
 0x2ff   :  { %3286 = vpow2.f32 %v3263_v22  ;;  %v3007_v27 = vmul.f32 %v8909_v62, %v2852_v23  ;;  %v2773_v50 = vpop.permute.xlu0 %2772  ;;  %v2838_v4 = vmul.f32 %v7308_v32, %v2775_v2  ;;  %v2755_v35 = vadd.f32 %v2739_v14, %v2654_v11  ;;  %v8926_v22 = vld [vmem:[#allocation46_spill] sm:$0xff]  ;;  %v8929_v2 = vld [vmem:[#allocation120_spill] sm:$0xff] }
 0x300   :  { %3288 = vpow2.f32 %v3262_v3  ;;  %v3006_v45 = vmul.f32 %v8909_v62, %v2851_v43  ;;  %v2837_v28 = vmul.f32 %v8924_v26, %v2773_v50  ;;  %v2741_v56 = vmul.f32 %v8927_v16, %v8926_v22  ;;  %v8930_v3 = vld [vmem:[#allocation41_spill] sm:$0xff] }
 0x301   :  { %v3265_v21 = vmul.f32 -1.442695, %v3007_v27  ;;  %v2854_v49 = vadd.f32 %v2838_v4, %v2753_v20  ;;  %v2754_v63 = vadd.f32 %v2738_v53, %v2653_v57  ;;  %v2740_v43 = vmul.f32 %v8930_v3, %v8929_v2  ;;  %v8931_v27 = vld [vmem:[#allocation128_spill] sm:$0xff]  ;;  %v8934_v57 = vld [vmem:[#allocation87_spill] sm:$0xff] }
 0x302   :  { %v2779_v1 = vpop.permute.xlu1 %2778  ;;  %v3264_v46 = vmul.f32 -1.442695, %v3006_v45  ;;  %v2853_v23 = vadd.f32 %v2837_v28, %v2752_v37  ;;  %v2743_v7 = vmul.f32 %v8931_v27, %v7334_v18  ;;  %v8932_v20 = vld [vmem:[#allocation144_spill] sm:$0xff]  ;;  %v2757_v4 = vadd.f32 %v2741_v56, %v2656_v17  ;;  %v8933_v37 = vld [vmem:[#allocation129_spill] sm:$0xff] }
 0x303   :  { %3290 = vpow2.f32 %v3265_v21  ;;  %v2840_v32 = vmul.f32 %v8928_v13, %v2779_v1  ;;  %v3009_v51 = vmul.f32 %v8909_v62, %v2854_v49  ;;  %v2777_v11 = vpop.permute.xlu0 %2776  ;;  %v2742_v45 = vmul.f32 %v8933_v37, %v7352_v34  ;;  %v8935_v1 = vld [vmem:[#allocation99_spill] sm:$0xff] }
 0x304   :  { %3292 = vpow2.f32 %v3264_v46  ;;  %v3008_v14 = vmul.f32 %v8909_v62, %v2853_v23  ;;  %v2839_v8 = vmul.f32 %v8932_v20, %v2777_v11  ;;  %v2662_v53 = vadd.f32 %v8934_v57, %v2593_v48  ;;  %v8936_v46 = vld [vmem:[#allocation155_spill] sm:$0xff] }
 0x305   :  { %v2856_v50 = vadd.f32 %v2840_v32, %v2755_v35  ;;  %v3267_v21 = vmul.f32 -1.442695, %v3009_v51  ;;  %v2756_v16 = vadd.f32 %v2740_v43, %v7450_v9  ;;  %v2759_v49 = vadd.f32 %v2743_v7, %v2658_v0  ;;  %v8937_v32 = vld [vmem:[#allocation130_spill] sm:$0xff] }
 0x306   :  { %v2783_v26 = vpop.permute.xlu1 %2782  ;;  %v3266_v28 = vmul.f32 -1.442695, %v3008_v14  ;;  %v2855_v59 = vadd.f32 %v2839_v8, %v2754_v63  ;;  %v2745_v35 = vmul.f32 %v8935_v1, %v7370_v39  ;;  %v2758_v13 = vadd.f32 %v2742_v45, %v7457_v44  ;;  %v8938_v8 = vld [vmem:[#allocation97_spill] sm:$0xff] }
 0x307   :  { %v3011_v18 = vmul.f32 %v8909_v62, %v2856_v50  ;;  %v2842_v22 = vmul.f32 %v7330_v19, %v2783_v26  ;;  %3294 = vpow2.f32 %v3267_v21  ;;  %v2781_v17 = vpop.permute.xlu0 %2780  ;;  %v2744_v19 = vmul.f32 %v8937_v32, %v7400_v60 }
 0x308   :  { %3296 = vpow2.f32 %v3266_v28  ;;  %v3010_v34 = vmul.f32 %v8909_v62, %v2855_v59  ;;  %v2841_v23 = vmul.f32 %v8936_v46, %v2781_v17  ;;  %v2761_v27 = vadd.f32 %v2745_v35, %v7467_v5  ;;  %v8939_v59 = vld [vmem:[#allocation95_spill] sm:$0xff]  ;;  %v8940_v35 = vld [vmem:[#allocation29_spill] sm:$0xff] }
 0x309   :  { %v3287_v56 = vpop.eup %3286  ;;  %v3269_v48 = vmul.f32 -1.442695, %v3011_v18  ;;  %v2858_v9 = vadd.f32 %v2842_v22, %v2757_v4  ;;  %v2747_v50 = vmul.f32 %v8938_v8, %v7414_v30  ;;  %v2760_v28 = vadd.f32 %v2744_v19, %v7477_v38  ;;  %v2947_v8 = vld [vmem:[%s7618_s0 + $0x48] sm:$0xff] }
 0x30a   :  { %v3069_v63 = vadd.f32 1.0, %v3287_v56  ;;  %v2787_v0 = vpop.permute.xlu1 %2786  ;;  %v3289_v2 = vpop.eup %3288  ;;  %v3268_v3 = vmul.f32 -1.442695, %v3010_v34  ;;  %v2857_v39 = vadd.f32 %v2841_v23, %v2756_v16  ;;  %v2661_v17 = vadd.f32 %v8940_v35, %v7486_v29 }
 0x30b   :  { %3298 = vpow2.f32 %v3269_v48  ;;  %v2844_v43 = vmul.f32 %v7336_v47, %v2787_v0  ;;  %v3068_v7 = vadd.f32 1.0, %v3289_v2  ;;  %v3013_v51 = vmul.f32 %v8909_v62, %v2858_v9  ;;  %v2785_v11 = vpop.permute.xlu0 %2784 }
 0x30c   :  { %3300 = vrcp.f32 %v3069_v63  ;;  %v3012_v60 = vmul.f32 %v8909_v62, %v2857_v39  ;;  %v2843_v14 = vmul.f32 %v7332_v31, %v2785_v11  ;;  %v2746_v31 = vmul.f32 %v8939_v59, %v7428_v58 }
 0x30d   :  { %v3291_v44 = vpop.eup %3290  ;;  %3302 = vpow2.f32 %v3268_v3  ;;  %v2860_v20 = vadd.f32 %v2844_v43, %v2759_v49  ;;  %v3271_v47 = vmul.f32 -1.442695, %v3013_v51  ;;  %v2763_v56 = vadd.f32 %v2747_v50, %v2662_v53  ;;  %v2963_v50 = vld [vmem:[%s7620_s2 + $0x48] sm:$0xff] }
 0x30e   :  { %3304 = vrcp.f32 %v3068_v7  ;;  %v3071_v4 = vadd.f32 1.0, %v3291_v44  ;;  %v2791_v37 = vpop.permute.xlu1 %2790  ;;  %v3293_v5 = vpop.eup %3292  ;;  %v3270_v45 = vmul.f32 -1.442695, %v3012_v60  ;;  %v2859_v57 = vadd.f32 %v2843_v14, %v2758_v13 }
 0x30f   :  { %v3015_v21 = vmul.f32 %v8909_v62, %v2860_v20  ;;  %v2846_v26 = vmul.f32 %v7340_v33, %v2791_v37  ;;  %v3070_v18 = vadd.f32 1.0, %v3293_v5  ;;  %v2789_v22 = vpop.permute.xlu0 %2788  ;;  %v2762_v63 = vadd.f32 %v2746_v31, %v2661_v17 }
 0x310   :  { %3306 = vrcp.f32 %v3071_v4  ;;  %v3014_v30 = vmul.f32 %v8909_v62, %v2859_v57  ;;  %v2845_v49 = vmul.f32 %v7338_v24, %v2789_v22  ;;  %v3152_v11 = vmul.f32 0.05, %v3136_v25 }
 0x311   :  { %3308 = vpow2.f32 %v3270_v45  ;;  %v3273_v16 = vmul.f32 -1.442695, %v3015_v21  ;;  %v3295_v1 = vpop.eup %3294  ;;  %v2862_v33 = vadd.f32 %v2846_v26, %v2761_v27  ;;  %v2946_v27 = vld [vmem:[%s7618_s0 + $0x40] sm:$0xff]  ;;  %v8943_v59 = vsub.f32 1.0, %v7358_v15 }
 0x312   :  { %3310 = vrcp.f32 %v3070_v18  ;;  %v2795_v38 = vpop.permute.xlu1 %2794  ;;  %v3297_v34 = vpop.eup %3296  ;;  %v3073_v48 = vadd.f32 1.0, %v3295_v1  ;;  %v3272_v58 = vmul.f32 -1.442695, %v3014_v30  ;;  %v2861_v46 = vadd.f32 %v2845_v49, %v2760_v28  ;;  %v2965_v1 = vld [vmem:[%s7620_s2 + $0x58] sm:$0xff] }
 0x313   :  { %3312 = vpow2.f32 %v3271_v47  ;;  %v3072_v23 = vadd.f32 1.0, %v3297_v34  ;;  %v3017_v13 = vmul.f32 %v8909_v62, %v2862_v33  ;;  %v2793_v32 = vpop.permute.xlu0 %2792  ;;  %v2848_v24 = vmul.f32 %v7382_v40, %v2795_v38  ;;  %v2962_v40 = vld [vmem:[%s7620_s2 + $0x40] sm:$0xff] }
 0x314   :  { %3314 = vpow2.f32 %v3273_v16  ;;  %v3016_v29 = vmul.f32 %v8909_v62, %v2861_v46  ;;  %v2847_v53 = vmul.f32 %v7348_v52, %v2793_v32  ;;  %v3139_v47 = vsub.f32 1.0, %v7416_v12 }
 0x315   :  { %v3299_v19 = vpop.eup %3298  ;;  %3316 = vrcp.f32 %v3073_v48  ;;  %v3275_v2 = vmul.f32 -1.442695, %v3017_v13  ;;  %v2864_v3 = vadd.f32 %v2848_v24, %v2763_v56  ;;  %v7551_v37 = vadd.f32 %v2962_v40, %v2946_v27 }
 0x316   :  { %v3301_v9 = vpop.eup %3300  ;;  %3318 = vrcp.f32 %v3072_v23  ;;  %v3075_v0 = vadd.f32 1.0, %v3299_v19  ;;  %v3274_v7 = vmul.f32 -1.442695, %v3016_v29  ;;  %v2863_v51 = vadd.f32 %v2847_v53, %v2762_v63 }
 0x317   :  { %v3303_v39 = vpop.eup %3302  ;;  %v3165_v43 = vmul.f32 %v3301_v9, %v7356_v54  ;;  %3320 = vpow2.f32 %v3272_v58  ;;  %v3019_v60 = vmul.f32 %v8909_v62, %v2864_v3  ;;  %v8941_v54 = vld [vmem:[#allocation110_spill] sm:$0xff]  ;;  %v3153_v31 = vmul.f32 0.05, %v8943_v59 }
 0x318   :  { %v3305_v52 = vpop.eup %3304  ;;  %v3074_v44 = vadd.f32 1.0, %v3303_v39  ;;  %3322 = vrcp.f32 %v3075_v0  ;;  %v3018_v4 = vmul.f32 %v8909_v62, %v2863_v51  ;;  %v2979_v18 = vadd.f32 %v2963_v50, %v2947_v8  ;;  %v2950_v0 = vld [vmem:[%s7618_s0 + $0x60] sm:$0xff]  ;;  %v2953_v8 = vld [vmem:[%s7618_s0 + $0x78] sm:$0xff] }
 0x319   :  { %v3164_v14 = vmul.f32 %v3305_v52, %v8941_v54  ;;  %v3181_v20 = vadd.f32 %v3165_v43, %v7354_v6  ;;  %3324 = vpow2.f32 %v3274_v7  ;;  %v3277_v5 = vmul.f32 -1.442695, %v3019_v60  ;;  %v8942_v6 = vld [vmem:[#allocation133_spill] sm:$0xff]  ;;  %v2951_v52 = vld [vmem:[%s7618_s0 + $0x68] sm:$0xff] }
 0x31a   :  { %v3307_v25 = vpop.eup %3306  ;;  %3326 = vrcp.f32 %v3074_v44  ;;  %v3276_v26 = vmul.f32 -1.442695, %v3018_v4  ;;  %v3138_v49 = vsub.f32 1.0, %v7407_v42  ;;  %v3120_v17 = vmul.f32 0.95, %v7346_v55  ;;  %v2948_v55 = vld [vmem:[%s7618_s0 + $0x50] sm:$0xff] }
 0x31b   :  { %v3309_v45 = vpop.eup %3308  ;;  %v3180_v57 = vadd.f32 %v3164_v14, %v8942_v6  ;;  %3197 = vst [vmem:[#allocation7 + $0x8] sm:$0xff] %v3181_v20  ;;  %v3167_v21 = vmul.f32 %v3307_v25, %v7366_v36  ;;  %3328 = vpow2.f32 %v3275_v2  ;;  %v2949_v36 = vld [vmem:[%s7618_s0 + $0x58] sm:$0xff]  ;;  %v3121_v56 = vmul.f32 0.95, %v7358_v15  ;;  %v2964_v15 = vld [vmem:[%s7620_s2 + $0x50] sm:$0xff]  ;;  %v2966_v2 = vld [vmem:[%s7620_s2 + $0x60] sm:$0xff] }
 0x31c   :  { %v3311_v28 = vpop.eup %3310  ;;  %v3076_v62 = vadd.f32 1.0, %v3309_v45  ;;  %3330 = vpow2.f32 %v3277_v5  ;;  %v3155_v38 = vmul.f32 0.05, %v3139_v47  ;;  %v3140_v34 = vsub.f32 1.0, %v7551_v37  ;;  %v2969_v50 = vld [vmem:[%s7620_s2 + $0x78] sm:$0xff]  ;;  %v2952_v5 = vld [vmem:[%s7618_s0 + $0x70] sm:$0xff] }
 0x31d   :  { %v3313_v22 = vpop.eup %3312  ;;  %3196 = vst [vmem:[#allocation7] sm:$0xff] %v3180_v57  ;;  %v3166_v30 = vmul.f32 %v3311_v28, %v7364_v41  ;;  %v3183_v16 = vadd.f32 %v3167_v21, %v7374_v10  ;;  %3332 = vpow2.f32 %v3276_v26  ;;  %v3141_v23 = vsub.f32 1.0, %v2979_v18  ;;  %s3405_s0 = smov [#allocation7]  }
 0x31e   :  { %v3315_v35 = vpop.eup %3314  ;;  %3334 = vrcp.f32 %v3076_v62  ;;  %v3077_v41 = vadd.f32 1.0, %v3313_v22  ;;  %v2981_v13 = vadd.f32 %v2965_v1, %v2949_v36  ;;  %v3154_v24 = vmul.f32 0.05, %v3138_v49 }
 0x31f   :  { %v3317_v33 = vpop.eup %3316  ;;  %v3182_v10 = vadd.f32 %v3166_v30, %v7372_v61  ;;  %3199 = vst [vmem:[#allocation7 + $0x18] sm:$0xff] %v3183_v16  ;;  %v3079_v48 = vadd.f32 1.0, %v3315_v35  ;;  %v3123_v19 = vmul.f32 0.95, %v7416_v12  ;;  %v3122_v53 = vmul.f32 0.95, %v7407_v42 }
 0x320   :  { %v3319_v58 = vpop.eup %3318  ;;  %v3169_v46 = vmul.f32 %v3317_v33, %v3153_v31  ;;  %3336 = vrcp.f32 %v3077_v41  ;;  %v3156_v27 = vmul.f32 0.05, %v3140_v34  ;;  %v2980_v40 = vadd.f32 %v2964_v15, %v2948_v55 }
 0x321   :  { %v3321_v32 = vpop.eup %3320  ;;  %3198 = vst [vmem:[#allocation7 + $0x10] sm:$0xff] %v3182_v10  ;;  %v3168_v61 = vmul.f32 %v3319_v58, %v3152_v11  ;;  %3338 = vrcp.f32 %v3079_v48  ;;  %v3157_v7 = vmul.f32 0.05, %v3141_v23  ;;  %v3143_v51 = vsub.f32 1.0, %v2981_v13  ;;  %v2967_v11 = vld [vmem:[%s7620_s2 + $0x68] sm:$0xff] }
 0x322   :  { %v3323_v63 = vpop.eup %3322  ;;  %v3185_v29 = vadd.f32 %v3169_v46, %v3121_v56  ;;  %v3078_v9 = vadd.f32 1.0, %v3321_v32  ;;  %v3124_v14 = vmul.f32 0.95, %v7551_v37  ;;  %v2982_v20 = vadd.f32 %v2966_v2, %v2950_v0  ;;  %v2968_v37 = vld [vmem:[%s7620_s2 + $0x70] sm:$0xff]  ;;  %s3250_s2 = sshll.u32 %s3405_s0, 4  ;;  %s3251_s2 = int_to_ptr.vmem [resolvable:$true] %s3250_s2 }
 0x323   :  { %v3325_v3 = vpop.eup %3324  ;;  %v3184_v39 = vadd.f32 %v3168_v61, %v3120_v17  ;;  %v3171_v43 = vmul.f32 %v3323_v63, %v3155_v38  ;;  %v3125_v25 = vmul.f32 0.95, %v2979_v18  ;;  %v3142_v57 = vsub.f32 1.0, %v2980_v40  ;;  %s3372_s9 = scalar_lea.vmem %s3251_s2, 4096  ;;  %p3377_p9 = scmp.lt.s32.totalorder %s3251_s2, %s3251_s2 }
 0x324   :  { %v3327_v12 = vpop.eup %3326  ;;  %3201 = vst [vmem:[#allocation7 + $0x28] sm:$0xff] %v3185_v29  ;;  %3340 = vrcp.f32 %v3078_v9  ;;  %v3080_v42 = vadd.f32 1.0, %v3325_v3  ;;  %v2983_v21 = vadd.f32 %v2967_v11, %v2951_v52  ;;  %v3159_v59 = vmul.f32 0.05, %v3143_v51  ;;  %p3373_p8 = scmp.ne.s32.totalorder %s3251_s2, %s3372_s9  ;;  %p3378_p10 = scmp.lt.s32.totalorder %s3372_s9, %s3372_s9 }
 0x325   :  { %v3329_v44 = vpop.eup %3328  ;;  %3200 = vst [vmem:[#allocation7 + $0x20] sm:$0xff] %v3184_v39  ;;  %v3170_v60 = vmul.f32 %v3327_v12, %v3154_v24  ;;  %v3187_v54 = vadd.f32 %v3171_v43, %v3123_v19  ;;  %v2985_v62 = vadd.f32 %v2969_v50, %v2953_v8  ;;  %v3144_v22 = vsub.f32 1.0, %v2982_v20 }
 0x326   :  { %v3331_v4 = vpop.eup %3330  ;;  %3342 = vrcp.f32 %v3080_v42  ;;  %v3081_v47 = vadd.f32 1.0, %v3329_v44  ;;  %v2984_v30 = vadd.f32 %v2968_v37, %v2952_v5  ;;  %v3127_v49 = vmul.f32 0.95, %v2981_v13  ;;  %p3379_p11 = por %p3378_p10, %p3377_p9 }
 0x327   :  { %v3333_v45 = vpop.eup %3332  ;;  %v3186_v6 = vadd.f32 %v3170_v60, %v3122_v53  ;;  %3203 = vst [vmem:[#allocation7 + $0x38] sm:$0xff] %v3187_v54  ;;  %v3083_v26 = vadd.f32 1.0, %v3331_v4  ;;  %v3158_v17 = vmul.f32 0.05, %v3142_v57  ;;  %v3145_v56 = vsub.f32 1.0, %v2983_v21 }
 0x328   :  { %v3335_v28 = vpop.eup %3334  ;;  %3344 = vrcp.f32 %v3081_v47  ;;  %v3082_v31 = vadd.f32 1.0, %v3333_v45  ;;  %v3147_v33 = vsub.f32 1.0, %v2985_v62  ;;  %v3126_v38 = vmul.f32 0.95, %v2980_v40  ;;  %p3380_p12 = pnand %p3379_p11, %p3373_p8 }
 0x329   :  { %3202 = vst [vmem:[#allocation7 + $0x30] sm:$0xff] %v3186_v6  ;;  %v3172_v18 = vmul.f32 %v3335_v28, %v3156_v27  ;;  %3346 = vrcp.f32 %v3083_v26  ;;  %v3160_v34 = vmul.f32 0.05, %v3144_v22  ;;  %v3146_v48 = vsub.f32 1.0, %v2984_v30 }
 0x32a   :  { %v3337_v16 = vpop.eup %3336  ;;  %3348 = vrcp.f32 %v3082_v31  ;;  %v3128_v55 = vmul.f32 0.95, %v2982_v20  ;;  %v3161_v15 = vmul.f32 0.05, %v3145_v56  ;;  %v3163_v32 = vmul.f32 0.05, %v3147_v33 }
 0x32b   :  { %v3339_v36 = vpop.eup %3338  ;;  %v3188_v1 = vadd.f32 %v3172_v18, %v3124_v14  ;;  %v3173_v35 = vmul.f32 %v3337_v16, %v3157_v7  ;;  %v3129_v19 = vmul.f32 0.95, %v2983_v21  ;;  %v3162_v63 = vmul.f32 0.05, %v3146_v48 }
 0x32c   :  { %v3175_v41 = vmul.f32 %v3339_v36, %v3159_v59  ;;  %v3131_v53 = vmul.f32 0.95, %v2985_v62  ;;  %v3130_v3 = vmul.f32 0.95, %v2984_v30 }
 0x32d   :  { %3204 = vst [vmem:[#allocation7 + $0x40] sm:$0xff] %v3188_v1  ;;  %v3189_v10 = vadd.f32 %v3173_v35, %v3125_v25 }
 0x32e   :  { %v3341_v58 = vpop.eup %3340  ;;  %v3191_v46 = vadd.f32 %v3175_v41, %v3127_v49 }
 0x32f   :  { %3205 = vst [vmem:[#allocation7 + $0x48] sm:$0xff] %v3189_v10  ;;  %v3174_v23 = vmul.f32 %v3341_v58, %v3158_v17 }
 0x330   :  { %v3343_v13 = vpop.eup %3342  ;;  %3207 = vst [vmem:[#allocation7 + $0x58] sm:$0xff] %v3191_v46 }
 0x331   :  { %v3190_v61 = vadd.f32 %v3174_v23, %v3126_v38  ;;  %v3176_v24 = vmul.f32 %v3343_v13, %v3160_v34 }
 0x332   :  { %v3345_v29 = vpop.eup %3344 }
 0x333   :  { %v3347_v9 = vpop.eup %3346  ;;  %3206 = vst [vmem:[#allocation7 + $0x50] sm:$0xff] %v3190_v61  ;;  %v3192_v0 = vadd.f32 %v3176_v24, %v3128_v55  ;;  %v3177_v2 = vmul.f32 %v3345_v29, %v3161_v15 }
 0x334   :  { %v3349_v39 = vpop.eup %3348  ;;  %v3179_v43 = vmul.f32 %v3347_v9, %v3163_v32 }
 0x335   :  { %3208 = vst [vmem:[#allocation7 + $0x60] sm:$0xff] %v3192_v0  ;;  %v3193_v27 = vadd.f32 %v3177_v2, %v3129_v19  ;;  %v3178_v40 = vmul.f32 %v3349_v39, %v3162_v63 }
 0x336   :  { %v3195_v12 = vadd.f32 %v3179_v43, %v3131_v53 }
 0x337   :  { %3209 = vst [vmem:[#allocation7 + $0x68] sm:$0xff] %v3193_v27  ;;  %v3194_v7 = vadd.f32 %v3178_v40, %v3130_v3 }
 0x338   :  { %3211 = vst [vmem:[#allocation7 + $0x78] sm:$0xff] %v3195_v12 }
 0x339   :  { %3210 = vst [vmem:[#allocation7 + $0x70] sm:$0xff] %v3194_v7 }
 0x33a   :  { %3383 = shalt.err (!%p3380_p12)
}
 0x33b   :  { %s3384_s13 = scalar_lea.hbm %s7623_s5, 4096 }
 0x33c   :  { %p3385_p13 = scmp.ne.s32.totalorder %s7623_s5, %s3384_s13  ;;  %p3388_p0 = scmp.lt.u32.totalorder %s3384_s13, %s7623_s5 }
 0x33e   :  { %p3390_p1 = pnand %p3388_p0, %p3385_p13 }
 0x340   :  { %3393 = shalt.err (!%p3390_p1)
}
 0x341   :  { %3256 = dma.vmem_to_hbm [thread:$0]  %s3251_s2, 4096, %s7623_s5, [#allocation6], %s3399_s28, %s3399_s28, %s3400_s29  }
 0x342   :  { %3396 = dma.done.wait [#allocation6], 4096  }
 0x343   :  { %3397 = vsyncadd [#allocation6], 4294963200 }
 0x344   :  { %3260 = vsyncpa [#allocation5], 1 }
 0x345   :  { %3261 = vsyncpa [#allocation6], 1 }

</bundles_post_ra>
